<compile_context>
chip_gen: v7x
topology: tpu7x:2x2x1
jax: 0.10.0
libtpu: 0.0.40
codegen_flags: <defaults>
</compile_context>

<pallas_src>
import functools

import jax
import jax.numpy as jnp
from jax.experimental import pallas as pl
from jax.experimental.pallas import tpu as pltpu

INPUT_FEATURES = 19
LAYER1_NEURONS = 2048
LAYER2_NEURONS = 1024
LAYER3_NEURONS = 512
OUTPUT_RESULTS = 5

PAD_IN = 128     # 19 -> 128 zero-padded K for the first dot (inside VMEM only)
PAD_OUT = 128    # 5  -> 128 lane-dense output block (w4 cols / b4 zero-padded)

MAX_BATCH_TILE = 1024               # keeps activations inside v7x's 64 MiB VMEM
VMEM_LIMIT_BYTES = 48 * 1024 * 1024  # safe on v7x; v5e/v6e (128 MiB) have headroom

_MACS_PER_ROW = (PAD_IN * LAYER1_NEURONS + LAYER1_NEURONS * LAYER2_NEURONS
                 + LAYER2_NEURONS * LAYER3_NEURONS + LAYER3_NEURONS * PAD_OUT)
_WEIGHT_BYTES = 2 * (PAD_IN * LAYER1_NEURONS + LAYER1_NEURONS * LAYER2_NEURONS
                     + LAYER2_NEURONS * LAYER3_NEURONS + LAYER3_NEURONS * PAD_OUT)
_BIAS_BYTES = 4 * (LAYER1_NEURONS + LAYER2_NEURONS + LAYER3_NEURONS + PAD_OUT)

# Flipped to False (once) if this jax/libtpu rejects pl.Buffered(1).
_single_buffer_ok = True


def _round_up(x, m):
    return (x + m - 1) // m * m


def _choose_batch_tile(B, max_tile=MAX_BATCH_TILE):
    """Large, MXU-friendly batch tile; >=2 (even) grid steps when the batch is
    big enough so both v7x TensorCores get work; capped for v7x VMEM."""
    B = max(int(B), 1)
    max_tile = max(8, min(int(max_tile), MAX_BATCH_TILE))
    if B <= 16:
        return _round_up(B, 8)                      # single tiny tile
    n_tiles = max(2, pl.cdiv(B, max_tile))          # at least 2 steps (dual-TC)
    if n_tiles % 2:
        n_tiles += 1                                # even split across 2 cores
    bt8 = _round_up(pl.cdiv(B, n_tiles), 8)
    bt128 = _round_up(bt8, 128)
    # Prefer 128-row (MXU pass) alignment only if it adds little batch padding.
    bt = bt128 if bt128 * n_tiles <= B + max(B // 16, 128) else bt8
    return min(max_tile, bt)


def _mlp_kernel(x_ref,
                w1_ref, b1_ref, w2_ref, b2_ref, w3_ref, b3_ref, w4_ref, b4_ref,
                o_ref, xpad_ref):
    # Zero-pad the 19 input features to a 128-lane tile inside VMEM (no HBM copy).
    xpad_ref[...] = jnp.zeros_like(xpad_ref)
    xpad_ref[:, :INPUT_FEATURES] = x_ref[...]

    # bf16 MXU matmuls, f32 accumulation; bias + ReLU are free VPU filler.
    h = jnp.dot(xpad_ref[...].astype(jnp.bfloat16), w1_ref[...],
                preferred_element_type=jnp.float32)
    h = jnp.maximum(h + b1_ref[...], 0.0)                               # layer1 + ReLU
    h = jnp.dot(h.astype(jnp.bfloat16), w2_ref[...],
                preferred_element_type=jnp.float32)
    h = jnp.maximum(h + b2_ref[...], 0.0)                               # layer2 + ReLU
    h = jnp.dot(h.astype(jnp.bfloat16), w3_ref[...],
                preferred_element_type=jnp.float32)
    h = jnp.maximum(h + b3_ref[...], 0.0)                               # layer3 + ReLU
    h = jnp.dot(h.astype(jnp.bfloat16), w4_ref[...],
                preferred_element_type=jnp.float32)
    o_ref[...] = h + b4_ref[...]                                        # layer_out


@functools.lru_cache(maxsize=None)
def _build_call(batch_tile, n_tiles, single_buffer_weights):
    """Builds (and caches) the jitted pallas_call for a given batch tiling."""

    def const_spec(shape):
        # Grid-invariant parameter, resident in VMEM across all grid steps
        # (constant block index => fetched once; Buffered(1) avoids allocating
        # a useless second buffer).
        nd = len(shape)
        kwargs = {}
        if single_buffer_weights:
            kwargs["pipeline_mode"] = pl.Buffered(1)
        return pl.BlockSpec(shape, lambda i, nd=nd: (0,) * nd, **kwargs)

    in_specs = [
        pl.BlockSpec((batch_tile, INPUT_FEATURES), lambda i: (i, 0)),   # x tile (unpadded)
        const_spec((PAD_IN, LAYER1_NEURONS)),         const_spec((1, LAYER1_NEURONS)),
        const_spec((LAYER1_NEURONS, LAYER2_NEURONS)), const_spec((1, LAYER2_NEURONS)),
        const_spec((LAYER2_NEURONS, LAYER3_NEURONS)), const_spec((1, LAYER3_NEURONS)),
        const_spec((LAYER3_NEURONS, PAD_OUT)),        const_spec((1, PAD_OUT)),
    ]

    b_pad = n_tiles * batch_tile
    cost = pl.CostEstimate(
        flops=2 * b_pad * _MACS_PER_ROW,
        transcendentals=0,
        bytes_accessed=(_WEIGHT_BYTES + _BIAS_BYTES
                        + b_pad * (INPUT_FEATURES * 4 + PAD_OUT * 4)),
    )

    call = pl.pallas_call(
        _mlp_kernel,
        out_shape=jax.ShapeDtypeStruct((b_pad, PAD_OUT), jnp.float32),
        grid=(n_tiles,),
        in_specs=in_specs,
        out_specs=pl.BlockSpec((batch_tile, PAD_OUT), lambda i: (i, 0)),
        scratch_shapes=[pltpu.VMEM((batch_tile, PAD_IN), jnp.float32)],
        compiler_params=pltpu.CompilerParams(
            dimension_semantics=("parallel",),      # shards grid over v7x's 2 TCs
            vmem_limit_bytes=VMEM_LIMIT_BYTES,
        ),
        cost_estimate=cost,
    )
    return jax.jit(call)


def prepare_params(params):
    """One-time weight preparation (call at init/load time, NOT per forward):
    transpose-layout weights padded + cast to bf16, biases to f32 rows."""
    (w1, b1), (w2, b2), (w3, b3), (w4, b4) = params
    w1_p = jnp.zeros((PAD_IN, LAYER1_NEURONS), jnp.bfloat16)
    w1_p = w1_p.at[:INPUT_FEATURES, :].set(w1.astype(jnp.bfloat16))
    w2_p = w2.astype(jnp.bfloat16)
    w3_p = w3.astype(jnp.bfloat16)
    w4_p = jnp.zeros((LAYER3_NEURONS, PAD_OUT), jnp.bfloat16)
    w4_p = w4_p.at[:, :OUTPUT_RESULTS].set(w4.astype(jnp.bfloat16))
    b1_p = b1.reshape(1, -1).astype(jnp.float32)
    b2_p = b2.reshape(1, -1).astype(jnp.float32)
    b3_p = b3.reshape(1, -1).astype(jnp.float32)
    b4_p = jnp.zeros((1, PAD_OUT), jnp.float32)
    b4_p = b4_p.at[:, :OUTPUT_RESULTS].set(b4.reshape(1, -1).astype(jnp.float32))
    prepared = (w1_p, b1_p, w2_p, b2_p, w3_p, b3_p, w4_p, b4_p)
    return tuple(jax.device_put(p) for p in prepared)


def mlp_forward(x, prepared_params, *, max_batch_tile=MAX_BATCH_TILE):
    """Runs the 4-layer MLP as a single Pallas kernel, tiled over the batch.

    `prepared_params` must come from `prepare_params` (weights pre-padded/cast)."""
    global _single_buffer_ok
    B, F = x.shape
    assert F == INPUT_FEATURES

    bt = _choose_batch_tile(B, max_batch_tile)
    B_pad = _round_up(B, bt)
    n_tiles = B_pad // bt

    x_p = x.astype(jnp.float32)
    if B_pad != B:
        x_p = jnp.pad(x_p, ((0, B_pad - B), (0, 0)))   # batch pad only; no feature pad

    args = (x_p,) + tuple(prepared_params)
    if _single_buffer_ok:
        try:
            out = _build_call(bt, n_tiles, True)(*args)
            return out[:B, :OUTPUT_RESULTS]
        except (TypeError, ValueError, NotImplementedError, pltpu.LoweringException):
            # Narrow fallback: only if pl.Buffered(1) is unsupported by this
            # jax/libtpu; any other failure reproduces (and surfaces) below.
            _single_buffer_ok = False
    out = _build_call(bt, n_tiles, False)(*args)
    return out[:B, :OUTPUT_RESULTS]


def init_params(key):
    """Deterministic nn.Linear-style init: U(-1/sqrt(fan_in), 1/sqrt(fan_in)),
    weights already in [in, out] layout."""
    dims = [INPUT_FEATURES, LAYER1_NEURONS, LAYER2_NEURONS, LAYER3_NEURONS,
            OUTPUT_RESULTS]
    params = []
    for fan_in, fan_out in zip(dims[:-1], dims[1:]):
        key, kw, kb = jax.random.split(key, 3)
        bound = 1.0 / (fan_in ** 0.5)
        w = jax.random.uniform(kw, (fan_in, fan_out), jnp.float32, -bound, bound)
        b = jax.random.uniform(kb, (1, fan_out), jnp.float32, -bound, bound)
        params.append((w, b))
    return params


def mlp_reference_bf16(x, params):
    """Pure-JAX reference mirroring the kernel numerics (bf16 operands, f32 acc)."""
    h = x.astype(jnp.bfloat16)
    for i, (w, b) in enumerate(params):
        h = jnp.dot(h, w.astype(jnp.bfloat16), preferred_element_type=jnp.float32)
        h = h + b.astype(jnp.float32)
        if i < len(params) - 1:
            h = jnp.maximum(h, 0.0).astype(jnp.bfloat16)
    return h


if __name__ == "__main__":
    key = jax.random.PRNGKey(0)
    key, kx = jax.random.split(key)
    params = init_params(key)
    prepared = prepare_params(params)   # weight pad/cast happens exactly once

    # Small sanity batch.
    B_small = 8
    x_small = jax.random.normal(kx, (B_small, INPUT_FEATURES), jnp.float32)
    out_small = jax.block_until_ready(mlp_forward(x_small, prepared))
    ref_small = mlp_reference_bf16(x_small, params)
    assert out_small.shape == (B_small, OUTPUT_RESULTS)
    assert jnp.allclose(out_small, ref_small, atol=1e-2, rtol=1e-2), \
        "small-batch mismatch vs reference"

    # Larger batch: exercises 256-row MXU tiles and a 2-step parallel grid
    # (keeps both TensorCores busy on v7x).
    B_big = 512
    key, kb = jax.random.split(key)
    x_big = jax.random.normal(kb, (B_big, INPUT_FEATURES), jnp.float32)
    out_big = jax.block_until_ready(mlp_forward(x_big, prepared))
    ref_big = mlp_reference_bf16(x_big, params)
    assert out_big.shape == (B_big, OUTPUT_RESULTS)
    assert jnp.allclose(out_big, ref_big, atol=1e-2, rtol=1e-2), \
        "large-batch mismatch vs reference"

    print("KERNEL_OK")
</pallas_src>

<mosaic_0001>
module attributes {stable_mosaic.version = 11 : i64} {
  func.func @_mlp_kernel(%arg0: i32, %arg1: memref<8x19xf32, #tpu.memory_space<vmem>>, %arg2: memref<128x2048xbf16, #tpu.memory_space<vmem>>, %arg3: memref<1x2048xf32, #tpu.memory_space<vmem>>, %arg4: memref<2048x1024xbf16, #tpu.memory_space<vmem>>, %arg5: memref<1x1024xf32, #tpu.memory_space<vmem>>, %arg6: memref<1024x512xbf16, #tpu.memory_space<vmem>>, %arg7: memref<1x512xf32, #tpu.memory_space<vmem>>, %arg8: memref<512x128xbf16, #tpu.memory_space<vmem>>, %arg9: memref<1x128xf32, #tpu.memory_space<vmem>>, %arg10: memref<8x128xf32, #tpu.memory_space<vmem>>, %arg11: memref<8x128xf32, #tpu.memory_space<vmem>>) attributes {dimension_semantics = [#tpu.dimension_semantics<parallel>], iteration_bounds = array<i64: 1>, scalar_prefetch = 0 : i64, scratch_operands = 1 : i64, tpu.core_type = #tpu.core_type<tc>, window_params = [{transform_indices = @transform_0, window_bounds = array<i64: 8, 19>}, {pipeline_mode = #tpu.pipeline_mode<synchronous>, transform_indices = @transform_1, window_bounds = array<i64: 128, 2048>}, {pipeline_mode = #tpu.pipeline_mode<synchronous>, transform_indices = @transform_2, window_bounds = array<i64: 1, 2048>}, {pipeline_mode = #tpu.pipeline_mode<synchronous>, transform_indices = @transform_3, window_bounds = array<i64: 2048, 1024>}, {pipeline_mode = #tpu.pipeline_mode<synchronous>, transform_indices = @transform_4, window_bounds = array<i64: 1, 1024>}, {pipeline_mode = #tpu.pipeline_mode<synchronous>, transform_indices = @transform_5, window_bounds = array<i64: 1024, 512>}, {pipeline_mode = #tpu.pipeline_mode<synchronous>, transform_indices = @transform_6, window_bounds = array<i64: 1, 512>}, {pipeline_mode = #tpu.pipeline_mode<synchronous>, transform_indices = @transform_7, window_bounds = array<i64: 512, 128>}, {pipeline_mode = #tpu.pipeline_mode<synchronous>, transform_indices = @transform_8, window_bounds = array<i64: 1, 128>}, {transform_indices = @transform_9, window_bounds = array<i64: 8, 128>}]} {
    %cst = arith.constant 0.000000e+00 : f32
    %0 = vector.broadcast %cst : f32 to vector<8x128xf32>
    %c0 = arith.constant 0 : index
    %c0_0 = arith.constant 0 : index
    %1 = vector.load %arg11[%c0, %c0_0] : memref<8x128xf32, #tpu.memory_space<vmem>>, vector<8x128xf32>
    tpu.vector_store %arg11[%c0, %c0_0], %0 {strides = array<i32>} : memref<8x128xf32, #tpu.memory_space<vmem>>, vector<8x128xf32>,
    %c0_1 = arith.constant 0 : index
    %c0_2 = arith.constant 0 : index
    %2 = vector.load %arg1[%c0_1, %c0_2] : memref<8x19xf32, #tpu.memory_space<vmem>>, vector<8x19xf32>
    %c0_3 = arith.constant 0 : index
    %c0_4 = arith.constant 0 : index
    %3 = vector.load %arg11[%c0_3, %c0_4] : memref<8x128xf32, #tpu.memory_space<vmem>>, vector<8x19xf32>
    tpu.vector_store %arg11[%c0_3, %c0_4], %2 {strides = array<i32>} : memref<8x128xf32, #tpu.memory_space<vmem>>, vector<8x19xf32>,
    %c0_5 = arith.constant 0 : index
    %c0_6 = arith.constant 0 : index
    %4 = vector.load %arg11[%c0_5, %c0_6] : memref<8x128xf32, #tpu.memory_space<vmem>>, vector<8x128xf32>
    %5 = arith.truncf %4 : vector<8x128xf32> to vector<8x128xbf16>
    %c0_7 = arith.constant 0 : index
    %c0_8 = arith.constant 0 : index
    %6 = vector.load %arg2[%c0_7, %c0_8] : memref<128x2048xbf16, #tpu.memory_space<vmem>>, vector<128x2048xbf16>
    %cst_9 = arith.constant dense<0.000000e+00> : vector<8x2048xf32>
    %7 = tpu.matmul %5, %6, %cst_9 {dimension_numbers = #tpu.dot_dimension_numbers<[1], [0], [0], [1], [0, 0, 1, 1], [], []>} : vector<8x128xbf16>, vector<128x2048xbf16>, vector<8x2048xf32> -> vector<8x2048xf32>
    %c0_10 = arith.constant 0 : index
    %c0_11 = arith.constant 0 : index
    %8 = vector.load %arg3[%c0_10, %c0_11] : memref<1x2048xf32, #tpu.memory_space<vmem>>, vector<1x2048xf32>
    %9 = vector.broadcast %8 : vector<1x2048xf32> to vector<8x2048xf32>
    %10 = arith.addf %7, %9 : vector<8x2048xf32>
    %cst_12 = arith.constant 0.000000e+00 : f32
    %11 = vector.broadcast %cst_12 : f32 to vector<8x2048xf32>
    %12 = arith.maximumf %10, %11 : vector<8x2048xf32>
    %13 = arith.truncf %12 : vector<8x2048xf32> to vector<8x2048xbf16>
    %c0_13 = arith.constant 0 : index
    %c0_14 = arith.constant 0 : index
    %14 = vector.load %arg4[%c0_13, %c0_14] : memref<2048x1024xbf16, #tpu.memory_space<vmem>>, vector<2048x1024xbf16>
    %cst_15 = arith.constant dense<0.000000e+00> : vector<8x1024xf32>
    %15 = tpu.matmul %13, %14, %cst_15 {dimension_numbers = #tpu.dot_dimension_numbers<[1], [0], [0], [1], [0, 0, 1, 1], [], []>} : vector<8x2048xbf16>, vector<2048x1024xbf16>, vector<8x1024xf32> -> vector<8x1024xf32>
    %c0_16 = arith.constant 0 : index
    %c0_17 = arith.constant 0 : index
    %16 = vector.load %arg5[%c0_16, %c0_17] : memref<1x1024xf32, #tpu.memory_space<vmem>>, vector<1x1024xf32>
    %17 = vector.broadcast %16 : vector<1x1024xf32> to vector<8x1024xf32>
    %18 = arith.addf %15, %17 : vector<8x1024xf32>
    %cst_18 = arith.constant 0.000000e+00 : f32
    %19 = vector.broadcast %cst_18 : f32 to vector<8x1024xf32>
    %20 = arith.maximumf %18, %19 : vector<8x1024xf32>
    %21 = arith.truncf %20 : vector<8x1024xf32> to vector<8x1024xbf16>
    %c0_19 = arith.constant 0 : index
    %c0_20 = arith.constant 0 : index
    %22 = vector.load %arg6[%c0_19, %c0_20] : memref<1024x512xbf16, #tpu.memory_space<vmem>>, vector<1024x512xbf16>
    %cst_21 = arith.constant dense<0.000000e+00> : vector<8x512xf32>
    %23 = tpu.matmul %21, %22, %cst_21 {dimension_numbers = #tpu.dot_dimension_numbers<[1], [0], [0], [1], [0, 0, 1, 1], [], []>} : vector<8x1024xbf16>, vector<1024x512xbf16>, vector<8x512xf32> -> vector<8x512xf32>
    %c0_22 = arith.constant 0 : index
    %c0_23 = arith.constant 0 : index
    %24 = vector.load %arg7[%c0_22, %c0_23] : memref<1x512xf32, #tpu.memory_space<vmem>>, vector<1x512xf32>
    %25 = vector.broadcast %24 : vector<1x512xf32> to vector<8x512xf32>
    %26 = arith.addf %23, %25 : vector<8x512xf32>
    %cst_24 = arith.constant 0.000000e+00 : f32
    %27 = vector.broadcast %cst_24 : f32 to vector<8x512xf32>
    %28 = arith.maximumf %26, %27 : vector<8x512xf32>
    %29 = arith.truncf %28 : vector<8x512xf32> to vector<8x512xbf16>
    %c0_25 = arith.constant 0 : index
    %c0_26 = arith.constant 0 : index
    %30 = vector.load %arg8[%c0_25, %c0_26] : memref<512x128xbf16, #tpu.memory_space<vmem>>, vector<512x128xbf16>
    %cst_27 = arith.constant dense<0.000000e+00> : vector<8x128xf32>
    %31 = tpu.matmul %29, %30, %cst_27 {dimension_numbers = #tpu.dot_dimension_numbers<[1], [0], [0], [1], [0, 0, 1, 1], [], []>} : vector<8x512xbf16>, vector<512x128xbf16>, vector<8x128xf32> -> vector<8x128xf32>
    %c0_28 = arith.constant 0 : index
    %c0_29 = arith.constant 0 : index
    %32 = vector.load %arg9[%c0_28, %c0_29] : memref<1x128xf32, #tpu.memory_space<vmem>>, vector<1x128xf32>
    %33 = vector.broadcast %32 : vector<1x128xf32> to vector<8x128xf32>
    %34 = arith.addf %31, %33 : vector<8x128xf32>
    %c0_30 = arith.constant 0 : index
    %c0_31 = arith.constant 0 : index
    %35 = vector.load %arg10[%c0_30, %c0_31] : memref<8x128xf32, #tpu.memory_space<vmem>>, vector<8x128xf32>
    tpu.vector_store %arg10[%c0_30, %c0_31], %34 {strides = array<i32>} : memref<8x128xf32, #tpu.memory_space<vmem>>, vector<8x128xf32>,
    return
  }
  func.func @transform_0(%arg0: i32) -> (i32, i32) {
    %c0_i32 = arith.constant 0 : i32
    %c0_i32_0 = arith.constant 0 : i32
    return %arg0, %c0_i32 : i32, i32
  }
  func.func @transform_1(%arg0: i32) -> (i32, i32) {
    %c0_i32 = arith.constant 0 : i32
    %c0_i32_0 = arith.constant 0 : i32
    %c0_i32_1 = arith.constant 0 : i32
    return %c0_i32, %c0_i32_0 : i32, i32
  }
  func.func @transform_2(%arg0: i32) -> (i32, i32) {
    %c0_i32 = arith.constant 0 : i32
    %c0_i32_0 = arith.constant 0 : i32
    %c0_i32_1 = arith.constant 0 : i32
    return %c0_i32, %c0_i32_0 : i32, i32
  }
  func.func @transform_3(%arg0: i32) -> (i32, i32) {
    %c0_i32 = arith.constant 0 : i32
    %c0_i32_0 = arith.constant 0 : i32
    %c0_i32_1 = arith.constant 0 : i32
    return %c0_i32, %c0_i32_0 : i32, i32
  }
  func.func @transform_4(%arg0: i32) -> (i32, i32) {
    %c0_i32 = arith.constant 0 : i32
    %c0_i32_0 = arith.constant 0 : i32
    %c0_i32_1 = arith.constant 0 : i32
    return %c0_i32, %c0_i32_0 : i32, i32
  }
  func.func @transform_5(%arg0: i32) -> (i32, i32) {
    %c0_i32 = arith.constant 0 : i32
    %c0_i32_0 = arith.constant 0 : i32
    %c0_i32_1 = arith.constant 0 : i32
    return %c0_i32, %c0_i32_0 : i32, i32
  }
  func.func @transform_6(%arg0: i32) -> (i32, i32) {
    %c0_i32 = arith.constant 0 : i32
    %c0_i32_0 = arith.constant 0 : i32
    %c0_i32_1 = arith.constant 0 : i32
    return %c0_i32, %c0_i32_0 : i32, i32
  }
  func.func @transform_7(%arg0: i32) -> (i32, i32) {
    %c0_i32 = arith.constant 0 : i32
    %c0_i32_0 = arith.constant 0 : i32
    %c0_i32_1 = arith.constant 0 : i32
    return %c0_i32, %c0_i32_0 : i32, i32
  }
  func.func @transform_8(%arg0: i32) -> (i32, i32) {
    %c0_i32 = arith.constant 0 : i32
    %c0_i32_0 = arith.constant 0 : i32
    %c0_i32_1 = arith.constant 0 : i32
    return %c0_i32, %c0_i32_0 : i32, i32
  }
  func.func @transform_9(%arg0: i32) -> (i32, i32) {
    %c0_i32 = arith.constant 0 : i32
    %c0_i32_0 = arith.constant 0 : i32
    return %arg0, %c0_i32 : i32, i32
  }
}

</mosaic_0001>

<bundles_post_ra>
// kernel: tpu_custom_call.1
= control target key start
LH: loop header
LB: loop body
LE: loop exit
PB: predicated region body
PF: predicated region fallthrough
CT: control target
= control target key end

     0   :  { %14 = vsyncpa [#allocation4], 0  ;;  %s13887_s0 = inlined_call_operand.hbm [shape: f32[8,19], index: 0, kind: input, shape index: {}]   ;;  %s13888_s1 = inlined_call_operand.hbm [shape: bf16[128,2048], index: 1, kind: input, shape index: {}]   ;;  %s13889_s2 = inlined_call_operand.hbm [shape: f32[1,2048], index: 2, kind: input, shape index: {}]   ;;  %s13890_s3 = inlined_call_operand.hbm [shape: bf16[2048,1024], index: 3, kind: input, shape index: {}]   ;;  %s13891_s4 = inlined_call_operand.hbm [shape: f32[1,1024], index: 4, kind: input, shape index: {}]   ;;  %s13892_s5 = inlined_call_operand.hbm [shape: bf16[1024,512], index: 5, kind: input, shape index: {}]   ;;  %s13893_s6 = inlined_call_operand.hbm [shape: f32[1,512], index: 6, kind: input, shape index: {}]   ;;  %s13894_s7 = inlined_call_operand.hbm [shape: bf16[512,128], index: 7, kind: input, shape index: {}]   ;;  %s13895_s8 = inlined_call_operand.hbm [shape: f32[1,128], index: 8, kind: input, shape index: {}]   ;;  %s13896_s9 = inlined_call_operand.hbm [shape: f32[8,128], index: 9, kind: output, shape index: {}]  }
   0x1   :  { %15 = vsyncpa [#allocation7], 0 }
   0x2   :  { %16 = vsyncpa [#allocation10], 0 }
   0x3   :  { %17 = vsyncpa [#allocation13], 0 }
   0x4   :  { %18 = vsyncpa [#allocation16], 0 }
   0x5   :  { %19 = vsyncpa [#allocation5], 0  ;;  %s13438_s30 = smov [#allocation6]   ;;  %s13206_s13 = scalar_lea.hbm %s13888_s1, 16384 }
   0x6   :  { %s35_s10 = sshll.u32 %s13438_s30, 4  ;;  %p13207_p0 = scmp.ne.s32.totalorder %s13888_s1, %s13206_s13  ;;  %s36_s10 = int_to_ptr.vmem [resolvable:$true] %s35_s10 }
   0x7   :  { %p13210_p1 = scmp.lt.u32.totalorder %s13206_s13, %s13888_s1 }
   0x9   :  { %p13212_p2 = pnand %p13210_p1, %p13207_p0 }
   0xb   :  { %13215 = shalt.err (!%p13212_p2)
}
   0xc   :  { %s13216_s18 = scalar_lea.vmem %s36_s10, 16384  ;;  %p13221_p4 = scmp.lt.s32.totalorder %s36_s10, %s36_s10 }
   0xd   :  { %p13217_p3 = scmp.ne.s32.totalorder %s36_s10, %s13216_s18  ;;  %p13222_p5 = scmp.lt.s32.totalorder %s13216_s18, %s13216_s18 }
   0xf   :  { %p13223_p6 = por %p13222_p5, %p13221_p4 }
  0x11   :  { %p13224_p7 = pnand %p13223_p6, %p13217_p3 }
  0x13   :  { %13227 = shalt.err (!%p13224_p7)
}
  0x14   :  { %s13439_s19 = smov 1024   ;;  %s13440_s20 = smov 64  }
  0x15   :  { %41 = dma.hbm_to_vmem [thread:$0]  %s13888_s1, 16384, %s36_s10, [#allocation7], %s13439_s19, %s13439_s19, %s13440_s20  }
  0x16   :  { %s13441_s23 = smov [#allocation9]   ;;  %s13228_s27 = scalar_lea.hbm %s13890_s3, 131072 }
  0x17   :  { %s57_s24 = sshll.u32 %s13441_s23, 4  ;;  %p13229_p8 = scmp.ne.s32.totalorder %s13890_s3, %s13228_s27  ;;  %s58_s24 = int_to_ptr.vmem [resolvable:$true] %s57_s24 }
  0x18   :  { %p13232_p9 = scmp.lt.u32.totalorder %s13228_s27, %s13890_s3 }
  0x1a   :  { %p13234_p10 = pnand %p13232_p9, %p13229_p8 }
  0x1c   :  { %13237 = shalt.err (!%p13234_p10)
}
  0x1d   :  { %s13238_s12 = scalar_lea.vmem %s58_s24, 131072  ;;  %p13243_p12 = scmp.lt.s32.totalorder %s58_s24, %s58_s24 }
  0x1e   :  { %p13239_p11 = scmp.ne.s32.totalorder %s58_s24, %s13238_s12  ;;  %p13244_p13 = scmp.lt.s32.totalorder %s13238_s12, %s13238_s12 }
  0x20   :  { %p13245_p0 = por %p13244_p13, %p13243_p12 }
  0x22   :  { %p13246_p1 = pnand %p13245_p0, %p13239_p11 }
  0x24   :  { %13249 = shalt.err (!%p13246_p1)
}
  0x25   :  { %s13442_s1 = smov 512   ;;  %s13443_s10 = smov 32  }
  0x26   :  { %63 = dma.hbm_to_vmem [thread:$0]  %s13890_s3, 131072, %s58_s24, [#allocation10], %s13442_s1, %s13442_s1, %s13443_s10  }
  0x27   :  { %s13444_s15 = smov [#allocation12]   ;;  %s13250_s19 = scalar_lea.hbm %s13892_s5, 32768 }
  0x28   :  { %s79_s16 = sshll.u32 %s13444_s15, 4  ;;  %p13251_p2 = scmp.ne.s32.totalorder %s13892_s5, %s13250_s19  ;;  %s80_s16 = int_to_ptr.vmem [resolvable:$true] %s79_s16 }
  0x29   :  { %p13254_p3 = scmp.lt.u32.totalorder %s13250_s19, %s13892_s5 }
  0x2b   :  { %p13256_p4 = pnand %p13254_p3, %p13251_p2 }
  0x2d   :  { %13259 = shalt.err (!%p13256_p4)
}
  0x2e   :  { %s13260_s26 = scalar_lea.vmem %s80_s16, 32768  ;;  %p13265_p6 = scmp.lt.s32.totalorder %s80_s16, %s80_s16 }
  0x2f   :  { %p13261_p5 = scmp.ne.s32.totalorder %s80_s16, %s13260_s26  ;;  %p13266_p7 = scmp.lt.s32.totalorder %s13260_s26, %s13260_s26 }
  0x31   :  { %p13267_p8 = por %p13266_p7, %p13265_p6 }
  0x33   :  { %p13268_p9 = pnand %p13267_p8, %p13261_p5 }
  0x35   :  { %13271 = shalt.err (!%p13268_p9)
}
  0x36   :  { %s13445_s3 = smov 256   ;;  %s13446_s24 = smov 16  }
  0x37   :  { %85 = dma.hbm_to_vmem [thread:$0]  %s13892_s5, 32768, %s80_s16, [#allocation13], %s13445_s3, %s13445_s3, %s13446_s24  }
  0x38   :  { %s13447_s29 = smov [#allocation15]   ;;  %s13272_s1 = scalar_lea.hbm %s13894_s7, 4096 }
  0x39   :  { %s101_s30 = sshll.u32 %s13447_s29, 4  ;;  %p13273_p10 = scmp.ne.s32.totalorder %s13894_s7, %s13272_s1  ;;  %s102_s30 = int_to_ptr.vmem [resolvable:$true] %s101_s30 }
  0x3a   :  { %p13276_p11 = scmp.lt.u32.totalorder %s13272_s1, %s13894_s7 }
  0x3c   :  { %p13278_p12 = pnand %p13276_p11, %p13273_p10 }
  0x3e   :  { %13281 = shalt.err (!%p13278_p12)
}
  0x3f   :  { %s13282_s17 = scalar_lea.vmem %s102_s30, 4096  ;;  %p13287_p0 = scmp.lt.s32.totalorder %s102_s30, %s102_s30 }
  0x40   :  { %p13283_p13 = scmp.ne.s32.totalorder %s102_s30, %s13282_s17  ;;  %p13288_p1 = scmp.lt.s32.totalorder %s13282_s17, %s13282_s17 }
  0x42   :  { %p13289_p2 = por %p13288_p1, %p13287_p0 }
  0x44   :  { %p13290_p3 = pnand %p13289_p2, %p13283_p13 }
  0x46   :  { %13293 = shalt.err (!%p13290_p3)
}
  0x47   :  { %s13448_s5 = smov 4   ;;  %s13449_s19 = smov [#allocation3]  }
  0x48   :  { %107 = dma.hbm_to_vmem [thread:$0]  %s13894_s7, 4096, %s102_s30, [#allocation16], %s13440_s20, %s13440_s20, %s13448_s5  }
  0x49   :  { %s26_s21 = sshll.u32 %s13449_s19, 4  ;;  %s13450_s22 = smov [#allocation8]   ;;  %s27_s21 = int_to_ptr.vmem [resolvable:$true] %s26_s21 }
  0x4a   :  { %s48_s23 = sshll.u32 %s13450_s22, 4  ;;  %s13294_s3 = scalar_lea.hbm %s13887_s0, 128  ;;  %s49_s23 = int_to_ptr.vmem [resolvable:$true] %s48_s23 }
  0x4b   :  { %p13295_p4 = scmp.ne.s32.totalorder %s13887_s0, %s13294_s3  ;;  %p13298_p5 = scmp.lt.u32.totalorder %s13294_s3, %s13887_s0 }
  0x4d   :  { %p13300_p6 = pnand %p13298_p5, %p13295_p4 }
  0x4f   :  { %13303 = shalt.err (!%p13300_p6)
}
  0x50   :  { %s13304_s7 = scalar_lea.vmem %s27_s21, 128  ;;  %p13309_p8 = scmp.lt.s32.totalorder %s27_s21, %s27_s21 }
  0x51   :  { %p13305_p7 = scmp.ne.s32.totalorder %s27_s21, %s13304_s7  ;;  %p13310_p9 = scmp.lt.s32.totalorder %s13304_s7, %s13304_s7 }
  0x53   :  { %p13311_p10 = por %p13310_p9, %p13309_p8 }
  0x55   :  { %p13312_p11 = pnand %p13311_p10, %p13305_p7 }
  0x57   :  { %13315 = shalt.err (!%p13312_p11)
}
  0x58   :  { %29 = dma.hbm_to_vmem [thread:$0]  %s13887_s0, 128, %s27_s21, [#allocation4]  }
  0x59   :  { %s13316_s1 = scalar_lea.hbm %s13889_s2, 256 }
  0x5a   :  { %p13317_p12 = scmp.ne.s32.totalorder %s13889_s2, %s13316_s1  ;;  %p13320_p13 = scmp.lt.u32.totalorder %s13316_s1, %s13889_s2 }
  0x5c   :  { %p13322_p0 = pnand %p13320_p13, %p13317_p12 }
  0x5e   :  { %13325 = shalt.err (!%p13322_p0)
}
  0x5f   :  { %s13326_s17 = scalar_lea.vmem %s49_s23, 256  ;;  %p13331_p2 = scmp.lt.s32.totalorder %s49_s23, %s49_s23 }
  0x60   :  { %p13327_p1 = scmp.ne.s32.totalorder %s49_s23, %s13326_s17  ;;  %p13332_p3 = scmp.lt.s32.totalorder %s13326_s17, %s13326_s17 }
  0x62   :  { %p13333_p4 = por %p13332_p3, %p13331_p2 }
  0x64   :  { %p13334_p5 = pnand %p13333_p4, %p13327_p1 }
  0x66   :  { %13337 = shalt.err (!%p13334_p5)
}
  0x67   :  { %51 = dma.hbm_to_vmem [thread:$0]  %s13889_s2, 256, %s49_s23, [#allocation7]  }
  0x68   :  { %s13451_s16 = smov [#allocation11]   ;;  %s13452_s19 = smov [#allocation14]  }
  0x69   :  { %s70_s18 = sshll.u32 %s13451_s16, 4  ;;  %s92_s21 = sshll.u32 %s13452_s19, 4  ;;  %s71_s18 = int_to_ptr.vmem [resolvable:$true] %s70_s18  ;;  %s93_s21 = int_to_ptr.vmem [resolvable:$true] %s92_s21 }
  0x6a   :  { %s13338_s26 = scalar_lea.hbm %s13891_s4, 128 }
  0x6b   :  { %p13339_p6 = scmp.ne.s32.totalorder %s13891_s4, %s13338_s26  ;;  %p13342_p7 = scmp.lt.u32.totalorder %s13338_s26, %s13891_s4 }
  0x6d   :  { %p13344_p8 = pnand %p13342_p7, %p13339_p6 }
  0x6f   :  { %13347 = shalt.err (!%p13344_p8)
}
  0x70   :  { %s13348_s2 = scalar_lea.vmem %s71_s18, 128  ;;  %p13353_p10 = scmp.lt.s32.totalorder %s71_s18, %s71_s18 }
  0x71   :  { %p13349_p9 = scmp.ne.s32.totalorder %s71_s18, %s13348_s2  ;;  %p13354_p11 = scmp.lt.s32.totalorder %s13348_s2, %s13348_s2 }
  0x73   :  { %p13355_p12 = por %p13354_p11, %p13353_p10 }
  0x75   :  { %p13356_p13 = pnand %p13355_p12, %p13349_p9 }
  0x77   :  { %13359 = shalt.err (!%p13356_p13)
}
  0x78   :  { %73 = dma.hbm_to_vmem [thread:$0]  %s13891_s4, 128, %s71_s18, [#allocation10]  }
  0x79   :  { %s13360_s30 = scalar_lea.hbm %s13893_s6, 64 }
  0x7a   :  { %p13361_p0 = scmp.ne.s32.totalorder %s13893_s6, %s13360_s30  ;;  %p13364_p1 = scmp.lt.u32.totalorder %s13360_s30, %s13893_s6 }
  0x7c   :  { %p13366_p2 = pnand %p13364_p1, %p13361_p0 }
  0x7e   :  { %13369 = shalt.err (!%p13366_p2)
}
  0x7f   :  { %s13370_s13 = scalar_lea.vmem %s93_s21, 64  ;;  %p13375_p4 = scmp.lt.s32.totalorder %s93_s21, %s93_s21 }
  0x80   :  { %p13371_p3 = scmp.ne.s32.totalorder %s93_s21, %s13370_s13  ;;  %p13376_p5 = scmp.lt.s32.totalorder %s13370_s13, %s13370_s13 }
  0x82   :  { %p13377_p6 = por %p13376_p5, %p13375_p4 }
  0x84   :  { %p13378_p7 = pnand %p13377_p6, %p13371_p3 }
  0x86   :  { %13381 = shalt.err (!%p13378_p7)
}
  0x87   :  { %95 = dma.hbm_to_vmem [thread:$0]  %s13893_s6, 64, %s93_s21, [#allocation13]  }
  0x88   :  { %s13453_s15 = smov [#allocation17]   ;;  %s13382_s16 = scalar_lea.hbm %s13895_s8, 16 }
  0x89   :  { %s114_s17 = sshll.u32 %s13453_s15, 4  ;;  %p13383_p8 = scmp.ne.s32.totalorder %s13895_s8, %s13382_s16  ;;  %s115_s17 = int_to_ptr.vmem [resolvable:$true] %s114_s17 }
  0x8a   :  { %p13386_p9 = scmp.lt.u32.totalorder %s13382_s16, %s13895_s8 }
  0x8c   :  { %p13388_p10 = pnand %p13386_p9, %p13383_p8 }
  0x8e   :  { %13391 = shalt.err (!%p13388_p10)
}
  0x8f   :  { %s13392_s26 = scalar_lea.vmem %s115_s17, 16  ;;  %s13396_s6 = scalar_lea.vmem %s115_s17, 32 }
  0x90   :  { %p13393_p11 = scmp.ne.s32.totalorder %s115_s17, %s13392_s26  ;;  %p13397_p12 = scmp.lt.s32.totalorder %s115_s17, %s115_s17 }
  0x91   :  { %p13398_p13 = scmp.lt.s32.totalorder %s13396_s6, %s13392_s26 }
  0x93   :  { %p13399_p0 = por %p13398_p13, %p13397_p12 }
  0x95   :  { %p13400_p1 = pnand %p13399_p0, %p13393_p11 }
  0x97   :  { %13403 = shalt.err (!%p13400_p1)
}
  0x98   :  { %117 = dma.hbm_to_vmem [thread:$0]  %s13895_s8, 16, %s115_s17, [#allocation16]  }
  0x99   :  { %13426 = dma.done.wait [#allocation4], 128  }
  0x9a   :  { %13427 = vsyncadd [#allocation4], 4294967168 }
  0x9b   :  { %13428 = dma.done.wait [#allocation7], 16640  }
  0x9c   :  { %13429 = vsyncadd [#allocation7], 4294950656 }
  0x9d   :  { %13430 = dma.done.wait [#allocation10], 131200  }
  0x9e   :  { %13431 = vsyncadd [#allocation10], 4294836096 }
  0x9f   :  { %13432 = dma.done.wait [#allocation13], 32832  }
  0xa0   :  { %13433 = vsyncadd [#allocation13], 4294934464 }
  0xa1   :  { %13434 = dma.done.wait [#allocation16], 4112  }
  0xa2   :  { %13435 = vsyncadd [#allocation16], 4294963184  ;;  %v13454_v0 = vmov 0   ;;  %v13455_v1 = vmov 0.0   ;;  %v152_v2 = vld [vmem:[#allocation6] sm:$0xff]  ;;  %vm148_vm0 = vcmask 154624  }
  0xa3   :  { %1036 = vmatprep.mubr.bf16.mxu0 %v13454_v0  ;;  %146 = vst [vmem:[#allocation2] sm:$0xff] %v13455_v1  ;;  %1077 = vmatprep.mubr.bf16.mxu1 %v13454_v0  ;;  %v160_v3 = vld [vmem:[#allocation6 + $0x40] sm:$0xff]  ;;  %v147_v15 = vld [vmem:[#allocation3] sm:$0xff]  ;;  %v153_v16 = vld [vmem:[#allocation6 + $0x8] sm:$0xff]  ;;  %s13456_s8 = smov [#allocation18]  }
  0xa4   :  { %v168_v4 = vld [vmem:[#allocation6 + $0x80] sm:$0xff]  ;;  %v11136_v5 = vcombine.high %v152_v2, %v160_v3  ;;  %v11135_v6 = vcombine.low %v152_v2, %v160_v3  ;;  %149 = vst.msk [vmem:[#allocation2] sm:$0xff] %vm148_vm0, %v147_v15  ;;  %v161_v17 = vld [vmem:[#allocation6 + $0x48] sm:$0xff]  ;;  %v154_v60 = vld [vmem:[#allocation6 + $0x10] sm:$0xff]  ;;  %s11122_s24 = sshll.u32 %s13456_s8, 4  ;;  %s11123_s24 = int_to_ptr.vmem [resolvable:$true] %s11122_s24 }
  0xa5   :  { %v176_v7 = vld [vmem:[#allocation6 + $0xc0] sm:$0xff]  ;;  %v169_v18 = vld [vmem:[#allocation6 + $0x88] sm:$0xff]  ;;  %v11138_v20 = vcombine.high %v153_v16, %v161_v17  ;;  %v11137_v21 = vcombine.low %v153_v16, %v161_v17  ;;  %v162_v61 = vld [vmem:[#allocation6 + $0x50] sm:$0xff]  ;;  %s13404_s27 = scalar_lea.vmem %s11123_s24, 128  ;;  %p13409_p3 = scmp.lt.s32.totalorder %s11123_s24, %s11123_s24 }
  0xa6   :  { %v11152_v8 = vcombine.high %v168_v4, %v176_v7  ;;  %v184_v9 = vld [vmem:[#allocation6 + $0x100] sm:$0xff]  ;;  %1004 = vmatprep.subr.bf16.mxu0 %v11136_v5  ;;  %v11151_v11 = vcombine.low %v168_v4, %v176_v7  ;;  %v177_v19 = vld [vmem:[#allocation6 + $0xc8] sm:$0xff]  ;;  %v11140_v4 = vcombine.high %v154_v60, %v162_v61  ;;  %v178_v7 = vld [vmem:[#allocation6 + $0xd0] sm:$0xff]  ;;  %p13405_p2 = scmp.ne.s32.totalorder %s11123_s24, %s13404_s27  ;;  %p13410_p4 = scmp.lt.s32.totalorder %s13404_s27, %s13404_s27 }
  0xa7   :  { %v192_v10 = vld [vmem:[#allocation6 + $0x140] sm:$0xff]  ;;  %1005 = vmatpush1.bf16.msra.mxu0 %v11135_v6  ;;  %v11154_v22 = vcombine.high %v169_v18, %v177_v19  ;;  %v185_v24 = vld [vmem:[#allocation6 + $0x108] sm:$0xff]  ;;  %1045 = vmatprep.subr.bf16.mxu1 %v11138_v20  ;;  %v11153_v29 = vcombine.low %v169_v18, %v177_v19  ;;  %v170_v6 = vld [vmem:[#allocation6 + $0x90] sm:$0xff] }
  0xa8   :  { %v200_v12 = vld [vmem:[#allocation6 + $0x180] sm:$0xff]  ;;  %1006 = vmatprep.subr.bf16.mxu0 %v11152_v8  ;;  %v11168_v13 = vcombine.high %v184_v9, %v192_v10  ;;  %v11167_v23 = vcombine.low %v184_v9, %v192_v10  ;;  %v193_v25 = vld [vmem:[#allocation6 + $0x148] sm:$0xff]  ;;  %1046 = vmatpush1.bf16.msra.mxu1 %v11137_v21  ;;  %v11139_v10 = vcombine.low %v154_v60, %v162_v61  ;;  %v186_v15 = vld [vmem:[#allocation6 + $0x110] sm:$0xff]  ;;  %p13411_p5 = por %p13410_p4, %p13409_p3 }
  0xa9   :  { %v208_v14 = vld [vmem:[#allocation6 + $0x1c0] sm:$0xff]  ;;  %1047 = vmatprep.subr.bf16.mxu1 %v11154_v22  ;;  %v11170_v30 = vcombine.high %v185_v24, %v193_v25  ;;  %v201_v32 = vld [vmem:[#allocation6 + $0x188] sm:$0xff]  ;;  %v11169_v37 = vcombine.low %v185_v24, %v193_v25  ;;  %v194_v16 = vld [vmem:[#allocation6 + $0x150] sm:$0xff]  ;;  %v11155_v18 = vcombine.low %v170_v6, %v178_v7 }
  0xaa   :  { %v11184_v26 = vcombine.high %v200_v12, %v208_v14  ;;  %v216_v27 = vld [vmem:[#allocation6 + $0x200] sm:$0xff]  ;;  %v11183_v31 = vcombine.low %v200_v12, %v208_v14  ;;  %v209_v33 = vld [vmem:[#allocation6 + $0x1c8] sm:$0xff]  ;;  %v163_v12 = vld [vmem:[#allocation6 + $0x58] sm:$0xff]  ;;  %v11172_v21 = vcombine.high %v186_v15, %v194_v16  ;;  %p13412_p6 = pnand %p13411_p5, %p13405_p2 }
  0xab   :  { %1007 = vmatpush1.bf16.msra.mxu0 %v11151_v11  ;;  %v224_v28 = vld [vmem:[#allocation6 + $0x240] sm:$0xff]  ;;  %v11186_v38 = vcombine.high %v201_v32, %v209_v33  ;;  %v217_v40 = vld [vmem:[#allocation6 + $0x208] sm:$0xff]  ;;  %v11185_v45 = vcombine.low %v201_v32, %v209_v33  ;;  %v150_v1 = vld [vmem:[#allocation2] sm:$0xff] }
  0xac   :  { %1008 = vmatprep.subr.bf16.mxu0 %v11168_v13  ;;  %v11200_v34 = vcombine.high %v216_v27, %v224_v28  ;;  %v232_v35 = vld [vmem:[#allocation6 + $0x280] sm:$0xff]  ;;  %1048 = vmatpush1.bf16.msra.mxu1 %v11153_v29  ;;  %v11199_v39 = vcombine.low %v216_v27, %v224_v28  ;;  %v225_v41 = vld [vmem:[#allocation6 + $0x248] sm:$0xff]  ;;  %v13620_v8 = vpack.c.bf16 %v150_v1, %v150_v1  ;;  %v155_v11 = vld [vmem:[#allocation6 + $0x18] sm:$0xff] }
  0xad   :  { %v240_v36 = vld [vmem:[#allocation6 + $0x2c0] sm:$0xff]  ;;  %1049 = vmatprep.subr.bf16.mxu1 %v11170_v30  ;;  %v11202_v46 = vcombine.high %v217_v40, %v225_v41  ;;  %v233_v48 = vld [vmem:[#allocation6 + $0x288] sm:$0xff]  ;;  %v11201_v53 = vcombine.low %v217_v40, %v225_v41  ;;  %v11156_v13 = vcombine.high %v170_v6, %v178_v7  ;;  %v11142_v17 = vcombine.high %v155_v11, %v163_v12  ;;  %v171_v19 = vld [vmem:[#allocation6 + $0x98] sm:$0xff] }
  0xae   :  { %v11216_v42 = vcombine.high %v232_v35, %v240_v36  ;;  %v248_v43 = vld [vmem:[#allocation6 + $0x300] sm:$0xff]  ;;  %v11215_v47 = vcombine.low %v232_v35, %v240_v36  ;;  %v241_v49 = vld [vmem:[#allocation6 + $0x2c8] sm:$0xff]  ;;  %v179_v20 = vld [vmem:[#allocation6 + $0xd8] sm:$0xff]  ;;  %v11141_v22 = vcombine.low %v155_v11, %v163_v12 }
  0xaf   :  { %1009 = vmatpush1.bf16.msra.mxu0 %v11167_v23  ;;  %v256_v44 = vld [vmem:[#allocation6 + $0x340] sm:$0xff]  ;;  %v11218_v54 = vcombine.high %v233_v48, %v241_v49  ;;  %v249_v56 = vld [vmem:[#allocation6 + $0x308] sm:$0xff]  ;;  %v11217_v59 = vcombine.low %v233_v48, %v241_v49  ;;  %v202_v23 = vld [vmem:[#allocation6 + $0x190] sm:$0xff]  ;;  %v11158_v25 = vcombine.high %v171_v19, %v179_v20  ;;  %v11157_v30 = vcombine.low %v171_v19, %v179_v20 }
  0xb0   :  { %1010 = vmatprep.subr.bf16.mxu0 %v11184_v26  ;;  %1050 = vmatpush1.bf16.msra.mxu1 %v11169_v37  ;;  %v11232_v50 = vcombine.high %v248_v43, %v256_v44  ;;  %v264_v51 = vld [vmem:[#allocation6 + $0x380] sm:$0xff]  ;;  %v11231_v55 = vcombine.low %v248_v43, %v256_v44  ;;  %v257_v57 = vld [vmem:[#allocation6 + $0x348] sm:$0xff]  ;;  %v210_v24 = vld [vmem:[#allocation6 + $0x1d0] sm:$0xff]  ;;  %v11171_v26 = vcombine.low %v186_v15, %v194_v16 }
  0xb1   :  { %1051 = vmatprep.subr.bf16.mxu1 %v11186_v38  ;;  %v272_v52 = vld [vmem:[#allocation6 + $0x3c0] sm:$0xff]  ;;  %v11234_v62 = vcombine.high %v249_v56, %v257_v57  ;;  %v265_v2 = vld [vmem:[#allocation6 + $0x388] sm:$0xff]  ;;  %v11233_v5 = vcombine.low %v249_v56, %v257_v57  ;;  %v187_v27 = vld [vmem:[#allocation6 + $0x118] sm:$0xff]  ;;  %v11188_v29 = vcombine.high %v202_v23, %v210_v24 }
  0xb2   :  { %v11248_v58 = vcombine.high %v264_v51, %v272_v52  ;;  %v11247_v63 = vcombine.low %v264_v51, %v272_v52  ;;  %v273_v3 = vld [vmem:[#allocation6 + $0x3c8] sm:$0xff]  ;;  %v195_v28 = vld [vmem:[#allocation6 + $0x158] sm:$0xff]  ;;  %v226_v32 = vld [vmem:[#allocation6 + $0x250] sm:$0xff] }
  0xb3   :  { %1011 = vmatpush1.bf16.msra.mxu0 %v11183_v31  ;;  %v11250_v9 = vcombine.high %v265_v2, %v273_v3  ;;  %v11249_v14 = vcombine.low %v265_v2, %v273_v3  ;;  %v218_v31 = vld [vmem:[#allocation6 + $0x210] sm:$0xff]  ;;  %v11174_v33 = vcombine.high %v187_v27, %v195_v28  ;;  %v203_v35 = vld [vmem:[#allocation6 + $0x198] sm:$0xff]  ;;  %v11173_v38 = vcombine.low %v187_v27, %v195_v28  ;;  %v164_v1 = vld [vmem:[#allocation6 + $0x60] sm:$0xff] }
  0xb4   :  { %1012 = vmatprep.subr.bf16.mxu0 %v11200_v34  ;;  %1052 = vmatpush1.bf16.msra.mxu1 %v11185_v45  ;;  %v11187_v34 = vcombine.low %v202_v23, %v210_v24  ;;  %v211_v36 = vld [vmem:[#allocation6 + $0x1d8] sm:$0xff]  ;;  %v11204_v37 = vcombine.high %v218_v31, %v226_v32  ;;  %v242_v40 = vld [vmem:[#allocation6 + $0x2d0] sm:$0xff]  ;;  %v172_v7 = vld [vmem:[#allocation6 + $0xa0] sm:$0xff] }
  0xb5   :  { %1053 = vmatprep.subr.bf16.mxu1 %v11202_v46  ;;  %v11190_v41 = vcombine.high %v203_v35, %v211_v36  ;;  %v219_v43 = vld [vmem:[#allocation6 + $0x218] sm:$0xff]  ;;  %v11189_v46 = vcombine.low %v203_v35, %v211_v36  ;;  %v258_v48 = vld [vmem:[#allocation6 + $0x350] sm:$0xff]  ;;  %v165_v11 = vld [vmem:[#allocation6 + $0x68] sm:$0xff] }
  0xb6   :  { %v227_v44 = vld [vmem:[#allocation6 + $0x258] sm:$0xff]  ;;  %v274_v56 = vld [vmem:[#allocation6 + $0x3d0] sm:$0xff]  ;;  %v180_v12 = vld [vmem:[#allocation6 + $0xe0] sm:$0xff] }
  0xb7   :  { %1013 = vmatpush1.bf16.msra.mxu0 %v11199_v39  ;;  %v234_v39 = vld [vmem:[#allocation6 + $0x290] sm:$0xff]  ;;  %v11206_v49 = vcombine.high %v219_v43, %v227_v44  ;;  %v235_v51 = vld [vmem:[#allocation6 + $0x298] sm:$0xff]  ;;  %v188_v15 = vld [vmem:[#allocation6 + $0x120] sm:$0xff] }
  0xb8   :  { %1014 = vmatprep.subr.bf16.mxu0 %v11216_v42  ;;  %1054 = vmatpush1.bf16.msra.mxu1 %v11201_v53  ;;  %v11203_v42 = vcombine.low %v218_v31, %v226_v32  ;;  %v11220_v45 = vcombine.high %v234_v39, %v242_v40  ;;  %v243_v52 = vld [vmem:[#allocation6 + $0x2d8] sm:$0xff]  ;;  %v196_v16 = vld [vmem:[#allocation6 + $0x160] sm:$0xff]  ;;  %v173_v19 = vld [vmem:[#allocation6 + $0xa8] sm:$0xff] }
  0xb9   :  { %1055 = vmatprep.subr.bf16.mxu1 %v11218_v54  ;;  %v11205_v54 = vcombine.low %v219_v43, %v227_v44  ;;  %v11222_v57 = vcombine.high %v235_v51, %v243_v52  ;;  %v259_v60 = vld [vmem:[#allocation6 + $0x358] sm:$0xff]  ;;  %v181_v20 = vld [vmem:[#allocation6 + $0xe8] sm:$0xff]  ;;  %v204_v23 = vld [vmem:[#allocation6 + $0x1a0] sm:$0xff] }
  0xba   :  { %v212_v24 = vld [vmem:[#allocation6 + $0x1e0] sm:$0xff]  ;;  %v189_v27 = vld [vmem:[#allocation6 + $0x128] sm:$0xff] }
  0xbb   :  { %1015 = vmatpush1.bf16.msra.mxu0 %v11215_v47  ;;  %v250_v47 = vld [vmem:[#allocation6 + $0x310] sm:$0xff]  ;;  %v197_v28 = vld [vmem:[#allocation6 + $0x168] sm:$0xff]  ;;  %v220_v31 = vld [vmem:[#allocation6 + $0x220] sm:$0xff] }
  0xbc   :  { %1016 = vmatprep.subr.bf16.mxu0 %v11232_v50  ;;  %1056 = vmatpush1.bf16.msra.mxu1 %v11217_v59  ;;  %v11219_v50 = vcombine.low %v234_v39, %v242_v40  ;;  %v11236_v53 = vcombine.high %v250_v47, %v258_v48  ;;  %v251_v59 = vld [vmem:[#allocation6 + $0x318] sm:$0xff]  ;;  %v228_v32 = vld [vmem:[#allocation6 + $0x260] sm:$0xff]  ;;  %v205_v35 = vld [vmem:[#allocation6 + $0x1a8] sm:$0xff] }
  0xbd   :  { %1057 = vmatprep.subr.bf16.mxu1 %v11234_v62  ;;  %v11221_v62 = vcombine.low %v235_v51, %v243_v52  ;;  %v11238_v2 = vcombine.high %v251_v59, %v259_v60  ;;  %v213_v36 = vld [vmem:[#allocation6 + $0x1e8] sm:$0xff]  ;;  %v236_v39 = vld [vmem:[#allocation6 + $0x2a0] sm:$0xff] }
  0xbe   :  { %v244_v40 = vld [vmem:[#allocation6 + $0x2e0] sm:$0xff]  ;;  %v221_v43 = vld [vmem:[#allocation6 + $0x228] sm:$0xff] }
  0xbf   :  { %1017 = vmatpush1.bf16.msra.mxu0 %v11231_v55  ;;  %v266_v55 = vld [vmem:[#allocation6 + $0x390] sm:$0xff]  ;;  %v229_v44 = vld [vmem:[#allocation6 + $0x268] sm:$0xff] }
  0xc0   :  { %1018 = vmatprep.subr.bf16.mxu0 %v11248_v58  ;;  %1058 = vmatpush1.bf16.msra.mxu1 %v11233_v5  ;;  %v11235_v58 = vcombine.low %v250_v47, %v258_v48  ;;  %v11252_v61 = vcombine.high %v266_v55, %v274_v56  ;;  %v11251_v3 = vcombine.low %v266_v55, %v274_v56  ;;  %v275_v5 = vld [vmem:[#allocation6 + $0x3d8] sm:$0xff]  ;;  %v252_v47 = vld [vmem:[#allocation6 + $0x320] sm:$0xff]  ;;  %v237_v51 = vld [vmem:[#allocation6 + $0x2a8] sm:$0xff] }
  0xc1   :  { %1059 = vmatprep.subr.bf16.mxu1 %v11250_v9  ;;  %v11237_v9 = vcombine.low %v251_v59, %v259_v60  ;;  %v260_v48 = vld [vmem:[#allocation6 + $0x360] sm:$0xff]  ;;  %v245_v52 = vld [vmem:[#allocation6 + $0x2e8] sm:$0xff] }
  0xc2   :  { %v268_v55 = vld [vmem:[#allocation6 + $0x3a0] sm:$0xff]  ;;  %v253_v59 = vld [vmem:[#allocation6 + $0x328] sm:$0xff] }
  0xc3   :  { %1019 = vmatpush1.bf16.msra.mxu0 %v11247_v63  ;;  %v156_v63 = vld [vmem:[#allocation6 + $0x20] sm:$0xff]  ;;  %v261_v60 = vld [vmem:[#allocation6 + $0x368] sm:$0xff] }
  0xc4   :  { %1086 = vmatprep.subr.bf16.mxu0 %v11140_v4  ;;  %1060 = vmatpush1.bf16.msra.mxu1 %v11249_v14  ;;  %v267_v4 = vld [vmem:[#allocation6 + $0x398] sm:$0xff]  ;;  %v11144_v6 = vcombine.high %v156_v63, %v164_v1  ;;  %v11143_v14 = vcombine.low %v156_v63, %v164_v1  ;;  %v276_v56 = vld [vmem:[#allocation6 + $0x3e0] sm:$0xff]  ;;  %v158_v63 = vld [vmem:[#allocation6 + $0x30] sm:$0xff] }
  0xc5   :  { %1127 = vmatprep.subr.bf16.mxu1 %v11142_v17  ;;  %v11160_v17 = vcombine.high %v172_v7, %v180_v12  ;;  %v166_v1 = vld [vmem:[#allocation6 + $0x70] sm:$0xff] }
  0xc6   :  { %1037 = vmatmul.mubr.bf16.vlgmr.msra.gmra.mrb[0].mxu0 %v13620_v8 }
  0xc7   :  { %1087 = vmatpush1.bf16.msra.mxu0 %v11139_v10  ;;  %1118 = vmatprep.mubr.bf16.mxu0 %v13454_v0  ;;  %v157_v10 = vld [vmem:[#allocation6 + $0x28] sm:$0xff] }
  0xc8   :  { %1088 = vmatprep.subr.bf16.mxu0 %v11156_v13  ;;  %1078 = vmatmul.mubr.bf16.vlgmr.msra.gmra.mrb[0].mxu1 %v13620_v8  ;;  %v11254_v13 = vcombine.high %v267_v4, %v275_v5 }
  0xc9   :  { %1128 = vmatpush1.bf16.msra.mxu1 %v11141_v22  ;;  %1159 = vmatprep.mubr.bf16.mxu1 %v13454_v0  ;;  %v11159_v22 = vcombine.low %v172_v7, %v180_v12  ;;  %v11255_v7 = vcombine.low %v268_v55, %v276_v56  ;;  %v11241_v12 = vcombine.low %v253_v59, %v261_v60 }
  0xca   :  { %1129 = vmatprep.subr.bf16.mxu1 %v11158_v25  ;;  %v11176_v25 = vcombine.high %v188_v15, %v196_v16 }
  0xcb   :  { %1089 = vmatpush1.bf16.msra.mxu0 %v11155_v18  ;;  %v11253_v18 = vcombine.low %v267_v4, %v275_v5  ;;  %v269_v4 = vld [vmem:[#allocation6 + $0x3a8] sm:$0xff] }
  0xcc   :  { %1090 = vmatprep.subr.bf16.mxu0 %v11172_v21  ;;  %v11146_v21 = vcombine.high %v157_v10, %v165_v11  ;;  %v277_v5 = vld [vmem:[#allocation6 + $0x3e8] sm:$0xff] }
  0xcd   :  { %1130 = vmatpush1.bf16.msra.mxu1 %v11157_v30  ;;  %v11175_v30 = vcombine.low %v188_v15, %v196_v16  ;;  %v11258_v15 = vcombine.high %v269_v4, %v277_v5  ;;  %v11147_v16 = vcombine.low %v158_v63, %v166_v1 }
  0xce   :  { %1131 = vmatprep.subr.bf16.mxu1 %v11174_v33  ;;  %v11192_v33 = vcombine.high %v204_v23, %v212_v24 }
  0xcf   :  { %1091 = vmatpush1.bf16.msra.mxu0 %v11171_v26  ;;  %v11145_v26 = vcombine.low %v157_v10, %v165_v11  ;;  %v182_v10 = vld [vmem:[#allocation6 + $0xf0] sm:$0xff]  ;;  %v11148_v11 = vcombine.high %v158_v63, %v166_v1 }
  0xd0   :  { %1092 = vmatprep.subr.bf16.mxu0 %v11188_v29  ;;  %v11162_v29 = vcombine.high %v173_v19, %v181_v20  ;;  %v1364_v1 = vld [vmem:[#allocation9] sm:$0xff] }
  0xd1   :  { %1132 = vmatpush1.bf16.msra.mxu1 %v11173_v38  ;;  %v11191_v38 = vcombine.low %v204_v23, %v212_v24 }
  0xd2   :  { %1133 = vmatprep.subr.bf16.mxu1 %v11190_v41  ;;  %v11208_v41 = vcombine.high %v220_v31, %v228_v32 }
  0xd3   :  { %1093 = vmatpush1.bf16.msra.mxu0 %v11187_v34  ;;  %v11161_v34 = vcombine.low %v173_v19, %v181_v20  ;;  %v11257_v20 = vcombine.low %v269_v4, %v277_v5 }
  0xd4   :  { %1094 = vmatprep.subr.bf16.mxu0 %v11204_v37  ;;  %v11178_v37 = vcombine.high %v189_v27, %v197_v28 }
  0xd5   :  { %1134 = vmatpush1.bf16.msra.mxu1 %v11189_v46  ;;  %v11207_v46 = vcombine.low %v220_v31, %v228_v32 }
  0xd6   :  { %1135 = vmatprep.subr.bf16.mxu1 %v11206_v49  ;;  %v11224_v49 = vcombine.high %v236_v39, %v244_v40 }
  0xd7   :  { %1095 = vmatpush1.bf16.msra.mxu0 %v11203_v42  ;;  %v11177_v42 = vcombine.low %v189_v27, %v197_v28 }
  0xd8   :  { %1096 = vmatprep.subr.bf16.mxu0 %v11220_v45  ;;  %v11194_v45 = vcombine.high %v205_v35, %v213_v36 }
  0xd9   :  { %1136 = vmatpush1.bf16.msra.mxu1 %v11205_v54  ;;  %v11223_v54 = vcombine.low %v236_v39, %v244_v40 }
  0xda   :  { %1137 = vmatprep.subr.bf16.mxu1 %v11222_v57  ;;  %v11240_v57 = vcombine.high %v252_v47, %v260_v48 }
  0xdb   :  { %1097 = vmatpush1.bf16.msra.mxu0 %v11219_v50  ;;  %v11193_v50 = vcombine.low %v205_v35, %v213_v36 }
  0xdc   :  { %1098 = vmatprep.subr.bf16.mxu0 %v11236_v53  ;;  %v11210_v53 = vcombine.high %v221_v43, %v229_v44 }
  0xdd   :  { %1138 = vmatpush1.bf16.msra.mxu1 %v11221_v62  ;;  %v11239_v62 = vcombine.low %v252_v47, %v260_v48 }
  0xde   :  { %1139 = vmatprep.subr.bf16.mxu1 %v11238_v2  ;;  %v11256_v2 = vcombine.high %v268_v55, %v276_v56  ;;  %v270_v56 = vld [vmem:[#allocation6 + $0x3b0] sm:$0xff] }
  0xdf   :  { %1099 = vmatpush1.bf16.msra.mxu0 %v11235_v58  ;;  %v11209_v58 = vcombine.low %v221_v43, %v229_v44 }
  0xe0   :  { %1100 = vmatprep.subr.bf16.mxu0 %v11252_v61  ;;  %v11226_v61 = vcombine.high %v237_v51, %v245_v52 }
  0xe1   :  { %1140 = vmatpush1.bf16.msra.mxu1 %v11237_v9  ;;  %v174_v9 = vld [vmem:[#allocation6 + $0xb0] sm:$0xff] }
  0xe2   :  { %1141 = vmatprep.subr.bf16.mxu1 %v11254_v13  ;;  %v159_v13 = vld [vmem:[#allocation6 + $0x38] sm:$0xff]  ;;  %v11164_v19 = vcombine.high %v174_v9, %v182_v10  ;;  %v11163_v24 = vcombine.low %v174_v9, %v182_v10  ;;  %v1372_v10 = vld [vmem:[#allocation9 + $0x40] sm:$0xff] }
  0xe3   :  { %1101 = vmatpush1.bf16.msra.mxu0 %v11251_v3  ;;  %v11225_v3 = vcombine.low %v237_v51, %v245_v52 }
  0xe4   :  { %1168 = vmatprep.subr.bf16.mxu0 %v11144_v6  ;;  %v11242_v6 = vcombine.high %v253_v59, %v261_v60 }
  0xe5   :  { %1142 = vmatpush1.bf16.msra.mxu1 %v11253_v18  ;;  %v198_v18 = vld [vmem:[#allocation6 + $0x170] sm:$0xff] }
  0xe6   :  { %1119 = vmatmul.mubr.bf16.vlgmr.msra.gmra.mrb[4].mxu0 %v13620_v8  ;;  %1209 = vmatprep.subr.bf16.mxu1 %v11146_v21  ;;  %v175_v21 = vld [vmem:[#allocation6 + $0xb8] sm:$0xff] }
  0xe7   :  { %1169 = vmatpush1.bf16.msra.mxu0 %v11143_v14  ;;  %1200 = vmatprep.mubr.bf16.mxu0 %v13454_v0  ;;  %v167_v14 = vld [vmem:[#allocation6 + $0x78] sm:$0xff] }
  0xe8   :  { %1170 = vmatprep.subr.bf16.mxu0 %v11160_v17  ;;  %1160 = vmatmul.mubr.bf16.vlgmr.msra.gmra.mrb[4].mxu1 %v13620_v8  ;;  %v190_v17 = vld [vmem:[#allocation6 + $0x130] sm:$0xff]  ;;  %v11150_v23 = vcombine.high %v159_v13, %v167_v14  ;;  %v11149_v28 = vcombine.low %v159_v13, %v167_v14 }
  0xe9   :  { %1210 = vmatpush1.bf16.msra.mxu1 %v11145_v26  ;;  %1241 = vmatprep.mubr.bf16.mxu1 %v13454_v0  ;;  %v214_v26 = vld [vmem:[#allocation6 + $0x1f0] sm:$0xff]  ;;  %v11180_v27 = vcombine.high %v190_v17, %v198_v18  ;;  %v11179_v32 = vcombine.low %v190_v17, %v198_v18  ;;  %v1369_v17 = vld [vmem:[#allocation9 + $0x28] sm:$0xff] }
  0xea   :  { %1211 = vmatprep.subr.bf16.mxu1 %v11162_v29  ;;  %v191_v29 = vld [vmem:[#allocation6 + $0x138] sm:$0xff]  ;;  %v1380_v18 = vld [vmem:[#allocation9 + $0x80] sm:$0xff] }
  0xeb   :  { %1171 = vmatpush1.bf16.msra.mxu0 %v11159_v22  ;;  %v183_v22 = vld [vmem:[#allocation6 + $0xf8] sm:$0xff] }
  0xec   :  { %1172 = vmatprep.subr.bf16.mxu0 %v11176_v25  ;;  %v206_v25 = vld [vmem:[#allocation6 + $0x1b0] sm:$0xff]  ;;  %v11166_v31 = vcombine.high %v175_v21, %v183_v22  ;;  %v11165_v36 = vcombine.low %v175_v21, %v183_v22 }
  0xed   :  { %1212 = vmatpush1.bf16.msra.mxu1 %v11161_v34  ;;  %v230_v34 = vld [vmem:[#allocation6 + $0x270] sm:$0xff]  ;;  %v11196_v35 = vcombine.high %v206_v25, %v214_v26  ;;  %v11195_v40 = vcombine.low %v206_v25, %v214_v26  ;;  %v1377_v25 = vld [vmem:[#allocation9 + $0x68] sm:$0xff] }
  0xee   :  { %1213 = vmatprep.subr.bf16.mxu1 %v11178_v37  ;;  %v207_v37 = vld [vmem:[#allocation6 + $0x1b8] sm:$0xff]  ;;  %v1388_v26 = vld [vmem:[#allocation9 + $0xc0] sm:$0xff] }
  0xef   :  { %1173 = vmatpush1.bf16.msra.mxu0 %v11175_v30  ;;  %v199_v30 = vld [vmem:[#allocation6 + $0x178] sm:$0xff] }
  0xf0   :  { %1174 = vmatprep.subr.bf16.mxu0 %v11192_v33  ;;  %v222_v33 = vld [vmem:[#allocation6 + $0x230] sm:$0xff]  ;;  %v11182_v39 = vcombine.high %v191_v29, %v199_v30  ;;  %v11181_v44 = vcombine.low %v191_v29, %v199_v30 }
  0xf1   :  { %1214 = vmatpush1.bf16.msra.mxu1 %v11177_v42  ;;  %v246_v42 = vld [vmem:[#allocation6 + $0x2f0] sm:$0xff]  ;;  %v11212_v43 = vcombine.high %v222_v33, %v230_v34  ;;  %v11211_v48 = vcombine.low %v222_v33, %v230_v34  ;;  %v1385_v33 = vld [vmem:[#allocation9 + $0xa8] sm:$0xff] }
  0xf2   :  { %1215 = vmatprep.subr.bf16.mxu1 %v11194_v45  ;;  %v223_v45 = vld [vmem:[#allocation6 + $0x238] sm:$0xff]  ;;  %v1396_v34 = vld [vmem:[#allocation9 + $0x100] sm:$0xff] }
  0xf3   :  { %1175 = vmatpush1.bf16.msra.mxu0 %v11191_v38  ;;  %v215_v38 = vld [vmem:[#allocation6 + $0x1f8] sm:$0xff] }
  0xf4   :  { %1176 = vmatprep.subr.bf16.mxu0 %v11208_v41  ;;  %v238_v41 = vld [vmem:[#allocation6 + $0x2b0] sm:$0xff]  ;;  %v11198_v47 = vcombine.high %v207_v37, %v215_v38  ;;  %v11197_v51 = vcombine.low %v207_v37, %v215_v38 }
  0xf5   :  { %1216 = vmatpush1.bf16.msra.mxu1 %v11193_v50  ;;  %v262_v50 = vld [vmem:[#allocation6 + $0x370] sm:$0xff]  ;;  %v11227_v55 = vcombine.low %v238_v41, %v246_v42 }
  0xf6   :  { %1217 = vmatprep.subr.bf16.mxu1 %v11210_v53  ;;  %v239_v53 = vld [vmem:[#allocation6 + $0x2b8] sm:$0xff] }
  0xf7   :  { %1177 = vmatpush1.bf16.msra.mxu0 %v11207_v46  ;;  %v231_v46 = vld [vmem:[#allocation6 + $0x278] sm:$0xff] }
  0xf8   :  { %1178 = vmatprep.subr.bf16.mxu0 %v11224_v49  ;;  %v254_v49 = vld [vmem:[#allocation6 + $0x330] sm:$0xff]  ;;  %v11214_v52 = vcombine.high %v223_v45, %v231_v46  ;;  %v11213_v59 = vcombine.low %v223_v45, %v231_v46 }
  0xf9   :  { %1218 = vmatpush1.bf16.msra.mxu1 %v11209_v58  ;;  %v11244_v58 = vcombine.high %v254_v49, %v262_v50  ;;  %v11243_v63 = vcombine.low %v254_v49, %v262_v50  ;;  %v1412_v49 = vld [vmem:[#allocation9 + $0x180] sm:$0xff] }
  0xfa   :  { %1219 = vmatprep.subr.bf16.mxu1 %v11226_v61  ;;  %v255_v61 = vld [vmem:[#allocation6 + $0x338] sm:$0xff] }
  0xfb   :  { %1179 = vmatpush1.bf16.msra.mxu0 %v11223_v54  ;;  %v247_v54 = vld [vmem:[#allocation6 + $0x2f8] sm:$0xff] }
  0xfc   :  { %1180 = vmatprep.subr.bf16.mxu0 %v11240_v57  ;;  %v278_v57 = vld [vmem:[#allocation6 + $0x3f0] sm:$0xff]  ;;  %v11230_v60 = vcombine.high %v239_v53, %v247_v54  ;;  %v11229_v4 = vcombine.low %v239_v53, %v247_v54  ;;  %v1405_v54 = vld [vmem:[#allocation9 + $0x148] sm:$0xff] }
  0xfd   :  { %1220 = vmatpush1.bf16.msra.mxu1 %v11225_v3  ;;  %v11260_v3 = vcombine.high %v270_v56, %v278_v57  ;;  %v11259_v9 = vcombine.low %v270_v56, %v278_v57  ;;  %v1420_v56 = vld [vmem:[#allocation9 + $0x1c0] sm:$0xff] }
  0xfe   :  { %1221 = vmatprep.subr.bf16.mxu1 %v11242_v6  ;;  %v271_v6 = vld [vmem:[#allocation6 + $0x3b8] sm:$0xff] }
  0xff   :  { %1181 = vmatpush1.bf16.msra.mxu0 %v11239_v62  ;;  %v263_v62 = vld [vmem:[#allocation6 + $0x378] sm:$0xff] }
 0x100   :  { %1182 = vmatprep.subr.bf16.mxu0 %v11256_v2  ;;  %v1368_v2 = vld [vmem:[#allocation9 + $0x20] sm:$0xff]  ;;  %v11246_v5 = vcombine.high %v255_v61, %v263_v62  ;;  %v11245_v13 = vcombine.low %v255_v61, %v263_v62  ;;  %v1413_v62 = vld [vmem:[#allocation9 + $0x188] sm:$0xff] }
 0x101   :  { %1222 = vmatpush1.bf16.msra.mxu1 %v11241_v12  ;;  %v11264_v12 = vcombine.high %v1364_v1, %v1368_v2 }
 0x102   :  { %1223 = vmatprep.subr.bf16.mxu1 %v11258_v15  ;;  %v11263_v15 = vcombine.low %v1364_v1, %v1368_v2  ;;  %v1428_v1 = vld [vmem:[#allocation9 + $0x200] sm:$0xff] }
 0x103   :  { %1183 = vmatpush1.bf16.msra.mxu0 %v11255_v7  ;;  %v279_v7 = vld [vmem:[#allocation6 + $0x3f8] sm:$0xff] }
 0x104   :  { %1250 = vmatprep.subr.bf16.mxu0 %v11148_v11  ;;  %v1376_v11 = vld [vmem:[#allocation9 + $0x60] sm:$0xff]  ;;  %v11262_v14 = vcombine.high %v271_v6, %v279_v7  ;;  %v11261_v21 = vcombine.low %v271_v6, %v279_v7  ;;  %v1421_v7 = vld [vmem:[#allocation9 + $0x1c8] sm:$0xff] }
 0x105   :  { %1224 = vmatpush1.bf16.msra.mxu1 %v11257_v20  ;;  %v1384_v20 = vld [vmem:[#allocation9 + $0xa0] sm:$0xff] }
 0x106   :  { %1201 = vmatmul.mubr.bf16.vlgmr.msra.gmra.mrb[8].mxu0 %v13620_v8  ;;  %1291 = vmatprep.subr.bf16.mxu1 %v11150_v23  ;;  %v11271_v23 = vcombine.low %v1372_v10, %v1376_v11 }
 0x107   :  { %1251 = vmatpush1.bf16.msra.mxu0 %v11147_v16  ;;  %1282 = vmatprep.mubr.bf16.mxu0 %v13454_v0  ;;  %v1365_v16 = vld [vmem:[#allocation9 + $0x8] sm:$0xff] }
 0x108   :  { %1252 = vmatprep.subr.bf16.mxu0 %v11164_v19  ;;  %1242 = vmatmul.mubr.bf16.vlgmr.msra.gmra.mrb[8].mxu1 %v13620_v8  ;;  %v11272_v19 = vcombine.high %v1372_v10, %v1376_v11  ;;  %v11266_v22 = vcombine.high %v1365_v16, %v1369_v17  ;;  %v11265_v29 = vcombine.low %v1365_v16, %v1369_v17  ;;  %v1436_v10 = vld [vmem:[#allocation9 + $0x240] sm:$0xff]  ;;  %v1429_v16 = vld [vmem:[#allocation9 + $0x208] sm:$0xff] }
 0x109   :  { %1292 = vmatpush1.bf16.msra.mxu1 %v11149_v28  ;;  %1323 = vmatprep.mubr.bf16.mxu1 %v13454_v0  ;;  %v11228_v0 = vcombine.high %v238_v41, %v246_v42  ;;  %v1392_v28 = vld [vmem:[#allocation9 + $0xe0] sm:$0xff]  ;;  %v1393_v41 = vld [vmem:[#allocation9 + $0xe8] sm:$0xff] }
 0x10a   :  { %1293 = vmatprep.subr.bf16.mxu1 %v11166_v31  ;;  %v11279_v31 = vcombine.low %v1380_v18, %v1384_v20  ;;  %v1404_v42 = vld [vmem:[#allocation9 + $0x140] sm:$0xff]  ;;  %v1433_v17 = vld [vmem:[#allocation9 + $0x228] sm:$0xff] }
 0x10b   :  { %1253 = vmatpush1.bf16.msra.mxu0 %v11163_v24  ;;  %v1373_v24 = vld [vmem:[#allocation9 + $0x48] sm:$0xff] }
 0x10c   :  { %1254 = vmatprep.subr.bf16.mxu0 %v11180_v27  ;;  %v11280_v27 = vcombine.high %v1380_v18, %v1384_v20  ;;  %v11274_v30 = vcombine.high %v1373_v24, %v1377_v25  ;;  %v11273_v37 = vcombine.low %v1373_v24, %v1377_v25  ;;  %v1444_v18 = vld [vmem:[#allocation9 + $0x280] sm:$0xff]  ;;  %v1437_v24 = vld [vmem:[#allocation9 + $0x248] sm:$0xff] }
 0x10d   :  { %1294 = vmatpush1.bf16.msra.mxu1 %v11165_v36  ;;  %v1400_v36 = vld [vmem:[#allocation9 + $0x120] sm:$0xff]  ;;  %v1441_v25 = vld [vmem:[#allocation9 + $0x268] sm:$0xff] }
 0x10e   :  { %1295 = vmatprep.subr.bf16.mxu1 %v11182_v39  ;;  %v11287_v39 = vcombine.low %v1388_v26, %v1392_v28  ;;  %v1448_v20 = vld [vmem:[#allocation9 + $0x2a0] sm:$0xff] }
 0x10f   :  { %1255 = vmatpush1.bf16.msra.mxu0 %v11179_v32  ;;  %v1381_v32 = vld [vmem:[#allocation9 + $0x88] sm:$0xff] }
 0x110   :  { %1256 = vmatprep.subr.bf16.mxu0 %v11196_v35  ;;  %v11288_v35 = vcombine.high %v1388_v26, %v1392_v28  ;;  %v11282_v38 = vcombine.high %v1381_v32, %v1385_v33  ;;  %v11281_v45 = vcombine.low %v1381_v32, %v1385_v33  ;;  %v1452_v26 = vld [vmem:[#allocation9 + $0x2c0] sm:$0xff]  ;;  %v1445_v32 = vld [vmem:[#allocation9 + $0x288] sm:$0xff] }
 0x111   :  { %1296 = vmatpush1.bf16.msra.mxu1 %v11181_v44  ;;  %v1408_v44 = vld [vmem:[#allocation9 + $0x160] sm:$0xff]  ;;  %v1449_v33 = vld [vmem:[#allocation9 + $0x2a8] sm:$0xff] }
 0x112   :  { %1297 = vmatprep.subr.bf16.mxu1 %v11198_v47  ;;  %v1397_v47 = vld [vmem:[#allocation9 + $0x108] sm:$0xff]  ;;  %v11304_v50 = vcombine.high %v1404_v42, %v1408_v44  ;;  %v11303_v53 = vcombine.low %v1404_v42, %v1408_v44  ;;  %v1456_v28 = vld [vmem:[#allocation9 + $0x2e0] sm:$0xff] }
 0x113   :  { %1257 = vmatpush1.bf16.msra.mxu0 %v11195_v40  ;;  %v1389_v40 = vld [vmem:[#allocation9 + $0xc8] sm:$0xff]  ;;  %v1468_v42 = vld [vmem:[#allocation9 + $0x340] sm:$0xff] }
 0x114   :  { %1258 = vmatprep.subr.bf16.mxu0 %v11212_v43  ;;  %v11296_v43 = vcombine.high %v1396_v34, %v1400_v36  ;;  %v11290_v46 = vcombine.high %v1389_v40, %v1393_v41  ;;  %v1472_v44 = vld [vmem:[#allocation9 + $0x360] sm:$0xff] }
 0x115   :  { %1298 = vmatpush1.bf16.msra.mxu1 %v11197_v51  ;;  %v11289_v51 = vcombine.low %v1389_v40, %v1393_v41  ;;  %v1453_v40 = vld [vmem:[#allocation9 + $0x2c8] sm:$0xff] }
 0x116   :  { %1299 = vmatprep.subr.bf16.mxu1 %v11214_v52  ;;  %v1457_v41 = vld [vmem:[#allocation9 + $0x2e8] sm:$0xff] }
 0x117   :  { %1259 = vmatpush1.bf16.msra.mxu0 %v11211_v48  ;;  %v1401_v48 = vld [vmem:[#allocation9 + $0x128] sm:$0xff] }
 0x118   :  { %1260 = vmatprep.subr.bf16.mxu0 %v11228_v0  ;;  %v1416_v0 = vld [vmem:[#allocation9 + $0x1a0] sm:$0xff]  ;;  %v11298_v52 = vcombine.high %v1397_v47, %v1401_v48 }
 0x119   :  { %1300 = vmatpush1.bf16.msra.mxu1 %v11213_v59  ;;  %v11312_v57 = vcombine.high %v1412_v49, %v1416_v0  ;;  %v11297_v59 = vcombine.low %v1397_v47, %v1401_v48  ;;  %v11311_v61 = vcombine.low %v1412_v49, %v1416_v0  ;;  %v1461_v47 = vld [vmem:[#allocation9 + $0x308] sm:$0xff]  ;;  %v1476_v49 = vld [vmem:[#allocation9 + $0x380] sm:$0xff] }
 0x11a   :  { %1301 = vmatprep.subr.bf16.mxu1 %v11230_v60  ;;  %v1465_v48 = vld [vmem:[#allocation9 + $0x328] sm:$0xff]  ;;  %v1480_v0 = vld [vmem:[#allocation9 + $0x3a0] sm:$0xff] }
 0x11b   :  { %1261 = vmatpush1.bf16.msra.mxu0 %v11227_v55  ;;  %v1409_v55 = vld [vmem:[#allocation9 + $0x168] sm:$0xff] }
 0x11c   :  { %1262 = vmatprep.subr.bf16.mxu0 %v11244_v58  ;;  %v1424_v58 = vld [vmem:[#allocation9 + $0x1e0] sm:$0xff]  ;;  %v11306_v60 = vcombine.high %v1405_v54, %v1409_v55 }
 0x11d   :  { %1302 = vmatpush1.bf16.msra.mxu1 %v11229_v4  ;;  %v11320_v2 = vcombine.high %v1420_v56, %v1424_v58  ;;  %v11305_v4 = vcombine.low %v1405_v54, %v1409_v55  ;;  %v11319_v6 = vcombine.low %v1420_v56, %v1424_v58  ;;  %v1469_v54 = vld [vmem:[#allocation9 + $0x348] sm:$0xff]  ;;  %v1484_v56 = vld [vmem:[#allocation9 + $0x3c0] sm:$0xff] }
 0x11e   :  { %1303 = vmatprep.subr.bf16.mxu1 %v11246_v5  ;;  %v1473_v55 = vld [vmem:[#allocation9 + $0x368] sm:$0xff]  ;;  %v1488_v58 = vld [vmem:[#allocation9 + $0x3e0] sm:$0xff] }
 0x11f   :  { %1263 = vmatpush1.bf16.msra.mxu0 %v11243_v63  ;;  %v1417_v63 = vld [vmem:[#allocation9 + $0x1a8] sm:$0xff] }
 0x120   :  { %1264 = vmatprep.subr.bf16.mxu0 %v11260_v3  ;;  %v1432_v3 = vld [vmem:[#allocation9 + $0x220] sm:$0xff]  ;;  %v11314_v5 = vcombine.high %v1413_v62, %v1417_v63 }
 0x121   :  { %1304 = vmatpush1.bf16.msra.mxu1 %v11245_v13  ;;  %v11328_v11 = vcombine.high %v1428_v1, %v1432_v3  ;;  %v11313_v13 = vcombine.low %v1413_v62, %v1417_v63  ;;  %v1477_v62 = vld [vmem:[#allocation9 + $0x388] sm:$0xff] }
 0x122   :  { %1305 = vmatprep.subr.bf16.mxu1 %v11262_v14  ;;  %v1481_v63 = vld [vmem:[#allocation9 + $0x3a8] sm:$0xff] }
 0x123   :  { %1265 = vmatpush1.bf16.msra.mxu0 %v11259_v9  ;;  %v1425_v9 = vld [vmem:[#allocation9 + $0x1e8] sm:$0xff] }
 0x124   :  { %7550 = vmatprep.subr.bf16.mxu0 %v11264_v12  ;;  %v1440_v12 = vld [vmem:[#allocation9 + $0x260] sm:$0xff]  ;;  %v11322_v14 = vcombine.high %v1421_v7, %v1425_v9 }
 0x125   :  { %1306 = vmatpush1.bf16.msra.mxu1 %v11261_v21  ;;  %v11321_v21 = vcombine.low %v1421_v7, %v1425_v9  ;;  %v1485_v7 = vld [vmem:[#allocation9 + $0x3c8] sm:$0xff] }
 0x126   :  { %1283 = vmatmul.mubr.bf16.vlgmr.msra.gmra.mrb[12].mxu0 %v13620_v8  ;;  %7878 = vmatprep.subr.bf16.mxu1 %v11266_v22  ;;  %v11330_v22 = vcombine.high %v1429_v16, %v1433_v17  ;;  %v1489_v9 = vld [vmem:[#allocation9 + $0x3e8] sm:$0xff] }
 0x127   :  { %7551 = vmatpush1.bf16.msra.mxu0 %v11263_v15  ;;  %v11327_v15 = vcombine.low %v1428_v1, %v1432_v3  ;;  %v13636_v1 = vld [vmem:[#allocation9 + $0x400] sm:$0xff] }
 0x128   :  { %7552 = vmatprep.subr.bf16.mxu0 %v11272_v19  ;;  %1324 = vmatmul.mubr.bf16.vlgmr.msra.gmra.mrb[12].mxu1 %v13620_v8  ;;  %v11295_v8 = vcombine.low %v1396_v34, %v1400_v36  ;;  %v11336_v19 = vcombine.high %v1436_v10, %v1440_v12  ;;  %v1460_v34 = vld [vmem:[#allocation9 + $0x300] sm:$0xff] }
 0x129   :  { %7879 = vmatpush1.bf16.msra.mxu1 %v11265_v29  ;;  %v11329_v29 = vcombine.low %v1429_v16, %v1433_v17  ;;  %v1464_v36 = vld [vmem:[#allocation9 + $0x320] sm:$0xff]  ;;  %v284_v17 = vlaneseq }
 0x12a   :  { %7880 = vmatprep.subr.bf16.mxu1 %v11274_v30  ;;  %v11338_v30 = vcombine.high %v1437_v24, %v1441_v25  ;;  %v13638_v3 = vld [vmem:[#allocation9 + $0x420] sm:$0xff] }
 0x12b   :  { %7553 = vmatpush1.bf16.msra.mxu0 %v11271_v23  ;;  %v11335_v23 = vcombine.low %v1436_v10, %v1440_v12  ;;  %v11392_v10 = vcombine.high %v13636_v1, %v13638_v3  ;;  %v11386_v12 = vcombine.high %v1485_v7, %v1489_v9 }
 0x12c   :  { %7554 = vmatprep.subr.bf16.mxu0 %v11280_v27  ;;  %v11344_v27 = vcombine.high %v1444_v18, %v1448_v20 }
 0x12d   :  { %7881 = vmatpush1.bf16.msra.mxu1 %v11273_v37  ;;  %v11337_v37 = vcombine.low %v1437_v24, %v1441_v25 }
 0x12e   :  { %7882 = vmatprep.subr.bf16.mxu1 %v11282_v38  ;;  %v11346_v38 = vcombine.high %v1445_v32, %v1449_v33 }
 0x12f   :  { %7555 = vmatpush1.bf16.msra.mxu0 %v11279_v31  ;;  %v11343_v31 = vcombine.low %v1444_v18, %v1448_v20  ;;  %v13642_v18 = vshrl.u32 %v284_v17, 7  ;;  %v13647_v20 = vld [vmem:[#allocation8] sm:$0xff] }
 0x130   :  { %7556 = vmatprep.subr.bf16.mxu0 %v11288_v35  ;;  %v11352_v35 = vcombine.high %v1452_v26, %v1456_v28 }
 0x131   :  { %7883 = vmatpush1.bf16.msra.mxu1 %v11281_v45  ;;  %v11345_v45 = vcombine.low %v1445_v32, %v1449_v33  ;;  %v13657_v25 = vsub.s32 3, %v13642_v18  ;;  %v1500_v32 = vld [vmem:[#allocation9 + $0x440] sm:$0xff] }
 0x132   :  { %7884 = vmatprep.subr.bf16.mxu1 %v11290_v46  ;;  %v11354_v46 = vcombine.high %v1453_v40, %v1457_v41 }
 0x133   :  { %7557 = vmatpush1.bf16.msra.mxu0 %v11287_v39  ;;  %v11351_v39 = vcombine.low %v1452_v26, %v1456_v28 }
 0x134   :  { %7558 = vmatprep.subr.bf16.mxu0 %v11296_v43  ;;  %v11360_v43 = vcombine.high %v1460_v34, %v1464_v36 }
 0x135   :  { %7885 = vmatpush1.bf16.msra.mxu1 %v11289_v51  ;;  %v11353_v51 = vcombine.low %v1453_v40, %v1457_v41 }
 0x136   :  { %7886 = vmatprep.subr.bf16.mxu1 %v11298_v52  ;;  %v11362_v52 = vcombine.high %v1461_v47, %v1465_v48 }
 0x137   :  { %7559 = vmatpush1.bf16.msra.mxu0 %v11295_v8  ;;  %v11359_v8 = vcombine.low %v1460_v34, %v1464_v36  ;;  %v1504_v34 = vld [vmem:[#allocation9 + $0x460] sm:$0xff]  ;;  %v1505_v36 = vld [vmem:[#allocation9 + $0x468] sm:$0xff] }
 0x138   :  { %7560 = vmatprep.subr.bf16.mxu0 %v11304_v50  ;;  %v11368_v50 = vcombine.high %v1468_v42, %v1472_v44 }
 0x139   :  { %7887 = vmatpush1.bf16.msra.mxu1 %v11297_v59  ;;  %v11361_v59 = vcombine.low %v1461_v47, %v1465_v48  ;;  %v1509_v47 = vld [vmem:[#allocation9 + $0x488] sm:$0xff] }
 0x13a   :  { %7888 = vmatprep.subr.bf16.mxu1 %v11306_v60  ;;  %v11370_v60 = vcombine.high %v1469_v54, %v1473_v55  ;;  %v1513_v48 = vld [vmem:[#allocation9 + $0x4a8] sm:$0xff] }
 0x13b   :  { %7561 = vmatpush1.bf16.msra.mxu0 %v11303_v53  ;;  %v11367_v53 = vcombine.low %v1468_v42, %v1472_v44 }
 0x13c   :  { %7562 = vmatprep.subr.bf16.mxu0 %v11312_v57  ;;  %v11376_v57 = vcombine.high %v1476_v49, %v1480_v0 }
 0x13d   :  { %7889 = vmatpush1.bf16.msra.mxu1 %v11305_v4  ;;  %v11369_v4 = vcombine.low %v1469_v54, %v1473_v55  ;;  %v11410_v55 = vcombine.high %v1509_v47, %v1513_v48 }
 0x13e   :  { %7890 = vmatprep.subr.bf16.mxu1 %v11314_v5  ;;  %v11378_v5 = vcombine.high %v1477_v62, %v1481_v63 }
 0x13f   :  { %7563 = vmatpush1.bf16.msra.mxu0 %v11311_v61  ;;  %v11375_v61 = vcombine.low %v1476_v49, %v1480_v0 }
 0x140   :  { %7564 = vmatprep.subr.bf16.mxu0 %v11320_v2  ;;  %v11384_v2 = vcombine.high %v1484_v56, %v1488_v58 }
 0x141   :  { %7891 = vmatpush1.bf16.msra.mxu1 %v11313_v13  ;;  %v1493_v13 = vld [vmem:[#allocation9 + $0x408] sm:$0xff] }
 0x142   :  { %7892 = vmatprep.subr.bf16.mxu1 %v11322_v14  ;;  %v1497_v14 = vld [vmem:[#allocation9 + $0x428] sm:$0xff] }
 0x143   :  { %7565 = vmatpush1.bf16.msra.mxu0 %v11319_v6  ;;  %v11383_v6 = vcombine.low %v1484_v56, %v1488_v58  ;;  %v11394_v16 = vcombine.high %v1493_v13, %v1497_v14  ;;  %v11393_v40 = vcombine.low %v1493_v13, %v1497_v14  ;;  %v1516_v56 = vld [vmem:[#allocation9 + $0x4c0] sm:$0xff]  ;;  %v1517_v58 = vld [vmem:[#allocation9 + $0x4c8] sm:$0xff] }
 0x144   :  { %7566 = vmatprep.subr.bf16.mxu0 %v11328_v11  ;;  %v11377_v11 = vcombine.low %v1477_v62, %v1481_v63  ;;  %v11409_v62 = vcombine.low %v1509_v47, %v1513_v48  ;;  %v1533_v13 = vld [vmem:[#allocation9 + $0x548] sm:$0xff] }
 0x145   :  { %7893 = vmatpush1.bf16.msra.mxu1 %v11321_v21  ;;  %v13650_v21 = vsub.s32 1, %v13642_v18  ;;  %v1537_v14 = vld [vmem:[#allocation9 + $0x568] sm:$0xff] }
 0x146   :  { %7894 = vmatprep.subr.bf16.mxu1 %v11330_v22 }
 0x147   :  { %7567 = vmatpush1.bf16.msra.mxu0 %v11327_v15  ;;  %v11385_v15 = vcombine.low %v1485_v7, %v1489_v9 }
 0x148   :  { %7568 = vmatprep.subr.bf16.mxu0 %v11336_v19  ;;  %v13645_v19 = vsub.s32 0, %v13642_v18 }
 0x149   :  { %7895 = vmatpush1.bf16.msra.mxu1 %v11329_v29 }
 0x14a   :  { %7896 = vmatprep.subr.bf16.mxu1 %v11338_v30  ;;  %v287_v22 = vrot.slane %v13647_v20, %v13645_v19 }
 0x14b   :  { %7569 = vmatpush1.bf16.msra.mxu0 %v11335_v23  ;;  %v291_v23 = vrot.slane %v13647_v20, %v13650_v21 }
 0x14c   :  { %7570 = vmatprep.subr.bf16.mxu0 %v11344_v27 }
 0x14d   :  { %7897 = vmatpush1.bf16.msra.mxu1 %v11337_v37  ;;  %v299_v37 = vrot.slane %v13647_v20, %v13657_v25 }
 0x14e   :  { %7898 = vmatprep.subr.bf16.mxu1 %v11346_v38 }
 0x14f   :  { %7571 = vmatpush1.bf16.msra.mxu0 %v11343_v31 }
 0x150   :  { %7572 = vmatprep.subr.bf16.mxu0 %v11352_v35  ;;  %v1501_v35 = vld [vmem:[#allocation9 + $0x448] sm:$0xff] }
 0x151   :  { %7899 = vmatpush1.bf16.msra.mxu1 %v11345_v45  ;;  %v11402_v44 = vcombine.high %v1501_v35, %v1505_v36  ;;  %v1508_v45 = vld [vmem:[#allocation9 + $0x480] sm:$0xff] }
 0x152   :  { %7900 = vmatprep.subr.bf16.mxu1 %v11354_v46 }
 0x153   :  { %7573 = vmatpush1.bf16.msra.mxu0 %v11351_v39  ;;  %v11391_v39 = vcombine.low %v13636_v1, %v13638_v3  ;;  %v1528_v3 = vld [vmem:[#allocation9 + $0x520] sm:$0xff] }
 0x154   :  { %7574 = vmatprep.subr.bf16.mxu0 %v11360_v43  ;;  %v11400_v43 = vcombine.high %v1500_v32, %v1504_v34 }
 0x155   :  { %7901 = vmatpush1.bf16.msra.mxu1 %v11353_v51  ;;  %v11399_v51 = vcombine.low %v1500_v32, %v1504_v34  ;;  %v1548_v32 = vld [vmem:[#allocation9 + $0x5c0] sm:$0xff]  ;;  %v1549_v34 = vld [vmem:[#allocation9 + $0x5c8] sm:$0xff] }
 0x156   :  { %7902 = vmatprep.subr.bf16.mxu1 %v11362_v52  ;;  %v11401_v52 = vcombine.low %v1501_v35, %v1505_v36  ;;  %v1553_v35 = vld [vmem:[#allocation9 + $0x5e8] sm:$0xff] }
 0x157   :  { %7575 = vmatpush1.bf16.msra.mxu0 %v11359_v8  ;;  %v1512_v8 = vld [vmem:[#allocation9 + $0x4a0] sm:$0xff] }
 0x158   :  { %7576 = vmatprep.subr.bf16.mxu0 %v11368_v50  ;;  %v11408_v54 = vcombine.high %v1508_v45, %v1512_v8 }
 0x159   :  { %7903 = vmatpush1.bf16.msra.mxu1 %v11361_v59  ;;  %v1521_v59 = vld [vmem:[#allocation9 + $0x4e8] sm:$0xff] }
 0x15a   :  { %7904 = vmatprep.subr.bf16.mxu1 %v11370_v60  ;;  %v11418_v1 = vcombine.high %v1517_v58, %v1521_v59  ;;  %v11417_v7 = vcombine.low %v1517_v58, %v1521_v59 }
 0x15b   :  { %7577 = vmatpush1.bf16.msra.mxu0 %v11367_v53 }
 0x15c   :  { %7578 = vmatprep.subr.bf16.mxu0 %v11376_v57  ;;  %v1520_v57 = vld [vmem:[#allocation9 + $0x4e0] sm:$0xff] }
 0x15d   :  { %7905 = vmatpush1.bf16.msra.mxu1 %v11369_v4  ;;  %v11416_v63 = vcombine.high %v1516_v56, %v1520_v57  ;;  %v1525_v4 = vld [vmem:[#allocation9 + $0x508] sm:$0xff] }
 0x15e   :  { %7906 = vmatprep.subr.bf16.mxu1 %v11378_v5  ;;  %v1529_v5 = vld [vmem:[#allocation9 + $0x528] sm:$0xff] }
 0x15f   :  { %7579 = vmatpush1.bf16.msra.mxu0 %v11375_v61  ;;  %v11407_v61 = vcombine.low %v1508_v45, %v1512_v8  ;;  %v1557_v45 = vld [vmem:[#allocation9 + $0x608] sm:$0xff] }
 0x160   :  { %7580 = vmatprep.subr.bf16.mxu0 %v11384_v2  ;;  %v1524_v2 = vld [vmem:[#allocation9 + $0x500] sm:$0xff] }
 0x161   :  { %7907 = vmatpush1.bf16.msra.mxu1 %v11377_v11  ;;  %v11424_v9 = vcombine.high %v1524_v2, %v1528_v3  ;;  %v1532_v11 = vld [vmem:[#allocation9 + $0x540] sm:$0xff] }
 0x162   :  { %7908 = vmatprep.subr.bf16.mxu1 %v11386_v12  ;;  %v1536_v12 = vld [vmem:[#allocation9 + $0x560] sm:$0xff] }
 0x163   :  { %7581 = vmatpush1.bf16.msra.mxu0 %v11383_v6  ;;  %v11415_v6 = vcombine.low %v1516_v56, %v1520_v57  ;;  %v11432_v17 = vcombine.high %v1532_v11, %v1536_v12  ;;  %v1569_v56 = vld [vmem:[#allocation9 + $0x668] sm:$0xff] }
 0x164   :  { %7591 = vmatprep.subr.bf16.mxu0 %v11392_v10  ;;  %v11426_v10 = vcombine.high %v1525_v4, %v1529_v5 }
 0x165   :  { %7909 = vmatpush1.bf16.msra.mxu1 %v11385_v15  ;;  %v11423_v15 = vcombine.low %v1524_v2, %v1528_v3  ;;  %v1576_v2 = vld [vmem:[#allocation9 + $0x6a0] sm:$0xff]  ;;  %v1573_v3 = vld [vmem:[#allocation9 + $0x688] sm:$0xff] }
 0x166   :  { %7919 = vmatprep.subr.bf16.mxu1 %v11394_v16  ;;  %v11425_v16 = vcombine.low %v1525_v4, %v1529_v5  ;;  %v1577_v4 = vld [vmem:[#allocation9 + $0x6a8] sm:$0xff] }
 0x199   :  { %v1038_v24 = vpop.f32.mrb[0].mxu0 }
 0x19a   :  { %v1039_v26 = vadd.f32 %v1038_v24, %v287_v22  ;;  %v1040_v27 = vpop.f32.mrb[1].mxu0  ;;  %v11434_v22 = vcombine.high %v1533_v13, %v1537_v14  ;;  %v1544_v24 = vld [vmem:[#allocation9 + $0x5a0] sm:$0xff] }
 0x19b   :  { %v1041_v28 = vadd.f32 %v1040_v27, %v291_v23  ;;  %v1042_v29 = vpop.f32.mrb[2].mxu0  ;;  %v13665_v41 = vpop.f32.mrb[0].mxu1  ;;  %v1540_v23 = vld [vmem:[#allocation9 + $0x580] sm:$0xff]  ;;  %v1545_v27 = vld [vmem:[#allocation9 + $0x5a8] sm:$0xff] }
 0x19c   :  { %v1332_v30 = vmax.f32 %v1039_v26, 0.0  ;;  %v1043_v31 = vpop.f32.mrb[3].mxu0  ;;  %v1081_v46 = vpop.f32.mrb[1].mxu1  ;;  %v1541_v26 = vld [vmem:[#allocation9 + $0x588] sm:$0xff]  ;;  %v11433_v29 = vcombine.low %v1533_v13, %v1537_v14  ;;  %v11439_v36 = vcombine.low %v1540_v23, %v1544_v24  ;;  %v1584_v13 = vld [vmem:[#allocation9 + $0x6e0] sm:$0xff] }
 0x19d   :  { %v1333_v33 = vmax.f32 %v1041_v28, 0.0  ;;  %v1082_v49 = vadd.f32 %v1081_v46, %v299_v37  ;;  %v1083_v50 = vpop.f32.mrb[2].mxu1  ;;  %v11431_v28 = vcombine.low %v1532_v11, %v1536_v12  ;;  %v11442_v31 = vcombine.high %v1541_v26, %v1545_v27  ;;  %v1561_v46 = vld [vmem:[#allocation9 + $0x628] sm:$0xff]  ;;  %v1580_v12 = vld [vmem:[#allocation9 + $0x6c0] sm:$0xff] }
 0x19e   :  { %v13667_v42 = vpack.c.bf16 %v1332_v30, %v1332_v30  ;;  %v1084_v0 = vpop.f32.mrb[3].mxu1  ;;  %v11440_v30 = vcombine.high %v1540_v23, %v1544_v24  ;;  %v11441_v37 = vcombine.low %v1541_v26, %v1545_v27  ;;  %v11457_v58 = vcombine.low %v1557_v45, %v1561_v46  ;;  %v1581_v14 = vld [vmem:[#allocation9 + $0x6c8] sm:$0xff]  ;;  %v1588_v24 = vld [vmem:[#allocation9 + $0x700] sm:$0xff] }
 0x19f   :  { %v13661_v38 = vpack.c.bf16 %v1333_v33, %v1333_v33  ;;  %v1335_v53 = vmax.f32 %v1082_v49, 0.0  ;;  %v1552_v33 = vld [vmem:[#allocation9 + $0x5e0] sm:$0xff]  ;;  %v11449_v49 = vcombine.low %v1549_v34, %v1553_v35  ;;  %v11474_v11 = vcombine.high %v1573_v3, %v1577_v4  ;;  %v1589_v27 = vld [vmem:[#allocation9 + $0x708] sm:$0xff] }
 0x1a0   :  { %v11447_v48 = vcombine.low %v1548_v32, %v1552_v33  ;;  %v1592_v26 = vld [vmem:[#allocation9 + $0x720] sm:$0xff] }
 0x1a1   :  { %7582 = vmatprep.mubr.bf16.mxu0 %v13661_v38  ;;  %7910 = vmatprep.mubr.bf16.mxu1 %v13661_v38  ;;  %v13673_v60 = vpack.c.bf16 %v1335_v53, %v1335_v53 }
 0x1a2   :  { %7583 = vmatmul.mubr.bf16.vlgmr.msra.gmra.mrb[16].mxu0 %v13667_v42  ;;  %7911 = vmatmul.mubr.bf16.vlgmr.msra.gmra.mrb[16].mxu1 %v13667_v42 }
 0x1a3   :  { %7592 = vmatpush1.bf16.msra.mxu0 %v11391_v39  ;;  %7920 = vmatpush1.bf16.msra.mxu1 %v11393_v40  ;;  %v11448_v39 = vcombine.high %v1548_v32, %v1552_v33  ;;  %v11450_v40 = vcombine.high %v1549_v34, %v1553_v35  ;;  %v1596_v33 = vld [vmem:[#allocation9 + $0x740] sm:$0xff]  ;;  %v1597_v35 = vld [vmem:[#allocation9 + $0x748] sm:$0xff] }
 0x1a4   :  { %7593 = vmatprep.subr.bf16.mxu0 %v11400_v43  ;;  %7921 = vmatprep.subr.bf16.mxu1 %v11402_v44  ;;  %v1556_v43 = vld [vmem:[#allocation9 + $0x600] sm:$0xff] }
 0x1a5   :  { %7623 = vmatprep.mubr.bf16.mxu0 %v13673_v60  ;;  %7951 = vmatprep.mubr.bf16.mxu1 %v13673_v60  ;;  %v1560_v44 = vld [vmem:[#allocation9 + $0x620] sm:$0xff] }
 0x1a6   :  { %v11456_v0 = vcombine.high %v1556_v43, %v1560_v44  ;;  %v11455_v57 = vcombine.low %v1556_v43, %v1560_v44  ;;  %v1600_v34 = vld [vmem:[#allocation9 + $0x760] sm:$0xff] }
 0x1a7   :  { %7594 = vmatpush1.bf16.msra.mxu0 %v11399_v51  ;;  %7922 = vmatpush1.bf16.msra.mxu1 %v11401_v52  ;;  %v11458_v51 = vcombine.high %v1557_v45, %v1561_v46  ;;  %v1564_v52 = vld [vmem:[#allocation9 + $0x640] sm:$0xff]  ;;  %v11496_v43 = vcombine.high %v1596_v33, %v1600_v34 }
 0x1a8   :  { %7595 = vmatprep.subr.bf16.mxu0 %v11408_v54  ;;  %7923 = vmatprep.subr.bf16.mxu1 %v11410_v55  ;;  %v1568_v54 = vld [vmem:[#allocation9 + $0x660] sm:$0xff]  ;;  %v1565_v55 = vld [vmem:[#allocation9 + $0x648] sm:$0xff] }
 0x1a9   :  { %v1604_v45 = vld [vmem:[#allocation9 + $0x780] sm:$0xff] }
 0x1aa   :  { %v1608_v46 = vld [vmem:[#allocation9 + $0x7a0] sm:$0xff] }
 0x1ab   :  { %7596 = vmatpush1.bf16.msra.mxu0 %v11407_v61  ;;  %7924 = vmatpush1.bf16.msra.mxu1 %v11409_v62  ;;  %v11464_v61 = vcombine.high %v1564_v52, %v1568_v54  ;;  %v11466_v62 = vcombine.high %v1565_v55, %v1569_v56 }
 0x1ac   :  { %7597 = vmatprep.subr.bf16.mxu0 %v11416_v63  ;;  %7925 = vmatprep.subr.bf16.mxu1 %v11418_v1  ;;  %v1572_v63 = vld [vmem:[#allocation9 + $0x680] sm:$0xff] }
 0x1af   :  { %7598 = vmatpush1.bf16.msra.mxu0 %v11415_v6  ;;  %7926 = vmatpush1.bf16.msra.mxu1 %v11417_v7  ;;  %v11463_v7 = vcombine.low %v1564_v52, %v1568_v54 }
 0x1b0   :  { %7599 = vmatprep.subr.bf16.mxu0 %v11424_v9  ;;  %7927 = vmatprep.subr.bf16.mxu1 %v11426_v10  ;;  %v11465_v9 = vcombine.low %v1565_v55, %v1569_v56  ;;  %v11472_v10 = vcombine.high %v1572_v63, %v1576_v2  ;;  %v1612_v55 = vld [vmem:[#allocation9 + $0x7c0] sm:$0xff] }
 0x1b1   :  { %v1616_v56 = vld [vmem:[#allocation9 + $0x7e0] sm:$0xff] }
 0x1b3   :  { %7600 = vmatpush1.bf16.msra.mxu0 %v11423_v15  ;;  %7928 = vmatpush1.bf16.msra.mxu1 %v11425_v16  ;;  %v1585_v15 = vld [vmem:[#allocation9 + $0x6e8] sm:$0xff]  ;;  %v11471_v16 = vcombine.low %v1572_v63, %v1576_v2  ;;  %v11503_v63 = vcombine.low %v1604_v45, %v1608_v46 }
 0x1b4   :  { %7601 = vmatprep.subr.bf16.mxu0 %v11432_v17  ;;  %7929 = vmatprep.subr.bf16.mxu1 %v11434_v22  ;;  %v11473_v17 = vcombine.low %v1573_v3, %v1577_v4  ;;  %v11480_v22 = vcombine.high %v1580_v12, %v1584_v13  ;;  %v11482_v23 = vcombine.high %v1581_v14, %v1585_v15 }
 0x1b5   :  { %v11512_v3 = vcombine.high %v1612_v55, %v1616_v56 }
 0x1b7   :  { %7602 = vmatpush1.bf16.msra.mxu0 %v11431_v28  ;;  %7930 = vmatpush1.bf16.msra.mxu1 %v11433_v29  ;;  %v1593_v28 = vld [vmem:[#allocation9 + $0x728] sm:$0xff]  ;;  %v11479_v29 = vcombine.low %v1580_v12, %v1584_v13 }
 0x1b8   :  { %7603 = vmatprep.subr.bf16.mxu0 %v11440_v30  ;;  %7931 = vmatprep.subr.bf16.mxu1 %v11442_v31  ;;  %v11481_v30 = vcombine.low %v1581_v14, %v1585_v15  ;;  %v11488_v31 = vcombine.high %v1588_v24, %v1592_v26  ;;  %v11490_v32 = vcombine.high %v1589_v27, %v1593_v28  ;;  %v13701_v15 = vld [vmem:[#allocation8 + $0x8] sm:$0xff] }
 0x1b9   :  { %v13677_v8 = vpop.f32.mrb[4].mxu0 }
 0x1ba   :  { %v13679_v47 = vpop.f32.mrb[5].mxu0 }
 0x1bb   :  { %7604 = vmatpush1.bf16.msra.mxu0 %v11439_v36  ;;  %7932 = vmatpush1.bf16.msra.mxu1 %v11441_v37  ;;  %v1124_v50 = vpop.f32.mrb[6].mxu0  ;;  %v13681_v59 = vpop.f32.mrb[4].mxu1  ;;  %v1601_v36 = vld [vmem:[#allocation9 + $0x768] sm:$0xff]  ;;  %v13686_v37 = vsub.s32 2, %v13642_v18 }
 0x1bc   :  { %7605 = vmatprep.subr.bf16.mxu0 %v11448_v39  ;;  %7933 = vmatprep.subr.bf16.mxu1 %v11450_v40  ;;  %v1125_v53 = vpop.f32.mrb[7].mxu0  ;;  %v13683_v1 = vpop.f32.mrb[5].mxu1  ;;  %v11487_v39 = vcombine.low %v1588_v24, %v1592_v26  ;;  %v11489_v40 = vcombine.low %v1589_v27, %v1593_v28  ;;  %v11498_v44 = vcombine.high %v1597_v35, %v1601_v36  ;;  %v13689_v50 = vsub.s32 5, %v13642_v18  ;;  %v1632_v26 = vld [vmem:[#allocation9 + $0x860] sm:$0xff]  ;;  %v1629_v27 = vld [vmem:[#allocation9 + $0x848] sm:$0xff] }
 0x1bd   :  { %v1165_v5 = vpop.f32.mrb[6].mxu1  ;;  %v11497_v52 = vcombine.low %v1597_v35, %v1601_v36  ;;  %v11504_v53 = vcombine.high %v1604_v45, %v1608_v46  ;;  %v1633_v28 = vld [vmem:[#allocation9 + $0x868] sm:$0xff] }
 0x1be   :  { %v1166_v6 = vpop.f32.mrb[7].mxu1  ;;  %v1620_v5 = vld [vmem:[#allocation9 + $0x800] sm:$0xff]  ;;  %v11530_v36 = vcombine.high %v1629_v27, %v1633_v28  ;;  %v1637_v45 = vld [vmem:[#allocation9 + $0x888] sm:$0xff] }
 0x1bf   :  { %7606 = vmatpush1.bf16.msra.mxu0 %v11447_v48  ;;  %7934 = vmatpush1.bf16.msra.mxu1 %v11449_v49  ;;  %v1605_v48 = vld [vmem:[#allocation9 + $0x788] sm:$0xff]  ;;  %v1624_v6 = vld [vmem:[#allocation9 + $0x820] sm:$0xff] }
 0x1c0   :  { %7607 = vmatprep.subr.bf16.mxu0 %v11456_v0  ;;  %7935 = vmatprep.subr.bf16.mxu1 %v11458_v51  ;;  %v1609_v49 = vld [vmem:[#allocation9 + $0x7a8] sm:$0xff]  ;;  %v295_v0 = vrot.slane %v13647_v20, %v13686_v37  ;;  %v11495_v51 = vcombine.low %v1596_v33, %v1600_v34 }
 0x1c1   :  { %v11506_v54 = vcombine.high %v1605_v48, %v1609_v49  ;;  %v11505_v2 = vcombine.low %v1605_v48, %v1609_v49  ;;  %v1641_v46 = vld [vmem:[#allocation9 + $0x8a8] sm:$0xff] }
 0x1c3   :  { %7608 = vmatpush1.bf16.msra.mxu0 %v11455_v57  ;;  %7936 = vmatpush1.bf16.msra.mxu1 %v11457_v58  ;;  %v1613_v57 = vld [vmem:[#allocation9 + $0x7c8] sm:$0xff] }
 0x1c4   :  { %7609 = vmatprep.subr.bf16.mxu0 %v11464_v61  ;;  %7937 = vmatprep.subr.bf16.mxu1 %v11466_v62  ;;  %v1617_v58 = vld [vmem:[#allocation9 + $0x7e8] sm:$0xff]  ;;  %v307_v61 = vrot.slane %v13647_v20, %v13689_v50  ;;  %v1080_v62 = vadd.f32 %v13665_v41, %v295_v0  ;;  %v11511_v41 = vcombine.low %v1612_v55, %v1616_v56  ;;  %v1644_v56 = vld [vmem:[#allocation9 + $0x8c0] sm:$0xff] }
 0x1c5   :  { %v11514_v4 = vcombine.high %v1613_v57, %v1617_v58  ;;  %v11513_v14 = vcombine.low %v1613_v57, %v1617_v58  ;;  %v11538_v55 = vcombine.high %v1637_v45, %v1641_v46  ;;  %v1648_v57 = vld [vmem:[#allocation9 + $0x8e0] sm:$0xff]  ;;  %v1645_v58 = vld [vmem:[#allocation9 + $0x8c8] sm:$0xff] }
 0x1c6   :  { %v1334_v12 = vmax.f32 %v1080_v62, 0.0 }
 0x1c7   :  { %7610 = vmatpush1.bf16.msra.mxu0 %v11463_v7  ;;  %7938 = vmatpush1.bf16.msra.mxu1 %v11465_v9  ;;  %v1621_v7 = vld [vmem:[#allocation9 + $0x808] sm:$0xff] }
 0x1c8   :  { %7611 = vmatprep.subr.bf16.mxu0 %v11472_v10  ;;  %7939 = vmatprep.subr.bf16.mxu1 %v11474_v11  ;;  %v1625_v9 = vld [vmem:[#allocation9 + $0x828] sm:$0xff]  ;;  %v1123_v10 = vadd.f32 %v13679_v47, %v307_v61  ;;  %v327_v47 = vrot.slane %v13701_v15, %v13686_v37 }
 0x1c9   :  { %v11521_v33 = vcombine.low %v1621_v7, %v1625_v9  ;;  %v1649_v61 = vld [vmem:[#allocation9 + $0x8e8] sm:$0xff] }
 0x1cb   :  { %7612 = vmatpush1.bf16.msra.mxu0 %v11471_v16  ;;  %7940 = vmatpush1.bf16.msra.mxu1 %v11473_v17  ;;  %v11520_v17 = vcombine.high %v1620_v5, %v1624_v6 }
 0x1cc   :  { %7613 = vmatprep.subr.bf16.mxu0 %v11480_v22  ;;  %7941 = vmatprep.subr.bf16.mxu1 %v11482_v23  ;;  %v11522_v22 = vcombine.high %v1621_v7, %v1625_v9  ;;  %v1628_v23 = vld [vmem:[#allocation9 + $0x840] sm:$0xff]  ;;  %v1657_v7 = vld [vmem:[#allocation9 + $0x928] sm:$0xff]  ;;  %v11543_v9 = vcombine.low %v1644_v56, %v1648_v57 }
 0x1cd   :  { %v11528_v35 = vcombine.high %v1628_v23, %v1632_v26 }
 0x1cf   :  { %7614 = vmatpush1.bf16.msra.mxu0 %v11479_v29  ;;  %7942 = vmatpush1.bf16.msra.mxu1 %v11481_v30  ;;  %v1337_v29 = vmax.f32 %v1123_v10, 0.0  ;;  %v331_v30 = vrot.slane %v13701_v15, %v13657_v25  ;;  %v11545_v10 = vcombine.low %v1645_v58, %v1649_v61 }
 0x1d0   :  { %7615 = vmatprep.subr.bf16.mxu0 %v11488_v31  ;;  %7943 = vmatprep.subr.bf16.mxu1 %v11490_v32  ;;  %v13707_v31 = vpack.c.bf16 %v1334_v12, %v1334_v12  ;;  %v11519_v32 = vcombine.low %v1620_v5, %v1624_v6  ;;  %v1656_v5 = vld [vmem:[#allocation9 + $0x920] sm:$0xff]  ;;  %v1653_v6 = vld [vmem:[#allocation9 + $0x908] sm:$0xff] }
 0x1d1   :  { %v13711_v48 = vpack.c.bf16 %v1337_v29, %v1337_v29  ;;  %v1669_v29 = vld [vmem:[#allocation9 + $0x988] sm:$0xff] }
 0x1d3   :  { %7616 = vmatpush1.bf16.msra.mxu0 %v11487_v39  ;;  %7944 = vmatpush1.bf16.msra.mxu1 %v11489_v40  ;;  %v1636_v39 = vld [vmem:[#allocation9 + $0x880] sm:$0xff] }
 0x1d4   :  { %7617 = vmatprep.subr.bf16.mxu0 %v11496_v43  ;;  %7945 = vmatprep.subr.bf16.mxu1 %v11498_v44  ;;  %v1640_v44 = vld [vmem:[#allocation9 + $0x8a0] sm:$0xff] }
 0x1d5   :  { %v11535_v62 = vcombine.low %v1636_v39, %v1640_v44 }
 0x1d7   :  { %7618 = vmatpush1.bf16.msra.mxu0 %v11495_v51  ;;  %7946 = vmatpush1.bf16.msra.mxu1 %v11497_v52  ;;  %v11527_v52 = vcombine.low %v1628_v23, %v1632_v26 }
 0x1d8   :  { %7619 = vmatprep.subr.bf16.mxu0 %v11504_v53  ;;  %7947 = vmatprep.subr.bf16.mxu1 %v11506_v54  ;;  %v11529_v53 = vcombine.low %v1629_v27, %v1633_v28  ;;  %v11536_v54 = vcombine.high %v1636_v39, %v1640_v44  ;;  %v1668_v27 = vld [vmem:[#allocation9 + $0x980] sm:$0xff]  ;;  %v1677_v44 = vld [vmem:[#allocation9 + $0x9c8] sm:$0xff] }
 0x1d9   :  { %v13697_v11 = vpop.f32.mrb[8].mxu0  ;;  %v1672_v28 = vld [vmem:[#allocation9 + $0x9a0] sm:$0xff] }
 0x1da   :  { %v13699_v13 = vpop.f32.mrb[9].mxu0  ;;  %v1676_v39 = vld [vmem:[#allocation9 + $0x9c0] sm:$0xff] }
 0x1db   :  { %7620 = vmatpush1.bf16.msra.mxu0 %v11503_v63  ;;  %7948 = vmatpush1.bf16.msra.mxu1 %v11505_v2  ;;  %v1206_v16 = vpop.f32.mrb[10].mxu0  ;;  %v1243_v34 = vpop.f32.mrb[8].mxu1  ;;  %v11537_v63 = vcombine.low %v1637_v45, %v1641_v46  ;;  %v11544_v2 = vcombine.high %v1644_v56, %v1648_v57  ;;  %v1681_v45 = vld [vmem:[#allocation9 + $0x9e8] sm:$0xff]  ;;  %v1688_v56 = vld [vmem:[#allocation9 + $0xa20] sm:$0xff] }
 0x1dc   :  { %7621 = vmatprep.subr.bf16.mxu0 %v11512_v3  ;;  %7949 = vmatprep.subr.bf16.mxu1 %v11514_v4  ;;  %v1207_v24 = vpop.f32.mrb[11].mxu0  ;;  %v13709_v40 = vadd.f32 %v1243_v34, %v327_v47  ;;  %v1245_v43 = vpop.f32.mrb[9].mxu1  ;;  %v11546_v3 = vcombine.high %v1645_v58, %v1649_v61  ;;  %v1652_v4 = vld [vmem:[#allocation9 + $0x900] sm:$0xff]  ;;  %v13720_v34 = vsub.s32 4, %v13642_v18  ;;  %v1685_v57 = vld [vmem:[#allocation9 + $0xa08] sm:$0xff] }
 0x1dd   :  { %v13713_v49 = vadd.f32 %v1245_v43, %v331_v30  ;;  %v1247_v0 = vpop.f32.mrb[10].mxu1  ;;  %v11552_v12 = vcombine.high %v1652_v4, %v1656_v5  ;;  %v1664_v16 = vld [vmem:[#allocation9 + $0x960] sm:$0xff]  ;;  %v11551_v23 = vcombine.low %v1652_v4, %v1656_v5  ;;  %v11553_v24 = vcombine.low %v1653_v6, %v1657_v7  ;;  %v1673_v30 = vld [vmem:[#allocation9 + $0x9a8] sm:$0xff] }
 0x1de   :  { %v1248_v51 = vpop.f32.mrb[11].mxu1  ;;  %v1680_v43 = vld [vmem:[#allocation9 + $0x9e0] sm:$0xff]  ;;  %v335_v46 = vrot.slane %v13701_v15, %v13720_v34  ;;  %v11567_v0 = vcombine.low %v1668_v27, %v1672_v28  ;;  %v1689_v58 = vld [vmem:[#allocation9 + $0xa28] sm:$0xff]  ;;  %v11577_v4 = vcombine.low %v1677_v44, %v1681_v45  ;;  %v13732_v5 = vsub.s32 7, %v13642_v18 }
 0x1df   :  { %7622 = vmatpush1.bf16.msra.mxu0 %v11511_v41  ;;  %7950 = vmatpush1.bf16.msra.mxu1 %v11513_v14  ;;  %v11554_v41 = vcombine.high %v1653_v6, %v1657_v7  ;;  %v1660_v14 = vld [vmem:[#allocation9 + $0x940] sm:$0xff]  ;;  %v11569_v51 = vcombine.low %v1669_v29, %v1673_v30 }
 0x1e0   :  { %7632 = vmatprep.subr.bf16.mxu0 %v11520_v17  ;;  %7960 = vmatprep.subr.bf16.mxu1 %v11522_v22  ;;  %v1661_v17 = vld [vmem:[#allocation9 + $0x948] sm:$0xff]  ;;  %v11560_v47 = vcombine.high %v1660_v14, %v1664_v16 }
 0x1e1   :  { %v1665_v22 = vld [vmem:[#allocation9 + $0x968] sm:$0xff] }
 0x1e2   :  { %7624 = vmatmul.mubr.bf16.vlgmr.msra.gmra.mrb[16].mxu0 %v13707_v31  ;;  %7952 = vmatmul.mubr.bf16.vlgmr.msra.gmra.mrb[16].mxu1 %v13707_v31  ;;  %v11562_v26 = vcombine.high %v1661_v17, %v1665_v22 }
 0x1e3   :  { %7633 = vmatpush1.bf16.msra.mxu0 %v11519_v32  ;;  %7961 = vmatpush1.bf16.msra.mxu1 %v11521_v33  ;;  %v11559_v32 = vcombine.low %v1660_v14, %v1664_v16  ;;  %v11561_v33 = vcombine.low %v1661_v17, %v1665_v22  ;;  %v1696_v16 = vld [vmem:[#allocation9 + $0xa60] sm:$0xff]  ;;  %v1693_v17 = vld [vmem:[#allocation9 + $0xa48] sm:$0xff] }
 0x1e4   :  { %7634 = vmatprep.subr.bf16.mxu0 %v11528_v35  ;;  %7962 = vmatprep.subr.bf16.mxu1 %v11530_v36  ;;  %v11568_v35 = vcombine.high %v1668_v27, %v1672_v28  ;;  %v11570_v36 = vcombine.high %v1669_v29, %v1673_v30  ;;  %v1697_v22 = vld [vmem:[#allocation9 + $0xa68] sm:$0xff]  ;;  %v1700_v28 = vld [vmem:[#allocation9 + $0xa80] sm:$0xff] }
 0x1e5   :  { %7664 = vmatprep.mubr.bf16.mxu0 %v13711_v48  ;;  %7992 = vmatprep.mubr.bf16.mxu1 %v13711_v48  ;;  %v11594_v27 = vcombine.high %v1693_v17, %v1697_v22 }
 0x1e7   :  { %7635 = vmatpush1.bf16.msra.mxu0 %v11527_v52  ;;  %7963 = vmatpush1.bf16.msra.mxu1 %v11529_v53  ;;  %v339_v52 = vrot.slane %v13701_v15, %v13689_v50  ;;  %v11576_v53 = vcombine.high %v1676_v39, %v1680_v43 }
 0x1e8   :  { %7636 = vmatprep.subr.bf16.mxu0 %v11536_v54  ;;  %7964 = vmatprep.subr.bf16.mxu1 %v11538_v55  ;;  %v11578_v54 = vcombine.high %v1677_v44, %v1681_v45  ;;  %v1684_v55 = vld [vmem:[#allocation9 + $0xa00] sm:$0xff]  ;;  %v11593_v45 = vcombine.low %v1693_v17, %v1697_v22  ;;  %v1729_v17 = vld [vmem:[#allocation9 + $0xb68] sm:$0xff] }
 0x1eb   :  { %7637 = vmatpush1.bf16.msra.mxu0 %v11535_v62  ;;  %7965 = vmatpush1.bf16.msra.mxu1 %v11537_v63  ;;  %v13727_v62 = vsub.s32 6, %v13642_v18  ;;  %v11583_v18 = vcombine.low %v1684_v55, %v1688_v56 }
 0x1ec   :  { %7638 = vmatprep.subr.bf16.mxu0 %v11544_v2  ;;  %7966 = vmatprep.subr.bf16.mxu1 %v11546_v3  ;;  %v11575_v3 = vcombine.low %v1676_v39, %v1680_v43 }
 0x1ed   :  { %v343_v14 = vrot.slane %v13701_v15, %v13727_v62 }
 0x1ef   :  { %7639 = vmatpush1.bf16.msra.mxu0 %v11543_v9  ;;  %7967 = vmatpush1.bf16.msra.mxu1 %v11545_v10  ;;  %v11584_v9 = vcombine.high %v1684_v55, %v1688_v56  ;;  %v11586_v10 = vcombine.high %v1685_v57, %v1689_v58 }
 0x1f0   :  { %7640 = vmatprep.subr.bf16.mxu0 %v11552_v12  ;;  %7968 = vmatprep.subr.bf16.mxu1 %v11554_v41  ;;  %v1692_v12 = vld [vmem:[#allocation9 + $0xa40] sm:$0xff] }
 0x1f1   :  { %v11591_v44 = vcombine.low %v1692_v12, %v1696_v16 }
 0x1f3   :  { %7641 = vmatpush1.bf16.msra.mxu0 %v11551_v23  ;;  %7969 = vmatpush1.bf16.msra.mxu1 %v11553_v24  ;;  %v347_v23 = vrot.slane %v13701_v15, %v13732_v5  ;;  %v11585_v24 = vcombine.low %v1685_v57, %v1689_v58 }
 0x1f4   :  { %7642 = vmatprep.subr.bf16.mxu0 %v11560_v47  ;;  %7970 = vmatprep.subr.bf16.mxu1 %v11562_v26  ;;  %v11592_v26 = vcombine.high %v1692_v12, %v1696_v16  ;;  %v1725_v16 = vld [vmem:[#allocation9 + $0xb48] sm:$0xff] }
 0x1f7   :  { %7643 = vmatpush1.bf16.msra.mxu0 %v11559_v32  ;;  %7971 = vmatpush1.bf16.msra.mxu1 %v11561_v33  ;;  %v1704_v32 = vld [vmem:[#allocation9 + $0xaa0] sm:$0xff]  ;;  %v1701_v33 = vld [vmem:[#allocation9 + $0xa88] sm:$0xff] }
 0x1f8   :  { %7644 = vmatprep.subr.bf16.mxu0 %v11568_v35  ;;  %7972 = vmatprep.subr.bf16.mxu1 %v11570_v36  ;;  %v1705_v35 = vld [vmem:[#allocation9 + $0xaa8] sm:$0xff]  ;;  %v11599_v55 = vcombine.low %v1700_v28, %v1704_v32 }
 0x1f9   :  { %v1284_v61 = vpop.f32.mrb[12].mxu0  ;;  %v11601_v56 = vcombine.low %v1701_v33, %v1705_v35 }
 0x1fa   :  { %v13729_v63 = vadd.f32 %v1284_v61, %v335_v46  ;;  %v1286_v2 = vpop.f32.mrb[13].mxu0  ;;  %v11600_v46 = vcombine.high %v1700_v28, %v1704_v32  ;;  %v1716_v61 = vld [vmem:[#allocation9 + $0xb00] sm:$0xff]  ;;  %v1737_v28 = vld [vmem:[#allocation9 + $0xba8] sm:$0xff]  ;;  %v11625_v32 = vcombine.low %v1725_v16, %v1729_v17 }
 0x1fb   :  { %7645 = vmatpush1.bf16.msra.mxu0 %v11567_v0  ;;  %7973 = vmatpush1.bf16.msra.mxu1 %v11569_v51  ;;  %v13734_v6 = vadd.f32 %v1286_v2, %v339_v52  ;;  %v1288_v7 = vpop.f32.mrb[14].mxu0  ;;  %v1325_v47 = vpop.f32.mrb[12].mxu1  ;;  %v11602_v0 = vcombine.high %v1701_v33, %v1705_v35  ;;  %v1708_v51 = vld [vmem:[#allocation9 + $0xac0] sm:$0xff]  ;;  %v303_v33 = vrot.slane %v13647_v20, %v13720_v34 }
 0x1fc   :  { %7646 = vmatprep.subr.bf16.mxu0 %v11576_v53  ;;  %7974 = vmatprep.subr.bf16.mxu1 %v11578_v54  ;;  %v1289_v41 = vpop.f32.mrb[15].mxu0  ;;  %v13740_v29 = vadd.f32 %v1325_v47, %v343_v14  ;;  %v1327_v30 = vpop.f32.mrb[13].mxu1  ;;  %v1712_v52 = vld [vmem:[#allocation9 + $0xae0] sm:$0xff]  ;;  %v1709_v53 = vld [vmem:[#allocation9 + $0xac8] sm:$0xff] }
 0x1fd   :  { %v13742_v36 = vadd.f32 %v1327_v30, %v347_v23  ;;  %v1329_v39 = vpop.f32.mrb[14].mxu1  ;;  %v1713_v54 = vld [vmem:[#allocation9 + $0xae8] sm:$0xff]  ;;  %v11608_v57 = vcombine.high %v1708_v51, %v1712_v52  ;;  %v1720_v2 = vld [vmem:[#allocation9 + $0xb20] sm:$0xff]  ;;  %v11607_v7 = vcombine.low %v1708_v51, %v1712_v52 }
 0x1fe   :  { %v1330_v43 = vpop.f32.mrb[15].mxu1  ;;  %v11610_v58 = vcombine.high %v1709_v53, %v1713_v54  ;;  %v1724_v41 = vld [vmem:[#allocation9 + $0xb40] sm:$0xff]  ;;  %v11615_v22 = vcombine.low %v1716_v61, %v1720_v2 }
 0x1ff   :  { %7647 = vmatpush1.bf16.msra.mxu0 %v11575_v3  ;;  %7975 = vmatpush1.bf16.msra.mxu1 %v11577_v4  ;;  %v1717_v3 = vld [vmem:[#allocation9 + $0xb08] sm:$0xff]  ;;  %v1728_v14 = vld [vmem:[#allocation9 + $0xb60] sm:$0xff] }
 0x200   :  { %7648 = vmatprep.subr.bf16.mxu0 %v11584_v9  ;;  %7976 = vmatprep.subr.bf16.mxu1 %v11586_v10  ;;  %v1721_v4 = vld [vmem:[#allocation9 + $0xb28] sm:$0xff]  ;;  %v11609_v9 = vcombine.low %v1709_v53, %v1713_v54  ;;  %v11616_v10 = vcombine.high %v1716_v61, %v1720_v2  ;;  %v1732_v47 = vld [vmem:[#allocation9 + $0xb80] sm:$0xff]  ;;  %v11623_v30 = vcombine.low %v1724_v41, %v1728_v14 }
 0x201   :  { %v11618_v12 = vcombine.high %v1717_v3, %v1721_v4  ;;  %v11617_v23 = vcombine.low %v1717_v3, %v1721_v4  ;;  %v1740_v43 = vld [vmem:[#allocation9 + $0xbc0] sm:$0xff]  ;;  %v1121_v53 = vadd.f32 %v13677_v8, %v303_v33  ;;  %v1749_v61 = vld [vmem:[#allocation9 + $0xc08] sm:$0xff] }
 0x202   :  { %v1753_v2 = vld [vmem:[#allocation9 + $0xc28] sm:$0xff] }
 0x203   :  { %7649 = vmatpush1.bf16.msra.mxu0 %v11583_v18  ;;  %7977 = vmatpush1.bf16.msra.mxu1 %v11585_v24  ;;  %v11624_v18 = vcombine.high %v1724_v41, %v1728_v14  ;;  %v11626_v24 = vcombine.high %v1725_v16, %v1729_v17  ;;  %v1336_v4 = vmax.f32 %v1121_v53, 0.0  ;;  %v1757_v41 = vld [vmem:[#allocation9 + $0xc48] sm:$0xff]  ;;  %v11649_v17 = vcombine.low %v1749_v61, %v1753_v2  ;;  %v1784_v53 = vld [vmem:[#allocation9 + $0xd20] sm:$0xff] }
 0x204   :  { %7650 = vmatprep.subr.bf16.mxu0 %v11592_v26  ;;  %7978 = vmatprep.subr.bf16.mxu1 %v11594_v27  ;;  %v1736_v26 = vld [vmem:[#allocation9 + $0xba0] sm:$0xff]  ;;  %v1733_v27 = vld [vmem:[#allocation9 + $0xb88] sm:$0xff] }
 0x205   :  { %v11632_v35 = vcombine.high %v1732_v47, %v1736_v26  ;;  %v11634_v39 = vcombine.high %v1733_v27, %v1737_v28  ;;  %v11631_v51 = vcombine.low %v1732_v47, %v1736_v26  ;;  %v11633_v52 = vcombine.low %v1733_v27, %v1737_v28  ;;  %v1761_v14 = vld [vmem:[#allocation9 + $0xc68] sm:$0xff]  ;;  %v1768_v47 = vld [vmem:[#allocation9 + $0xca0] sm:$0xff] }
 0x206   :  { %v13750_v16 = vpack.c.bf16 %v1336_v4, %v1336_v4  ;;  %v1765_v26 = vld [vmem:[#allocation9 + $0xc88] sm:$0xff] }
 0x207   :  { %7651 = vmatpush1.bf16.msra.mxu0 %v11591_v44  ;;  %7979 = vmatpush1.bf16.msra.mxu1 %v11593_v45  ;;  %v315_v44 = vrot.slane %v13647_v20, %v13732_v5  ;;  %v1744_v45 = vld [vmem:[#allocation9 + $0xbe0] sm:$0xff]  ;;  %v1769_v27 = vld [vmem:[#allocation9 + $0xca8] sm:$0xff] }
 0x208   :  { %7652 = vmatprep.subr.bf16.mxu0 %v11600_v46  ;;  %7980 = vmatprep.subr.bf16.mxu1 %v11602_v0  ;;  %v1741_v46 = vld [vmem:[#allocation9 + $0xbc8] sm:$0xff]  ;;  %v11640_v54 = vcombine.high %v1740_v43, %v1744_v45  ;;  %v11639_v20 = vcombine.low %v1740_v43, %v1744_v45  ;;  %v11666_v33 = vcombine.high %v1765_v26, %v1769_v27 }
 0x209   :  { %v1745_v0 = vld [vmem:[#allocation9 + $0xbe8] sm:$0xff] }
 0x20a   :  { %v11641_v3 = vcombine.low %v1741_v46, %v1745_v0  ;;  %v1773_v43 = vld [vmem:[#allocation9 + $0xcc8] sm:$0xff] }
 0x20b   :  { %7653 = vmatpush1.bf16.msra.mxu0 %v11599_v55  ;;  %7981 = vmatpush1.bf16.msra.mxu1 %v11601_v56  ;;  %v11642_v55 = vcombine.high %v1741_v46, %v1745_v0  ;;  %v1748_v56 = vld [vmem:[#allocation9 + $0xc00] sm:$0xff]  ;;  %v11665_v46 = vcombine.low %v1765_v26, %v1769_v27  ;;  %v1793_v4 = vld [vmem:[#allocation9 + $0xd68] sm:$0xff] }
 0x20c   :  { %7654 = vmatprep.subr.bf16.mxu0 %v11608_v57  ;;  %7982 = vmatprep.subr.bf16.mxu1 %v11610_v58  ;;  %v1164_v57 = vadd.f32 %v13683_v1, %v315_v44  ;;  %v1752_v58 = vld [vmem:[#allocation9 + $0xc20] sm:$0xff]  ;;  %v1777_v44 = vld [vmem:[#allocation9 + $0xce8] sm:$0xff] }
 0x20d   :  { %v11647_v1 = vcombine.low %v1748_v56, %v1752_v58  ;;  %v1808_v26 = vld [vmem:[#allocation9 + $0xde0] sm:$0xff]  ;;  %v1805_v27 = vld [vmem:[#allocation9 + $0xdc8] sm:$0xff] }
 0x20e   :  { %v1339_v8 = vmax.f32 %v1164_v57, 0.0  ;;  %v11673_v57 = vcombine.low %v1773_v43, %v1777_v44 }
 0x20f   :  { %7655 = vmatpush1.bf16.msra.mxu0 %v11607_v7  ;;  %7983 = vmatpush1.bf16.msra.mxu1 %v11609_v9  ;;  %v11648_v7 = vcombine.high %v1748_v56, %v1752_v58  ;;  %v11650_v9 = vcombine.high %v1749_v61, %v1753_v2  ;;  %v1788_v2 = vld [vmem:[#allocation9 + $0xd40] sm:$0xff] }
 0x210   :  { %7656 = vmatprep.subr.bf16.mxu0 %v11616_v10  ;;  %7984 = vmatprep.subr.bf16.mxu1 %v11618_v12  ;;  %v1756_v10 = vld [vmem:[#allocation9 + $0xc40] sm:$0xff] }
 0x211   :  { %v1760_v12 = vld [vmem:[#allocation9 + $0xc60] sm:$0xff] }
 0x212   :  { %v11655_v28 = vcombine.low %v1756_v10, %v1760_v12 }
 0x213   :  { %7657 = vmatpush1.bf16.msra.mxu0 %v11615_v22  ;;  %7985 = vmatpush1.bf16.msra.mxu1 %v11617_v23  ;;  %v13752_v22 = vpack.c.bf16 %v1339_v8, %v1339_v8  ;;  %v11656_v23 = vcombine.high %v1756_v10, %v1760_v12  ;;  %v1796_v12 = vld [vmem:[#allocation9 + $0xd80] sm:$0xff] }
 0x214   :  { %7658 = vmatprep.subr.bf16.mxu0 %v11624_v18  ;;  %7986 = vmatprep.subr.bf16.mxu1 %v11626_v24  ;;  %v11658_v18 = vcombine.high %v1757_v41, %v1761_v14  ;;  %v1764_v24 = vld [vmem:[#allocation9 + $0xc80] sm:$0xff] }
 0x215   :  { %v11663_v45 = vcombine.low %v1764_v24, %v1768_v47 }
 0x217   :  { %7659 = vmatpush1.bf16.msra.mxu0 %v11623_v30  ;;  %7987 = vmatpush1.bf16.msra.mxu1 %v11625_v32  ;;  %v11657_v30 = vcombine.low %v1757_v41, %v1761_v14  ;;  %v11664_v32 = vcombine.high %v1764_v24, %v1768_v47  ;;  %v1800_v41 = vld [vmem:[#allocation9 + $0xda0] sm:$0xff]  ;;  %v1797_v14 = vld [vmem:[#allocation9 + $0xd88] sm:$0xff] }
 0x218   :  { %7660 = vmatprep.subr.bf16.mxu0 %v11632_v35  ;;  %7988 = vmatprep.subr.bf16.mxu1 %v11634_v39  ;;  %v1772_v35 = vld [vmem:[#allocation9 + $0xcc0] sm:$0xff] }
 0x219   :  { %v1776_v39 = vld [vmem:[#allocation9 + $0xce0] sm:$0xff] }
 0x21a   :  { %v11672_v0 = vcombine.high %v1772_v35, %v1776_v39  ;;  %v11671_v56 = vcombine.low %v1772_v35, %v1776_v39  ;;  %v1804_v47 = vld [vmem:[#allocation9 + $0xdc0] sm:$0xff] }
 0x21b   :  { %7661 = vmatpush1.bf16.msra.mxu0 %v11631_v51  ;;  %7989 = vmatpush1.bf16.msra.mxu1 %v11633_v52  ;;  %v11674_v51 = vcombine.high %v1773_v43, %v1777_v44  ;;  %v1780_v52 = vld [vmem:[#allocation9 + $0xd00] sm:$0xff]  ;;  %v1813_v44 = vld [vmem:[#allocation9 + $0xe08] sm:$0xff] }
 0x21c   :  { %7662 = vmatprep.subr.bf16.mxu0 %v11640_v54  ;;  %7990 = vmatprep.subr.bf16.mxu1 %v11642_v55  ;;  %v1781_v54 = vld [vmem:[#allocation9 + $0xd08] sm:$0xff]  ;;  %v11680_v58 = vcombine.high %v1780_v52, %v1784_v53  ;;  %v1812_v39 = vld [vmem:[#allocation9 + $0xe00] sm:$0xff] }
 0x21d   :  { %v1785_v55 = vld [vmem:[#allocation9 + $0xd28] sm:$0xff]  ;;  %v1816_v43 = vld [vmem:[#allocation9 + $0xe20] sm:$0xff] }
 0x21e   :  { %v11682_v61 = vcombine.high %v1781_v54, %v1785_v55 }
 0x21f   :  { %7663 = vmatpush1.bf16.msra.mxu0 %v11639_v20  ;;  %7991 = vmatpush1.bf16.msra.mxu1 %v11641_v3  ;;  %v1792_v20 = vld [vmem:[#allocation9 + $0xd60] sm:$0xff]  ;;  %v1789_v3 = vld [vmem:[#allocation9 + $0xd48] sm:$0xff] }
 0x220   :  { %7673 = vmatprep.subr.bf16.mxu0 %v11648_v7  ;;  %8001 = vmatprep.subr.bf16.mxu1 %v11650_v9  ;;  %v11679_v7 = vcombine.low %v1780_v52, %v1784_v53  ;;  %v11681_v9 = vcombine.low %v1781_v54, %v1785_v55  ;;  %v11688_v8 = vcombine.high %v1788_v2, %v1792_v20  ;;  %v1820_v53 = vld [vmem:[#allocation9 + $0xe40] sm:$0xff]  ;;  %v1821_v55 = vld [vmem:[#allocation9 + $0xe48] sm:$0xff] }
 0x221   :  { %v11690_v10 = vcombine.high %v1789_v3, %v1793_v4  ;;  %v1824_v54 = vld [vmem:[#allocation9 + $0xe60] sm:$0xff] }
 0x222   :  { %7665 = vmatmul.mubr.bf16.vlgmr.msra.gmra.mrb[16].mxu0 %v13750_v16  ;;  %7993 = vmatmul.mubr.bf16.vlgmr.msra.gmra.mrb[16].mxu1 %v13750_v16 }
 0x223   :  { %7674 = vmatpush1.bf16.msra.mxu0 %v11647_v1  ;;  %7705 = vmatprep.mubr.bf16.mxu0 %v13752_v22  ;;  %v1801_v1 = vld [vmem:[#allocation9 + $0xda8] sm:$0xff] }
 0x224   :  { %8002 = vmatpush1.bf16.msra.mxu1 %v11649_v17  ;;  %8033 = vmatprep.mubr.bf16.mxu1 %v13752_v22  ;;  %v11687_v17 = vcombine.low %v1788_v2, %v1792_v20  ;;  %v11698_v24 = vcombine.high %v1797_v14, %v1801_v1  ;;  %v1828_v20 = vld [vmem:[#allocation9 + $0xe80] sm:$0xff] }
 0x225   :  { %7675 = vmatprep.subr.bf16.mxu0 %v11656_v23  ;;  %8003 = vmatprep.subr.bf16.mxu1 %v11658_v18  ;;  %v11689_v23 = vcombine.low %v1789_v3, %v1793_v4  ;;  %v11696_v18 = vcombine.high %v1796_v12, %v1800_v41  ;;  %v1832_v3 = vld [vmem:[#allocation9 + $0xea0] sm:$0xff]  ;;  %v1829_v4 = vld [vmem:[#allocation9 + $0xe88] sm:$0xff] }
 0x227   :  { %7676 = vmatpush1.bf16.msra.mxu0 %v11655_v28  ;;  %v1809_v28 = vld [vmem:[#allocation9 + $0xde8] sm:$0xff] }
 0x228   :  { %8004 = vmatpush1.bf16.msra.mxu1 %v11657_v30  ;;  %7677 = vmatprep.subr.bf16.mxu0 %v11664_v32  ;;  %v11695_v30 = vcombine.low %v1796_v12, %v1800_v41  ;;  %v11697_v32 = vcombine.low %v1797_v14, %v1801_v1  ;;  %v11706_v35 = vcombine.high %v1805_v27, %v1809_v28  ;;  %v1836_v41 = vld [vmem:[#allocation9 + $0xec0] sm:$0xff]  ;;  %v1837_v1 = vld [vmem:[#allocation9 + $0xec8] sm:$0xff] }
 0x229   :  { %8005 = vmatprep.subr.bf16.mxu1 %v11666_v33  ;;  %v11704_v33 = vcombine.high %v1804_v47, %v1808_v26  ;;  %v1840_v14 = vld [vmem:[#allocation9 + $0xee0] sm:$0xff] }
 0x22b   :  { %7678 = vmatpush1.bf16.msra.mxu0 %v11663_v45  ;;  %v1817_v45 = vld [vmem:[#allocation9 + $0xe28] sm:$0xff] }
 0x22c   :  { %8006 = vmatpush1.bf16.msra.mxu1 %v11665_v46  ;;  %7679 = vmatprep.subr.bf16.mxu0 %v11672_v0  ;;  %v11703_v46 = vcombine.low %v1804_v47, %v1808_v26  ;;  %v11705_v0 = vcombine.low %v1805_v27, %v1809_v28  ;;  %v11714_v52 = vcombine.high %v1813_v44, %v1817_v45  ;;  %v1844_v26 = vld [vmem:[#allocation9 + $0xf00] sm:$0xff]  ;;  %v1845_v28 = vld [vmem:[#allocation9 + $0xf08] sm:$0xff] }
 0x22d   :  { %8007 = vmatprep.subr.bf16.mxu1 %v11674_v51  ;;  %v11712_v51 = vcombine.high %v1812_v39, %v1816_v43  ;;  %v1848_v27 = vld [vmem:[#allocation9 + $0xf20] sm:$0xff] }
 0x22f   :  { %7680 = vmatpush1.bf16.msra.mxu0 %v11671_v56  ;;  %v1825_v56 = vld [vmem:[#allocation9 + $0xe68] sm:$0xff] }
 0x230   :  { %8008 = vmatpush1.bf16.msra.mxu1 %v11673_v57  ;;  %7681 = vmatprep.subr.bf16.mxu0 %v11680_v58  ;;  %v11711_v57 = vcombine.low %v1812_v39, %v1816_v43  ;;  %v11713_v58 = vcombine.low %v1813_v44, %v1817_v45  ;;  %v11722_v2 = vcombine.high %v1821_v55, %v1825_v56  ;;  %v1852_v43 = vld [vmem:[#allocation9 + $0xf40] sm:$0xff]  ;;  %v1853_v45 = vld [vmem:[#allocation9 + $0xf48] sm:$0xff] }
 0x231   :  { %8009 = vmatprep.subr.bf16.mxu1 %v11682_v61  ;;  %v11720_v61 = vcombine.high %v1820_v53, %v1824_v54  ;;  %v1856_v44 = vld [vmem:[#allocation9 + $0xf60] sm:$0xff] }
 0x233   :  { %7682 = vmatpush1.bf16.msra.mxu0 %v11679_v7  ;;  %v1833_v7 = vld [vmem:[#allocation9 + $0xea8] sm:$0xff] }
 0x234   :  { %8010 = vmatpush1.bf16.msra.mxu1 %v11681_v9  ;;  %7683 = vmatprep.subr.bf16.mxu0 %v11688_v8  ;;  %v11719_v9 = vcombine.low %v1820_v53, %v1824_v54  ;;  %v11721_v8 = vcombine.low %v1821_v55, %v1825_v56  ;;  %v11730_v12 = vcombine.high %v1829_v4, %v1833_v7  ;;  %v1860_v54 = vld [vmem:[#allocation9 + $0xf80] sm:$0xff]  ;;  %v1861_v56 = vld [vmem:[#allocation9 + $0xf88] sm:$0xff] }
 0x235   :  { %8011 = vmatprep.subr.bf16.mxu1 %v11690_v10  ;;  %v11728_v10 = vcombine.high %v1828_v20, %v1832_v3  ;;  %v1864_v55 = vld [vmem:[#allocation9 + $0xfa0] sm:$0xff] }
 0x237   :  { %7684 = vmatpush1.bf16.msra.mxu0 %v11687_v17  ;;  %v1841_v17 = vld [vmem:[#allocation9 + $0xee8] sm:$0xff] }
 0x238   :  { %8012 = vmatpush1.bf16.msra.mxu1 %v11689_v23  ;;  %7685 = vmatprep.subr.bf16.mxu0 %v11696_v18  ;;  %v11727_v23 = vcombine.low %v1828_v20, %v1832_v3  ;;  %v11729_v18 = vcombine.low %v1829_v4, %v1833_v7  ;;  %v11738_v47 = vcombine.high %v1837_v1, %v1841_v17  ;;  %v1868_v7 = vld [vmem:[#allocation9 + $0xfc0] sm:$0xff] }
 0x239   :  { %8013 = vmatprep.subr.bf16.mxu1 %v11698_v24  ;;  %v11736_v24 = vcombine.high %v1836_v41, %v1840_v14  ;;  %v11760_v3 = vcombine.high %v1860_v54, %v1864_v55 }
 0x23b   :  { %7686 = vmatpush1.bf16.msra.mxu0 %v11695_v30  ;;  %v1849_v30 = vld [vmem:[#allocation9 + $0xf28] sm:$0xff] }
 0x23c   :  { %8014 = vmatpush1.bf16.msra.mxu1 %v11697_v32  ;;  %7687 = vmatprep.subr.bf16.mxu0 %v11704_v33  ;;  %v11735_v32 = vcombine.low %v1836_v41, %v1840_v14  ;;  %v11737_v33 = vcombine.low %v1837_v1, %v1841_v17  ;;  %v11746_v39 = vcombine.high %v1845_v28, %v1849_v30 }
 0x23d   :  { %8015 = vmatprep.subr.bf16.mxu1 %v11706_v35  ;;  %v11744_v35 = vcombine.high %v1844_v26, %v1848_v27  ;;  %v11759_v41 = vcombine.low %v1860_v54, %v1864_v55  ;;  %v1893_v55 = vld [vmem:[#allocation9 + $0x1088] sm:$0xff] }
 0x23f   :  { %7688 = vmatpush1.bf16.msra.mxu0 %v11703_v46  ;;  %v1857_v46 = vld [vmem:[#allocation9 + $0xf68] sm:$0xff] }
 0x240   :  { %8016 = vmatpush1.bf16.msra.mxu1 %v11705_v0  ;;  %7689 = vmatprep.subr.bf16.mxu0 %v11712_v51  ;;  %v11743_v0 = vcombine.low %v1844_v26, %v1848_v27  ;;  %v11745_v51 = vcombine.low %v1845_v28, %v1849_v30  ;;  %v11754_v53 = vcombine.high %v1853_v45, %v1857_v46  ;;  %v1877_v26 = vld [vmem:[#allocation9 + $0x1008] sm:$0xff] }
 0x241   :  { %8017 = vmatprep.subr.bf16.mxu1 %v11714_v52  ;;  %v11752_v52 = vcombine.high %v1852_v43, %v1856_v44  ;;  %v11753_v20 = vcombine.low %v1853_v45, %v1857_v46  ;;  %v1881_v27 = vld [vmem:[#allocation9 + $0x1028] sm:$0xff] }
 0x242   :  { %v1889_v45 = vld [vmem:[#allocation9 + $0x1068] sm:$0xff] }
 0x243   :  { %7690 = vmatpush1.bf16.msra.mxu0 %v11711_v57  ;;  %v1865_v57 = vld [vmem:[#allocation9 + $0xfa8] sm:$0xff] }
 0x244   :  { %8018 = vmatpush1.bf16.msra.mxu1 %v11713_v58  ;;  %7691 = vmatprep.subr.bf16.mxu0 %v11720_v61  ;;  %v11751_v58 = vcombine.low %v1852_v43, %v1856_v44  ;;  %v13203_v61 = vld [vmem:[#allocation8] sm:$0xff]  ;;  %v11762_v4 = vcombine.high %v1861_v56, %v1865_v57  ;;  %v11761_v1 = vcombine.low %v1861_v56, %v1865_v57  ;;  %v1885_v44 = vld [vmem:[#allocation9 + $0x1048] sm:$0xff] }
 0x245   :  { %8019 = vmatprep.subr.bf16.mxu1 %v11722_v2  ;;  %v311_v2 = vrot.slane %v13203_v61, %v13727_v62  ;;  %v11786_v54 = vcombine.high %v1885_v44, %v1889_v45  ;;  %v1897_v56 = vld [vmem:[#allocation9 + $0x10a8] sm:$0xff] }
 0x247   :  { %7692 = vmatpush1.bf16.msra.mxu0 %v11719_v9  ;;  %v1872_v9 = vld [vmem:[#allocation9 + $0xfe0] sm:$0xff]  ;;  %v1162_v14 = vadd.f32 %v13681_v59, %v311_v2  ;;  %v11778_v59 = vcombine.high %v1877_v26, %v1881_v27  ;;  %v11794_v2 = vcombine.high %v1893_v55, %v1897_v56 }
 0x248   :  { %8020 = vmatpush1.bf16.msra.mxu1 %v11721_v8  ;;  %7693 = vmatprep.subr.bf16.mxu0 %v11728_v10  ;;  %v323_v8 = vrot.slane %v13701_v15, %v13650_v21  ;;  %v1869_v10 = vld [vmem:[#allocation9 + $0xfc8] sm:$0xff]  ;;  %v11768_v17 = vcombine.high %v1868_v7, %v1872_v9  ;;  %v11767_v15 = vcombine.low %v1868_v7, %v1872_v9 }
 0x249   :  { %8021 = vmatprep.subr.bf16.mxu1 %v11730_v12  ;;  %v1873_v12 = vld [vmem:[#allocation9 + $0xfe8] sm:$0xff]  ;;  %v1338_v28 = vmax.f32 %v1162_v14, 0.0  ;;  %v1912_v14 = vld [vmem:[#allocation9 + $0x1120] sm:$0xff] }
 0x24a   :  { %v11769_v30 = vcombine.low %v1869_v10, %v1873_v12  ;;  %v1905_v7 = vld [vmem:[#allocation9 + $0x10e8] sm:$0xff] }
 0x24b   :  { %7694 = vmatpush1.bf16.msra.mxu0 %v11727_v23  ;;  %v11770_v23 = vcombine.high %v1869_v10, %v1873_v12  ;;  %v13763_v46 = vpack.c.bf16 %v1338_v28, %v1338_v28  ;;  %v1921_v28 = vld [vmem:[#allocation9 + $0x1168] sm:$0xff] }
 0x24c   :  { %8022 = vmatpush1.bf16.msra.mxu1 %v11729_v18  ;;  %7695 = vmatprep.subr.bf16.mxu0 %v11736_v24  ;;  %v1876_v18 = vld [vmem:[#allocation9 + $0x1000] sm:$0xff] }
 0x24d   :  { %8023 = vmatprep.subr.bf16.mxu1 %v11738_v47  ;;  %v1880_v24 = vld [vmem:[#allocation9 + $0x1020] sm:$0xff]  ;;  %v1205_v47 = vadd.f32 %v13699_v13, %v323_v8  ;;  %v11777_v13 = vcombine.low %v1877_v26, %v1881_v27  ;;  %v11793_v8 = vcombine.low %v1893_v55, %v1897_v56  ;;  %v1933_v55 = vld [vmem:[#allocation9 + $0x11c8] sm:$0xff] }
 0x24e   :  { %v11775_v43 = vcombine.low %v1876_v18, %v1880_v24  ;;  %v1916_v26 = vld [vmem:[#allocation9 + $0x1140] sm:$0xff]  ;;  %v1937_v56 = vld [vmem:[#allocation9 + $0x11e8] sm:$0xff] }
 0x24f   :  { %7696 = vmatpush1.bf16.msra.mxu0 %v11735_v32  ;;  %v11776_v32 = vcombine.high %v1876_v18, %v1880_v24  ;;  %v1920_v27 = vld [vmem:[#allocation9 + $0x1160] sm:$0xff] }
 0x250   :  { %8024 = vmatpush1.bf16.msra.mxu1 %v11737_v33  ;;  %7697 = vmatprep.subr.bf16.mxu0 %v11744_v35  ;;  %v1341_v33 = vmax.f32 %v1205_v47, 0.0  ;;  %v1884_v35 = vld [vmem:[#allocation9 + $0x1040] sm:$0xff] }
 0x251   :  { %8025 = vmatprep.subr.bf16.mxu1 %v11746_v39  ;;  %v1888_v39 = vld [vmem:[#allocation9 + $0x1060] sm:$0xff] }
 0x252   :  { %v11783_v57 = vcombine.low %v1884_v35, %v1888_v39 }
 0x253   :  { %7698 = vmatpush1.bf16.msra.mxu0 %v11743_v0  ;;  %v11784_v0 = vcombine.high %v1884_v35, %v1888_v39  ;;  %v1924_v35 = vld [vmem:[#allocation9 + $0x1180] sm:$0xff] }
 0x254   :  { %8026 = vmatpush1.bf16.msra.mxu1 %v11745_v51  ;;  %7699 = vmatprep.subr.bf16.mxu0 %v11752_v52  ;;  %v1892_v51 = vld [vmem:[#allocation9 + $0x1080] sm:$0xff] }
 0x255   :  { %8027 = vmatprep.subr.bf16.mxu1 %v11754_v53  ;;  %v1896_v52 = vld [vmem:[#allocation9 + $0x10a0] sm:$0xff]  ;;  %v13765_v53 = vpack.c.bf16 %v1341_v33, %v1341_v33 }
 0x256   :  { %v11792_v61 = vcombine.high %v1892_v51, %v1896_v52  ;;  %v11791_v9 = vcombine.low %v1892_v51, %v1896_v52  ;;  %v1928_v39 = vld [vmem:[#allocation9 + $0x11a0] sm:$0xff] }
 0x257   :  { %7700 = vmatpush1.bf16.msra.mxu0 %v11751_v58  ;;  %v11785_v58 = vcombine.low %v1885_v44, %v1889_v45  ;;  %v1929_v44 = vld [vmem:[#allocation9 + $0x11a8] sm:$0xff]  ;;  %v11815_v45 = vcombine.low %v1916_v26, %v1920_v27  ;;  %v1932_v52 = vld [vmem:[#allocation9 + $0x11c0] sm:$0xff] }
 0x258   :  { %8028 = vmatpush1.bf16.msra.mxu1 %v11753_v20  ;;  %7701 = vmatprep.subr.bf16.mxu0 %v11760_v3  ;;  %v1900_v20 = vld [vmem:[#allocation9 + $0x10c0] sm:$0xff] }
 0x259   :  { %8029 = vmatprep.subr.bf16.mxu1 %v11762_v4  ;;  %v1904_v3 = vld [vmem:[#allocation9 + $0x10e0] sm:$0xff]  ;;  %v1901_v4 = vld [vmem:[#allocation9 + $0x10c8] sm:$0xff] }
 0x25a   :  { %v11800_v10 = vcombine.high %v1900_v20, %v1904_v3  ;;  %v11802_v12 = vcombine.high %v1901_v4, %v1905_v7  ;;  %v11801_v18 = vcombine.low %v1901_v4, %v1905_v7  ;;  %v1941_v4 = vld [vmem:[#allocation9 + $0x1208] sm:$0xff] }
 0x25b   :  { %7702 = vmatpush1.bf16.msra.mxu0 %v11759_v41  ;;  %v1908_v41 = vld [vmem:[#allocation9 + $0x1100] sm:$0xff]  ;;  %v1945_v7 = vld [vmem:[#allocation9 + $0x1228] sm:$0xff] }
 0x25c   :  { %8030 = vmatpush1.bf16.msra.mxu1 %v11761_v1  ;;  %7703 = vmatprep.subr.bf16.mxu0 %v11768_v17  ;;  %v1909_v1 = vld [vmem:[#allocation9 + $0x1108] sm:$0xff]  ;;  %v11808_v24 = vcombine.high %v1908_v41, %v1912_v14 }
 0x25d   :  { %8031 = vmatprep.subr.bf16.mxu1 %v11770_v23  ;;  %v1913_v17 = vld [vmem:[#allocation9 + $0x1128] sm:$0xff]  ;;  %v11799_v23 = vcombine.low %v1900_v20, %v1904_v3  ;;  %v1940_v20 = vld [vmem:[#allocation9 + $0x1200] sm:$0xff] }
 0x25e   :  { %v11810_v47 = vcombine.high %v1909_v1, %v1913_v17  ;;  %v1944_v3 = vld [vmem:[#allocation9 + $0x1220] sm:$0xff] }
 0x25f   :  { %7704 = vmatpush1.bf16.msra.mxu0 %v11767_v15  ;;  %v1917_v15 = vld [vmem:[#allocation9 + $0x1148] sm:$0xff] }
 0x260   :  { %8032 = vmatpush1.bf16.msra.mxu1 %v11769_v30  ;;  %7714 = vmatprep.subr.bf16.mxu0 %v11776_v32  ;;  %v11807_v30 = vcombine.low %v1908_v41, %v1912_v14  ;;  %v11809_v32 = vcombine.low %v1909_v1, %v1913_v17  ;;  %v11818_v33 = vcombine.high %v1917_v15, %v1921_v28  ;;  %v1948_v41 = vld [vmem:[#allocation9 + $0x1240] sm:$0xff]  ;;  %v1949_v1 = vld [vmem:[#allocation9 + $0x1248] sm:$0xff] }
 0x261   :  { %8042 = vmatprep.subr.bf16.mxu1 %v11778_v59  ;;  %v11816_v59 = vcombine.high %v1916_v26, %v1920_v27  ;;  %v1952_v14 = vld [vmem:[#allocation9 + $0x1260] sm:$0xff]  ;;  %v1953_v17 = vld [vmem:[#allocation9 + $0x1268] sm:$0xff] }
 0x262   :  { %7706 = vmatmul.mubr.bf16.vlgmr.msra.gmra.mrb[16].mxu0 %v13763_v46  ;;  %v1956_v26 = vld [vmem:[#allocation9 + $0x1280] sm:$0xff] }
 0x263   :  { %8034 = vmatmul.mubr.bf16.vlgmr.msra.gmra.mrb[16].mxu1 %v13763_v46  ;;  %7715 = vmatpush1.bf16.msra.mxu0 %v11775_v43  ;;  %v1925_v43 = vld [vmem:[#allocation9 + $0x1188] sm:$0xff]  ;;  %v1960_v27 = vld [vmem:[#allocation9 + $0x12a0] sm:$0xff] }
 0x264   :  { %7746 = vmatprep.mubr.bf16.mxu0 %v13765_v53  ;;  %8043 = vmatpush1.bf16.msra.mxu1 %v11777_v13  ;;  %v11817_v13 = vcombine.low %v1917_v15, %v1921_v28  ;;  %v11826_v51 = vcombine.high %v1925_v43, %v1929_v44  ;;  %v1957_v15 = vld [vmem:[#allocation9 + $0x1288] sm:$0xff] }
 0x265   :  { %8074 = vmatprep.mubr.bf16.mxu1 %v13765_v53  ;;  %7716 = vmatprep.subr.bf16.mxu0 %v11784_v0  ;;  %v11824_v0 = vcombine.high %v1924_v35, %v1928_v39  ;;  %v1961_v28 = vld [vmem:[#allocation9 + $0x12a8] sm:$0xff] }
 0x266   :  { %8044 = vmatprep.subr.bf16.mxu1 %v11786_v54  ;;  %v1936_v54 = vld [vmem:[#allocation9 + $0x11e0] sm:$0xff] }
 0x267   :  { %7717 = vmatpush1.bf16.msra.mxu0 %v11783_v57  ;;  %v11823_v57 = vcombine.low %v1924_v35, %v1928_v39  ;;  %v1964_v35 = vld [vmem:[#allocation9 + $0x12c0] sm:$0xff] }
 0x268   :  { %8045 = vmatpush1.bf16.msra.mxu1 %v11785_v58  ;;  %7718 = vmatprep.subr.bf16.mxu0 %v11792_v61  ;;  %v11825_v58 = vcombine.low %v1925_v43, %v1929_v44  ;;  %v11832_v61 = vcombine.high %v1932_v52, %v1936_v54  ;;  %v1968_v39 = vld [vmem:[#allocation9 + $0x12e0] sm:$0xff]  ;;  %v1965_v43 = vld [vmem:[#allocation9 + $0x12c8] sm:$0xff] }
 0x269   :  { %8046 = vmatprep.subr.bf16.mxu1 %v11794_v2  ;;  %v11834_v2 = vcombine.high %v1933_v55, %v1937_v56  ;;  %v1969_v44 = vld [vmem:[#allocation9 + $0x12e8] sm:$0xff] }
 0x26b   :  { %7719 = vmatpush1.bf16.msra.mxu0 %v11791_v9  ;;  %v11831_v9 = vcombine.low %v1932_v52, %v1936_v54  ;;  %v1972_v52 = vld [vmem:[#allocation9 + $0x1300] sm:$0xff] }
 0x26c   :  { %8047 = vmatpush1.bf16.msra.mxu1 %v11793_v8  ;;  %7720 = vmatprep.subr.bf16.mxu0 %v11800_v10  ;;  %v11833_v8 = vcombine.low %v1933_v55, %v1937_v56  ;;  %v11840_v10 = vcombine.high %v1940_v20, %v1944_v3  ;;  %v1976_v54 = vld [vmem:[#allocation9 + $0x1320] sm:$0xff]  ;;  %v1973_v55 = vld [vmem:[#allocation9 + $0x1308] sm:$0xff] }
 0x26d   :  { %8048 = vmatprep.subr.bf16.mxu1 %v11802_v12  ;;  %v11842_v12 = vcombine.high %v1941_v4, %v1945_v7  ;;  %v1977_v56 = vld [vmem:[#allocation9 + $0x1328] sm:$0xff] }
 0x26f   :  { %7721 = vmatpush1.bf16.msra.mxu0 %v11799_v23  ;;  %v11839_v23 = vcombine.low %v1940_v20, %v1944_v3  ;;  %v1980_v20 = vld [vmem:[#allocation9 + $0x1340] sm:$0xff] }
 0x270   :  { %8049 = vmatpush1.bf16.msra.mxu1 %v11801_v18  ;;  %7722 = vmatprep.subr.bf16.mxu0 %v11808_v24  ;;  %v11841_v18 = vcombine.low %v1941_v4, %v1945_v7  ;;  %v11848_v24 = vcombine.high %v1948_v41, %v1952_v14  ;;  %v1984_v3 = vld [vmem:[#allocation9 + $0x1360] sm:$0xff]  ;;  %v1981_v4 = vld [vmem:[#allocation9 + $0x1348] sm:$0xff] }
 0x271   :  { %8050 = vmatprep.subr.bf16.mxu1 %v11810_v47  ;;  %v11850_v47 = vcombine.high %v1949_v1, %v1953_v17  ;;  %v1985_v7 = vld [vmem:[#allocation9 + $0x1368] sm:$0xff] }
 0x273   :  { %7723 = vmatpush1.bf16.msra.mxu0 %v11807_v30  ;;  %v11847_v30 = vcombine.low %v1948_v41, %v1952_v14  ;;  %v1988_v41 = vld [vmem:[#allocation9 + $0x1380] sm:$0xff] }
 0x274   :  { %8051 = vmatpush1.bf16.msra.mxu1 %v11809_v32  ;;  %7724 = vmatprep.subr.bf16.mxu0 %v11816_v59  ;;  %v11849_v32 = vcombine.low %v1949_v1, %v1953_v17  ;;  %v11856_v59 = vcombine.high %v1956_v26, %v1960_v27  ;;  %v1992_v14 = vld [vmem:[#allocation9 + $0x13a0] sm:$0xff]  ;;  %v1989_v1 = vld [vmem:[#allocation9 + $0x1388] sm:$0xff] }
 0x275   :  { %8052 = vmatprep.subr.bf16.mxu1 %v11818_v33  ;;  %v11858_v33 = vcombine.high %v1957_v15, %v1961_v28  ;;  %v1993_v17 = vld [vmem:[#allocation9 + $0x13a8] sm:$0xff] }
 0x277   :  { %7725 = vmatpush1.bf16.msra.mxu0 %v11815_v45  ;;  %v11855_v45 = vcombine.low %v1956_v26, %v1960_v27  ;;  %v11888_v26 = vcombine.high %v1988_v41, %v1992_v14  ;;  %v11890_v27 = vcombine.high %v1989_v1, %v1993_v17 }
 0x278   :  { %8053 = vmatpush1.bf16.msra.mxu1 %v11817_v13  ;;  %7726 = vmatprep.subr.bf16.mxu0 %v11824_v0  ;;  %v11857_v13 = vcombine.low %v1957_v15, %v1961_v28  ;;  %v11864_v0 = vcombine.high %v1964_v35, %v1968_v39  ;;  %v1996_v15 = vld [vmem:[#allocation9 + $0x13c0] sm:$0xff] }
 0x279   :  { %8054 = vmatprep.subr.bf16.mxu1 %v11826_v51  ;;  %v11866_v51 = vcombine.high %v1965_v43, %v1969_v44  ;;  %v2000_v28 = vld [vmem:[#allocation9 + $0x13e0] sm:$0xff] }
 0x27b   :  { %7727 = vmatpush1.bf16.msra.mxu0 %v11823_v57  ;;  %v11863_v57 = vcombine.low %v1964_v35, %v1968_v39  ;;  %v11889_v35 = vcombine.low %v1989_v1, %v1993_v17  ;;  %v11896_v39 = vcombine.high %v1996_v15, %v2000_v28 }
 0x27c   :  { %8055 = vmatpush1.bf16.msra.mxu1 %v11825_v58  ;;  %7728 = vmatprep.subr.bf16.mxu0 %v11832_v61  ;;  %v11865_v58 = vcombine.low %v1965_v43, %v1969_v44  ;;  %v11872_v61 = vcombine.high %v1972_v52, %v1976_v54  ;;  %v2004_v44 = vld [vmem:[#allocation9 + $0x1400] sm:$0xff] }
 0x27d   :  { %8056 = vmatprep.subr.bf16.mxu1 %v11834_v2  ;;  %v11874_v2 = vcombine.high %v1973_v55, %v1977_v56 }
 0x27f   :  { %7729 = vmatpush1.bf16.msra.mxu0 %v11831_v9  ;;  %v11871_v9 = vcombine.low %v1972_v52, %v1976_v54 }
 0x280   :  { %8057 = vmatpush1.bf16.msra.mxu1 %v11833_v8  ;;  %7730 = vmatprep.subr.bf16.mxu0 %v11840_v10  ;;  %v11873_v8 = vcombine.low %v1973_v55, %v1977_v56  ;;  %v11880_v10 = vcombine.high %v1980_v20, %v1984_v3 }
 0x281   :  { %8058 = vmatprep.subr.bf16.mxu1 %v11842_v12  ;;  %v11882_v12 = vcombine.high %v1981_v4, %v1985_v7 }
 0x283   :  { %7731 = vmatpush1.bf16.msra.mxu0 %v11839_v23  ;;  %v11879_v23 = vcombine.low %v1980_v20, %v1984_v3  ;;  %v2017_v20 = vld [vmem:[#allocation9 + $0x1468] sm:$0xff] }
 0x284   :  { %8059 = vmatpush1.bf16.msra.mxu1 %v11841_v18  ;;  %7732 = vmatprep.subr.bf16.mxu0 %v11848_v24  ;;  %v13204_v18 = vld [vmem:[#allocation8 + $0x8] sm:$0xff] }
 0x285   :  { %8060 = vmatprep.subr.bf16.mxu1 %v11850_v47  ;;  %v319_v24 = vrot.slane %v13204_v18, %v13645_v19  ;;  %v11881_v47 = vcombine.low %v1981_v4, %v1985_v7  ;;  %v2028_v18 = vld [vmem:[#allocation9 + $0x14c0] sm:$0xff] }
 0x287   :  { %7733 = vmatpush1.bf16.msra.mxu0 %v11847_v30  ;;  %v1997_v30 = vld [vmem:[#allocation9 + $0x13c8] sm:$0xff] }
 0x288   :  { %8061 = vmatpush1.bf16.msra.mxu1 %v11849_v32  ;;  %7734 = vmatprep.subr.bf16.mxu0 %v11856_v59  ;;  %v2001_v32 = vld [vmem:[#allocation9 + $0x13e8] sm:$0xff]  ;;  %v11887_v59 = vcombine.low %v1988_v41, %v1992_v14 }
 0x289   :  { %8062 = vmatprep.subr.bf16.mxu1 %v11858_v33  ;;  %v1203_v33 = vadd.f32 %v13697_v11, %v319_v24  ;;  %v11898_v43 = vcombine.high %v1997_v30, %v2001_v32  ;;  %v11897_v54 = vcombine.low %v1997_v30, %v2001_v32  ;;  %v1343_v11 = vmax.f32 %v13713_v49, 0.0  ;;  %v2025_v41 = vld [vmem:[#allocation9 + $0x14a8] sm:$0xff]  ;;  %v2032_v24 = vld [vmem:[#allocation9 + $0x14e0] sm:$0xff] }
 0x28a   :  { %v2036_v32 = vld [vmem:[#allocation9 + $0x1500] sm:$0xff] }
 0x28b   :  { %7735 = vmatpush1.bf16.msra.mxu0 %v11855_v45  ;;  %v2008_v45 = vld [vmem:[#allocation9 + $0x1420] sm:$0xff]  ;;  %v1340_v52 = vmax.f32 %v1203_v33, 0.0  ;;  %v2037_v33 = vld [vmem:[#allocation9 + $0x1508] sm:$0xff] }
 0x28c   :  { %8063 = vmatpush1.bf16.msra.mxu1 %v11857_v13  ;;  %7736 = vmatprep.subr.bf16.mxu0 %v11864_v0  ;;  %v2005_v13 = vld [vmem:[#allocation9 + $0x1408] sm:$0xff]  ;;  %v11904_v55 = vcombine.high %v2004_v44, %v2008_v45 }
 0x28d   :  { %8064 = vmatprep.subr.bf16.mxu1 %v11866_v51  ;;  %v2009_v0 = vld [vmem:[#allocation9 + $0x1428] sm:$0xff]  ;;  %v11895_v51 = vcombine.low %v1996_v15, %v2000_v28  ;;  %v13774_v3 = vpack.c.bf16 %v1340_v52, %v1340_v52  ;;  %v11928_v28 = vcombine.high %v2028_v18, %v2032_v24 }
 0x28e   :  { %v11906_v56 = vcombine.high %v2005_v13, %v2009_v0  ;;  %v11905_v4 = vcombine.low %v2005_v13, %v2009_v0  ;;  %v2044_v13 = vld [vmem:[#allocation9 + $0x1540] sm:$0xff]  ;;  %v2049_v52 = vld [vmem:[#allocation9 + $0x1568] sm:$0xff] }
 0x28f   :  { %7737 = vmatpush1.bf16.msra.mxu0 %v11863_v57  ;;  %v2012_v57 = vld [vmem:[#allocation9 + $0x1440] sm:$0xff] }
 0x290   :  { %8065 = vmatpush1.bf16.msra.mxu1 %v11865_v58  ;;  %7738 = vmatprep.subr.bf16.mxu0 %v11872_v61  ;;  %v2016_v58 = vld [vmem:[#allocation9 + $0x1460] sm:$0xff]  ;;  %v11903_v61 = vcombine.low %v2004_v44, %v2008_v45 }
 0x291   :  { %8066 = vmatprep.subr.bf16.mxu1 %v11874_v2  ;;  %v2013_v2 = vld [vmem:[#allocation9 + $0x1448] sm:$0xff]  ;;  %v11912_v7 = vcombine.high %v2012_v57, %v2016_v58  ;;  %v11911_v14 = vcombine.low %v2012_v57, %v2016_v58  ;;  %v2048_v0 = vld [vmem:[#allocation9 + $0x1560] sm:$0xff] }
 0x292   :  { %v11914_v49 = vcombine.high %v2013_v2, %v2017_v20  ;;  %v11913_v1 = vcombine.low %v2013_v2, %v2017_v20  ;;  %v2052_v57 = vld [vmem:[#allocation9 + $0x1580] sm:$0xff]  ;;  %v2057_v2 = vld [vmem:[#allocation9 + $0x15a8] sm:$0xff]  ;;  %v11943_v20 = vcombine.low %v2044_v13, %v2048_v0 }
 0x293   :  { %7739 = vmatpush1.bf16.msra.mxu0 %v11871_v9  ;;  %v2020_v9 = vld [vmem:[#allocation9 + $0x1480] sm:$0xff] }
 0x294   :  { %8067 = vmatpush1.bf16.msra.mxu1 %v11873_v8  ;;  %7740 = vmatprep.subr.bf16.mxu0 %v11880_v10  ;;  %v2024_v8 = vld [vmem:[#allocation9 + $0x14a0] sm:$0xff]  ;;  %v13776_v10 = vpack.c.bf16 %v1343_v11, %v1343_v11 }
 0x295   :  { %8068 = vmatprep.subr.bf16.mxu1 %v11882_v12  ;;  %v2021_v12 = vld [vmem:[#allocation9 + $0x1488] sm:$0xff]  ;;  %v11920_v17 = vcombine.high %v2020_v9, %v2024_v8  ;;  %v2056_v58 = vld [vmem:[#allocation9 + $0x15a0] sm:$0xff] }
 0x296   :  { %v11921_v15 = vcombine.low %v2021_v12, %v2025_v41 }
 0x297   :  { %7741 = vmatpush1.bf16.msra.mxu0 %v11879_v23  ;;  %v11922_v23 = vcombine.high %v2021_v12, %v2025_v41  ;;  %v2061_v12 = vld [vmem:[#allocation9 + $0x15c8] sm:$0xff] }
 0x298   :  { %8069 = vmatpush1.bf16.msra.mxu1 %v11881_v47  ;;  %7742 = vmatprep.subr.bf16.mxu0 %v11888_v26  ;;  %v2029_v47 = vld [vmem:[#allocation9 + $0x14c8] sm:$0xff] }
 0x299   :  { %8070 = vmatprep.subr.bf16.mxu1 %v11890_v27  ;;  %v2033_v26 = vld [vmem:[#allocation9 + $0x14e8] sm:$0xff]  ;;  %v11919_v27 = vcombine.low %v2020_v9, %v2024_v8  ;;  %v2060_v8 = vld [vmem:[#allocation9 + $0x15c0] sm:$0xff] }
 0x29a   :  { %v11930_v30 = vcombine.high %v2029_v47, %v2033_v26  ;;  %v2065_v41 = vld [vmem:[#allocation9 + $0x15e8] sm:$0xff] }
 0x29b   :  { %7743 = vmatpush1.bf16.msra.mxu0 %v11887_v59  ;;  %v2040_v59 = vld [vmem:[#allocation9 + $0x1520] sm:$0xff] }
 0x29c   :  { %8071 = vmatpush1.bf16.msra.mxu1 %v11889_v35  ;;  %7744 = vmatprep.subr.bf16.mxu0 %v11896_v39  ;;  %v2041_v35 = vld [vmem:[#allocation9 + $0x1528] sm:$0xff]  ;;  %v11927_v39 = vcombine.low %v2028_v18, %v2032_v24  ;;  %v11936_v44 = vcombine.high %v2036_v32, %v2040_v59  ;;  %v2068_v18 = vld [vmem:[#allocation9 + $0x1600] sm:$0xff] }
 0x29d   :  { %8072 = vmatprep.subr.bf16.mxu1 %v11898_v43  ;;  %v11929_v43 = vcombine.low %v2029_v47, %v2033_v26  ;;  %v11938_v45 = vcombine.high %v2037_v33, %v2041_v35  ;;  %v2072_v24 = vld [vmem:[#allocation9 + $0x1620] sm:$0xff]  ;;  %v2069_v47 = vld [vmem:[#allocation9 + $0x1608] sm:$0xff] }
 0x29e   :  { %v2073_v26 = vld [vmem:[#allocation9 + $0x1628] sm:$0xff] }
 0x29f   :  { %7745 = vmatpush1.bf16.msra.mxu0 %v11895_v51  ;;  %v2045_v51 = vld [vmem:[#allocation9 + $0x1548] sm:$0xff] }
 0x2a0   :  { %8073 = vmatpush1.bf16.msra.mxu1 %v11897_v54  ;;  %7755 = vmatprep.subr.bf16.mxu0 %v11904_v55  ;;  %v11935_v54 = vcombine.low %v2036_v32, %v2040_v59  ;;  %v11937_v55 = vcombine.low %v2037_v33, %v2041_v35  ;;  %v11946_v11 = vcombine.high %v2045_v51, %v2049_v52  ;;  %v2076_v32 = vld [vmem:[#allocation9 + $0x1640] sm:$0xff]  ;;  %v2077_v33 = vld [vmem:[#allocation9 + $0x1648] sm:$0xff] }
 0x2a1   :  { %8083 = vmatprep.subr.bf16.mxu1 %v11906_v56  ;;  %v11944_v56 = vcombine.high %v2044_v13, %v2048_v0  ;;  %v2080_v59 = vld [vmem:[#allocation9 + $0x1660] sm:$0xff]  ;;  %v2081_v35 = vld [vmem:[#allocation9 + $0x1668] sm:$0xff] }
 0x2a2   :  { %7747 = vmatmul.mubr.bf16.vlgmr.msra.gmra.mrb[16].mxu0 %v13774_v3  ;;  %v2084_v13 = vld [vmem:[#allocation9 + $0x1680] sm:$0xff] }
 0x2a3   :  { %8075 = vmatmul.mubr.bf16.vlgmr.msra.gmra.mrb[16].mxu1 %v13774_v3  ;;  %7756 = vmatpush1.bf16.msra.mxu0 %v11903_v61  ;;  %v2053_v61 = vld [vmem:[#allocation9 + $0x1588] sm:$0xff]  ;;  %v2088_v0 = vld [vmem:[#allocation9 + $0x16a0] sm:$0xff] }
 0x2a4   :  { %7787 = vmatprep.mubr.bf16.mxu0 %v13776_v10  ;;  %8084 = vmatpush1.bf16.msra.mxu1 %v11905_v4  ;;  %v11945_v4 = vcombine.low %v2045_v51, %v2049_v52  ;;  %v11954_v9 = vcombine.high %v2053_v61, %v2057_v2  ;;  %v2085_v51 = vld [vmem:[#allocation9 + $0x1688] sm:$0xff] }
 0x2a5   :  { %8115 = vmatprep.mubr.bf16.mxu1 %v13776_v10  ;;  %7757 = vmatprep.subr.bf16.mxu0 %v11912_v7  ;;  %v11952_v7 = vcombine.high %v2052_v57, %v2056_v58  ;;  %v2089_v52 = vld [vmem:[#allocation9 + $0x16a8] sm:$0xff] }
 0x2a6   :  { %8085 = vmatprep.subr.bf16.mxu1 %v11914_v49  ;;  %v2064_v49 = vld [vmem:[#allocation9 + $0x15e0] sm:$0xff] }
 0x2a7   :  { %7758 = vmatpush1.bf16.msra.mxu0 %v11911_v14  ;;  %v11951_v14 = vcombine.low %v2052_v57, %v2056_v58  ;;  %v2092_v57 = vld [vmem:[#allocation9 + $0x16c0] sm:$0xff] }
 0x2a8   :  { %8086 = vmatpush1.bf16.msra.mxu1 %v11913_v1  ;;  %7759 = vmatprep.subr.bf16.mxu0 %v11920_v17  ;;  %v11953_v1 = vcombine.low %v2053_v61, %v2057_v2  ;;  %v11960_v17 = vcombine.high %v2060_v8, %v2064_v49  ;;  %v2096_v58 = vld [vmem:[#allocation9 + $0x16e0] sm:$0xff]  ;;  %v2093_v61 = vld [vmem:[#allocation9 + $0x16c8] sm:$0xff] }
 0x2a9   :  { %8087 = vmatprep.subr.bf16.mxu1 %v11922_v23  ;;  %v11962_v23 = vcombine.high %v2061_v12, %v2065_v41  ;;  %v2097_v2 = vld [vmem:[#allocation9 + $0x16e8] sm:$0xff] }
 0x2ab   :  { %7760 = vmatpush1.bf16.msra.mxu0 %v11919_v27  ;;  %v11959_v27 = vcombine.low %v2060_v8, %v2064_v49  ;;  %v2100_v8 = vld [vmem:[#allocation9 + $0x1700] sm:$0xff] }
 0x2ac   :  { %8088 = vmatpush1.bf16.msra.mxu1 %v11921_v15  ;;  %7761 = vmatprep.subr.bf16.mxu0 %v11928_v28  ;;  %v11961_v15 = vcombine.low %v2061_v12, %v2065_v41  ;;  %v11968_v28 = vcombine.high %v2068_v18, %v2072_v24  ;;  %v2104_v49 = vld [vmem:[#allocation9 + $0x1720] sm:$0xff]  ;;  %v2101_v12 = vld [vmem:[#allocation9 + $0x1708] sm:$0xff] }
 0x2ad   :  { %8089 = vmatprep.subr.bf16.mxu1 %v11930_v30  ;;  %v11970_v30 = vcombine.high %v2069_v47, %v2073_v26  ;;  %v2105_v41 = vld [vmem:[#allocation9 + $0x1728] sm:$0xff] }
 0x2af   :  { %7762 = vmatpush1.bf16.msra.mxu0 %v11927_v39  ;;  %v11967_v39 = vcombine.low %v2068_v18, %v2072_v24  ;;  %v2108_v18 = vld [vmem:[#allocation9 + $0x1740] sm:$0xff] }
 0x2b0   :  { %8090 = vmatpush1.bf16.msra.mxu1 %v11929_v43  ;;  %7763 = vmatprep.subr.bf16.mxu0 %v11936_v44  ;;  %v11969_v43 = vcombine.low %v2069_v47, %v2073_v26  ;;  %v11976_v44 = vcombine.high %v2076_v32, %v2080_v59  ;;  %v2112_v24 = vld [vmem:[#allocation9 + $0x1760] sm:$0xff]  ;;  %v2109_v47 = vld [vmem:[#allocation9 + $0x1748] sm:$0xff] }
 0x2b1   :  { %8091 = vmatprep.subr.bf16.mxu1 %v11938_v45  ;;  %v11978_v45 = vcombine.high %v2077_v33, %v2081_v35  ;;  %v2113_v26 = vld [vmem:[#allocation9 + $0x1768] sm:$0xff] }
 0x2b3   :  { %7764 = vmatpush1.bf16.msra.mxu0 %v11935_v54  ;;  %v11975_v54 = vcombine.low %v2076_v32, %v2080_v59  ;;  %v2116_v32 = vld [vmem:[#allocation9 + $0x1780] sm:$0xff] }
 0x2b4   :  { %8092 = vmatpush1.bf16.msra.mxu1 %v11937_v55  ;;  %7765 = vmatprep.subr.bf16.mxu0 %v11944_v56  ;;  %v11977_v55 = vcombine.low %v2077_v33, %v2081_v35  ;;  %v11984_v56 = vcombine.high %v2084_v13, %v2088_v0  ;;  %v2120_v59 = vld [vmem:[#allocation9 + $0x17a0] sm:$0xff]  ;;  %v2117_v33 = vld [vmem:[#allocation9 + $0x1788] sm:$0xff] }
 0x2b5   :  { %8093 = vmatprep.subr.bf16.mxu1 %v11946_v11  ;;  %v11986_v11 = vcombine.high %v2085_v51, %v2089_v52  ;;  %v2121_v35 = vld [vmem:[#allocation9 + $0x17a8] sm:$0xff] }
 0x2b7   :  { %7766 = vmatpush1.bf16.msra.mxu0 %v11943_v20  ;;  %v11983_v20 = vcombine.low %v2084_v13, %v2088_v0  ;;  %v2124_v13 = vld [vmem:[#allocation9 + $0x17c0] sm:$0xff] }
 0x2b8   :  { %8094 = vmatpush1.bf16.msra.mxu1 %v11945_v4  ;;  %7767 = vmatprep.subr.bf16.mxu0 %v11952_v7  ;;  %v11985_v4 = vcombine.low %v2085_v51, %v2089_v52  ;;  %v11992_v7 = vcombine.high %v2092_v57, %v2096_v58  ;;  %v2128_v0 = vld [vmem:[#allocation9 + $0x17e0] sm:$0xff]  ;;  %v2125_v51 = vld [vmem:[#allocation9 + $0x17c8] sm:$0xff] }
 0x2b9   :  { %8095 = vmatprep.subr.bf16.mxu1 %v11954_v9  ;;  %v11994_v9 = vcombine.high %v2093_v61, %v2097_v2  ;;  %v2129_v52 = vld [vmem:[#allocation9 + $0x17e8] sm:$0xff] }
 0x2bb   :  { %7768 = vmatpush1.bf16.msra.mxu0 %v11951_v14  ;;  %v11991_v14 = vcombine.low %v2092_v57, %v2096_v58  ;;  %v2132_v57 = vld [vmem:[#allocation9 + $0x1800] sm:$0xff] }
 0x2bc   :  { %8096 = vmatpush1.bf16.msra.mxu1 %v11953_v1  ;;  %7769 = vmatprep.subr.bf16.mxu0 %v11960_v17  ;;  %v11993_v1 = vcombine.low %v2093_v61, %v2097_v2  ;;  %v12000_v17 = vcombine.high %v2100_v8, %v2104_v49  ;;  %v2136_v58 = vld [vmem:[#allocation9 + $0x1820] sm:$0xff]  ;;  %v2133_v61 = vld [vmem:[#allocation9 + $0x1808] sm:$0xff] }
 0x2bd   :  { %8097 = vmatprep.subr.bf16.mxu1 %v11962_v23  ;;  %v12002_v23 = vcombine.high %v2101_v12, %v2105_v41  ;;  %v2137_v2 = vld [vmem:[#allocation9 + $0x1828] sm:$0xff] }
 0x2bf   :  { %7770 = vmatpush1.bf16.msra.mxu0 %v11959_v27  ;;  %v11999_v27 = vcombine.low %v2100_v8, %v2104_v49  ;;  %v12034_v8 = vcombine.high %v2133_v61, %v2137_v2  ;;  %v1345_v49 = vmax.f32 %v13734_v6, 0.0 }
 0x2c0   :  { %8098 = vmatpush1.bf16.msra.mxu1 %v11961_v15  ;;  %7771 = vmatprep.subr.bf16.mxu0 %v11968_v28  ;;  %v12001_v15 = vcombine.low %v2101_v12, %v2105_v41  ;;  %v12008_v28 = vcombine.high %v2108_v18, %v2112_v24  ;;  %v2140_v12 = vld [vmem:[#allocation9 + $0x1840] sm:$0xff] }
 0x2c1   :  { %8099 = vmatprep.subr.bf16.mxu1 %v11970_v30  ;;  %v12010_v30 = vcombine.high %v2109_v47, %v2113_v26  ;;  %v2144_v41 = vld [vmem:[#allocation9 + $0x1860] sm:$0xff] }
 0x2c3   :  { %7772 = vmatpush1.bf16.msra.mxu0 %v11967_v39  ;;  %v12007_v39 = vcombine.low %v2108_v18, %v2112_v24  ;;  %v12033_v18 = vcombine.low %v2133_v61, %v2137_v2  ;;  %v2148_v24 = vld [vmem:[#allocation9 + $0x1880] sm:$0xff] }
 0x2c4   :  { %8100 = vmatpush1.bf16.msra.mxu1 %v11969_v43  ;;  %7773 = vmatprep.subr.bf16.mxu0 %v11976_v44  ;;  %v12009_v43 = vcombine.low %v2109_v47, %v2113_v26  ;;  %v12016_v44 = vcombine.high %v2116_v32, %v2120_v59  ;;  %v2152_v47 = vld [vmem:[#allocation9 + $0x18a0] sm:$0xff]  ;;  %v13786_v26 = vpack.c.bf16 %v1345_v49, %v1345_v49 }
 0x2c5   :  { %8101 = vmatprep.subr.bf16.mxu1 %v11978_v45  ;;  %v12018_v45 = vcombine.high %v2117_v33, %v2121_v35  ;;  %v2172_v61 = vld [vmem:[#allocation9 + $0x1940] sm:$0xff] }
 0x2c6   :  { %v2176_v2 = vld [vmem:[#allocation9 + $0x1960] sm:$0xff] }
 0x2c7   :  { %7774 = vmatpush1.bf16.msra.mxu0 %v11975_v54  ;;  %v12015_v54 = vcombine.low %v2116_v32, %v2120_v59  ;;  %v12048_v32 = vcombine.high %v2148_v24, %v2152_v47 }
 0x2c8   :  { %8102 = vmatpush1.bf16.msra.mxu1 %v11977_v55  ;;  %7775 = vmatprep.subr.bf16.mxu0 %v11984_v56  ;;  %v12017_v55 = vcombine.low %v2117_v33, %v2121_v35  ;;  %v12024_v56 = vcombine.high %v2124_v13, %v2128_v0  ;;  %v2156_v33 = vld [vmem:[#allocation9 + $0x18c0] sm:$0xff] }
 0x2c9   :  { %8103 = vmatprep.subr.bf16.mxu1 %v11986_v11  ;;  %v12026_v11 = vcombine.high %v2125_v51, %v2129_v52  ;;  %v2160_v35 = vld [vmem:[#allocation9 + $0x18e0] sm:$0xff] }
 0x2cb   :  { %7776 = vmatpush1.bf16.msra.mxu0 %v11983_v20  ;;  %v12023_v20 = vcombine.low %v2124_v13, %v2128_v0  ;;  %v12056_v13 = vcombine.high %v2156_v33, %v2160_v35 }
 0x2cc   :  { %8104 = vmatpush1.bf16.msra.mxu1 %v11985_v4  ;;  %7777 = vmatprep.subr.bf16.mxu0 %v11992_v7  ;;  %v1342_v4 = vmax.f32 %v13709_v40, 0.0  ;;  %v12025_v7 = vcombine.low %v2125_v51, %v2129_v52  ;;  %v12040_v40 = vcombine.high %v2140_v12, %v2144_v41  ;;  %v2164_v51 = vld [vmem:[#allocation9 + $0x1900] sm:$0xff] }
 0x2cd   :  { %8105 = vmatprep.subr.bf16.mxu1 %v11994_v9  ;;  %v12032_v9 = vcombine.high %v2132_v57, %v2136_v58  ;;  %v2168_v52 = vld [vmem:[#allocation9 + $0x1920] sm:$0xff] }
 0x2cf   :  { %7778 = vmatpush1.bf16.msra.mxu0 %v11991_v14  ;;  %v12031_v14 = vcombine.low %v2132_v57, %v2136_v58  ;;  %v12064_v57 = vcombine.high %v2164_v51, %v2168_v52 }
 0x2d0   :  { %8106 = vmatpush1.bf16.msra.mxu1 %v11993_v1  ;;  %7779 = vmatprep.subr.bf16.mxu0 %v12000_v17  ;;  %v2141_v1 = vld [vmem:[#allocation9 + $0x1848] sm:$0xff] }
 0x2d1   :  { %8107 = vmatprep.subr.bf16.mxu1 %v12002_v23  ;;  %v2145_v17 = vld [vmem:[#allocation9 + $0x1868] sm:$0xff]  ;;  %v13784_v23 = vpack.c.bf16 %v1342_v4, %v1342_v4 }
 0x2d2   :  { %v12042_v6 = vcombine.high %v2141_v1, %v2145_v17  ;;  %v2177_v4 = vld [vmem:[#allocation9 + $0x1968] sm:$0xff] }
 0x2d3   :  { %7780 = vmatpush1.bf16.msra.mxu0 %v11999_v27  ;;  %v2149_v27 = vld [vmem:[#allocation9 + $0x1888] sm:$0xff] }
 0x2d4   :  { %8108 = vmatpush1.bf16.msra.mxu1 %v12001_v15  ;;  %7781 = vmatprep.subr.bf16.mxu0 %v12008_v28  ;;  %v2153_v15 = vld [vmem:[#allocation9 + $0x18a8] sm:$0xff]  ;;  %v12039_v28 = vcombine.low %v2140_v12, %v2144_v41  ;;  %v2180_v12 = vld [vmem:[#allocation9 + $0x1980] sm:$0xff] }
 0x2d5   :  { %8109 = vmatprep.subr.bf16.mxu1 %v12010_v30  ;;  %v12041_v30 = vcombine.low %v2141_v1, %v2145_v17  ;;  %v12050_v59 = vcombine.high %v2149_v27, %v2153_v15  ;;  %v2184_v41 = vld [vmem:[#allocation9 + $0x19a0] sm:$0xff]  ;;  %v2185_v1 = vld [vmem:[#allocation9 + $0x19a8] sm:$0xff]  ;;  %v12071_v17 = vcombine.low %v2172_v61, %v2176_v2 }
 0x2d7   :  { %7782 = vmatpush1.bf16.msra.mxu0 %v12007_v39  ;;  %v2157_v39 = vld [vmem:[#allocation9 + $0x18c8] sm:$0xff] }
 0x2d8   :  { %8110 = vmatpush1.bf16.msra.mxu1 %v12009_v43  ;;  %7783 = vmatprep.subr.bf16.mxu0 %v12016_v44  ;;  %v2161_v43 = vld [vmem:[#allocation9 + $0x18e8] sm:$0xff]  ;;  %v12047_v44 = vcombine.low %v2148_v24, %v2152_v47  ;;  %v2188_v47 = vld [vmem:[#allocation9 + $0x19c0] sm:$0xff] }
 0x2d9   :  { %8111 = vmatprep.subr.bf16.mxu1 %v12018_v45  ;;  %v12049_v45 = vcombine.low %v2149_v27, %v2153_v15  ;;  %v12058_v0 = vcombine.high %v2157_v39, %v2161_v43  ;;  %v2189_v27 = vld [vmem:[#allocation9 + $0x19c8] sm:$0xff] }
 0x2da   :  { %v2193_v15 = vld [vmem:[#allocation9 + $0x19e8] sm:$0xff] }
 0x2db   :  { %7784 = vmatpush1.bf16.msra.mxu0 %v12015_v54  ;;  %v2165_v54 = vld [vmem:[#allocation9 + $0x1908] sm:$0xff] }
 0x2dc   :  { %8112 = vmatpush1.bf16.msra.mxu1 %v12017_v55  ;;  %7785 = vmatprep.subr.bf16.mxu0 %v12024_v56  ;;  %v2169_v55 = vld [vmem:[#allocation9 + $0x1928] sm:$0xff]  ;;  %v12055_v56 = vcombine.low %v2156_v33, %v2160_v35  ;;  %v2196_v33 = vld [vmem:[#allocation9 + $0x1a00] sm:$0xff] }
 0x2dd   :  { %8113 = vmatprep.subr.bf16.mxu1 %v12026_v11  ;;  %v12057_v11 = vcombine.low %v2157_v39, %v2161_v43  ;;  %v12066_v58 = vcombine.high %v2165_v54, %v2169_v55  ;;  %v2200_v35 = vld [vmem:[#allocation9 + $0x1a20] sm:$0xff]  ;;  %v2197_v39 = vld [vmem:[#allocation9 + $0x1a08] sm:$0xff] }
 0x2de   :  { %v2201_v43 = vld [vmem:[#allocation9 + $0x1a28] sm:$0xff] }
 0x2df   :  { %7786 = vmatpush1.bf16.msra.mxu0 %v12023_v20  ;;  %v2173_v20 = vld [vmem:[#allocation9 + $0x1948] sm:$0xff] }
 0x2e0   :  { %8114 = vmatpush1.bf16.msra.mxu1 %v12025_v7  ;;  %7796 = vmatprep.subr.bf16.mxu0 %v12032_v9  ;;  %v12063_v7 = vcombine.low %v2164_v51, %v2168_v52  ;;  %v12065_v9 = vcombine.low %v2165_v54, %v2169_v55  ;;  %v12074_v49 = vcombine.high %v2173_v20, %v2177_v4  ;;  %v2204_v51 = vld [vmem:[#allocation9 + $0x1a40] sm:$0xff]  ;;  %v2205_v54 = vld [vmem:[#allocation9 + $0x1a48] sm:$0xff] }
 0x2e1   :  { %8124 = vmatprep.subr.bf16.mxu1 %v12034_v8  ;;  %v12072_v8 = vcombine.high %v2172_v61, %v2176_v2  ;;  %v2208_v52 = vld [vmem:[#allocation9 + $0x1a60] sm:$0xff]  ;;  %v2209_v55 = vld [vmem:[#allocation9 + $0x1a68] sm:$0xff] }
 0x2e2   :  { %7788 = vmatmul.mubr.bf16.vlgmr.msra.gmra.mrb[16].mxu0 %v13784_v23  ;;  %v2212_v61 = vld [vmem:[#allocation9 + $0x1a80] sm:$0xff] }
 0x2e3   :  { %8116 = vmatmul.mubr.bf16.vlgmr.msra.gmra.mrb[16].mxu1 %v13784_v23  ;;  %7797 = vmatpush1.bf16.msra.mxu0 %v12031_v14  ;;  %v2181_v14 = vld [vmem:[#allocation9 + $0x1988] sm:$0xff]  ;;  %v2216_v2 = vld [vmem:[#allocation9 + $0x1aa0] sm:$0xff] }
 0x2e4   :  { %7828 = vmatprep.mubr.bf16.mxu0 %v13786_v26  ;;  %8125 = vmatpush1.bf16.msra.mxu1 %v12033_v18  ;;  %v12073_v18 = vcombine.low %v2173_v20, %v2177_v4  ;;  %v12082_v24 = vcombine.high %v2181_v14, %v2185_v1  ;;  %v2213_v20 = vld [vmem:[#allocation9 + $0x1a88] sm:$0xff] }
 0x2e5   :  { %8156 = vmatprep.mubr.bf16.mxu1 %v13786_v26  ;;  %7798 = vmatprep.subr.bf16.mxu0 %v12040_v40  ;;  %v12080_v40 = vcombine.high %v2180_v12, %v2184_v41  ;;  %v2217_v4 = vld [vmem:[#allocation9 + $0x1aa8] sm:$0xff] }
 0x2e6   :  { %8126 = vmatprep.subr.bf16.mxu1 %v12042_v6  ;;  %v2192_v6 = vld [vmem:[#allocation9 + $0x19e0] sm:$0xff] }
 0x2e7   :  { %7799 = vmatpush1.bf16.msra.mxu0 %v12039_v28  ;;  %v12079_v28 = vcombine.low %v2180_v12, %v2184_v41  ;;  %v2220_v12 = vld [vmem:[#allocation9 + $0x1ac0] sm:$0xff] }
 0x2e8   :  { %8127 = vmatpush1.bf16.msra.mxu1 %v12041_v30  ;;  %7800 = vmatprep.subr.bf16.mxu0 %v12048_v32  ;;  %v12081_v30 = vcombine.low %v2181_v14, %v2185_v1  ;;  %v12088_v32 = vcombine.high %v2188_v47, %v2192_v6  ;;  %v2224_v41 = vld [vmem:[#allocation9 + $0x1ae0] sm:$0xff]  ;;  %v2221_v14 = vld [vmem:[#allocation9 + $0x1ac8] sm:$0xff] }
 0x2e9   :  { %8128 = vmatprep.subr.bf16.mxu1 %v12050_v59  ;;  %v12090_v59 = vcombine.high %v2189_v27, %v2193_v15  ;;  %v2225_v1 = vld [vmem:[#allocation9 + $0x1ae8] sm:$0xff] }
 0x2eb   :  { %7801 = vmatpush1.bf16.msra.mxu0 %v12047_v44  ;;  %v12087_v44 = vcombine.low %v2188_v47, %v2192_v6  ;;  %v2228_v47 = vld [vmem:[#allocation9 + $0x1b00] sm:$0xff] }
 0x2ec   :  { %8129 = vmatpush1.bf16.msra.mxu1 %v12049_v45  ;;  %7802 = vmatprep.subr.bf16.mxu0 %v12056_v13  ;;  %v12089_v45 = vcombine.low %v2189_v27, %v2193_v15  ;;  %v12096_v13 = vcombine.high %v2196_v33, %v2200_v35  ;;  %v2232_v6 = vld [vmem:[#allocation9 + $0x1b20] sm:$0xff]  ;;  %v2229_v27 = vld [vmem:[#allocation9 + $0x1b08] sm:$0xff] }
 0x2ed   :  { %8130 = vmatprep.subr.bf16.mxu1 %v12058_v0  ;;  %v12098_v0 = vcombine.high %v2197_v39, %v2201_v43  ;;  %v2233_v15 = vld [vmem:[#allocation9 + $0x1b28] sm:$0xff] }
 0x2ef   :  { %7803 = vmatpush1.bf16.msra.mxu0 %v12055_v56  ;;  %v12095_v56 = vcombine.low %v2196_v33, %v2200_v35  ;;  %v2236_v33 = vld [vmem:[#allocation9 + $0x1b40] sm:$0xff] }
 0x2f0   :  { %8131 = vmatpush1.bf16.msra.mxu1 %v12057_v11  ;;  %7804 = vmatprep.subr.bf16.mxu0 %v12064_v57  ;;  %v12097_v11 = vcombine.low %v2197_v39, %v2201_v43  ;;  %v12104_v57 = vcombine.high %v2204_v51, %v2208_v52  ;;  %v2240_v35 = vld [vmem:[#allocation9 + $0x1b60] sm:$0xff]  ;;  %v2237_v39 = vld [vmem:[#allocation9 + $0x1b48] sm:$0xff] }
 0x2f1   :  { %8132 = vmatprep.subr.bf16.mxu1 %v12066_v58  ;;  %v12106_v58 = vcombine.high %v2205_v54, %v2209_v55  ;;  %v2241_v43 = vld [vmem:[#allocation9 + $0x1b68] sm:$0xff] }
 0x2f3   :  { %7805 = vmatpush1.bf16.msra.mxu0 %v12063_v7  ;;  %v12103_v7 = vcombine.low %v2204_v51, %v2208_v52  ;;  %v2244_v51 = vld [vmem:[#allocation9 + $0x1b80] sm:$0xff] }
 0x2f4   :  { %8133 = vmatpush1.bf16.msra.mxu1 %v12065_v9  ;;  %7806 = vmatprep.subr.bf16.mxu0 %v12072_v8  ;;  %v12105_v9 = vcombine.low %v2205_v54, %v2209_v55  ;;  %v12112_v8 = vcombine.high %v2212_v61, %v2216_v2  ;;  %v2248_v52 = vld [vmem:[#allocation9 + $0x1ba0] sm:$0xff]  ;;  %v2245_v54 = vld [vmem:[#allocation9 + $0x1b88] sm:$0xff] }
 0x2f5   :  { %8134 = vmatprep.subr.bf16.mxu1 %v12074_v49  ;;  %v12114_v49 = vcombine.high %v2213_v20, %v2217_v4  ;;  %v2249_v55 = vld [vmem:[#allocation9 + $0x1ba8] sm:$0xff] }
 0x2f7   :  { %7807 = vmatpush1.bf16.msra.mxu0 %v12071_v17  ;;  %v12111_v17 = vcombine.low %v2212_v61, %v2216_v2  ;;  %v2252_v61 = vld [vmem:[#allocation9 + $0x1bc0] sm:$0xff] }
 0x2f8   :  { %8135 = vmatpush1.bf16.msra.mxu1 %v12073_v18  ;;  %7808 = vmatprep.subr.bf16.mxu0 %v12080_v40  ;;  %v12113_v18 = vcombine.low %v2213_v20, %v2217_v4  ;;  %v12120_v40 = vcombine.high %v2220_v12, %v2224_v41  ;;  %v2256_v2 = vld [vmem:[#allocation9 + $0x1be0] sm:$0xff]  ;;  %v2253_v20 = vld [vmem:[#allocation9 + $0x1bc8] sm:$0xff] }
 0x2f9   :  { %8136 = vmatprep.subr.bf16.mxu1 %v12082_v24  ;;  %v12122_v24 = vcombine.high %v2221_v14, %v2225_v1  ;;  %v2257_v4 = vld [vmem:[#allocation9 + $0x1be8] sm:$0xff] }
 0x2fb   :  { %7809 = vmatpush1.bf16.msra.mxu0 %v12079_v28  ;;  %v12119_v28 = vcombine.low %v2220_v12, %v2224_v41  ;;  %v2260_v12 = vld [vmem:[#allocation9 + $0x1c00] sm:$0xff] }
 0x2fc   :  { %8137 = vmatpush1.bf16.msra.mxu1 %v12081_v30  ;;  %7810 = vmatprep.subr.bf16.mxu0 %v12088_v32  ;;  %v12121_v30 = vcombine.low %v2221_v14, %v2225_v1  ;;  %v12128_v32 = vcombine.high %v2228_v47, %v2232_v6  ;;  %v2264_v41 = vld [vmem:[#allocation9 + $0x1c20] sm:$0xff]  ;;  %v2261_v14 = vld [vmem:[#allocation9 + $0x1c08] sm:$0xff] }
 0x2fd   :  { %8138 = vmatprep.subr.bf16.mxu1 %v12090_v59  ;;  %v12130_v59 = vcombine.high %v2229_v27, %v2233_v15  ;;  %v2265_v1 = vld [vmem:[#allocation9 + $0x1c28] sm:$0xff] }
 0x2ff   :  { %7811 = vmatpush1.bf16.msra.mxu0 %v12087_v44  ;;  %v12127_v44 = vcombine.low %v2228_v47, %v2232_v6  ;;  %v12162_v47 = vcombine.high %v2261_v14, %v2265_v1  ;;  %v1347_v6 = vmax.f32 %v13742_v36, 0.0 }
 0x300   :  { %8139 = vmatpush1.bf16.msra.mxu1 %v12089_v45  ;;  %7812 = vmatprep.subr.bf16.mxu0 %v12096_v13  ;;  %v12129_v45 = vcombine.low %v2229_v27, %v2233_v15  ;;  %v12136_v13 = vcombine.high %v2236_v33, %v2240_v35  ;;  %v2268_v27 = vld [vmem:[#allocation9 + $0x1c40] sm:$0xff] }
 0x301   :  { %8140 = vmatprep.subr.bf16.mxu1 %v12098_v0  ;;  %v12138_v0 = vcombine.high %v2237_v39, %v2241_v43  ;;  %v2272_v15 = vld [vmem:[#allocation9 + $0x1c60] sm:$0xff] }
 0x303   :  { %7813 = vmatpush1.bf16.msra.mxu0 %v12095_v56  ;;  %v12135_v56 = vcombine.low %v2236_v33, %v2240_v35  ;;  %v12161_v33 = vcombine.low %v2261_v14, %v2265_v1  ;;  %v2276_v35 = vld [vmem:[#allocation9 + $0x1c80] sm:$0xff] }
 0x304   :  { %8141 = vmatpush1.bf16.msra.mxu1 %v12097_v11  ;;  %7814 = vmatprep.subr.bf16.mxu0 %v12104_v57  ;;  %v12137_v11 = vcombine.low %v2237_v39, %v2241_v43  ;;  %v12144_v57 = vcombine.high %v2244_v51, %v2248_v52  ;;  %v2280_v39 = vld [vmem:[#allocation9 + $0x1ca0] sm:$0xff]  ;;  %v13796_v43 = vpack.c.bf16 %v1347_v6, %v1347_v6 }
 0x305   :  { %8142 = vmatprep.subr.bf16.mxu1 %v12106_v58  ;;  %v12146_v58 = vcombine.high %v2245_v54, %v2249_v55  ;;  %v2300_v14 = vld [vmem:[#allocation9 + $0x1d40] sm:$0xff] }
 0x306   :  { %v2304_v1 = vld [vmem:[#allocation9 + $0x1d60] sm:$0xff] }
 0x307   :  { %7815 = vmatpush1.bf16.msra.mxu0 %v12103_v7  ;;  %v12143_v7 = vcombine.low %v2244_v51, %v2248_v52  ;;  %v12176_v51 = vcombine.high %v2276_v35, %v2280_v39 }
 0x308   :  { %8143 = vmatpush1.bf16.msra.mxu1 %v12105_v9  ;;  %7816 = vmatprep.subr.bf16.mxu0 %v12112_v8  ;;  %v12145_v9 = vcombine.low %v2245_v54, %v2249_v55  ;;  %v12152_v8 = vcombine.high %v2252_v61, %v2256_v2  ;;  %v2284_v54 = vld [vmem:[#allocation9 + $0x1cc0] sm:$0xff] }
 0x309   :  { %8144 = vmatprep.subr.bf16.mxu1 %v12114_v49  ;;  %v12154_v49 = vcombine.high %v2253_v20, %v2257_v4  ;;  %v2288_v55 = vld [vmem:[#allocation9 + $0x1ce0] sm:$0xff] }
 0x30b   :  { %7817 = vmatpush1.bf16.msra.mxu0 %v12111_v17  ;;  %v12151_v17 = vcombine.low %v2252_v61, %v2256_v2  ;;  %v12184_v61 = vcombine.high %v2284_v54, %v2288_v55 }
 0x30c   :  { %8145 = vmatpush1.bf16.msra.mxu1 %v12113_v18  ;;  %7818 = vmatprep.subr.bf16.mxu0 %v12120_v40  ;;  %v1344_v18 = vmax.f32 %v13729_v63, 0.0  ;;  %v12153_v40 = vcombine.low %v2253_v20, %v2257_v4  ;;  %v12168_v63 = vcombine.high %v2268_v27, %v2272_v15  ;;  %v2292_v20 = vld [vmem:[#allocation9 + $0x1d00] sm:$0xff] }
 0x30d   :  { %8146 = vmatprep.subr.bf16.mxu1 %v12122_v24  ;;  %v12160_v24 = vcombine.high %v2260_v12, %v2264_v41  ;;  %v2296_v4 = vld [vmem:[#allocation9 + $0x1d20] sm:$0xff] }
 0x30f   :  { %7819 = vmatpush1.bf16.msra.mxu0 %v12119_v28  ;;  %v12159_v28 = vcombine.low %v2260_v12, %v2264_v41  ;;  %v12192_v12 = vcombine.high %v2292_v20, %v2296_v4 }
 0x310   :  { %8147 = vmatpush1.bf16.msra.mxu1 %v12121_v30  ;;  %7820 = vmatprep.subr.bf16.mxu0 %v12128_v32  ;;  %v2269_v30 = vld [vmem:[#allocation9 + $0x1c48] sm:$0xff] }
 0x311   :  { %8148 = vmatprep.subr.bf16.mxu1 %v12130_v59  ;;  %v2273_v32 = vld [vmem:[#allocation9 + $0x1c68] sm:$0xff]  ;;  %v13794_v59 = vpack.c.bf16 %v1344_v18, %v1344_v18 }
 0x312   :  { %v12170_v36 = vcombine.high %v2269_v30, %v2273_v32  ;;  %v2305_v18 = vld [vmem:[#allocation9 + $0x1d68] sm:$0xff] }
 0x313   :  { %7821 = vmatpush1.bf16.msra.mxu0 %v12127_v44  ;;  %v2277_v44 = vld [vmem:[#allocation9 + $0x1c88] sm:$0xff] }
 0x314   :  { %8149 = vmatpush1.bf16.msra.mxu1 %v12129_v45  ;;  %7822 = vmatprep.subr.bf16.mxu0 %v12136_v13  ;;  %v2281_v45 = vld [vmem:[#allocation9 + $0x1ca8] sm:$0xff]  ;;  %v12167_v13 = vcombine.low %v2268_v27, %v2272_v15  ;;  %v2308_v27 = vld [vmem:[#allocation9 + $0x1d80] sm:$0xff] }
 0x315   :  { %8150 = vmatprep.subr.bf16.mxu1 %v12138_v0  ;;  %v12169_v0 = vcombine.low %v2269_v30, %v2273_v32  ;;  %v12178_v52 = vcombine.high %v2277_v44, %v2281_v45  ;;  %v2312_v15 = vld [vmem:[#allocation9 + $0x1da0] sm:$0xff]  ;;  %v2313_v30 = vld [vmem:[#allocation9 + $0x1da8] sm:$0xff]  ;;  %v12199_v32 = vcombine.low %v2300_v14, %v2304_v1 }
 0x317   :  { %7823 = vmatpush1.bf16.msra.mxu0 %v12135_v56  ;;  %v2285_v56 = vld [vmem:[#allocation9 + $0x1cc8] sm:$0xff] }
 0x318   :  { %8151 = vmatpush1.bf16.msra.mxu1 %v12137_v11  ;;  %7824 = vmatprep.subr.bf16.mxu0 %v12144_v57  ;;  %v2289_v11 = vld [vmem:[#allocation9 + $0x1ce8] sm:$0xff]  ;;  %v12175_v57 = vcombine.low %v2276_v35, %v2280_v39  ;;  %v2316_v39 = vld [vmem:[#allocation9 + $0x1dc0] sm:$0xff] }
 0x319   :  { %8152 = vmatprep.subr.bf16.mxu1 %v12146_v58  ;;  %v12177_v58 = vcombine.low %v2277_v44, %v2281_v45  ;;  %v12186_v2 = vcombine.high %v2285_v56, %v2289_v11  ;;  %v2317_v44 = vld [vmem:[#allocation9 + $0x1dc8] sm:$0xff] }
 0x31a   :  { %v2321_v45 = vld [vmem:[#allocation9 + $0x1de8] sm:$0xff] }
 0x31b   :  { %7825 = vmatpush1.bf16.msra.mxu0 %v12143_v7  ;;  %v2293_v7 = vld [vmem:[#allocation9 + $0x1d08] sm:$0xff] }
 0x31c   :  { %8153 = vmatpush1.bf16.msra.mxu1 %v12145_v9  ;;  %7826 = vmatprep.subr.bf16.mxu0 %v12152_v8  ;;  %v2297_v9 = vld [vmem:[#allocation9 + $0x1d28] sm:$0xff]  ;;  %v12183_v8 = vcombine.low %v2284_v54, %v2288_v55  ;;  %v2324_v54 = vld [vmem:[#allocation9 + $0x1e00] sm:$0xff] }
 0x31d   :  { %8154 = vmatprep.subr.bf16.mxu1 %v12154_v49  ;;  %v12185_v49 = vcombine.low %v2285_v56, %v2289_v11  ;;  %v12194_v41 = vcombine.high %v2293_v7, %v2297_v9  ;;  %v2328_v55 = vld [vmem:[#allocation9 + $0x1e20] sm:$0xff]  ;;  %v2325_v56 = vld [vmem:[#allocation9 + $0x1e08] sm:$0xff] }
 0x31e   :  { %v2329_v11 = vld [vmem:[#allocation9 + $0x1e28] sm:$0xff] }
 0x31f   :  { %7827 = vmatpush1.bf16.msra.mxu0 %v12151_v17  ;;  %v2301_v17 = vld [vmem:[#allocation9 + $0x1d48] sm:$0xff] }
 0x320   :  { %8155 = vmatpush1.bf16.msra.mxu1 %v12153_v40  ;;  %7837 = vmatprep.subr.bf16.mxu0 %v12160_v24  ;;  %v12191_v40 = vcombine.low %v2292_v20, %v2296_v4  ;;  %v12193_v24 = vcombine.low %v2293_v7, %v2297_v9  ;;  %v12202_v6 = vcombine.high %v2301_v17, %v2305_v18  ;;  %v2332_v20 = vld [vmem:[#allocation9 + $0x1e40] sm:$0xff]  ;;  %v2333_v7 = vld [vmem:[#allocation9 + $0x1e48] sm:$0xff] }
 0x321   :  { %8165 = vmatprep.subr.bf16.mxu1 %v12162_v47  ;;  %v12200_v47 = vcombine.high %v2300_v14, %v2304_v1  ;;  %v2336_v4 = vld [vmem:[#allocation9 + $0x1e60] sm:$0xff]  ;;  %v2337_v9 = vld [vmem:[#allocation9 + $0x1e68] sm:$0xff] }
 0x322   :  { %7829 = vmatmul.mubr.bf16.vlgmr.msra.gmra.mrb[16].mxu0 %v13794_v59  ;;  %v2340_v14 = vld [vmem:[#allocation9 + $0x1e80] sm:$0xff] }
 0x323   :  { %8157 = vmatmul.mubr.bf16.vlgmr.msra.gmra.mrb[16].mxu1 %v13794_v59  ;;  %7838 = vmatpush1.bf16.msra.mxu0 %v12159_v28  ;;  %v2309_v28 = vld [vmem:[#allocation9 + $0x1d88] sm:$0xff]  ;;  %v2344_v1 = vld [vmem:[#allocation9 + $0x1ea0] sm:$0xff] }
 0x324   :  { %7869 = vmatprep.mubr.bf16.mxu0 %v13796_v43  ;;  %8166 = vmatpush1.bf16.msra.mxu1 %v12161_v33  ;;  %v12201_v33 = vcombine.low %v2301_v17, %v2305_v18  ;;  %v12210_v35 = vcombine.high %v2309_v28, %v2313_v30  ;;  %v2341_v17 = vld [vmem:[#allocation9 + $0x1e88] sm:$0xff] }
 0x325   :  { %8197 = vmatprep.mubr.bf16.mxu1 %v13796_v43  ;;  %7839 = vmatprep.subr.bf16.mxu0 %v12168_v63  ;;  %v12208_v63 = vcombine.high %v2308_v27, %v2312_v15  ;;  %v2345_v18 = vld [vmem:[#allocation9 + $0x1ea8] sm:$0xff] }
 0x326   :  { %8167 = vmatprep.subr.bf16.mxu1 %v12170_v36  ;;  %v2320_v36 = vld [vmem:[#allocation9 + $0x1de0] sm:$0xff] }
 0x327   :  { %7840 = vmatpush1.bf16.msra.mxu0 %v12167_v13  ;;  %v12207_v13 = vcombine.low %v2308_v27, %v2312_v15  ;;  %v2348_v27 = vld [vmem:[#allocation9 + $0x1ec0] sm:$0xff] }
 0x328   :  { %8168 = vmatpush1.bf16.msra.mxu1 %v12169_v0  ;;  %7841 = vmatprep.subr.bf16.mxu0 %v12176_v51  ;;  %v12209_v0 = vcombine.low %v2309_v28, %v2313_v30  ;;  %v12216_v51 = vcombine.high %v2316_v39, %v2320_v36  ;;  %v2352_v15 = vld [vmem:[#allocation9 + $0x1ee0] sm:$0xff]  ;;  %v2349_v28 = vld [vmem:[#allocation9 + $0x1ec8] sm:$0xff] }
 0x329   :  { %8169 = vmatprep.subr.bf16.mxu1 %v12178_v52  ;;  %v12218_v52 = vcombine.high %v2317_v44, %v2321_v45  ;;  %v2353_v30 = vld [vmem:[#allocation9 + $0x1ee8] sm:$0xff] }
 0x32b   :  { %7842 = vmatpush1.bf16.msra.mxu0 %v12175_v57  ;;  %v12215_v57 = vcombine.low %v2316_v39, %v2320_v36  ;;  %v2356_v39 = vld [vmem:[#allocation9 + $0x1f00] sm:$0xff] }
 0x32c   :  { %8170 = vmatpush1.bf16.msra.mxu1 %v12177_v58  ;;  %7843 = vmatprep.subr.bf16.mxu0 %v12184_v61  ;;  %v12217_v58 = vcombine.low %v2317_v44, %v2321_v45  ;;  %v12224_v61 = vcombine.high %v2324_v54, %v2328_v55  ;;  %v2360_v36 = vld [vmem:[#allocation9 + $0x1f20] sm:$0xff]  ;;  %v2357_v44 = vld [vmem:[#allocation9 + $0x1f08] sm:$0xff] }
 0x32d   :  { %8171 = vmatprep.subr.bf16.mxu1 %v12186_v2  ;;  %v12226_v2 = vcombine.high %v2325_v56, %v2329_v11  ;;  %v2361_v45 = vld [vmem:[#allocation9 + $0x1f28] sm:$0xff] }
 0x32f   :  { %7844 = vmatpush1.bf16.msra.mxu0 %v12183_v8  ;;  %v12223_v8 = vcombine.low %v2324_v54, %v2328_v55  ;;  %v2364_v54 = vld [vmem:[#allocation9 + $0x1f40] sm:$0xff] }
 0x330   :  { %8172 = vmatpush1.bf16.msra.mxu1 %v12185_v49  ;;  %7845 = vmatprep.subr.bf16.mxu0 %v12192_v12  ;;  %v12225_v49 = vcombine.low %v2325_v56, %v2329_v11  ;;  %v12232_v12 = vcombine.high %v2332_v20, %v2336_v4  ;;  %v2368_v55 = vld [vmem:[#allocation9 + $0x1f60] sm:$0xff]  ;;  %v2365_v56 = vld [vmem:[#allocation9 + $0x1f48] sm:$0xff] }
 0x331   :  { %8173 = vmatprep.subr.bf16.mxu1 %v12194_v41  ;;  %v12234_v41 = vcombine.high %v2333_v7, %v2337_v9  ;;  %v2369_v11 = vld [vmem:[#allocation9 + $0x1f68] sm:$0xff] }
 0x333   :  { %7846 = vmatpush1.bf16.msra.mxu0 %v12191_v40  ;;  %v12231_v40 = vcombine.low %v2332_v20, %v2336_v4  ;;  %v2372_v20 = vld [vmem:[#allocation9 + $0x1f80] sm:$0xff] }
 0x334   :  { %8174 = vmatpush1.bf16.msra.mxu1 %v12193_v24  ;;  %7847 = vmatprep.subr.bf16.mxu0 %v12200_v47  ;;  %v12233_v24 = vcombine.low %v2333_v7, %v2337_v9  ;;  %v12240_v47 = vcombine.high %v2340_v14, %v2344_v1  ;;  %v2376_v4 = vld [vmem:[#allocation9 + $0x1fa0] sm:$0xff]  ;;  %v2373_v7 = vld [vmem:[#allocation9 + $0x1f88] sm:$0xff] }
 0x335   :  { %8175 = vmatprep.subr.bf16.mxu1 %v12202_v6  ;;  %v12242_v6 = vcombine.high %v2341_v17, %v2345_v18  ;;  %v2377_v9 = vld [vmem:[#allocation9 + $0x1fa8] sm:$0xff] }
 0x337   :  { %7848 = vmatpush1.bf16.msra.mxu0 %v12199_v32  ;;  %v12239_v32 = vcombine.low %v2340_v14, %v2344_v1  ;;  %v2380_v14 = vld [vmem:[#allocation9 + $0x1fc0] sm:$0xff] }
 0x338   :  { %8176 = vmatpush1.bf16.msra.mxu1 %v12201_v33  ;;  %7849 = vmatprep.subr.bf16.mxu0 %v12208_v63  ;;  %v12241_v33 = vcombine.low %v2341_v17, %v2345_v18  ;;  %v12248_v63 = vcombine.high %v2348_v27, %v2352_v15  ;;  %v2384_v1 = vld [vmem:[#allocation9 + $0x1fe0] sm:$0xff]  ;;  %v2381_v17 = vld [vmem:[#allocation9 + $0x1fc8] sm:$0xff] }
 0x339   :  { %8177 = vmatprep.subr.bf16.mxu1 %v12210_v35  ;;  %v12250_v35 = vcombine.high %v2349_v28, %v2353_v30  ;;  %v2385_v18 = vld [vmem:[#allocation9 + $0x1fe8] sm:$0xff] }
 0x33b   :  { %7850 = vmatpush1.bf16.msra.mxu0 %v12207_v13  ;;  %v12247_v13 = vcombine.low %v2348_v27, %v2352_v15  ;;  %v1366_v27 = vld [vmem:[#allocation9 + $0x10] sm:$0xff] }
 0x33c   :  { %8178 = vmatpush1.bf16.msra.mxu1 %v12209_v0  ;;  %7851 = vmatprep.subr.bf16.mxu0 %v12216_v51  ;;  %v12249_v0 = vcombine.low %v2349_v28, %v2353_v30  ;;  %v12256_v51 = vcombine.high %v2356_v39, %v2360_v36  ;;  %v1370_v15 = vld [vmem:[#allocation9 + $0x30] sm:$0xff]  ;;  %v1367_v28 = vld [vmem:[#allocation9 + $0x18] sm:$0xff] }
 0x33d   :  { %8179 = vmatprep.subr.bf16.mxu1 %v12218_v52  ;;  %v12258_v52 = vcombine.high %v2357_v44, %v2361_v45  ;;  %v1371_v30 = vld [vmem:[#allocation9 + $0x38] sm:$0xff] }
 0x33f   :  { %7852 = vmatpush1.bf16.msra.mxu0 %v12215_v57  ;;  %v12255_v57 = vcombine.low %v2356_v39, %v2360_v36  ;;  %v11270_v39 = vcombine.high %v1367_v28, %v1371_v30  ;;  %v1374_v36 = vld [vmem:[#allocation9 + $0x50] sm:$0xff] }
 0x340   :  { %8180 = vmatpush1.bf16.msra.mxu1 %v12217_v58  ;;  %7853 = vmatprep.subr.bf16.mxu0 %v12224_v61  ;;  %v12257_v58 = vcombine.low %v2357_v44, %v2361_v45  ;;  %v12264_v61 = vcombine.high %v2364_v54, %v2368_v55  ;;  %v1378_v44 = vld [vmem:[#allocation9 + $0x70] sm:$0xff]  ;;  %v11267_v45 = vcombine.low %v1366_v27, %v1370_v15 }
 0x341   :  { %8181 = vmatprep.subr.bf16.mxu1 %v12226_v2  ;;  %v12266_v2 = vcombine.high %v2365_v56, %v2369_v11 }
 0x343   :  { %7854 = vmatpush1.bf16.msra.mxu0 %v12223_v8  ;;  %v12263_v8 = vcombine.low %v2364_v54, %v2368_v55  ;;  %v11276_v54 = vcombine.high %v1374_v36, %v1378_v44  ;;  %v1386_v55 = vld [vmem:[#allocation9 + $0xb0] sm:$0xff] }
 0x344   :  { %8182 = vmatpush1.bf16.msra.mxu1 %v12225_v49  ;;  %7855 = vmatprep.subr.bf16.mxu0 %v12232_v12  ;;  %v12265_v49 = vcombine.low %v2365_v56, %v2369_v11  ;;  %v12272_v12 = vcombine.high %v2372_v20, %v2376_v4  ;;  %v1383_v11 = vld [vmem:[#allocation9 + $0x98] sm:$0xff] }
 0x345   :  { %8183 = vmatprep.subr.bf16.mxu1 %v12234_v41  ;;  %v12274_v41 = vcombine.high %v2373_v7, %v2377_v9 }
 0x347   :  { %7856 = vmatpush1.bf16.msra.mxu0 %v12231_v40  ;;  %v12271_v40 = vcombine.low %v2372_v20, %v2376_v4  ;;  %v1390_v4 = vld [vmem:[#allocation9 + $0xd0] sm:$0xff] }
 0x348   :  { %8184 = vmatpush1.bf16.msra.mxu1 %v12233_v24  ;;  %7857 = vmatprep.subr.bf16.mxu0 %v12240_v47  ;;  %v12273_v24 = vcombine.low %v2373_v7, %v2377_v9  ;;  %v12280_v47 = vcombine.high %v2380_v14, %v2384_v1  ;;  %v1394_v7 = vld [vmem:[#allocation9 + $0xf0] sm:$0xff]  ;;  %v1391_v9 = vld [vmem:[#allocation9 + $0xd8] sm:$0xff] }
 0x349   :  { %8185 = vmatprep.subr.bf16.mxu1 %v12242_v6  ;;  %v12282_v6 = vcombine.high %v2381_v17, %v2385_v18 }
 0x34b   :  { %7858 = vmatpush1.bf16.msra.mxu0 %v12239_v32  ;;  %v12279_v32 = vcombine.low %v2380_v14, %v2384_v1  ;;  %v1398_v1 = vld [vmem:[#allocation9 + $0x110] sm:$0xff] }
 0x34c   :  { %8186 = vmatpush1.bf16.msra.mxu1 %v12241_v33  ;;  %7859 = vmatprep.subr.bf16.mxu0 %v12248_v63  ;;  %v1346_v33 = vmax.f32 %v13740_v29, 0.0  ;;  %v12281_v63 = vcombine.low %v2381_v17, %v2385_v18  ;;  %v1382_v29 = vld [vmem:[#allocation9 + $0x90] sm:$0xff]  ;;  %v1399_v18 = vld [vmem:[#allocation9 + $0x118] sm:$0xff] }
 0x34d   :  { %8187 = vmatprep.subr.bf16.mxu1 %v12250_v35  ;;  %v11268_v35 = vcombine.high %v1366_v27, %v1370_v15  ;;  %v1402_v17 = vld [vmem:[#allocation9 + $0x130] sm:$0xff] }
 0x34e   :  { %v1406_v27 = vld [vmem:[#allocation9 + $0x150] sm:$0xff] }
 0x34f   :  { %7860 = vmatpush1.bf16.msra.mxu0 %v12247_v13  ;;  %v1375_v13 = vld [vmem:[#allocation9 + $0x58] sm:$0xff]  ;;  %v1410_v15 = vld [vmem:[#allocation9 + $0x170] sm:$0xff] }
 0x350   :  { %8188 = vmatpush1.bf16.msra.mxu1 %v12249_v0  ;;  %7861 = vmatprep.subr.bf16.mxu0 %v12256_v51  ;;  %v1379_v0 = vld [vmem:[#allocation9 + $0x78] sm:$0xff]  ;;  %v13803_v51 = vpack.c.bf16 %v1346_v33, %v1346_v33 }
 0x351   :  { %8189 = vmatprep.subr.bf16.mxu1 %v12258_v52  ;;  %v11269_v52 = vcombine.low %v1367_v28, %v1371_v30  ;;  %v11278_v56 = vcombine.high %v1375_v13, %v1379_v0  ;;  %v1407_v28 = vld [vmem:[#allocation9 + $0x158] sm:$0xff] }
 0x352   :  { %v1411_v30 = vld [vmem:[#allocation9 + $0x178] sm:$0xff] }
 0x353   :  { %7862 = vmatpush1.bf16.msra.mxu0 %v12255_v57  ;;  %v1387_v57 = vld [vmem:[#allocation9 + $0xb8] sm:$0xff] }
 0x354   :  { %8190 = vmatpush1.bf16.msra.mxu1 %v12257_v58  ;;  %7863 = vmatprep.subr.bf16.mxu0 %v12264_v61  ;;  %v11275_v58 = vcombine.low %v1374_v36, %v1378_v44  ;;  %v11277_v61 = vcombine.low %v1375_v13, %v1379_v0  ;;  %v11286_v20 = vcombine.high %v1383_v11, %v1387_v57  ;;  %v1418_v36 = vld [vmem:[#allocation9 + $0x1b0] sm:$0xff]  ;;  %v1415_v44 = vld [vmem:[#allocation9 + $0x198] sm:$0xff] }
 0x355   :  { %8191 = vmatprep.subr.bf16.mxu1 %v12266_v2  ;;  %v11284_v2 = vcombine.high %v1382_v29, %v1386_v55  ;;  %v11307_v13 = vcombine.low %v1406_v27, %v1410_v15  ;;  %v11309_v0 = vcombine.low %v1407_v28, %v1411_v30 }
 0x357   :  { %7864 = vmatpush1.bf16.msra.mxu0 %v12263_v8  ;;  %v1395_v8 = vld [vmem:[#allocation9 + $0xf8] sm:$0xff] }
 0x358   :  { %8192 = vmatpush1.bf16.msra.mxu1 %v12265_v49  ;;  %7865 = vmatprep.subr.bf16.mxu0 %v12272_v12  ;;  %v11283_v49 = vcombine.low %v1382_v29, %v1386_v55  ;;  %v11285_v12 = vcombine.low %v1383_v11, %v1387_v57  ;;  %v11294_v14 = vcombine.high %v1391_v9, %v1395_v8  ;;  %v1422_v29 = vld [vmem:[#allocation9 + $0x1d0] sm:$0xff]  ;;  %v1427_v11 = vld [vmem:[#allocation9 + $0x1f8] sm:$0xff] }
 0x359   :  { %8193 = vmatprep.subr.bf16.mxu1 %v12274_v41  ;;  %v11292_v41 = vcombine.high %v1390_v4, %v1394_v7  ;;  %v1426_v55 = vld [vmem:[#allocation9 + $0x1f0] sm:$0xff] }
 0x35b   :  { %7866 = vmatpush1.bf16.msra.mxu0 %v12271_v40  ;;  %v1403_v40 = vld [vmem:[#allocation9 + $0x138] sm:$0xff] }
 0x35c   :  { %8194 = vmatpush1.bf16.msra.mxu1 %v12273_v24  ;;  %7867 = vmatprep.subr.bf16.mxu0 %v12280_v47  ;;  %v11293_v24 = vcombine.low %v1391_v9, %v1395_v8  ;;  %v11300_v47 = vcombine.high %v1398_v1, %v1402_v17  ;;  %v11301_v33 = vcombine.low %v1399_v18, %v1403_v40  ;;  %v1435_v9 = vld [vmem:[#allocation9 + $0x238] sm:$0xff] }
 0x35d   :  { %8195 = vmatprep.subr.bf16.mxu1 %v12282_v6  ;;  %v11302_v6 = vcombine.high %v1399_v18, %v1403_v40  ;;  %v11323_v8 = vcombine.low %v1422_v29, %v1426_v55  ;;  %v1443_v18 = vld [vmem:[#allocation9 + $0x278] sm:$0xff] }
 0x35f   :  { %7868 = vmatpush1.bf16.msra.mxu0 %v12279_v32  ;;  %v11299_v32 = vcombine.low %v1398_v1, %v1402_v17  ;;  %v1442_v1 = vld [vmem:[#allocation9 + $0x270] sm:$0xff]  ;;  %v1439_v17 = vld [vmem:[#allocation9 + $0x258] sm:$0xff] }
 0x360   :  { %8196 = vmatpush1.bf16.msra.mxu1 %v12281_v63  ;;  %8206 = vmatprep.subr.bf16.mxu0 %v11268_v35  ;;  %v11308_v63 = vcombine.high %v1406_v27, %v1410_v15  ;;  %v11310_v35 = vcombine.high %v1407_v28, %v1411_v30  ;;  %v1450_v27 = vld [vmem:[#allocation9 + $0x2b0] sm:$0xff]  ;;  %v1447_v15 = vld [vmem:[#allocation9 + $0x298] sm:$0xff] }
 0x361   :  { %8534 = vmatprep.subr.bf16.mxu1 %v11270_v39  ;;  %v1414_v39 = vld [vmem:[#allocation9 + $0x190] sm:$0xff]  ;;  %v1451_v28 = vld [vmem:[#allocation9 + $0x2b8] sm:$0xff] }
 0x362   :  { %7870 = vmatmul.mubr.bf16.vlgmr.msra.gmra.mrb[16].mxu0 %v13803_v51  ;;  %v11315_v57 = vcombine.low %v1414_v39, %v1418_v36 }
 0x363   :  { %8198 = vmatmul.mubr.bf16.vlgmr.msra.gmra.mrb[16].mxu1 %v13803_v51  ;;  %8207 = vmatpush1.bf16.msra.mxu0 %v11267_v45  ;;  %v1419_v45 = vld [vmem:[#allocation9 + $0x1b8] sm:$0xff] }
 0x364   :  { %8238 = vmatprep.mubr.bf16.mxu0 %v13661_v38  ;;  %8535 = vmatpush1.bf16.msra.mxu1 %v11269_v52  ;;  %v11316_v52 = vcombine.high %v1414_v39, %v1418_v36  ;;  %v1458_v39 = vld [vmem:[#allocation9 + $0x2f0] sm:$0xff]  ;;  %v1455_v36 = vld [vmem:[#allocation9 + $0x2d8] sm:$0xff] }
 0x365   :  { %8566 = vmatprep.mubr.bf16.mxu1 %v13661_v38  ;;  %8208 = vmatprep.subr.bf16.mxu0 %v11276_v54  ;;  %v11291_v38 = vcombine.low %v1390_v4, %v1394_v7  ;;  %v11318_v54 = vcombine.high %v1415_v44, %v1419_v45  ;;  %v1434_v4 = vld [vmem:[#allocation9 + $0x230] sm:$0xff]  ;;  %v1431_v7 = vld [vmem:[#allocation9 + $0x218] sm:$0xff] }
 0x366   :  { %8536 = vmatprep.subr.bf16.mxu1 %v11278_v56  ;;  %v1423_v56 = vld [vmem:[#allocation9 + $0x1d8] sm:$0xff] }
 0x367   :  { %8209 = vmatpush1.bf16.msra.mxu0 %v11275_v58  ;;  %v11317_v58 = vcombine.low %v1415_v44, %v1419_v45  ;;  %v1459_v44 = vld [vmem:[#allocation9 + $0x2f8] sm:$0xff] }
 0x368   :  { %8537 = vmatpush1.bf16.msra.mxu1 %v11277_v61  ;;  %8210 = vmatprep.subr.bf16.mxu0 %v11284_v2  ;;  %v11324_v61 = vcombine.high %v1422_v29, %v1426_v55  ;;  %v11326_v2 = vcombine.high %v1423_v56, %v1427_v11  ;;  %v1466_v29 = vld [vmem:[#allocation9 + $0x330] sm:$0xff]  ;;  %v1463_v55 = vld [vmem:[#allocation9 + $0x318] sm:$0xff] }
 0x369   :  { %8538 = vmatprep.subr.bf16.mxu1 %v11286_v20  ;;  %v1430_v20 = vld [vmem:[#allocation9 + $0x210] sm:$0xff] }
 0x36a   :  { %v11331_v40 = vcombine.low %v1430_v20, %v1434_v4 }
 0x36b   :  { %8211 = vmatpush1.bf16.msra.mxu0 %v11283_v49  ;;  %v11325_v49 = vcombine.low %v1423_v56, %v1427_v11  ;;  %v1467_v56 = vld [vmem:[#allocation9 + $0x338] sm:$0xff] }
 0x36c   :  { %8539 = vmatpush1.bf16.msra.mxu1 %v11285_v12  ;;  %8212 = vmatprep.subr.bf16.mxu0 %v11292_v41  ;;  %v11332_v12 = vcombine.high %v1430_v20, %v1434_v4  ;;  %v11334_v41 = vcombine.high %v1431_v7, %v1435_v9  ;;  %v1474_v20 = vld [vmem:[#allocation9 + $0x370] sm:$0xff]  ;;  %v1471_v4 = vld [vmem:[#allocation9 + $0x358] sm:$0xff] }
 0x36d   :  { %8540 = vmatprep.subr.bf16.mxu1 %v11294_v14  ;;  %v1438_v14 = vld [vmem:[#allocation9 + $0x250] sm:$0xff] }
 0x36e   :  { %v11339_v30 = vcombine.low %v1438_v14, %v1442_v1 }
 0x36f   :  { %8213 = vmatpush1.bf16.msra.mxu0 %v11291_v38  ;;  %v11333_v38 = vcombine.low %v1431_v7, %v1435_v9  ;;  %v1475_v7 = vld [vmem:[#allocation9 + $0x378] sm:$0xff] }
 0x370   :  { %8541 = vmatpush1.bf16.msra.mxu1 %v11293_v24  ;;  %8214 = vmatprep.subr.bf16.mxu0 %v11300_v47  ;;  %v11340_v24 = vcombine.high %v1438_v14, %v1442_v1  ;;  %v11342_v47 = vcombine.high %v1439_v17, %v1443_v18  ;;  %v1482_v14 = vld [vmem:[#allocation9 + $0x3b0] sm:$0xff]  ;;  %v1479_v1 = vld [vmem:[#allocation9 + $0x398] sm:$0xff] }
 0x371   :  { %8542 = vmatprep.subr.bf16.mxu1 %v11302_v6  ;;  %v1446_v6 = vld [vmem:[#allocation9 + $0x290] sm:$0xff] }
 0x372   :  { %v11347_v45 = vcombine.low %v1446_v6, %v1450_v27 }
 0x373   :  { %8215 = vmatpush1.bf16.msra.mxu0 %v11299_v32  ;;  %v11341_v32 = vcombine.low %v1439_v17, %v1443_v18  ;;  %v1483_v17 = vld [vmem:[#allocation9 + $0x3b8] sm:$0xff] }
 0x374   :  { %8543 = vmatpush1.bf16.msra.mxu1 %v11301_v33  ;;  %8216 = vmatprep.subr.bf16.mxu0 %v11308_v63  ;;  %v11348_v33 = vcombine.high %v1446_v6, %v1450_v27  ;;  %v11350_v63 = vcombine.high %v1447_v15, %v1451_v28  ;;  %v1490_v6 = vld [vmem:[#allocation9 + $0x3f0] sm:$0xff]  ;;  %v1487_v27 = vld [vmem:[#allocation9 + $0x3d8] sm:$0xff] }
 0x375   :  { %8544 = vmatprep.subr.bf16.mxu1 %v11310_v35  ;;  %v1454_v35 = vld [vmem:[#allocation9 + $0x2d0] sm:$0xff] }
 0x376   :  { %v11355_v11 = vcombine.low %v1454_v35, %v1458_v39 }
 0x377   :  { %8217 = vmatpush1.bf16.msra.mxu0 %v11307_v13  ;;  %v11349_v13 = vcombine.low %v1447_v15, %v1451_v28  ;;  %v1491_v15 = vld [vmem:[#allocation9 + $0x3f8] sm:$0xff] }
 0x378   :  { %8545 = vmatpush1.bf16.msra.mxu1 %v11309_v0  ;;  %8218 = vmatprep.subr.bf16.mxu0 %v11316_v52  ;;  %v11356_v0 = vcombine.high %v1454_v35, %v1458_v39  ;;  %v11358_v52 = vcombine.high %v1455_v36, %v1459_v44  ;;  %v1498_v35 = vld [vmem:[#allocation9 + $0x430] sm:$0xff]  ;;  %v1495_v39 = vld [vmem:[#allocation9 + $0x418] sm:$0xff] }
 0x379   :  { %8546 = vmatprep.subr.bf16.mxu1 %v11318_v54  ;;  %v1462_v54 = vld [vmem:[#allocation9 + $0x310] sm:$0xff] }
 0x37a   :  { %v11363_v9 = vcombine.low %v1462_v54, %v1466_v29 }
 0x37b   :  { %8219 = vmatpush1.bf16.msra.mxu0 %v11315_v57  ;;  %v11357_v57 = vcombine.low %v1455_v36, %v1459_v44  ;;  %v1499_v36 = vld [vmem:[#allocation9 + $0x438] sm:$0xff] }
 0x37c   :  { %8547 = vmatpush1.bf16.msra.mxu1 %v11317_v58  ;;  %8220 = vmatprep.subr.bf16.mxu0 %v11324_v61  ;;  %v11364_v58 = vcombine.high %v1462_v54, %v1466_v29  ;;  %v11366_v61 = vcombine.high %v1463_v55, %v1467_v56  ;;  %v1506_v54 = vld [vmem:[#allocation9 + $0x470] sm:$0xff] }
 0x37d   :  { %8548 = vmatprep.subr.bf16.mxu1 %v11326_v2  ;;  %v1470_v2 = vld [vmem:[#allocation9 + $0x350] sm:$0xff] }
 0x37e   :  { %v11371_v18 = vcombine.low %v1470_v2, %v1474_v20 }
 0x37f   :  { %8221 = vmatpush1.bf16.msra.mxu0 %v11323_v8  ;;  %v11365_v8 = vcombine.low %v1463_v55, %v1467_v56  ;;  %v1503_v55 = vld [vmem:[#allocation9 + $0x458] sm:$0xff] }
 0x380   :  { %8549 = vmatpush1.bf16.msra.mxu1 %v11325_v49  ;;  %8222 = vmatprep.subr.bf16.mxu0 %v11332_v12  ;;  %v11372_v49 = vcombine.high %v1470_v2, %v1474_v20  ;;  %v11374_v12 = vcombine.high %v1471_v4, %v1475_v7  ;;  %v1507_v56 = vld [vmem:[#allocation9 + $0x478] sm:$0xff] }
 0x381   :  { %8550 = vmatprep.subr.bf16.mxu1 %v11334_v41  ;;  %v1478_v41 = vld [vmem:[#allocation9 + $0x390] sm:$0xff]  ;;  %v11406_v2 = vcombine.high %v1503_v55, %v1507_v56  ;;  %v1511_v20 = vld [vmem:[#allocation9 + $0x498] sm:$0xff] }
 0x382   :  { %v11379_v28 = vcombine.low %v1478_v41, %v1482_v14 }
 0x383   :  { %8223 = vmatpush1.bf16.msra.mxu0 %v11331_v40  ;;  %v11373_v40 = vcombine.low %v1471_v4, %v1475_v7  ;;  %v1515_v4 = vld [vmem:[#allocation9 + $0x4b8] sm:$0xff] }
 0x384   :  { %8551 = vmatpush1.bf16.msra.mxu1 %v11333_v38  ;;  %8224 = vmatprep.subr.bf16.mxu0 %v11340_v24  ;;  %v11380_v38 = vcombine.high %v1478_v41, %v1482_v14  ;;  %v11382_v24 = vcombine.high %v1479_v1, %v1483_v17  ;;  %v1522_v41 = vld [vmem:[#allocation9 + $0x4f0] sm:$0xff]  ;;  %v1519_v14 = vld [vmem:[#allocation9 + $0x4d8] sm:$0xff] }
 0x385   :  { %8552 = vmatprep.subr.bf16.mxu1 %v11342_v47  ;;  %v1486_v47 = vld [vmem:[#allocation9 + $0x3d0] sm:$0xff] }
 0x386   :  { %v11387_v44 = vcombine.low %v1486_v47, %v1490_v6 }
 0x387   :  { %8225 = vmatpush1.bf16.msra.mxu0 %v11339_v30  ;;  %v11381_v30 = vcombine.low %v1479_v1, %v1483_v17  ;;  %v1523_v1 = vld [vmem:[#allocation9 + $0x4f8] sm:$0xff] }
 0x388   :  { %8553 = vmatpush1.bf16.msra.mxu1 %v11341_v32  ;;  %8226 = vmatprep.subr.bf16.mxu0 %v11348_v33  ;;  %v11388_v32 = vcombine.high %v1486_v47, %v1490_v6  ;;  %v11390_v33 = vcombine.high %v1487_v27, %v1491_v15  ;;  %v1527_v47 = vld [vmem:[#allocation9 + $0x518] sm:$0xff] }
 0x389   :  { %8554 = vmatprep.subr.bf16.mxu1 %v11350_v63  ;;  %v1494_v63 = vld [vmem:[#allocation9 + $0x410] sm:$0xff]  ;;  %v1531_v6 = vld [vmem:[#allocation9 + $0x538] sm:$0xff] }
 0x38a   :  { %v11395_v29 = vcombine.low %v1494_v63, %v1498_v35 }
 0x38b   :  { %8227 = vmatpush1.bf16.msra.mxu0 %v11347_v45  ;;  %v11389_v45 = vcombine.low %v1487_v27, %v1491_v15  ;;  %v11421_v27 = vcombine.low %v1519_v14, %v1523_v1 }
 0x38c   :  { %8555 = vmatpush1.bf16.msra.mxu1 %v11349_v13  ;;  %8228 = vmatprep.subr.bf16.mxu0 %v11356_v0  ;;  %v11396_v13 = vcombine.high %v1494_v63, %v1498_v35  ;;  %v11398_v0 = vcombine.high %v1495_v39, %v1499_v36  ;;  %v1539_v63 = vld [vmem:[#allocation9 + $0x578] sm:$0xff] }
 0x38d   :  { %8556 = vmatprep.subr.bf16.mxu1 %v11358_v52  ;;  %v1502_v52 = vld [vmem:[#allocation9 + $0x450] sm:$0xff] }
 0x38e   :  { %v11403_v7 = vcombine.low %v1502_v52, %v1506_v54 }
 0x38f   :  { %8229 = vmatpush1.bf16.msra.mxu0 %v11355_v11  ;;  %v11397_v11 = vcombine.low %v1495_v39, %v1499_v36  ;;  %v11429_v39 = vcombine.low %v1527_v47, %v1531_v6 }
 0x390   :  { %8557 = vmatpush1.bf16.msra.mxu1 %v11357_v57  ;;  %8230 = vmatprep.subr.bf16.mxu0 %v11364_v58  ;;  %v11404_v57 = vcombine.high %v1502_v52, %v1506_v54  ;;  %v1510_v58 = vld [vmem:[#allocation9 + $0x490] sm:$0xff]  ;;  %v1547_v52 = vld [vmem:[#allocation9 + $0x5b8] sm:$0xff] }
 0x391   :  { %8558 = vmatprep.subr.bf16.mxu1 %v11366_v61  ;;  %v1514_v61 = vld [vmem:[#allocation9 + $0x4b0] sm:$0xff] }
 0x392   :  { %v11411_v17 = vcombine.low %v1510_v58, %v1514_v61 }
 0x393   :  { %8231 = vmatpush1.bf16.msra.mxu0 %v11363_v9  ;;  %v11405_v9 = vcombine.low %v1503_v55, %v1507_v56 }
 0x394   :  { %8559 = vmatpush1.bf16.msra.mxu1 %v11365_v8  ;;  %8232 = vmatprep.subr.bf16.mxu0 %v11372_v49  ;;  %v11412_v8 = vcombine.high %v1510_v58, %v1514_v61  ;;  %v11414_v49 = vcombine.high %v1511_v20, %v1515_v4  ;;  %v1551_v58 = vld [vmem:[#allocation9 + $0x5d8] sm:$0xff] }
 0x395   :  { %8560 = vmatprep.subr.bf16.mxu1 %v11374_v12  ;;  %v1518_v12 = vld [vmem:[#allocation9 + $0x4d0] sm:$0xff]  ;;  %v1555_v61 = vld [vmem:[#allocation9 + $0x5f8] sm:$0xff] }
 0x397   :  { %8233 = vmatpush1.bf16.msra.mxu0 %v11371_v18  ;;  %v11420_v18 = vcombine.high %v1518_v12, %v1522_v41 }
 0x398   :  { %8561 = vmatpush1.bf16.msra.mxu1 %v11373_v40  ;;  %8234 = vmatprep.subr.bf16.mxu0 %v11380_v38  ;;  %v11422_v40 = vcombine.high %v1519_v14, %v1523_v1  ;;  %v1526_v38 = vld [vmem:[#allocation9 + $0x510] sm:$0xff]  ;;  %v11453_v14 = vcombine.low %v1551_v58, %v1555_v61 }
 0x399   :  { %8562 = vmatprep.subr.bf16.mxu1 %v11382_v24  ;;  %v1530_v24 = vld [vmem:[#allocation9 + $0x530] sm:$0xff] }
 0x39a   :  { %v11428_v15 = vcombine.high %v1526_v38, %v1530_v24  ;;  %v11427_v35 = vcombine.low %v1526_v38, %v1530_v24  ;;  %v1571_v38 = vld [vmem:[#allocation9 + $0x678] sm:$0xff] }
 0x39b   :  { %8235 = vmatpush1.bf16.msra.mxu0 %v11379_v28  ;;  %v11430_v28 = vcombine.high %v1527_v47, %v1531_v6 }
 0x39c   :  { %8563 = vmatpush1.bf16.msra.mxu1 %v11381_v30  ;;  %8236 = vmatprep.subr.bf16.mxu0 %v11388_v32  ;;  %v1534_v30 = vld [vmem:[#allocation9 + $0x550] sm:$0xff] }
 0x39d   :  { %8564 = vmatprep.subr.bf16.mxu1 %v11390_v33  ;;  %v1538_v32 = vld [vmem:[#allocation9 + $0x570] sm:$0xff]  ;;  %v1535_v33 = vld [vmem:[#allocation9 + $0x558] sm:$0xff] }
 0x39e   :  { %v11436_v36 = vcombine.high %v1534_v30, %v1538_v32  ;;  %v11435_v54 = vcombine.low %v1534_v30, %v1538_v32  ;;  %v1579_v30 = vld [vmem:[#allocation9 + $0x6b8] sm:$0xff] }
 0x39f   :  { %8237 = vmatpush1.bf16.msra.mxu0 %v11387_v44  ;;  %v11438_v44 = vcombine.high %v1535_v33, %v1539_v63 }
 0x3a0   :  { %8565 = vmatpush1.bf16.msra.mxu1 %v11389_v45  ;;  %8247 = vmatprep.subr.bf16.mxu0 %v11396_v13  ;;  %v1542_v45 = vld [vmem:[#allocation9 + $0x590] sm:$0xff] }
 0x3a1   :  { %8575 = vmatprep.subr.bf16.mxu1 %v11398_v0  ;;  %v1546_v13 = vld [vmem:[#allocation9 + $0x5b0] sm:$0xff]  ;;  %v1543_v0 = vld [vmem:[#allocation9 + $0x598] sm:$0xff] }
 0x3a2   :  { %8239 = vmatmul.mubr.bf16.vlgmr.msra.gmra.mrb[20].mxu0 %v13667_v42  ;;  %v11444_v55 = vcombine.high %v1542_v45, %v1546_v13  ;;  %v11446_v56 = vcombine.high %v1543_v0, %v1547_v52 }
 0x3a3   :  { %8567 = vmatmul.mubr.bf16.vlgmr.msra.gmra.mrb[20].mxu1 %v13667_v42  ;;  %8248 = vmatpush1.bf16.msra.mxu0 %v11395_v29  ;;  %v11413_v42 = vcombine.low %v1511_v20, %v1515_v4  ;;  %v11437_v29 = vcombine.low %v1535_v33, %v1539_v63  ;;  %v11445_v20 = vcombine.low %v1543_v0, %v1547_v52 }
 0x3a4   :  { %8279 = vmatprep.mubr.bf16.mxu0 %v13673_v60  ;;  %8576 = vmatpush1.bf16.msra.mxu1 %v11397_v11  ;;  %v1550_v11 = vld [vmem:[#allocation9 + $0x5d0] sm:$0xff] }
 0x3a5   :  { %8607 = vmatprep.mubr.bf16.mxu1 %v13673_v60  ;;  %8249 = vmatprep.subr.bf16.mxu0 %v11404_v57  ;;  %v11419_v60 = vcombine.low %v1518_v12, %v1522_v41  ;;  %v1554_v57 = vld [vmem:[#allocation9 + $0x5f0] sm:$0xff]  ;;  %v1563_v12 = vld [vmem:[#allocation9 + $0x638] sm:$0xff] }
 0x3a6   :  { %8577 = vmatprep.subr.bf16.mxu1 %v11406_v2  ;;  %v11443_v2 = vcombine.low %v1542_v45, %v1546_v13  ;;  %v11452_v4 = vcombine.high %v1550_v11, %v1554_v57  ;;  %v11451_v41 = vcombine.low %v1550_v11, %v1554_v57  ;;  %v1587_v45 = vld [vmem:[#allocation9 + $0x6f8] sm:$0xff] }
 0x3a7   :  { %8250 = vmatpush1.bf16.msra.mxu0 %v11403_v7  ;;  %v11454_v7 = vcombine.high %v1551_v58, %v1555_v61  ;;  %v1595_v11 = vld [vmem:[#allocation9 + $0x738] sm:$0xff] }
 0x3a8   :  { %8578 = vmatpush1.bf16.msra.mxu1 %v11405_v9  ;;  %8251 = vmatprep.subr.bf16.mxu0 %v11412_v8  ;;  %v1558_v9 = vld [vmem:[#allocation9 + $0x610] sm:$0xff] }
 0x3a9   :  { %8579 = vmatprep.subr.bf16.mxu1 %v11414_v49  ;;  %v1562_v8 = vld [vmem:[#allocation9 + $0x630] sm:$0xff]  ;;  %v1559_v49 = vld [vmem:[#allocation9 + $0x618] sm:$0xff] }
 0x3aa   :  { %v11460_v1 = vcombine.high %v1558_v9, %v1562_v8  ;;  %v11459_v24 = vcombine.low %v1558_v9, %v1562_v8  ;;  %v11461_v47 = vcombine.low %v1559_v49, %v1563_v12  ;;  %v1603_v9 = vld [vmem:[#allocation9 + $0x778] sm:$0xff] }
 0x3ab   :  { %8252 = vmatpush1.bf16.msra.mxu0 %v11411_v17  ;;  %v11462_v17 = vcombine.high %v1559_v49, %v1563_v12 }
 0x3ac   :  { %8580 = vmatpush1.bf16.msra.mxu1 %v11413_v42  ;;  %8253 = vmatprep.subr.bf16.mxu0 %v11420_v18  ;;  %v1566_v42 = vld [vmem:[#allocation9 + $0x650] sm:$0xff] }
 0x3ad   :  { %8581 = vmatprep.subr.bf16.mxu1 %v11422_v40  ;;  %v1570_v18 = vld [vmem:[#allocation9 + $0x670] sm:$0xff]  ;;  %v1567_v40 = vld [vmem:[#allocation9 + $0x658] sm:$0xff] }
 0x3ae   :  { %v11468_v6 = vcombine.high %v1566_v42, %v1570_v18  ;;  %v11467_v32 = vcombine.low %v1566_v42, %v1570_v18  ;;  %v11469_v33 = vcombine.low %v1567_v40, %v1571_v38  ;;  %v1611_v42 = vld [vmem:[#allocation9 + $0x7b8] sm:$0xff] }
 0x3af   :  { %8254 = vmatpush1.bf16.msra.mxu0 %v11419_v60  ;;  %v11470_v60 = vcombine.high %v1567_v40, %v1571_v38 }
 0x3b0   :  { %8582 = vmatpush1.bf16.msra.mxu1 %v11421_v27  ;;  %8255 = vmatprep.subr.bf16.mxu0 %v11428_v15  ;;  %v1574_v27 = vld [vmem:[#allocation9 + $0x690] sm:$0xff] }
 0x3b1   :  { %8583 = vmatprep.subr.bf16.mxu1 %v11430_v28  ;;  %v1578_v15 = vld [vmem:[#allocation9 + $0x6b0] sm:$0xff]  ;;  %v1575_v28 = vld [vmem:[#allocation9 + $0x698] sm:$0xff] }
 0x3b2   :  { %v11476_v63 = vcombine.high %v1574_v27, %v1578_v15  ;;  %v11475_v13 = vcombine.low %v1574_v27, %v1578_v15  ;;  %v11477_v0 = vcombine.low %v1575_v28, %v1579_v30  ;;  %v1619_v27 = vld [vmem:[#allocation9 + $0x7f8] sm:$0xff] }
 0x3b3   :  { %8256 = vmatpush1.bf16.msra.mxu0 %v11427_v35  ;;  %v11478_v35 = vcombine.high %v1575_v28, %v1579_v30 }
 0x3b4   :  { %8584 = vmatpush1.bf16.msra.mxu1 %v11429_v39  ;;  %8257 = vmatprep.subr.bf16.mxu0 %v11436_v36  ;;  %v1582_v39 = vld [vmem:[#allocation9 + $0x6d0] sm:$0xff] }
 0x3b5   :  { %8585 = vmatprep.subr.bf16.mxu1 %v11438_v44  ;;  %v1586_v36 = vld [vmem:[#allocation9 + $0x6f0] sm:$0xff]  ;;  %v1583_v44 = vld [vmem:[#allocation9 + $0x6d8] sm:$0xff] }
 0x3b6   :  { %v11484_v52 = vcombine.high %v1582_v39, %v1586_v36  ;;  %v11483_v57 = vcombine.low %v1582_v39, %v1586_v36  ;;  %v11485_v58 = vcombine.low %v1583_v44, %v1587_v45  ;;  %v1627_v39 = vld [vmem:[#allocation9 + $0x838] sm:$0xff] }
 0x3b7   :  { %8258 = vmatpush1.bf16.msra.mxu0 %v11435_v54  ;;  %v11486_v54 = vcombine.high %v1583_v44, %v1587_v45 }
 0x3b8   :  { %8586 = vmatpush1.bf16.msra.mxu1 %v11437_v29  ;;  %8259 = vmatprep.subr.bf16.mxu0 %v11444_v55  ;;  %v1590_v29 = vld [vmem:[#allocation9 + $0x710] sm:$0xff] }
 0x3b9   :  { %8587 = vmatprep.subr.bf16.mxu1 %v11446_v56  ;;  %v1594_v55 = vld [vmem:[#allocation9 + $0x730] sm:$0xff]  ;;  %v1591_v56 = vld [vmem:[#allocation9 + $0x718] sm:$0xff] }
 0x3ba   :  { %v11492_v61 = vcombine.high %v1590_v29, %v1594_v55  ;;  %v11491_v8 = vcombine.low %v1590_v29, %v1594_v55  ;;  %v11493_v49 = vcombine.low %v1591_v56, %v1595_v11  ;;  %v1631_v29 = vld [vmem:[#allocation9 + $0x858] sm:$0xff] }
 0x3bb   :  { %8260 = vmatpush1.bf16.msra.mxu0 %v11443_v2  ;;  %v11494_v2 = vcombine.high %v1591_v56, %v1595_v11  ;;  %v1635_v55 = vld [vmem:[#allocation9 + $0x878] sm:$0xff] }
 0x3bc   :  { %8588 = vmatpush1.bf16.msra.mxu1 %v11445_v20  ;;  %8261 = vmatprep.subr.bf16.mxu0 %v11452_v4  ;;  %v1598_v20 = vld [vmem:[#allocation9 + $0x750] sm:$0xff] }
 0x3bd   :  { %8589 = vmatprep.subr.bf16.mxu1 %v11454_v7  ;;  %v1602_v4 = vld [vmem:[#allocation9 + $0x770] sm:$0xff]  ;;  %v1599_v7 = vld [vmem:[#allocation9 + $0x758] sm:$0xff] }
 0x3be   :  { %v11500_v12 = vcombine.high %v1598_v20, %v1602_v4  ;;  %v11499_v18 = vcombine.low %v1598_v20, %v1602_v4  ;;  %v11501_v40 = vcombine.low %v1599_v7, %v1603_v9  ;;  %v1643_v20 = vld [vmem:[#allocation9 + $0x8b8] sm:$0xff] }
 0x3bf   :  { %8262 = vmatpush1.bf16.msra.mxu0 %v11451_v41  ;;  %v11502_v41 = vcombine.high %v1599_v7, %v1603_v9  ;;  %v11533_v7 = vcombine.low %v1631_v29, %v1635_v55 }
 0x3c0   :  { %8590 = vmatpush1.bf16.msra.mxu1 %v11453_v14  ;;  %8263 = vmatprep.subr.bf16.mxu0 %v11460_v1  ;;  %v1606_v14 = vld [vmem:[#allocation9 + $0x790] sm:$0xff] }
 0x3c1   :  { %8591 = vmatprep.subr.bf16.mxu1 %v11462_v17  ;;  %v1610_v1 = vld [vmem:[#allocation9 + $0x7b0] sm:$0xff]  ;;  %v1607_v17 = vld [vmem:[#allocation9 + $0x798] sm:$0xff] }
 0x3c2   :  { %v11508_v38 = vcombine.high %v1606_v14, %v1610_v1  ;;  %v11507_v15 = vcombine.low %v1606_v14, %v1610_v1  ;;  %v11509_v28 = vcombine.low %v1607_v17, %v1611_v42  ;;  %v1651_v14 = vld [vmem:[#allocation9 + $0x8f8] sm:$0xff] }
 0x3c3   :  { %8264 = vmatpush1.bf16.msra.mxu0 %v11459_v24  ;;  %v11510_v24 = vcombine.high %v1607_v17, %v1611_v42 }
 0x3c4   :  { %8592 = vmatpush1.bf16.msra.mxu1 %v11461_v47  ;;  %8265 = vmatprep.subr.bf16.mxu0 %v11468_v6  ;;  %v1614_v47 = vld [vmem:[#allocation9 + $0x7d0] sm:$0xff] }
 0x3c5   :  { %8593 = vmatprep.subr.bf16.mxu1 %v11470_v60  ;;  %v1618_v6 = vld [vmem:[#allocation9 + $0x7f0] sm:$0xff]  ;;  %v1615_v60 = vld [vmem:[#allocation9 + $0x7d8] sm:$0xff] }
 0x3c6   :  { %v11516_v30 = vcombine.high %v1614_v47, %v1618_v6  ;;  %v11515_v36 = vcombine.low %v1614_v47, %v1618_v6  ;;  %v11517_v44 = vcombine.low %v1615_v60, %v1619_v27 }
 0x3c7   :  { %8266 = vmatpush1.bf16.msra.mxu0 %v11467_v32  ;;  %v11518_v32 = vcombine.high %v1615_v60, %v1619_v27  ;;  %v1662_v27 = vld [vmem:[#allocation9 + $0x950] sm:$0xff] }
 0x3c8   :  { %8594 = vmatpush1.bf16.msra.mxu1 %v11469_v33  ;;  %8267 = vmatprep.subr.bf16.mxu0 %v11476_v63  ;;  %v1622_v33 = vld [vmem:[#allocation9 + $0x810] sm:$0xff] }
 0x3c9   :  { %8595 = vmatprep.subr.bf16.mxu1 %v11478_v35  ;;  %v1626_v63 = vld [vmem:[#allocation9 + $0x830] sm:$0xff]  ;;  %v1623_v35 = vld [vmem:[#allocation9 + $0x818] sm:$0xff] }
 0x3ca   :  { %v11524_v45 = vcombine.high %v1622_v33, %v1626_v63  ;;  %v11525_v56 = vcombine.low %v1623_v35, %v1627_v39 }
 0x3cb   :  { %8268 = vmatpush1.bf16.msra.mxu0 %v11475_v13  ;;  %v11526_v13 = vcombine.high %v1623_v35, %v1627_v39  ;;  %v1670_v39 = vld [vmem:[#allocation9 + $0x990] sm:$0xff] }
 0x3cc   :  { %8596 = vmatpush1.bf16.msra.mxu1 %v11477_v0  ;;  %8269 = vmatprep.subr.bf16.mxu0 %v11484_v52  ;;  %v1630_v0 = vld [vmem:[#allocation9 + $0x850] sm:$0xff] }
 0x3cd   :  { %8597 = vmatprep.subr.bf16.mxu1 %v11486_v54  ;;  %v1634_v52 = vld [vmem:[#allocation9 + $0x870] sm:$0xff]  ;;  %v11523_v54 = vcombine.low %v1622_v33, %v1626_v63 }
 0x3ce   :  { %v11532_v11 = vcombine.high %v1630_v0, %v1634_v52  ;;  %v11531_v4 = vcombine.low %v1630_v0, %v1634_v52 }
 0x3cf   :  { %8270 = vmatpush1.bf16.msra.mxu0 %v11483_v57  ;;  %v1638_v57 = vld [vmem:[#allocation9 + $0x890] sm:$0xff] }
 0x3d0   :  { %8598 = vmatpush1.bf16.msra.mxu1 %v11485_v58  ;;  %8271 = vmatprep.subr.bf16.mxu0 %v11492_v61  ;;  %v1642_v58 = vld [vmem:[#allocation9 + $0x8b0] sm:$0xff]  ;;  %v11534_v61 = vcombine.high %v1631_v29, %v1635_v55 }
 0x3d1   :  { %8599 = vmatprep.subr.bf16.mxu1 %v11494_v2  ;;  %v1639_v2 = vld [vmem:[#allocation9 + $0x898] sm:$0xff]  ;;  %v11540_v9 = vcombine.high %v1638_v57, %v1642_v58  ;;  %v11539_v1 = vcombine.low %v1638_v57, %v1642_v58  ;;  %v1678_v29 = vld [vmem:[#allocation9 + $0x9d0] sm:$0xff] }
 0x3d2   :  { %v1682_v55 = vld [vmem:[#allocation9 + $0x9f0] sm:$0xff] }
 0x3d3   :  { %8272 = vmatpush1.bf16.msra.mxu0 %v11491_v8  ;;  %v11542_v8 = vcombine.high %v1639_v2, %v1643_v20 }
 0x3d4   :  { %8600 = vmatpush1.bf16.msra.mxu1 %v11493_v49  ;;  %8273 = vmatprep.subr.bf16.mxu0 %v11500_v12  ;;  %v1646_v49 = vld [vmem:[#allocation9 + $0x8d0] sm:$0xff] }
 0x3d5   :  { %8601 = vmatprep.subr.bf16.mxu1 %v11502_v41  ;;  %v1650_v12 = vld [vmem:[#allocation9 + $0x8f0] sm:$0xff]  ;;  %v1647_v41 = vld [vmem:[#allocation9 + $0x8d8] sm:$0xff] }
 0x3d6   :  { %v11548_v17 = vcombine.high %v1646_v49, %v1650_v12  ;;  %v11550_v42 = vcombine.high %v1647_v41, %v1651_v14  ;;  %v11549_v47 = vcombine.low %v1647_v41, %v1651_v14  ;;  %v1694_v14 = vld [vmem:[#allocation9 + $0xa50] sm:$0xff] }
 0x3d7   :  { %8274 = vmatpush1.bf16.msra.mxu0 %v11499_v18  ;;  %v1654_v18 = vld [vmem:[#allocation9 + $0x910] sm:$0xff] }
 0x3d8   :  { %8602 = vmatpush1.bf16.msra.mxu1 %v11501_v40  ;;  %8275 = vmatprep.subr.bf16.mxu0 %v11508_v38  ;;  %v1658_v40 = vld [vmem:[#allocation9 + $0x930] sm:$0xff]  ;;  %v1655_v38 = vld [vmem:[#allocation9 + $0x918] sm:$0xff] }
 0x3d9   :  { %8603 = vmatprep.subr.bf16.mxu1 %v11510_v24  ;;  %v1659_v24 = vld [vmem:[#allocation9 + $0x938] sm:$0xff]  ;;  %v11556_v6 = vcombine.high %v1654_v18, %v1658_v40 }
 0x3da   :  { %v11558_v60 = vcombine.high %v1655_v38, %v1659_v24  ;;  %v11557_v33 = vcombine.low %v1655_v38, %v1659_v24  ;;  %v1702_v24 = vld [vmem:[#allocation9 + $0xa90] sm:$0xff] }
 0x3db   :  { %8276 = vmatpush1.bf16.msra.mxu0 %v11507_v15  ;;  %v1666_v15 = vld [vmem:[#allocation9 + $0x970] sm:$0xff] }
 0x3dc   :  { %8604 = vmatpush1.bf16.msra.mxu1 %v11509_v28  ;;  %8277 = vmatprep.subr.bf16.mxu0 %v11516_v30  ;;  %v1663_v28 = vld [vmem:[#allocation9 + $0x958] sm:$0xff]  ;;  %v11564_v63 = vcombine.high %v1662_v27, %v1666_v15 }
 0x3dd   :  { %8605 = vmatprep.subr.bf16.mxu1 %v11518_v32  ;;  %v1667_v30 = vld [vmem:[#allocation9 + $0x978] sm:$0xff]  ;;  %v11555_v32 = vcombine.low %v1654_v18, %v1658_v40 }
 0x3de   :  { %v11566_v35 = vcombine.high %v1663_v28, %v1667_v30  ;;  %v11565_v0 = vcombine.low %v1663_v28, %v1667_v30  ;;  %v1710_v30 = vld [vmem:[#allocation9 + $0xad0] sm:$0xff] }
 0x3df   :  { %8278 = vmatpush1.bf16.msra.mxu0 %v11515_v36  ;;  %v1674_v36 = vld [vmem:[#allocation9 + $0x9b0] sm:$0xff] }
 0x3e0   :  { %8606 = vmatpush1.bf16.msra.mxu1 %v11517_v44  ;;  %8288 = vmatprep.subr.bf16.mxu0 %v11524_v45  ;;  %v1671_v44 = vld [vmem:[#allocation9 + $0x998] sm:$0xff]  ;;  %v11572_v52 = vcombine.high %v1670_v39, %v1674_v36  ;;  %v11571_v57 = vcombine.low %v1670_v39, %v1674_v36 }
 0x3e1   :  { %8616 = vmatprep.subr.bf16.mxu1 %v11526_v13  ;;  %v1675_v45 = vld [vmem:[#allocation9 + $0x9b8] sm:$0xff]  ;;  %v11563_v13 = vcombine.low %v1662_v27, %v1666_v15 }
 0x3e2   :  { %8280 = vmatmul.mubr.bf16.vlgmr.msra.gmra.mrb[20].mxu0 %v13707_v31  ;;  %v11573_v58 = vcombine.low %v1671_v44, %v1675_v45 }
 0x3e3   :  { %8608 = vmatmul.mubr.bf16.vlgmr.msra.gmra.mrb[20].mxu1 %v13707_v31  ;;  %8289 = vmatpush1.bf16.msra.mxu0 %v11523_v54  ;;  %v11541_v31 = vcombine.low %v1639_v2, %v1643_v20  ;;  %v11574_v54 = vcombine.high %v1671_v44, %v1675_v45  ;;  %v1686_v20 = vld [vmem:[#allocation9 + $0xa10] sm:$0xff] }
 0x3e4   :  { %8320 = vmatprep.mubr.bf16.mxu0 %v13711_v48  ;;  %8617 = vmatpush1.bf16.msra.mxu1 %v11525_v56  ;;  %v1679_v56 = vld [vmem:[#allocation9 + $0x9d8] sm:$0xff]  ;;  %v1718_v45 = vld [vmem:[#allocation9 + $0xb10] sm:$0xff] }
 0x3e5   :  { %8648 = vmatprep.mubr.bf16.mxu1 %v13711_v48  ;;  %8290 = vmatprep.subr.bf16.mxu0 %v11532_v11  ;;  %v11547_v48 = vcombine.low %v1646_v49, %v1650_v12  ;;  %v1683_v11 = vld [vmem:[#allocation9 + $0x9f8] sm:$0xff] }
 0x3e6   :  { %8618 = vmatprep.subr.bf16.mxu1 %v11534_v61  ;;  %v11580_v61 = vcombine.high %v1678_v29, %v1682_v55  ;;  %v11582_v2 = vcombine.high %v1679_v56, %v1683_v11  ;;  %v11581_v49 = vcombine.low %v1679_v56, %v1683_v11  ;;  %v1726_v11 = vld [vmem:[#allocation9 + $0xb50] sm:$0xff] }
 0x3e7   :  { %8291 = vmatpush1.bf16.msra.mxu0 %v11531_v4  ;;  %v1690_v4 = vld [vmem:[#allocation9 + $0xa30] sm:$0xff] }
 0x3e8   :  { %8619 = vmatpush1.bf16.msra.mxu1 %v11533_v7  ;;  %8292 = vmatprep.subr.bf16.mxu0 %v11540_v9  ;;  %v1687_v7 = vld [vmem:[#allocation9 + $0xa18] sm:$0xff]  ;;  %v11588_v12 = vcombine.high %v1686_v20, %v1690_v4 }
 0x3e9   :  { %8620 = vmatprep.subr.bf16.mxu1 %v11542_v8  ;;  %v1691_v9 = vld [vmem:[#allocation9 + $0xa38] sm:$0xff]  ;;  %v11579_v8 = vcombine.low %v1678_v29, %v1682_v55 }
 0x3ea   :  { %v11590_v41 = vcombine.high %v1687_v7, %v1691_v9  ;;  %v11589_v18 = vcombine.low %v1687_v7, %v1691_v9  ;;  %v1734_v9 = vld [vmem:[#allocation9 + $0xb90] sm:$0xff] }
 0x3eb   :  { %8293 = vmatpush1.bf16.msra.mxu0 %v11539_v1  ;;  %v1698_v1 = vld [vmem:[#allocation9 + $0xa70] sm:$0xff] }
 0x3ec   :  { %8621 = vmatpush1.bf16.msra.mxu1 %v11541_v31  ;;  %8294 = vmatprep.subr.bf16.mxu0 %v11548_v17  ;;  %v1695_v31 = vld [vmem:[#allocation9 + $0xa58] sm:$0xff]  ;;  %v11596_v40 = vcombine.high %v1694_v14, %v1698_v1 }
 0x3ed   :  { %8622 = vmatprep.subr.bf16.mxu1 %v11550_v42  ;;  %v1699_v17 = vld [vmem:[#allocation9 + $0xa78] sm:$0xff]  ;;  %v11587_v42 = vcombine.low %v1686_v20, %v1690_v4 }
 0x3ee   :  { %v11598_v38 = vcombine.high %v1695_v31, %v1699_v17  ;;  %v11597_v27 = vcombine.low %v1695_v31, %v1699_v17  ;;  %v1742_v17 = vld [vmem:[#allocation9 + $0xbd0] sm:$0xff] }
 0x3ef   :  { %8295 = vmatpush1.bf16.msra.mxu0 %v11547_v48  ;;  %v1706_v48 = vld [vmem:[#allocation9 + $0xab0] sm:$0xff] }
 0x3f0   :  { %8623 = vmatpush1.bf16.msra.mxu1 %v11549_v47  ;;  %8296 = vmatprep.subr.bf16.mxu0 %v11556_v6  ;;  %v1703_v47 = vld [vmem:[#allocation9 + $0xa98] sm:$0xff]  ;;  %v11604_v15 = vcombine.high %v1702_v24, %v1706_v48 }
 0x3f1   :  { %8624 = vmatprep.subr.bf16.mxu1 %v11558_v60  ;;  %v1707_v6 = vld [vmem:[#allocation9 + $0xab8] sm:$0xff]  ;;  %v11595_v60 = vcombine.low %v1694_v14, %v1698_v1 }
 0x3f2   :  { %v11606_v28 = vcombine.high %v1703_v47, %v1707_v6  ;;  %v11605_v39 = vcombine.low %v1703_v47, %v1707_v6  ;;  %v1750_v6 = vld [vmem:[#allocation9 + $0xc10] sm:$0xff] }
 0x3f3   :  { %8297 = vmatpush1.bf16.msra.mxu0 %v11555_v32  ;;  %v1714_v32 = vld [vmem:[#allocation9 + $0xaf0] sm:$0xff] }
 0x3f4   :  { %8625 = vmatpush1.bf16.msra.mxu1 %v11557_v33  ;;  %8298 = vmatprep.subr.bf16.mxu0 %v11564_v63  ;;  %v1711_v33 = vld [vmem:[#allocation9 + $0xad8] sm:$0xff]  ;;  %v11612_v36 = vcombine.high %v1710_v30, %v1714_v32 }
 0x3f5   :  { %8626 = vmatprep.subr.bf16.mxu1 %v11566_v35  ;;  %v1715_v63 = vld [vmem:[#allocation9 + $0xaf8] sm:$0xff]  ;;  %v11603_v35 = vcombine.low %v1702_v24, %v1706_v48 }
 0x3f6   :  { %v11614_v44 = vcombine.high %v1711_v33, %v1715_v63  ;;  %v11613_v29 = vcombine.low %v1711_v33, %v1715_v63  ;;  %v1758_v63 = vld [vmem:[#allocation9 + $0xc50] sm:$0xff] }
 0x3f7   :  { %8299 = vmatpush1.bf16.msra.mxu0 %v11563_v13  ;;  %v1722_v13 = vld [vmem:[#allocation9 + $0xb30] sm:$0xff] }
 0x3f8   :  { %8627 = vmatpush1.bf16.msra.mxu1 %v11565_v0  ;;  %8300 = vmatprep.subr.bf16.mxu0 %v11572_v52  ;;  %v1719_v0 = vld [vmem:[#allocation9 + $0xb18] sm:$0xff]  ;;  %v11620_v55 = vcombine.high %v1718_v45, %v1722_v13 }
 0x3f9   :  { %8628 = vmatprep.subr.bf16.mxu1 %v11574_v54  ;;  %v1723_v52 = vld [vmem:[#allocation9 + $0xb38] sm:$0xff]  ;;  %v11611_v54 = vcombine.low %v1710_v30, %v1714_v32 }
 0x3fa   :  { %v11622_v56 = vcombine.high %v1719_v0, %v1723_v52  ;;  %v11621_v20 = vcombine.low %v1719_v0, %v1723_v52  ;;  %v1766_v0 = vld [vmem:[#allocation9 + $0xc90] sm:$0xff] }
 0x3fb   :  { %8301 = vmatpush1.bf16.msra.mxu0 %v11571_v57  ;;  %v1730_v57 = vld [vmem:[#allocation9 + $0xb70] sm:$0xff] }
 0x3fc   :  { %8629 = vmatpush1.bf16.msra.mxu1 %v11573_v58  ;;  %8302 = vmatprep.subr.bf16.mxu0 %v11580_v61  ;;  %v1727_v58 = vld [vmem:[#allocation9 + $0xb58] sm:$0xff]  ;;  %v11628_v4 = vcombine.high %v1726_v11, %v1730_v57  ;;  %v1770_v52 = vld [vmem:[#allocation9 + $0xcb0] sm:$0xff] }
 0x3fd   :  { %8630 = vmatprep.subr.bf16.mxu1 %v11582_v2  ;;  %v1731_v61 = vld [vmem:[#allocation9 + $0xb78] sm:$0xff]  ;;  %v11619_v2 = vcombine.low %v1718_v45, %v1722_v13 }
 0x3fe   :  { %v11630_v7 = vcombine.high %v1727_v58, %v1731_v61  ;;  %v11629_v14 = vcombine.low %v1727_v58, %v1731_v61  ;;  %v1774_v61 = vld [vmem:[#allocation9 + $0xcd0] sm:$0xff] }
 0x3ff   :  { %8303 = vmatpush1.bf16.msra.mxu0 %v11579_v8  ;;  %v1738_v8 = vld [vmem:[#allocation9 + $0xbb0] sm:$0xff] }
 0x400   :  { %8631 = vmatpush1.bf16.msra.mxu1 %v11581_v49  ;;  %8304 = vmatprep.subr.bf16.mxu0 %v11588_v12  ;;  %v1735_v49 = vld [vmem:[#allocation9 + $0xb98] sm:$0xff]  ;;  %v11636_v1 = vcombine.high %v1734_v9, %v1738_v8 }
 0x401   :  { %8632 = vmatprep.subr.bf16.mxu1 %v11590_v41  ;;  %v1739_v12 = vld [vmem:[#allocation9 + $0xbb8] sm:$0xff]  ;;  %v11627_v41 = vcombine.low %v1726_v11, %v1730_v57  ;;  %v11668_v57 = vcombine.high %v1766_v0, %v1770_v52 }
 0x402   :  { %v11638_v31 = vcombine.high %v1735_v49, %v1739_v12  ;;  %v11637_v24 = vcombine.low %v1735_v49, %v1739_v12  ;;  %v1782_v49 = vld [vmem:[#allocation9 + $0xd10] sm:$0xff] }
 0x403   :  { %8305 = vmatpush1.bf16.msra.mxu0 %v11587_v42  ;;  %v1746_v42 = vld [vmem:[#allocation9 + $0xbf0] sm:$0xff] }
 0x404   :  { %8633 = vmatpush1.bf16.msra.mxu1 %v11589_v18  ;;  %8306 = vmatprep.subr.bf16.mxu0 %v11596_v40  ;;  %v1743_v18 = vld [vmem:[#allocation9 + $0xbd8] sm:$0xff]  ;;  %v11644_v48 = vcombine.high %v1742_v17, %v1746_v42  ;;  %v1786_v12 = vld [vmem:[#allocation9 + $0xd30] sm:$0xff] }
 0x405   :  { %8634 = vmatprep.subr.bf16.mxu1 %v11598_v38  ;;  %v1747_v40 = vld [vmem:[#allocation9 + $0xbf8] sm:$0xff]  ;;  %v11635_v38 = vcombine.low %v1734_v9, %v1738_v8 }
 0x406   :  { %v11646_v47 = vcombine.high %v1743_v18, %v1747_v40  ;;  %v11645_v30 = vcombine.low %v1743_v18, %v1747_v40  ;;  %v1794_v18 = vld [vmem:[#allocation9 + $0xd70] sm:$0xff]  ;;  %v1791_v40 = vld [vmem:[#allocation9 + $0xd58] sm:$0xff] }
 0x407   :  { %8307 = vmatpush1.bf16.msra.mxu0 %v11595_v60  ;;  %v1754_v60 = vld [vmem:[#allocation9 + $0xc30] sm:$0xff] }
 0x408   :  { %8635 = vmatpush1.bf16.msra.mxu1 %v11597_v27  ;;  %8308 = vmatprep.subr.bf16.mxu0 %v11604_v15  ;;  %v1751_v27 = vld [vmem:[#allocation9 + $0xc18] sm:$0xff]  ;;  %v11652_v32 = vcombine.high %v1750_v6, %v1754_v60 }
 0x409   :  { %8636 = vmatprep.subr.bf16.mxu1 %v11606_v28  ;;  %v1755_v15 = vld [vmem:[#allocation9 + $0xc38] sm:$0xff]  ;;  %v11643_v28 = vcombine.low %v1742_v17, %v1746_v42  ;;  %v1790_v42 = vld [vmem:[#allocation9 + $0xd50] sm:$0xff] }
 0x40a   :  { %v11654_v33 = vcombine.high %v1751_v27, %v1755_v15  ;;  %v11653_v45 = vcombine.low %v1751_v27, %v1755_v15  ;;  %v1802_v27 = vld [vmem:[#allocation9 + $0xdb0] sm:$0xff]  ;;  %v1799_v15 = vld [vmem:[#allocation9 + $0xd98] sm:$0xff] }
 0x40b   :  { %8309 = vmatpush1.bf16.msra.mxu0 %v11603_v35  ;;  %v1762_v35 = vld [vmem:[#allocation9 + $0xc70] sm:$0xff] }
 0x40c   :  { %8637 = vmatpush1.bf16.msra.mxu1 %v11605_v39  ;;  %8310 = vmatprep.subr.bf16.mxu0 %v11612_v36  ;;  %v11651_v39 = vcombine.low %v1750_v6, %v1754_v60  ;;  %v1759_v36 = vld [vmem:[#allocation9 + $0xc58] sm:$0xff]  ;;  %v11660_v13 = vcombine.high %v1758_v63, %v1762_v35  ;;  %v1798_v60 = vld [vmem:[#allocation9 + $0xd90] sm:$0xff] }
 0x40d   :  { %8638 = vmatprep.subr.bf16.mxu1 %v11614_v44  ;;  %v1763_v44 = vld [vmem:[#allocation9 + $0xc78] sm:$0xff] }
 0x40e   :  { %v11661_v11 = vcombine.low %v1759_v36, %v1763_v44 }
 0x40f   :  { %8311 = vmatpush1.bf16.msra.mxu0 %v11611_v54  ;;  %v11662_v54 = vcombine.high %v1759_v36, %v1763_v44  ;;  %v1810_v36 = vld [vmem:[#allocation9 + $0xdf0] sm:$0xff] }
 0x410   :  { %8639 = vmatpush1.bf16.msra.mxu1 %v11613_v29  ;;  %8312 = vmatprep.subr.bf16.mxu0 %v11620_v55  ;;  %v1767_v29 = vld [vmem:[#allocation9 + $0xc98] sm:$0xff] }
 0x411   :  { %8640 = vmatprep.subr.bf16.mxu1 %v11622_v56  ;;  %v1771_v55 = vld [vmem:[#allocation9 + $0xcb8] sm:$0xff]  ;;  %v11659_v56 = vcombine.low %v1758_v63, %v1762_v35 }
 0x412   :  { %v11670_v58 = vcombine.high %v1767_v29, %v1771_v55 }
 0x413   :  { %8313 = vmatpush1.bf16.msra.mxu0 %v11619_v2  ;;  %v1778_v2 = vld [vmem:[#allocation9 + $0xcf0] sm:$0xff] }
 0x414   :  { %8641 = vmatpush1.bf16.msra.mxu1 %v11621_v20  ;;  %8314 = vmatprep.subr.bf16.mxu0 %v11628_v4  ;;  %v1775_v20 = vld [vmem:[#allocation9 + $0xcd8] sm:$0xff]  ;;  %v11676_v9 = vcombine.high %v1774_v61, %v1778_v2 }
 0x415   :  { %8642 = vmatprep.subr.bf16.mxu1 %v11630_v7  ;;  %v1779_v4 = vld [vmem:[#allocation9 + $0xcf8] sm:$0xff]  ;;  %v11667_v7 = vcombine.low %v1766_v0, %v1770_v52 }
 0x416   :  { %v11678_v8 = vcombine.high %v1775_v20, %v1779_v4  ;;  %v1811_v0 = vld [vmem:[#allocation9 + $0xdf8] sm:$0xff] }
 0x417   :  { %8315 = vmatpush1.bf16.msra.mxu0 %v11627_v41  ;;  %v1783_v41 = vld [vmem:[#allocation9 + $0xd18] sm:$0xff] }
 0x418   :  { %8643 = vmatpush1.bf16.msra.mxu1 %v11629_v14  ;;  %8316 = vmatprep.subr.bf16.mxu0 %v11636_v1  ;;  %v1787_v14 = vld [vmem:[#allocation9 + $0xd38] sm:$0xff]  ;;  %v11677_v1 = vcombine.low %v1775_v20, %v1779_v4  ;;  %v1818_v20 = vld [vmem:[#allocation9 + $0xe30] sm:$0xff] }
 0x419   :  { %8644 = vmatprep.subr.bf16.mxu1 %v11638_v31  ;;  %v11684_v31 = vcombine.high %v1782_v49, %v1786_v12  ;;  %v11686_v17 = vcombine.high %v1783_v41, %v1787_v14  ;;  %v1815_v4 = vld [vmem:[#allocation9 + $0xe18] sm:$0xff] }
 0x41b   :  { %8317 = vmatpush1.bf16.msra.mxu0 %v11635_v38  ;;  %v1795_v38 = vld [vmem:[#allocation9 + $0xd78] sm:$0xff] }
 0x41c   :  { %8645 = vmatpush1.bf16.msra.mxu1 %v11637_v24  ;;  %8318 = vmatprep.subr.bf16.mxu0 %v11644_v48  ;;  %v11683_v24 = vcombine.low %v1782_v49, %v1786_v12  ;;  %v11685_v48 = vcombine.low %v1783_v41, %v1787_v14  ;;  %v11694_v6 = vcombine.high %v1791_v40, %v1795_v38  ;;  %v1822_v12 = vld [vmem:[#allocation9 + $0xe50] sm:$0xff]  ;;  %v1823_v14 = vld [vmem:[#allocation9 + $0xe58] sm:$0xff] }
 0x41d   :  { %8646 = vmatprep.subr.bf16.mxu1 %v11646_v47  ;;  %v11692_v47 = vcombine.high %v1790_v42, %v1794_v18  ;;  %v1826_v41 = vld [vmem:[#allocation9 + $0xe70] sm:$0xff] }
 0x41f   :  { %8319 = vmatpush1.bf16.msra.mxu0 %v11643_v28  ;;  %v1803_v28 = vld [vmem:[#allocation9 + $0xdb8] sm:$0xff] }
 0x420   :  { %8647 = vmatpush1.bf16.msra.mxu1 %v11645_v30  ;;  %8329 = vmatprep.subr.bf16.mxu0 %v11652_v32  ;;  %v11691_v30 = vcombine.low %v1790_v42, %v1794_v18  ;;  %v11693_v32 = vcombine.low %v1791_v40, %v1795_v38  ;;  %v11702_v35 = vcombine.high %v1799_v15, %v1803_v28  ;;  %v1830_v18 = vld [vmem:[#allocation9 + $0xe90] sm:$0xff]  ;;  %v1831_v38 = vld [vmem:[#allocation9 + $0xe98] sm:$0xff] }
 0x421   :  { %8657 = vmatprep.subr.bf16.mxu1 %v11654_v33  ;;  %v11700_v33 = vcombine.high %v1798_v60, %v1802_v27  ;;  %v1834_v40 = vld [vmem:[#allocation9 + $0xeb0] sm:$0xff] }
 0x422   :  { %8321 = vmatmul.mubr.bf16.vlgmr.msra.gmra.mrb[20].mxu0 %v13750_v16 }
 0x423   :  { %8649 = vmatmul.mubr.bf16.vlgmr.msra.gmra.mrb[20].mxu1 %v13750_v16  ;;  %8330 = vmatpush1.bf16.msra.mxu0 %v11651_v39  ;;  %v11669_v16 = vcombine.low %v1767_v29, %v1771_v55  ;;  %v1806_v39 = vld [vmem:[#allocation9 + $0xdd0] sm:$0xff]  ;;  %v11699_v29 = vcombine.low %v1798_v60, %v1802_v27 }
 0x424   :  { %8361 = vmatprep.mubr.bf16.mxu0 %v13752_v22  ;;  %8658 = vmatpush1.bf16.msra.mxu1 %v11653_v45  ;;  %v1838_v27 = vld [vmem:[#allocation9 + $0xed0] sm:$0xff] }
 0x425   :  { %8689 = vmatprep.mubr.bf16.mxu1 %v13752_v22  ;;  %8331 = vmatprep.subr.bf16.mxu0 %v11660_v13  ;;  %v11675_v22 = vcombine.low %v1774_v61, %v1778_v2  ;;  %v1807_v13 = vld [vmem:[#allocation9 + $0xdd8] sm:$0xff]  ;;  %v1814_v2 = vld [vmem:[#allocation9 + $0xe10] sm:$0xff] }
 0x426   :  { %8659 = vmatprep.subr.bf16.mxu1 %v11662_v54  ;;  %v11710_v61 = vcombine.high %v1807_v13, %v1811_v0 }
 0x427   :  { %8332 = vmatpush1.bf16.msra.mxu0 %v11659_v56 }
 0x428   :  { %8660 = vmatpush1.bf16.msra.mxu1 %v11661_v11  ;;  %8333 = vmatprep.subr.bf16.mxu0 %v11668_v57  ;;  %v11701_v11 = vcombine.low %v1799_v15, %v1803_v28  ;;  %v11708_v57 = vcombine.high %v1806_v39, %v1810_v36  ;;  %v1842_v15 = vld [vmem:[#allocation9 + $0xef0] sm:$0xff]  ;;  %v1839_v28 = vld [vmem:[#allocation9 + $0xed8] sm:$0xff] }
 0x429   :  { %8661 = vmatprep.subr.bf16.mxu1 %v11670_v58 }
 0x42b   :  { %8334 = vmatpush1.bf16.msra.mxu0 %v11667_v7  ;;  %v1819_v7 = vld [vmem:[#allocation9 + $0xe38] sm:$0xff] }
 0x42c   :  { %8662 = vmatpush1.bf16.msra.mxu1 %v11669_v16  ;;  %8335 = vmatprep.subr.bf16.mxu0 %v11676_v9  ;;  %v11707_v16 = vcombine.low %v1806_v39, %v1810_v36  ;;  %v11709_v9 = vcombine.low %v1807_v13, %v1811_v0  ;;  %v11718_v49 = vcombine.high %v1815_v4, %v1819_v7  ;;  %v1846_v36 = vld [vmem:[#allocation9 + $0xf10] sm:$0xff]  ;;  %v1847_v0 = vld [vmem:[#allocation9 + $0xf18] sm:$0xff] }
 0x42d   :  { %8663 = vmatprep.subr.bf16.mxu1 %v11678_v8  ;;  %v11716_v8 = vcombine.high %v1814_v2, %v1818_v20  ;;  %v1850_v13 = vld [vmem:[#allocation9 + $0xf30] sm:$0xff] }
 0x42f   :  { %8336 = vmatpush1.bf16.msra.mxu0 %v11675_v22  ;;  %v1827_v22 = vld [vmem:[#allocation9 + $0xe78] sm:$0xff] }
 0x430   :  { %8664 = vmatpush1.bf16.msra.mxu1 %v11677_v1  ;;  %8337 = vmatprep.subr.bf16.mxu0 %v11684_v31  ;;  %v11715_v1 = vcombine.low %v1814_v2, %v1818_v20  ;;  %v11717_v31 = vcombine.low %v1815_v4, %v1819_v7  ;;  %v11726_v42 = vcombine.high %v1823_v14, %v1827_v22  ;;  %v1859_v2 = vld [vmem:[#allocation9 + $0xf78] sm:$0xff] }
 0x431   :  { %8665 = vmatprep.subr.bf16.mxu1 %v11686_v17  ;;  %v11724_v17 = vcombine.high %v1822_v12, %v1826_v41  ;;  %v11747_v20 = vcombine.low %v1846_v36, %v1850_v13 }
 0x433   :  { %8338 = vmatpush1.bf16.msra.mxu0 %v11683_v24  ;;  %v1835_v24 = vld [vmem:[#allocation9 + $0xeb8] sm:$0xff] }
 0x434   :  { %8666 = vmatpush1.bf16.msra.mxu1 %v11685_v48  ;;  %8339 = vmatprep.subr.bf16.mxu0 %v11692_v47  ;;  %v11723_v48 = vcombine.low %v1822_v12, %v1826_v41  ;;  %v11725_v47 = vcombine.low %v1823_v14, %v1827_v22  ;;  %v11734_v60 = vcombine.high %v1831_v38, %v1835_v24  ;;  %v1867_v12 = vld [vmem:[#allocation9 + $0xfb8] sm:$0xff] }
 0x435   :  { %v13821_v63 = vpop.f32.mrb[16].mxu0  ;;  %8667 = vmatprep.subr.bf16.mxu1 %v11694_v6  ;;  %v11732_v6 = vcombine.high %v1830_v18, %v1834_v40 }
 0x436   :  { %v13823_v44 = vpop.f32.mrb[16].mxu1  ;;  %v13825_v45 = vpop.f32.mrb[17].mxu0 }
 0x437   :  { %v13827_v52 = vpop.f32.mrb[17].mxu1  ;;  %v7875_v54 = vpop.f32.mrb[18].mxu0  ;;  %8340 = vmatpush1.bf16.msra.mxu0 %v11691_v30  ;;  %v1843_v30 = vld [vmem:[#allocation9 + $0xef8] sm:$0xff] }
 0x438   :  { %v8203_v55 = vpop.f32.mrb[18].mxu1  ;;  %8668 = vmatpush1.bf16.msra.mxu1 %v11693_v32  ;;  %v7876_v56 = vpop.f32.mrb[19].mxu0  ;;  %8341 = vmatprep.subr.bf16.mxu0 %v11700_v33  ;;  %v11731_v32 = vcombine.low %v1830_v18, %v1834_v40  ;;  %v11733_v33 = vcombine.low %v1831_v38, %v1835_v24  ;;  %v11742_v39 = vcombine.high %v1839_v28, %v1843_v30  ;;  %v1851_v54 = vld [vmem:[#allocation9 + $0xf38] sm:$0xff] }
 0x439   :  { %v8204_v58 = vpop.f32.mrb[19].mxu1  ;;  %8669 = vmatprep.subr.bf16.mxu1 %v11702_v35  ;;  %v11740_v35 = vcombine.high %v1838_v27, %v1842_v15  ;;  %v11741_v55 = vcombine.low %v1839_v28, %v1843_v30  ;;  %v11748_v56 = vcombine.high %v1846_v36, %v1850_v13  ;;  %v11749_v4 = vcombine.low %v1847_v0, %v1851_v54  ;;  %v1875_v18 = vld [vmem:[#allocation9 + $0xff8] sm:$0xff] }
 0x43a   :  { %v1858_v58 = vld [vmem:[#allocation9 + $0xf70] sm:$0xff]  ;;  %v1887_v36 = vld [vmem:[#allocation9 + $0x1058] sm:$0xff] }
 0x43b   :  { %8342 = vmatpush1.bf16.msra.mxu0 %v11699_v29  ;;  %v11739_v29 = vcombine.low %v1838_v27, %v1842_v15  ;;  %v1883_v27 = vld [vmem:[#allocation9 + $0x1038] sm:$0xff] }
 0x43c   :  { %8670 = vmatpush1.bf16.msra.mxu1 %v11701_v11  ;;  %8343 = vmatprep.subr.bf16.mxu0 %v11708_v57  ;;  %v11750_v11 = vcombine.high %v1847_v0, %v1851_v54  ;;  %v1854_v57 = vld [vmem:[#allocation9 + $0xf50] sm:$0xff]  ;;  %v1891_v13 = vld [vmem:[#allocation9 + $0x1078] sm:$0xff] }
 0x43d   :  { %8671 = vmatprep.subr.bf16.mxu1 %v11710_v61  ;;  %v1855_v61 = vld [vmem:[#allocation9 + $0xf58] sm:$0xff]  ;;  %v11756_v7 = vcombine.high %v1854_v57, %v1858_v58  ;;  %v11755_v41 = vcombine.low %v1854_v57, %v1858_v58 }
 0x43e   :  { %v11757_v14 = vcombine.low %v1855_v61, %v1859_v2  ;;  %v1899_v57 = vld [vmem:[#allocation9 + $0x10b8] sm:$0xff] }
 0x43f   :  { %8344 = vmatpush1.bf16.msra.mxu0 %v11707_v16  ;;  %v11758_v16 = vcombine.high %v1855_v61, %v1859_v2  ;;  %v11789_v61 = vcombine.low %v1887_v36, %v1891_v13 }
 0x440   :  { %8672 = vmatpush1.bf16.msra.mxu1 %v11709_v9  ;;  %8345 = vmatprep.subr.bf16.mxu0 %v11716_v8  ;;  %v1862_v9 = vld [vmem:[#allocation9 + $0xf90] sm:$0xff] }
 0x441   :  { %8673 = vmatprep.subr.bf16.mxu1 %v11718_v49  ;;  %v1866_v8 = vld [vmem:[#allocation9 + $0xfb0] sm:$0xff]  ;;  %v1863_v49 = vld [vmem:[#allocation9 + $0xf98] sm:$0xff] }
 0x442   :  { %v11764_v22 = vcombine.high %v1862_v9, %v1866_v8  ;;  %v11763_v40 = vcombine.low %v1862_v9, %v1866_v8  ;;  %v11765_v38 = vcombine.low %v1863_v49, %v1867_v12  ;;  %v1907_v9 = vld [vmem:[#allocation9 + $0x10f8] sm:$0xff] }
 0x443   :  { %8346 = vmatpush1.bf16.msra.mxu0 %v11715_v1  ;;  %v11766_v1 = vcombine.high %v1863_v49, %v1867_v12 }
 0x444   :  { %8674 = vmatpush1.bf16.msra.mxu1 %v11717_v31  ;;  %8347 = vmatprep.subr.bf16.mxu0 %v11724_v17  ;;  %v1870_v31 = vld [vmem:[#allocation9 + $0xfd0] sm:$0xff] }
 0x445   :  { %8675 = vmatprep.subr.bf16.mxu1 %v11726_v42  ;;  %v1874_v17 = vld [vmem:[#allocation9 + $0xff0] sm:$0xff]  ;;  %v1871_v42 = vld [vmem:[#allocation9 + $0xfd8] sm:$0xff] }
 0x446   :  { %v11772_v24 = vcombine.high %v1870_v31, %v1874_v17  ;;  %v11771_v15 = vcombine.low %v1870_v31, %v1874_v17  ;;  %v11773_v28 = vcombine.low %v1871_v42, %v1875_v18 }
 0x447   :  { %8348 = vmatpush1.bf16.msra.mxu0 %v11723_v48  ;;  %v11774_v48 = vcombine.high %v1871_v42, %v1875_v18  ;;  %v1918_v18 = vld [vmem:[#allocation9 + $0x1150] sm:$0xff] }
 0x448   :  { %8676 = vmatpush1.bf16.msra.mxu1 %v11725_v47  ;;  %8349 = vmatprep.subr.bf16.mxu0 %v11732_v6  ;;  %v1878_v47 = vld [vmem:[#allocation9 + $0x1010] sm:$0xff] }
 0x449   :  { %8677 = vmatprep.subr.bf16.mxu1 %v11734_v60  ;;  %v1882_v6 = vld [vmem:[#allocation9 + $0x1030] sm:$0xff]  ;;  %v1879_v60 = vld [vmem:[#allocation9 + $0x1018] sm:$0xff] }
 0x44a   :  { %v11780_v30 = vcombine.high %v1878_v47, %v1882_v6  ;;  %v11781_v0 = vcombine.low %v1879_v60, %v1883_v27 }
 0x44b   :  { %8350 = vmatpush1.bf16.msra.mxu0 %v11731_v32  ;;  %v11782_v32 = vcombine.high %v1879_v60, %v1883_v27  ;;  %v1926_v27 = vld [vmem:[#allocation9 + $0x1190] sm:$0xff] }
 0x44c   :  { %8678 = vmatpush1.bf16.msra.mxu1 %v11733_v33  ;;  %8351 = vmatprep.subr.bf16.mxu0 %v11740_v35  ;;  %v1886_v33 = vld [vmem:[#allocation9 + $0x1050] sm:$0xff] }
 0x44d   :  { %8679 = vmatprep.subr.bf16.mxu1 %v11742_v39  ;;  %v1890_v35 = vld [vmem:[#allocation9 + $0x1070] sm:$0xff]  ;;  %v11779_v39 = vcombine.low %v1878_v47, %v1882_v6 }
 0x44e   :  { %v11788_v54 = vcombine.high %v1886_v33, %v1890_v35  ;;  %v11787_v58 = vcombine.low %v1886_v33, %v1890_v35 }
 0x44f   :  { %8352 = vmatpush1.bf16.msra.mxu0 %v11739_v29  ;;  %v1894_v29 = vld [vmem:[#allocation9 + $0x1090] sm:$0xff] }
 0x450   :  { %8680 = vmatpush1.bf16.msra.mxu1 %v11741_v55  ;;  %8353 = vmatprep.subr.bf16.mxu0 %v11748_v56  ;;  %v1898_v55 = vld [vmem:[#allocation9 + $0x10b0] sm:$0xff]  ;;  %v11790_v56 = vcombine.high %v1887_v36, %v1891_v13 }
 0x451   :  { %8681 = vmatprep.subr.bf16.mxu1 %v11750_v11  ;;  %v1895_v11 = vld [vmem:[#allocation9 + $0x1098] sm:$0xff]  ;;  %v11796_v2 = vcombine.high %v1894_v29, %v1898_v55  ;;  %v11795_v8 = vcombine.low %v1894_v29, %v1898_v55  ;;  %v1934_v36 = vld [vmem:[#allocation9 + $0x11d0] sm:$0xff] }
 0x452   :  { %v1938_v13 = vld [vmem:[#allocation9 + $0x11f0] sm:$0xff] }
 0x453   :  { %8354 = vmatpush1.bf16.msra.mxu0 %v11747_v20  ;;  %v11798_v20 = vcombine.high %v1895_v11, %v1899_v57 }
 0x454   :  { %8682 = vmatpush1.bf16.msra.mxu1 %v11749_v4  ;;  %8355 = vmatprep.subr.bf16.mxu0 %v11756_v7  ;;  %v1902_v4 = vld [vmem:[#allocation9 + $0x10d0] sm:$0xff] }
 0x455   :  { %8683 = vmatprep.subr.bf16.mxu1 %v11758_v16  ;;  %v1906_v7 = vld [vmem:[#allocation9 + $0x10f0] sm:$0xff]  ;;  %v1903_v16 = vld [vmem:[#allocation9 + $0x10d8] sm:$0xff] }
 0x456   :  { %v11804_v49 = vcombine.high %v1902_v4, %v1906_v7  ;;  %v11806_v12 = vcombine.high %v1903_v16, %v1907_v9  ;;  %v11805_v31 = vcombine.low %v1903_v16, %v1907_v9  ;;  %v1950_v9 = vld [vmem:[#allocation9 + $0x1250] sm:$0xff] }
 0x457   :  { %8356 = vmatpush1.bf16.msra.mxu0 %v11755_v41  ;;  %v1910_v41 = vld [vmem:[#allocation9 + $0x1110] sm:$0xff] }
 0x458   :  { %8684 = vmatpush1.bf16.msra.mxu1 %v11757_v14  ;;  %8357 = vmatprep.subr.bf16.mxu0 %v11764_v22  ;;  %v1914_v14 = vld [vmem:[#allocation9 + $0x1130] sm:$0xff]  ;;  %v1911_v22 = vld [vmem:[#allocation9 + $0x1118] sm:$0xff] }
 0x459   :  { %8685 = vmatprep.subr.bf16.mxu1 %v11766_v1  ;;  %v1915_v1 = vld [vmem:[#allocation9 + $0x1138] sm:$0xff]  ;;  %v11812_v17 = vcombine.high %v1910_v41, %v1914_v14 }
 0x45a   :  { %v11814_v42 = vcombine.high %v1911_v22, %v1915_v1  ;;  %v11813_v47 = vcombine.low %v1911_v22, %v1915_v1  ;;  %v1958_v1 = vld [vmem:[#allocation9 + $0x1290] sm:$0xff] }
 0x45b   :  { %8358 = vmatpush1.bf16.msra.mxu0 %v11763_v40  ;;  %v1922_v40 = vld [vmem:[#allocation9 + $0x1170] sm:$0xff] }
 0x45c   :  { %8686 = vmatpush1.bf16.msra.mxu1 %v11765_v38  ;;  %8359 = vmatprep.subr.bf16.mxu0 %v11772_v24  ;;  %v1919_v38 = vld [vmem:[#allocation9 + $0x1158] sm:$0xff]  ;;  %v11820_v6 = vcombine.high %v1918_v18, %v1922_v40 }
 0x45d   :  { %8687 = vmatprep.subr.bf16.mxu1 %v11774_v48  ;;  %v1923_v24 = vld [vmem:[#allocation9 + $0x1178] sm:$0xff]  ;;  %v11811_v48 = vcombine.low %v1910_v41, %v1914_v14 }
 0x45e   :  { %v11822_v60 = vcombine.high %v1919_v38, %v1923_v24  ;;  %v11821_v33 = vcombine.low %v1919_v38, %v1923_v24  ;;  %v1966_v24 = vld [vmem:[#allocation9 + $0x12d0] sm:$0xff] }
 0x45f   :  { %8360 = vmatpush1.bf16.msra.mxu0 %v11771_v15  ;;  %v1930_v15 = vld [vmem:[#allocation9 + $0x11b0] sm:$0xff] }
 0x460   :  { %8688 = vmatpush1.bf16.msra.mxu1 %v11773_v28  ;;  %8370 = vmatprep.subr.bf16.mxu0 %v11780_v30  ;;  %v1927_v28 = vld [vmem:[#allocation9 + $0x1198] sm:$0xff]  ;;  %v11828_v35 = vcombine.high %v1926_v27, %v1930_v15  ;;  %v11827_v29 = vcombine.low %v1926_v27, %v1930_v15 }
 0x461   :  { %8698 = vmatprep.subr.bf16.mxu1 %v11782_v32  ;;  %v1931_v30 = vld [vmem:[#allocation9 + $0x11b8] sm:$0xff]  ;;  %v11819_v32 = vcombine.low %v1918_v18, %v1922_v40 }
 0x462   :  { %8362 = vmatmul.mubr.bf16.vlgmr.msra.gmra.mrb[20].mxu0 %v13763_v46  ;;  %v11829_v55 = vcombine.low %v1927_v28, %v1931_v30 }
 0x463   :  { %8690 = vmatmul.mubr.bf16.vlgmr.msra.gmra.mrb[20].mxu1 %v13763_v46  ;;  %8371 = vmatpush1.bf16.msra.mxu0 %v11779_v39  ;;  %v11797_v46 = vcombine.low %v1895_v11, %v1899_v57  ;;  %v11830_v39 = vcombine.high %v1927_v28, %v1931_v30  ;;  %v1942_v57 = vld [vmem:[#allocation9 + $0x1210] sm:$0xff] }
 0x464   :  { %8402 = vmatprep.mubr.bf16.mxu0 %v13765_v53  ;;  %8699 = vmatpush1.bf16.msra.mxu1 %v11781_v0  ;;  %v1935_v0 = vld [vmem:[#allocation9 + $0x11d8] sm:$0xff]  ;;  %v1974_v30 = vld [vmem:[#allocation9 + $0x1310] sm:$0xff] }
 0x465   :  { %8730 = vmatprep.mubr.bf16.mxu1 %v13765_v53  ;;  %8372 = vmatprep.subr.bf16.mxu0 %v11788_v54  ;;  %v11803_v53 = vcombine.low %v1902_v4, %v1906_v7  ;;  %v1939_v54 = vld [vmem:[#allocation9 + $0x11f8] sm:$0xff] }
 0x466   :  { %8700 = vmatprep.subr.bf16.mxu1 %v11790_v56  ;;  %v11836_v56 = vcombine.high %v1934_v36, %v1938_v13  ;;  %v11838_v11 = vcombine.high %v1935_v0, %v1939_v54  ;;  %v11837_v4 = vcombine.low %v1935_v0, %v1939_v54  ;;  %v1982_v54 = vld [vmem:[#allocation9 + $0x1350] sm:$0xff] }
 0x467   :  { %8373 = vmatpush1.bf16.msra.mxu0 %v11787_v58  ;;  %v1946_v58 = vld [vmem:[#allocation9 + $0x1230] sm:$0xff] }
 0x468   :  { %8701 = vmatpush1.bf16.msra.mxu1 %v11789_v61  ;;  %8374 = vmatprep.subr.bf16.mxu0 %v11796_v2  ;;  %v1943_v61 = vld [vmem:[#allocation9 + $0x1218] sm:$0xff]  ;;  %v11844_v7 = vcombine.high %v1942_v57, %v1946_v58 }
 0x469   :  { %8702 = vmatprep.subr.bf16.mxu1 %v11798_v20  ;;  %v1947_v2 = vld [vmem:[#allocation9 + $0x1238] sm:$0xff]  ;;  %v11835_v20 = vcombine.low %v1934_v36, %v1938_v13 }
 0x46a   :  { %v11846_v16 = vcombine.high %v1943_v61, %v1947_v2  ;;  %v11845_v41 = vcombine.low %v1943_v61, %v1947_v2  ;;  %v1990_v2 = vld [vmem:[#allocation9 + $0x1390] sm:$0xff] }
 0x46b   :  { %8375 = vmatpush1.bf16.msra.mxu0 %v11795_v8  ;;  %v1954_v8 = vld [vmem:[#allocation9 + $0x1270] sm:$0xff] }
 0x46c   :  { %8703 = vmatpush1.bf16.msra.mxu1 %v11797_v46  ;;  %8376 = vmatprep.subr.bf16.mxu0 %v11804_v49  ;;  %v1951_v46 = vld [vmem:[#allocation9 + $0x1258] sm:$0xff]  ;;  %v11852_v14 = vcombine.high %v1950_v9, %v1954_v8 }
 0x46d   :  { %8704 = vmatprep.subr.bf16.mxu1 %v11806_v12  ;;  %v1955_v49 = vld [vmem:[#allocation9 + $0x1278] sm:$0xff]  ;;  %v11843_v12 = vcombine.low %v1942_v57, %v1946_v58 }
 0x46e   :  { %v11854_v22 = vcombine.high %v1951_v46, %v1955_v49  ;;  %v11853_v18 = vcombine.low %v1951_v46, %v1955_v49  ;;  %v1998_v49 = vld [vmem:[#allocation9 + $0x13d0] sm:$0xff] }
 0x46f   :  { %8377 = vmatpush1.bf16.msra.mxu0 %v11803_v53  ;;  %v1962_v53 = vld [vmem:[#allocation9 + $0x12b0] sm:$0xff] }
 0x470   :  { %8705 = vmatpush1.bf16.msra.mxu1 %v11805_v31  ;;  %8378 = vmatprep.subr.bf16.mxu0 %v11812_v17  ;;  %v1959_v31 = vld [vmem:[#allocation9 + $0x1298] sm:$0xff]  ;;  %v11860_v40 = vcombine.high %v1958_v1, %v1962_v53 }
 0x471   :  { %8706 = vmatprep.subr.bf16.mxu1 %v11814_v42  ;;  %v1963_v17 = vld [vmem:[#allocation9 + $0x12b8] sm:$0xff]  ;;  %v11851_v42 = vcombine.low %v1950_v9, %v1954_v8 }
 0x472   :  { %v11862_v38 = vcombine.high %v1959_v31, %v1963_v17  ;;  %v11861_v27 = vcombine.low %v1959_v31, %v1963_v17  ;;  %v2006_v17 = vld [vmem:[#allocation9 + $0x1410] sm:$0xff] }
 0x473   :  { %8379 = vmatpush1.bf16.msra.mxu0 %v11811_v48  ;;  %v1970_v48 = vld [vmem:[#allocation9 + $0x12f0] sm:$0xff] }
 0x474   :  { %8707 = vmatpush1.bf16.msra.mxu1 %v11813_v47  ;;  %8380 = vmatprep.subr.bf16.mxu0 %v11820_v6  ;;  %v1967_v47 = vld [vmem:[#allocation9 + $0x12d8] sm:$0xff]  ;;  %v11868_v15 = vcombine.high %v1966_v24, %v1970_v48 }
 0x475   :  { %8708 = vmatprep.subr.bf16.mxu1 %v11822_v60  ;;  %v1971_v6 = vld [vmem:[#allocation9 + $0x12f8] sm:$0xff]  ;;  %v11859_v60 = vcombine.low %v1958_v1, %v1962_v53 }
 0x476   :  { %v11870_v28 = vcombine.high %v1967_v47, %v1971_v6  ;;  %v11869_v36 = vcombine.low %v1967_v47, %v1971_v6  ;;  %v2014_v6 = vld [vmem:[#allocation9 + $0x1450] sm:$0xff] }
 0x477   :  { %8381 = vmatpush1.bf16.msra.mxu0 %v11819_v32  ;;  %v1978_v32 = vld [vmem:[#allocation9 + $0x1330] sm:$0xff] }
 0x478   :  { %8709 = vmatpush1.bf16.msra.mxu1 %v11821_v33  ;;  %8382 = vmatprep.subr.bf16.mxu0 %v11828_v35  ;;  %v1975_v33 = vld [vmem:[#allocation9 + $0x1318] sm:$0xff]  ;;  %v11876_v13 = vcombine.high %v1974_v30, %v1978_v32 }
 0x479   :  { %8710 = vmatprep.subr.bf16.mxu1 %v11830_v39  ;;  %v1979_v35 = vld [vmem:[#allocation9 + $0x1338] sm:$0xff]  ;;  %v11867_v39 = vcombine.low %v1966_v24, %v1970_v48 }
 0x47a   :  { %v11878_v0 = vcombine.high %v1975_v33, %v1979_v35  ;;  %v11877_v57 = vcombine.low %v1975_v33, %v1979_v35  ;;  %v2022_v33 = vld [vmem:[#allocation9 + $0x1490] sm:$0xff] }
 0x47b   :  { %8383 = vmatpush1.bf16.msra.mxu0 %v11827_v29  ;;  %v1986_v29 = vld [vmem:[#allocation9 + $0x1370] sm:$0xff] }
 0x47c   :  { %8711 = vmatpush1.bf16.msra.mxu1 %v11829_v55  ;;  %8384 = vmatprep.subr.bf16.mxu0 %v11836_v56  ;;  %v1983_v55 = vld [vmem:[#allocation9 + $0x1358] sm:$0xff]  ;;  %v11884_v58 = vcombine.high %v1982_v54, %v1986_v29  ;;  %v2026_v35 = vld [vmem:[#allocation9 + $0x14b0] sm:$0xff] }
 0x47d   :  { %8712 = vmatprep.subr.bf16.mxu1 %v11838_v11  ;;  %v1987_v56 = vld [vmem:[#allocation9 + $0x1378] sm:$0xff]  ;;  %v11875_v11 = vcombine.low %v1974_v30, %v1978_v32 }
 0x47e   :  { %v11886_v61 = vcombine.high %v1983_v55, %v1987_v56  ;;  %v11885_v9 = vcombine.low %v1983_v55, %v1987_v56  ;;  %v2030_v56 = vld [vmem:[#allocation9 + $0x14d0] sm:$0xff] }
 0x47f   :  { %8385 = vmatpush1.bf16.msra.mxu0 %v11835_v20  ;;  %v1994_v20 = vld [vmem:[#allocation9 + $0x13b0] sm:$0xff] }
 0x480   :  { %8713 = vmatpush1.bf16.msra.mxu1 %v11837_v4  ;;  %8386 = vmatprep.subr.bf16.mxu0 %v11844_v7  ;;  %v1991_v4 = vld [vmem:[#allocation9 + $0x1398] sm:$0xff]  ;;  %v11892_v8 = vcombine.high %v1990_v2, %v1994_v20 }
 0x481   :  { %8714 = vmatprep.subr.bf16.mxu1 %v11846_v16  ;;  %v1995_v7 = vld [vmem:[#allocation9 + $0x13b8] sm:$0xff]  ;;  %v11883_v16 = vcombine.low %v1982_v54, %v1986_v29  ;;  %v11924_v29 = vcombine.high %v2022_v33, %v2026_v35 }
 0x482   :  { %v11894_v46 = vcombine.high %v1991_v4, %v1995_v7  ;;  %v11893_v1 = vcombine.low %v1991_v4, %v1995_v7  ;;  %v2038_v4 = vld [vmem:[#allocation9 + $0x1510] sm:$0xff] }
 0x483   :  { %8387 = vmatpush1.bf16.msra.mxu0 %v11843_v12  ;;  %v2002_v12 = vld [vmem:[#allocation9 + $0x13f0] sm:$0xff] }
 0x484   :  { %8715 = vmatpush1.bf16.msra.mxu1 %v11845_v41  ;;  %8388 = vmatprep.subr.bf16.mxu0 %v11852_v14  ;;  %v1999_v41 = vld [vmem:[#allocation9 + $0x13d8] sm:$0xff]  ;;  %v11900_v53 = vcombine.high %v1998_v49, %v2002_v12  ;;  %v2042_v7 = vld [vmem:[#allocation9 + $0x1530] sm:$0xff] }
 0x485   :  { %8716 = vmatprep.subr.bf16.mxu1 %v11854_v22  ;;  %v2003_v14 = vld [vmem:[#allocation9 + $0x13f8] sm:$0xff]  ;;  %v11891_v22 = vcombine.low %v1990_v2, %v1994_v20 }
 0x486   :  { %v11902_v31 = vcombine.high %v1999_v41, %v2003_v14  ;;  %v11901_v24 = vcombine.low %v1999_v41, %v2003_v14  ;;  %v2050_v41 = vld [vmem:[#allocation9 + $0x1570] sm:$0xff]  ;;  %v2047_v14 = vld [vmem:[#allocation9 + $0x1558] sm:$0xff] }
 0x487   :  { %8389 = vmatpush1.bf16.msra.mxu0 %v11851_v42  ;;  %v2010_v42 = vld [vmem:[#allocation9 + $0x1430] sm:$0xff] }
 0x488   :  { %8717 = vmatpush1.bf16.msra.mxu1 %v11853_v18  ;;  %8390 = vmatprep.subr.bf16.mxu0 %v11860_v40  ;;  %v2007_v18 = vld [vmem:[#allocation9 + $0x1418] sm:$0xff]  ;;  %v11908_v48 = vcombine.high %v2006_v17, %v2010_v42 }
 0x489   :  { %8718 = vmatprep.subr.bf16.mxu1 %v11862_v38  ;;  %v2011_v40 = vld [vmem:[#allocation9 + $0x1438] sm:$0xff]  ;;  %v11899_v38 = vcombine.low %v1998_v49, %v2002_v12  ;;  %v2046_v12 = vld [vmem:[#allocation9 + $0x1550] sm:$0xff] }
 0x48a   :  { %v11910_v47 = vcombine.high %v2007_v18, %v2011_v40  ;;  %v11909_v30 = vcombine.low %v2007_v18, %v2011_v40  ;;  %v2058_v18 = vld [vmem:[#allocation9 + $0x15b0] sm:$0xff]  ;;  %v2055_v40 = vld [vmem:[#allocation9 + $0x1598] sm:$0xff] }
 0x48b   :  { %8391 = vmatpush1.bf16.msra.mxu0 %v11859_v60  ;;  %v2018_v60 = vld [vmem:[#allocation9 + $0x1470] sm:$0xff] }
 0x48c   :  { %8719 = vmatpush1.bf16.msra.mxu1 %v11861_v27  ;;  %8392 = vmatprep.subr.bf16.mxu0 %v11868_v15  ;;  %v11907_v27 = vcombine.low %v2006_v17, %v2010_v42  ;;  %v2015_v15 = vld [vmem:[#allocation9 + $0x1458] sm:$0xff]  ;;  %v11916_v32 = vcombine.high %v2014_v6, %v2018_v60  ;;  %v2054_v42 = vld [vmem:[#allocation9 + $0x1590] sm:$0xff] }
 0x48d   :  { %8720 = vmatprep.subr.bf16.mxu1 %v11870_v28  ;;  %v2019_v28 = vld [vmem:[#allocation9 + $0x1478] sm:$0xff] }
 0x48e   :  { %v11917_v54 = vcombine.low %v2015_v15, %v2019_v28 }
 0x48f   :  { %8393 = vmatpush1.bf16.msra.mxu0 %v11867_v39  ;;  %v11918_v39 = vcombine.high %v2015_v15, %v2019_v28  ;;  %v2063_v15 = vld [vmem:[#allocation9 + $0x15d8] sm:$0xff] }
 0x490   :  { %8721 = vmatpush1.bf16.msra.mxu1 %v11869_v36  ;;  %8394 = vmatprep.subr.bf16.mxu0 %v11876_v13  ;;  %v2023_v36 = vld [vmem:[#allocation9 + $0x1498] sm:$0xff] }
 0x491   :  { %8722 = vmatprep.subr.bf16.mxu1 %v11878_v0  ;;  %v2027_v13 = vld [vmem:[#allocation9 + $0x14b8] sm:$0xff]  ;;  %v11915_v0 = vcombine.low %v2014_v6, %v2018_v60  ;;  %v2062_v60 = vld [vmem:[#allocation9 + $0x15d0] sm:$0xff] }
 0x492   :  { %v11926_v55 = vcombine.high %v2023_v36, %v2027_v13  ;;  %v2067_v28 = vld [vmem:[#allocation9 + $0x15f8] sm:$0xff] }
 0x493   :  { %8395 = vmatpush1.bf16.msra.mxu0 %v11875_v11  ;;  %v2034_v11 = vld [vmem:[#allocation9 + $0x14f0] sm:$0xff] }
 0x494   :  { %8723 = vmatpush1.bf16.msra.mxu1 %v11877_v57  ;;  %8396 = vmatprep.subr.bf16.mxu0 %v11884_v58  ;;  %v2031_v57 = vld [vmem:[#allocation9 + $0x14d8] sm:$0xff]  ;;  %v11932_v2 = vcombine.high %v2030_v56, %v2034_v11 }
 0x495   :  { %8724 = vmatprep.subr.bf16.mxu1 %v11886_v61  ;;  %v2035_v58 = vld [vmem:[#allocation9 + $0x14f8] sm:$0xff]  ;;  %v11923_v61 = vcombine.low %v2022_v33, %v2026_v35  ;;  %v11966_v35 = vcombine.high %v2063_v15, %v2067_v28 }
 0x496   :  { %v11934_v20 = vcombine.high %v2031_v57, %v2035_v58 }
 0x497   :  { %8397 = vmatpush1.bf16.msra.mxu0 %v11883_v16  ;;  %v2039_v16 = vld [vmem:[#allocation9 + $0x1518] sm:$0xff] }
 0x498   :  { %8725 = vmatpush1.bf16.msra.mxu1 %v11885_v9  ;;  %8398 = vmatprep.subr.bf16.mxu0 %v11892_v8  ;;  %v2043_v9 = vld [vmem:[#allocation9 + $0x1538] sm:$0xff]  ;;  %v11933_v8 = vcombine.low %v2031_v57, %v2035_v58  ;;  %v2082_v57 = vld [vmem:[#allocation9 + $0x1670] sm:$0xff] }
 0x499   :  { %8726 = vmatprep.subr.bf16.mxu1 %v11894_v46  ;;  %v11940_v46 = vcombine.high %v2038_v4, %v2042_v7  ;;  %v11942_v49 = vcombine.high %v2039_v16, %v2043_v9  ;;  %v2079_v58 = vld [vmem:[#allocation9 + $0x1658] sm:$0xff] }
 0x49b   :  { %8399 = vmatpush1.bf16.msra.mxu0 %v11891_v22  ;;  %v2051_v22 = vld [vmem:[#allocation9 + $0x1578] sm:$0xff] }
 0x49c   :  { %8727 = vmatpush1.bf16.msra.mxu1 %v11893_v1  ;;  %8400 = vmatprep.subr.bf16.mxu0 %v11900_v53  ;;  %v11939_v1 = vcombine.low %v2038_v4, %v2042_v7  ;;  %v11941_v53 = vcombine.low %v2039_v16, %v2043_v9  ;;  %v11950_v17 = vcombine.high %v2047_v14, %v2051_v22  ;;  %v2086_v7 = vld [vmem:[#allocation9 + $0x1690] sm:$0xff]  ;;  %v2087_v9 = vld [vmem:[#allocation9 + $0x1698] sm:$0xff] }
 0x49d   :  { %8728 = vmatprep.subr.bf16.mxu1 %v11902_v31  ;;  %v11948_v31 = vcombine.high %v2046_v12, %v2050_v41  ;;  %v2090_v16 = vld [vmem:[#allocation9 + $0x16b0] sm:$0xff] }
 0x49f   :  { %8401 = vmatpush1.bf16.msra.mxu0 %v11899_v38  ;;  %v2059_v38 = vld [vmem:[#allocation9 + $0x15b8] sm:$0xff] }
 0x4a0   :  { %8729 = vmatpush1.bf16.msra.mxu1 %v11901_v24  ;;  %8411 = vmatprep.subr.bf16.mxu0 %v11908_v48  ;;  %v11947_v24 = vcombine.low %v2046_v12, %v2050_v41  ;;  %v11949_v48 = vcombine.low %v2047_v14, %v2051_v22  ;;  %v11958_v6 = vcombine.high %v2055_v40, %v2059_v38  ;;  %v2094_v41 = vld [vmem:[#allocation9 + $0x16d0] sm:$0xff]  ;;  %v2095_v22 = vld [vmem:[#allocation9 + $0x16d8] sm:$0xff] }
 0x4a1   :  { %8739 = vmatprep.subr.bf16.mxu1 %v11910_v47  ;;  %v11956_v47 = vcombine.high %v2054_v42, %v2058_v18  ;;  %v2098_v14 = vld [vmem:[#allocation9 + $0x16f0] sm:$0xff] }
 0x4a2   :  { %8403 = vmatmul.mubr.bf16.vlgmr.msra.gmra.mrb[20].mxu0 %v13774_v3 }
 0x4a3   :  { %8731 = vmatmul.mubr.bf16.vlgmr.msra.gmra.mrb[20].mxu1 %v13774_v3  ;;  %8412 = vmatpush1.bf16.msra.mxu0 %v11907_v27  ;;  %v11925_v3 = vcombine.low %v2023_v36, %v2027_v13  ;;  %v2066_v27 = vld [vmem:[#allocation9 + $0x15f0] sm:$0xff]  ;;  %v2071_v13 = vld [vmem:[#allocation9 + $0x1618] sm:$0xff] }
 0x4a4   :  { %8443 = vmatprep.mubr.bf16.mxu0 %v13776_v10  ;;  %8740 = vmatpush1.bf16.msra.mxu1 %v11909_v30  ;;  %v11955_v30 = vcombine.low %v2054_v42, %v2058_v18  ;;  %v11964_v33 = vcombine.high %v2062_v60, %v2066_v27  ;;  %v2074_v36 = vld [vmem:[#allocation9 + $0x1630] sm:$0xff] }
 0x4a5   :  { %8771 = vmatprep.mubr.bf16.mxu1 %v13776_v10  ;;  %8413 = vmatprep.subr.bf16.mxu0 %v11916_v32  ;;  %v11931_v10 = vcombine.low %v2030_v56, %v2034_v11  ;;  %v11957_v32 = vcombine.low %v2055_v40, %v2059_v38  ;;  %v2078_v11 = vld [vmem:[#allocation9 + $0x1650] sm:$0xff]  ;;  %v2103_v38 = vld [vmem:[#allocation9 + $0x1718] sm:$0xff] }
 0x4a6   :  { %8741 = vmatprep.subr.bf16.mxu1 %v11918_v39  ;;  %v2070_v39 = vld [vmem:[#allocation9 + $0x1610] sm:$0xff] }
 0x4a7   :  { %8414 = vmatpush1.bf16.msra.mxu0 %v11915_v0  ;;  %v2075_v0 = vld [vmem:[#allocation9 + $0x1638] sm:$0xff]  ;;  %v2102_v18 = vld [vmem:[#allocation9 + $0x1710] sm:$0xff] }
 0x4a8   :  { %8742 = vmatpush1.bf16.msra.mxu1 %v11917_v54  ;;  %8415 = vmatprep.subr.bf16.mxu0 %v11924_v29  ;;  %v11963_v54 = vcombine.low %v2062_v60, %v2066_v27  ;;  %v11965_v29 = vcombine.low %v2063_v15, %v2067_v28  ;;  %v11974_v56 = vcombine.high %v2071_v13, %v2075_v0  ;;  %v2106_v40 = vld [vmem:[#allocation9 + $0x1730] sm:$0xff]  ;;  %v2111_v28 = vld [vmem:[#allocation9 + $0x1758] sm:$0xff] }
 0x4a9   :  { %8743 = vmatprep.subr.bf16.mxu1 %v11926_v55  ;;  %v11972_v55 = vcombine.high %v2070_v39, %v2074_v36  ;;  %v2110_v27 = vld [vmem:[#allocation9 + $0x1750] sm:$0xff] }
 0x4aa   :  { %v2114_v15 = vld [vmem:[#allocation9 + $0x1770] sm:$0xff] }
 0x4ab   :  { %8416 = vmatpush1.bf16.msra.mxu0 %v11923_v61  ;;  %v2083_v61 = vld [vmem:[#allocation9 + $0x1678] sm:$0xff] }
 0x4ac   :  { %8744 = vmatpush1.bf16.msra.mxu1 %v11925_v3  ;;  %8417 = vmatprep.subr.bf16.mxu0 %v11932_v2  ;;  %v11971_v3 = vcombine.low %v2070_v39, %v2074_v36  ;;  %v11973_v2 = vcombine.low %v2071_v13, %v2075_v0  ;;  %v11982_v4 = vcombine.high %v2079_v58, %v2083_v61  ;;  %v2118_v36 = vld [vmem:[#allocation9 + $0x1790] sm:$0xff]  ;;  %v2119_v0 = vld [vmem:[#allocation9 + $0x1798] sm:$0xff] }
 0x4ad   :  { %8745 = vmatprep.subr.bf16.mxu1 %v11934_v20  ;;  %v11980_v20 = vcombine.high %v2078_v11, %v2082_v57  ;;  %v2122_v13 = vld [vmem:[#allocation9 + $0x17b0] sm:$0xff] }
 0x4af   :  { %8418 = vmatpush1.bf16.msra.mxu0 %v11931_v10  ;;  %v2091_v10 = vld [vmem:[#allocation9 + $0x16b8] sm:$0xff] }
 0x4b0   :  { %8746 = vmatpush1.bf16.msra.mxu1 %v11933_v8  ;;  %8419 = vmatprep.subr.bf16.mxu0 %v11940_v46  ;;  %v11979_v8 = vcombine.low %v2078_v11, %v2082_v57  ;;  %v11981_v46 = vcombine.low %v2079_v58, %v2083_v61  ;;  %v11990_v12 = vcombine.high %v2087_v9, %v2091_v10  ;;  %v2126_v57 = vld [vmem:[#allocation9 + $0x17d0] sm:$0xff]  ;;  %v2127_v61 = vld [vmem:[#allocation9 + $0x17d8] sm:$0xff] }
 0x4b1   :  { %8747 = vmatprep.subr.bf16.mxu1 %v11942_v49  ;;  %v11988_v49 = vcombine.high %v2086_v7, %v2090_v16  ;;  %v2130_v58 = vld [vmem:[#allocation9 + $0x17f0] sm:$0xff] }
 0x4b3   :  { %8420 = vmatpush1.bf16.msra.mxu0 %v11939_v1  ;;  %v2099_v1 = vld [vmem:[#allocation9 + $0x16f8] sm:$0xff] }
 0x4b4   :  { %8748 = vmatpush1.bf16.msra.mxu1 %v11941_v53  ;;  %8421 = vmatprep.subr.bf16.mxu0 %v11948_v31  ;;  %v11987_v53 = vcombine.low %v2086_v7, %v2090_v16  ;;  %v11989_v31 = vcombine.low %v2087_v9, %v2091_v10  ;;  %v11998_v42 = vcombine.high %v2095_v22, %v2099_v1  ;;  %v2134_v16 = vld [vmem:[#allocation9 + $0x1810] sm:$0xff]  ;;  %v2135_v10 = vld [vmem:[#allocation9 + $0x1818] sm:$0xff] }
 0x4b5   :  { %8749 = vmatprep.subr.bf16.mxu1 %v11950_v17  ;;  %v11996_v17 = vcombine.high %v2094_v41, %v2098_v14  ;;  %v2138_v9 = vld [vmem:[#allocation9 + $0x1830] sm:$0xff] }
 0x4b7   :  { %8422 = vmatpush1.bf16.msra.mxu0 %v11947_v24  ;;  %v2107_v24 = vld [vmem:[#allocation9 + $0x1738] sm:$0xff] }
 0x4b8   :  { %8750 = vmatpush1.bf16.msra.mxu1 %v11949_v48  ;;  %8423 = vmatprep.subr.bf16.mxu0 %v11956_v47  ;;  %v11995_v48 = vcombine.low %v2094_v41, %v2098_v14  ;;  %v11997_v47 = vcombine.low %v2095_v22, %v2099_v1  ;;  %v12006_v60 = vcombine.high %v2103_v38, %v2107_v24  ;;  %v2142_v14 = vld [vmem:[#allocation9 + $0x1850] sm:$0xff] }
 0x4b9   :  { %8751 = vmatprep.subr.bf16.mxu1 %v11958_v6  ;;  %v12004_v6 = vcombine.high %v2102_v18, %v2106_v40  ;;  %v2146_v22 = vld [vmem:[#allocation9 + $0x1870] sm:$0xff]  ;;  %v12035_v1 = vcombine.low %v2134_v16, %v2138_v9 }
 0x4bb   :  { %8424 = vmatpush1.bf16.msra.mxu0 %v11955_v30  ;;  %v2115_v30 = vld [vmem:[#allocation9 + $0x1778] sm:$0xff] }
 0x4bc   :  { %8752 = vmatpush1.bf16.msra.mxu1 %v11957_v32  ;;  %8425 = vmatprep.subr.bf16.mxu0 %v11964_v33  ;;  %v12003_v32 = vcombine.low %v2102_v18, %v2106_v40  ;;  %v12005_v33 = vcombine.low %v2103_v38, %v2107_v24  ;;  %v12014_v39 = vcombine.high %v2111_v28, %v2115_v30  ;;  %v2150_v18 = vld [vmem:[#allocation9 + $0x1890] sm:$0xff]  ;;  %v2151_v24 = vld [vmem:[#allocation9 + $0x1898] sm:$0xff] }
 0x4bd   :  { %8753 = vmatprep.subr.bf16.mxu1 %v11966_v35  ;;  %v12012_v35 = vcombine.high %v2110_v27, %v2114_v15  ;;  %v2154_v40 = vld [vmem:[#allocation9 + $0x18b0] sm:$0xff] }
 0x4bf   :  { %8426 = vmatpush1.bf16.msra.mxu0 %v11963_v54  ;;  %v2123_v54 = vld [vmem:[#allocation9 + $0x17b8] sm:$0xff] }
 0x4c0   :  { %8754 = vmatpush1.bf16.msra.mxu1 %v11965_v29  ;;  %8427 = vmatprep.subr.bf16.mxu0 %v11972_v55  ;;  %v12011_v29 = vcombine.low %v2110_v27, %v2114_v15  ;;  %v12013_v55 = vcombine.low %v2111_v28, %v2115_v30  ;;  %v12022_v11 = vcombine.high %v2119_v0, %v2123_v54  ;;  %v2158_v15 = vld [vmem:[#allocation9 + $0x18d0] sm:$0xff]  ;;  %v2159_v30 = vld [vmem:[#allocation9 + $0x18d8] sm:$0xff] }
 0x4c1   :  { %8755 = vmatprep.subr.bf16.mxu1 %v11974_v56  ;;  %v12020_v56 = vcombine.high %v2118_v36, %v2122_v13  ;;  %v2162_v28 = vld [vmem:[#allocation9 + $0x18f0] sm:$0xff] }
 0x4c3   :  { %8428 = vmatpush1.bf16.msra.mxu0 %v11971_v3  ;;  %v2131_v3 = vld [vmem:[#allocation9 + $0x17f8] sm:$0xff] }
 0x4c4   :  { %8756 = vmatpush1.bf16.msra.mxu1 %v11973_v2  ;;  %8429 = vmatprep.subr.bf16.mxu0 %v11980_v20  ;;  %v12019_v2 = vcombine.low %v2118_v36, %v2122_v13  ;;  %v12021_v20 = vcombine.low %v2119_v0, %v2123_v54  ;;  %v12030_v7 = vcombine.high %v2127_v61, %v2131_v3  ;;  %v2166_v36 = vld [vmem:[#allocation9 + $0x1910] sm:$0xff]  ;;  %v2167_v0 = vld [vmem:[#allocation9 + $0x1918] sm:$0xff] }
 0x4c5   :  { %8757 = vmatprep.subr.bf16.mxu1 %v11982_v4  ;;  %v12028_v4 = vcombine.high %v2126_v57, %v2130_v58  ;;  %v2170_v13 = vld [vmem:[#allocation9 + $0x1930] sm:$0xff]  ;;  %v2171_v54 = vld [vmem:[#allocation9 + $0x1938] sm:$0xff] }
 0x4c7   :  { %8430 = vmatpush1.bf16.msra.mxu0 %v11979_v8  ;;  %v2139_v8 = vld [vmem:[#allocation9 + $0x1838] sm:$0xff] }
 0x4c8   :  { %8758 = vmatpush1.bf16.msra.mxu1 %v11981_v46  ;;  %8431 = vmatprep.subr.bf16.mxu0 %v11988_v49  ;;  %v12027_v46 = vcombine.low %v2126_v57, %v2130_v58  ;;  %v12029_v49 = vcombine.low %v2127_v61, %v2131_v3  ;;  %v12038_v41 = vcombine.high %v2135_v10, %v2139_v8  ;;  %v2178_v57 = vld [vmem:[#allocation9 + $0x1970] sm:$0xff]  ;;  %v2175_v58 = vld [vmem:[#allocation9 + $0x1958] sm:$0xff] }
 0x4c9   :  { %8759 = vmatprep.subr.bf16.mxu1 %v11990_v12  ;;  %v12036_v12 = vcombine.high %v2134_v16, %v2138_v9  ;;  %v2179_v61 = vld [vmem:[#allocation9 + $0x1978] sm:$0xff]  ;;  %v12067_v3 = vcombine.low %v2166_v36, %v2170_v13  ;;  %v2186_v16 = vld [vmem:[#allocation9 + $0x19b0] sm:$0xff] }
 0x4ca   :  { %v2183_v9 = vld [vmem:[#allocation9 + $0x1998] sm:$0xff] }
 0x4cb   :  { %8432 = vmatpush1.bf16.msra.mxu0 %v11987_v53  ;;  %v2143_v53 = vld [vmem:[#allocation9 + $0x1858] sm:$0xff] }
 0x4cc   :  { %8760 = vmatpush1.bf16.msra.mxu1 %v11989_v31  ;;  %8433 = vmatprep.subr.bf16.mxu0 %v11996_v17  ;;  %v2147_v31 = vld [vmem:[#allocation9 + $0x1878] sm:$0xff]  ;;  %v12037_v17 = vcombine.low %v2135_v10, %v2139_v8 }
 0x4cd   :  { %8761 = vmatprep.subr.bf16.mxu1 %v11998_v42  ;;  %v12044_v42 = vcombine.high %v2142_v14, %v2146_v22  ;;  %v12046_v38 = vcombine.high %v2143_v53, %v2147_v31  ;;  %v2187_v10 = vld [vmem:[#allocation9 + $0x19b8] sm:$0xff] }
 0x4cf   :  { %8434 = vmatpush1.bf16.msra.mxu0 %v11995_v48  ;;  %v2155_v48 = vld [vmem:[#allocation9 + $0x18b8] sm:$0xff] }
 0x4d0   :  { %8762 = vmatpush1.bf16.msra.mxu1 %v11997_v47  ;;  %8435 = vmatprep.subr.bf16.mxu0 %v12004_v6  ;;  %v12043_v47 = vcombine.low %v2142_v14, %v2146_v22  ;;  %v12045_v6 = vcombine.low %v2143_v53, %v2147_v31  ;;  %v12054_v27 = vcombine.high %v2151_v24, %v2155_v48  ;;  %v2194_v14 = vld [vmem:[#allocation9 + $0x19f0] sm:$0xff]  ;;  %v2191_v22 = vld [vmem:[#allocation9 + $0x19d8] sm:$0xff] }
 0x4d1   :  { %8763 = vmatprep.subr.bf16.mxu1 %v12006_v60  ;;  %v12052_v60 = vcombine.high %v2150_v18, %v2154_v40  ;;  %v12085_v31 = vcombine.low %v2183_v9, %v2187_v10 }
 0x4d3   :  { %8436 = vmatpush1.bf16.msra.mxu0 %v12003_v32  ;;  %v2163_v32 = vld [vmem:[#allocation9 + $0x18f8] sm:$0xff] }
 0x4d4   :  { %8764 = vmatpush1.bf16.msra.mxu1 %v12005_v33  ;;  %8437 = vmatprep.subr.bf16.mxu0 %v12012_v35  ;;  %v12051_v33 = vcombine.low %v2150_v18, %v2154_v40  ;;  %v12060_v35 = vcombine.high %v2158_v15, %v2162_v28  ;;  %v2198_v18 = vld [vmem:[#allocation9 + $0x1a10] sm:$0xff] }
 0x4d5   :  { %8765 = vmatprep.subr.bf16.mxu1 %v12014_v39  ;;  %v12062_v39 = vcombine.high %v2159_v30, %v2163_v32  ;;  %v2202_v40 = vld [vmem:[#allocation9 + $0x1a30] sm:$0xff] }
 0x4d7   :  { %8438 = vmatpush1.bf16.msra.mxu0 %v12011_v29  ;;  %v12061_v29 = vcombine.low %v2159_v30, %v2163_v32  ;;  %v2211_v30 = vld [vmem:[#allocation9 + $0x1a78] sm:$0xff]  ;;  %v12099_v32 = vcombine.low %v2198_v18, %v2202_v40 }
 0x4d8   :  { %8766 = vmatpush1.bf16.msra.mxu1 %v12013_v55  ;;  %8439 = vmatprep.subr.bf16.mxu0 %v12020_v56  ;;  %v12068_v55 = vcombine.high %v2166_v36, %v2170_v13  ;;  %v12070_v56 = vcombine.high %v2167_v0, %v2171_v54  ;;  %v2218_v36 = vld [vmem:[#allocation9 + $0x1ab0] sm:$0xff]  ;;  %v2215_v13 = vld [vmem:[#allocation9 + $0x1a98] sm:$0xff] }
 0x4d9   :  { %8767 = vmatprep.subr.bf16.mxu1 %v12022_v11  ;;  %v2174_v11 = vld [vmem:[#allocation9 + $0x1950] sm:$0xff] }
 0x4da   :  { %v12075_v8 = vcombine.low %v2174_v11, %v2178_v57 }
 0x4db   :  { %8440 = vmatpush1.bf16.msra.mxu0 %v12019_v2  ;;  %v12069_v2 = vcombine.low %v2167_v0, %v2171_v54  ;;  %v2219_v0 = vld [vmem:[#allocation9 + $0x1ab8] sm:$0xff] }
 0x4dc   :  { %8768 = vmatpush1.bf16.msra.mxu1 %v12021_v20  ;;  %8441 = vmatprep.subr.bf16.mxu0 %v12028_v4  ;;  %v12076_v20 = vcombine.high %v2174_v11, %v2178_v57  ;;  %v12078_v4 = vcombine.high %v2175_v58, %v2179_v61  ;;  %v2226_v11 = vld [vmem:[#allocation9 + $0x1af0] sm:$0xff]  ;;  %v2223_v57 = vld [vmem:[#allocation9 + $0x1ad8] sm:$0xff] }
 0x4dd   :  { %8769 = vmatprep.subr.bf16.mxu1 %v12030_v7  ;;  %v2182_v7 = vld [vmem:[#allocation9 + $0x1990] sm:$0xff] }
 0x4de   :  { %v12083_v53 = vcombine.low %v2182_v7, %v2186_v16 }
 0x4df   :  { %8442 = vmatpush1.bf16.msra.mxu0 %v12027_v46  ;;  %v12077_v46 = vcombine.low %v2175_v58, %v2179_v61  ;;  %v2227_v58 = vld [vmem:[#allocation9 + $0x1af8] sm:$0xff] }
 0x4e0   :  { %8770 = vmatpush1.bf16.msra.mxu1 %v12029_v49  ;;  %8452 = vmatprep.subr.bf16.mxu0 %v12036_v12  ;;  %v12084_v49 = vcombine.high %v2182_v7, %v2186_v16  ;;  %v12086_v12 = vcombine.high %v2183_v9, %v2187_v10  ;;  %v2234_v7 = vld [vmem:[#allocation9 + $0x1b30] sm:$0xff]  ;;  %v2231_v16 = vld [vmem:[#allocation9 + $0x1b18] sm:$0xff] }
 0x4e1   :  { %8780 = vmatprep.subr.bf16.mxu1 %v12038_v41  ;;  %v2190_v41 = vld [vmem:[#allocation9 + $0x19d0] sm:$0xff]  ;;  %v2235_v9 = vld [vmem:[#allocation9 + $0x1b38] sm:$0xff] }
 0x4e2   :  { %8444 = vmatmul.mubr.bf16.vlgmr.msra.gmra.mrb[20].mxu0 %v13784_v23 }
 0x4e3   :  { %8772 = vmatmul.mubr.bf16.vlgmr.msra.gmra.mrb[20].mxu1 %v13784_v23  ;;  %8453 = vmatpush1.bf16.msra.mxu0 %v12035_v1  ;;  %v12053_v23 = vcombine.low %v2151_v24, %v2155_v48  ;;  %v2195_v1 = vld [vmem:[#allocation9 + $0x19f8] sm:$0xff]  ;;  %v12091_v48 = vcombine.low %v2190_v41, %v2194_v14 }
 0x4e4   :  { %8484 = vmatprep.mubr.bf16.mxu0 %v13786_v26  ;;  %8781 = vmatpush1.bf16.msra.mxu1 %v12037_v17  ;;  %v12092_v17 = vcombine.high %v2190_v41, %v2194_v14  ;;  %v2203_v24 = vld [vmem:[#allocation9 + $0x1a38] sm:$0xff]  ;;  %v2242_v41 = vld [vmem:[#allocation9 + $0x1b70] sm:$0xff] }
 0x4e5   :  { %8812 = vmatprep.mubr.bf16.mxu1 %v13786_v26  ;;  %8454 = vmatprep.subr.bf16.mxu0 %v12044_v42  ;;  %v12059_v26 = vcombine.low %v2158_v15, %v2162_v28  ;;  %v12094_v42 = vcombine.high %v2191_v22, %v2195_v1  ;;  %v2210_v15 = vld [vmem:[#allocation9 + $0x1a70] sm:$0xff]  ;;  %v2207_v28 = vld [vmem:[#allocation9 + $0x1a58] sm:$0xff] }
 0x4e6   :  { %8782 = vmatprep.subr.bf16.mxu1 %v12046_v38  ;;  %v2199_v38 = vld [vmem:[#allocation9 + $0x1a18] sm:$0xff] }
 0x4e7   :  { %8455 = vmatpush1.bf16.msra.mxu0 %v12043_v47  ;;  %v12093_v47 = vcombine.low %v2191_v22, %v2195_v1  ;;  %v2239_v14 = vld [vmem:[#allocation9 + $0x1b58] sm:$0xff] }
 0x4e8   :  { %8783 = vmatpush1.bf16.msra.mxu1 %v12045_v6  ;;  %8456 = vmatprep.subr.bf16.mxu0 %v12052_v60  ;;  %v12100_v6 = vcombine.high %v2198_v18, %v2202_v40  ;;  %v12102_v60 = vcombine.high %v2199_v38, %v2203_v24  ;;  %v2243_v22 = vld [vmem:[#allocation9 + $0x1b78] sm:$0xff]  ;;  %v2250_v18 = vld [vmem:[#allocation9 + $0x1bb0] sm:$0xff] }
 0x4e9   :  { %8784 = vmatprep.subr.bf16.mxu1 %v12054_v27  ;;  %v2206_v27 = vld [vmem:[#allocation9 + $0x1a50] sm:$0xff]  ;;  %v2247_v40 = vld [vmem:[#allocation9 + $0x1b98] sm:$0xff] }
 0x4ea   :  { %v12107_v54 = vcombine.low %v2206_v27, %v2210_v15 }
 0x4eb   :  { %8457 = vmatpush1.bf16.msra.mxu0 %v12051_v33  ;;  %v12101_v33 = vcombine.low %v2199_v38, %v2203_v24  ;;  %v2251_v38 = vld [vmem:[#allocation9 + $0x1bb8] sm:$0xff] }
 0x4ec   :  { %8785 = vmatpush1.bf16.msra.mxu1 %v12053_v23  ;;  %8458 = vmatprep.subr.bf16.mxu0 %v12060_v35  ;;  %v12108_v23 = vcombine.high %v2206_v27, %v2210_v15  ;;  %v12110_v35 = vcombine.high %v2207_v28, %v2211_v30  ;;  %v2258_v27 = vld [vmem:[#allocation9 + $0x1bf0] sm:$0xff]  ;;  %v2255_v15 = vld [vmem:[#allocation9 + $0x1bd8] sm:$0xff] }
 0x4ed   :  { %8786 = vmatprep.subr.bf16.mxu1 %v12062_v39  ;;  %v2214_v39 = vld [vmem:[#allocation9 + $0x1a90] sm:$0xff] }
 0x4ee   :  { %v12115_v61 = vcombine.low %v2214_v39, %v2218_v36 }
 0x4ef   :  { %8459 = vmatpush1.bf16.msra.mxu0 %v12059_v26  ;;  %v12109_v26 = vcombine.low %v2207_v28, %v2211_v30  ;;  %v2259_v28 = vld [vmem:[#allocation9 + $0x1bf8] sm:$0xff] }
 0x4f0   :  { %8787 = vmatpush1.bf16.msra.mxu1 %v12061_v29  ;;  %8460 = vmatprep.subr.bf16.mxu0 %v12068_v55  ;;  %v12116_v29 = vcombine.high %v2214_v39, %v2218_v36  ;;  %v12118_v55 = vcombine.high %v2215_v13, %v2219_v0  ;;  %v2266_v39 = vld [vmem:[#allocation9 + $0x1c30] sm:$0xff]  ;;  %v2263_v36 = vld [vmem:[#allocation9 + $0x1c18] sm:$0xff] }
 0x4f1   :  { %8788 = vmatprep.subr.bf16.mxu1 %v12070_v56  ;;  %v2222_v56 = vld [vmem:[#allocation9 + $0x1ad0] sm:$0xff] }
 0x4f2   :  { %v12123_v10 = vcombine.low %v2222_v56, %v2226_v11 }
 0x4f3   :  { %8461 = vmatpush1.bf16.msra.mxu0 %v12067_v3  ;;  %v12117_v3 = vcombine.low %v2215_v13, %v2219_v0  ;;  %v2267_v13 = vld [vmem:[#allocation9 + $0x1c38] sm:$0xff] }
 0x4f4   :  { %8789 = vmatpush1.bf16.msra.mxu1 %v12069_v2  ;;  %8462 = vmatprep.subr.bf16.mxu0 %v12076_v20  ;;  %v12124_v2 = vcombine.high %v2222_v56, %v2226_v11  ;;  %v12126_v20 = vcombine.high %v2223_v57, %v2227_v58  ;;  %v2274_v56 = vld [vmem:[#allocation9 + $0x1c70] sm:$0xff] }
 0x4f5   :  { %8790 = vmatprep.subr.bf16.mxu1 %v12078_v4  ;;  %v2230_v4 = vld [vmem:[#allocation9 + $0x1b10] sm:$0xff] }
 0x4f6   :  { %v12131_v1 = vcombine.low %v2230_v4, %v2234_v7 }
 0x4f7   :  { %8463 = vmatpush1.bf16.msra.mxu0 %v12075_v8  ;;  %v12125_v8 = vcombine.low %v2223_v57, %v2227_v58  ;;  %v2271_v57 = vld [vmem:[#allocation9 + $0x1c58] sm:$0xff] }
 0x4f8   :  { %8791 = vmatpush1.bf16.msra.mxu1 %v12077_v46  ;;  %8464 = vmatprep.subr.bf16.mxu0 %v12084_v49  ;;  %v12132_v46 = vcombine.high %v2230_v4, %v2234_v7  ;;  %v12134_v49 = vcombine.high %v2231_v16, %v2235_v9  ;;  %v2275_v58 = vld [vmem:[#allocation9 + $0x1c78] sm:$0xff] }
 0x4f9   :  { %8792 = vmatprep.subr.bf16.mxu1 %v12086_v12  ;;  %v2238_v12 = vld [vmem:[#allocation9 + $0x1b50] sm:$0xff]  ;;  %v12174_v4 = vcombine.high %v2271_v57, %v2275_v58  ;;  %v2279_v7 = vld [vmem:[#allocation9 + $0x1c98] sm:$0xff] }
 0x4fa   :  { %v12139_v24 = vcombine.low %v2238_v12, %v2242_v41 }
 0x4fb   :  { %8465 = vmatpush1.bf16.msra.mxu0 %v12083_v53  ;;  %v12133_v53 = vcombine.low %v2231_v16, %v2235_v9  ;;  %v2283_v16 = vld [vmem:[#allocation9 + $0x1cb8] sm:$0xff] }
 0x4fc   :  { %8793 = vmatpush1.bf16.msra.mxu1 %v12085_v31  ;;  %8466 = vmatprep.subr.bf16.mxu0 %v12092_v17  ;;  %v12140_v31 = vcombine.high %v2238_v12, %v2242_v41  ;;  %v12142_v17 = vcombine.high %v2239_v14, %v2243_v22  ;;  %v2290_v12 = vld [vmem:[#allocation9 + $0x1cf0] sm:$0xff]  ;;  %v2287_v41 = vld [vmem:[#allocation9 + $0x1cd8] sm:$0xff] }
 0x4fd   :  { %8794 = vmatprep.subr.bf16.mxu1 %v12094_v42  ;;  %v2246_v42 = vld [vmem:[#allocation9 + $0x1b90] sm:$0xff] }
 0x4fe   :  { %v12147_v30 = vcombine.low %v2246_v42, %v2250_v18 }
 0x4ff   :  { %8467 = vmatpush1.bf16.msra.mxu0 %v12091_v48  ;;  %v12141_v48 = vcombine.low %v2239_v14, %v2243_v22  ;;  %v2291_v14 = vld [vmem:[#allocation9 + $0x1cf8] sm:$0xff] }
 0x500   :  { %8795 = vmatpush1.bf16.msra.mxu1 %v12093_v47  ;;  %8468 = vmatprep.subr.bf16.mxu0 %v12100_v6  ;;  %v12148_v47 = vcombine.high %v2246_v42, %v2250_v18  ;;  %v12150_v6 = vcombine.high %v2247_v40, %v2251_v38  ;;  %v2295_v42 = vld [vmem:[#allocation9 + $0x1d18] sm:$0xff] }
 0x501   :  { %8796 = vmatprep.subr.bf16.mxu1 %v12102_v60  ;;  %v2254_v60 = vld [vmem:[#allocation9 + $0x1bd0] sm:$0xff]  ;;  %v2299_v18 = vld [vmem:[#allocation9 + $0x1d38] sm:$0xff] }
 0x502   :  { %v12155_v0 = vcombine.low %v2254_v60, %v2258_v27 }
 0x503   :  { %8469 = vmatpush1.bf16.msra.mxu0 %v12099_v32  ;;  %v12149_v32 = vcombine.low %v2247_v40, %v2251_v38  ;;  %v12189_v40 = vcombine.low %v2287_v41, %v2291_v14 }
 0x504   :  { %8797 = vmatpush1.bf16.msra.mxu1 %v12101_v33  ;;  %8470 = vmatprep.subr.bf16.mxu0 %v12108_v23  ;;  %v12156_v33 = vcombine.high %v2254_v60, %v2258_v27  ;;  %v12158_v23 = vcombine.high %v2255_v15, %v2259_v28  ;;  %v2307_v60 = vld [vmem:[#allocation9 + $0x1d78] sm:$0xff] }
 0x505   :  { %8798 = vmatprep.subr.bf16.mxu1 %v12110_v35  ;;  %v2262_v35 = vld [vmem:[#allocation9 + $0x1c10] sm:$0xff] }
 0x506   :  { %v12163_v11 = vcombine.low %v2262_v35, %v2266_v39 }
 0x507   :  { %8471 = vmatpush1.bf16.msra.mxu0 %v12107_v54  ;;  %v12157_v54 = vcombine.low %v2255_v15, %v2259_v28  ;;  %v12197_v15 = vcombine.low %v2295_v42, %v2299_v18 }
 0x508   :  { %8799 = vmatpush1.bf16.msra.mxu1 %v12109_v26  ;;  %8472 = vmatprep.subr.bf16.mxu0 %v12116_v29  ;;  %v12164_v26 = vcombine.high %v2262_v35, %v2266_v39  ;;  %v12166_v29 = vcombine.high %v2263_v36, %v2267_v13  ;;  %v2315_v35 = vld [vmem:[#allocation9 + $0x1db8] sm:$0xff] }
 0x509   :  { %8800 = vmatprep.subr.bf16.mxu1 %v12118_v55  ;;  %v2270_v55 = vld [vmem:[#allocation9 + $0x1c50] sm:$0xff] }
 0x50a   :  { %v12171_v9 = vcombine.low %v2270_v55, %v2274_v56 }
 0x50b   :  { %8473 = vmatpush1.bf16.msra.mxu0 %v12115_v61  ;;  %v12165_v61 = vcombine.low %v2263_v36, %v2267_v13 }
 0x50c   :  { %8801 = vmatpush1.bf16.msra.mxu1 %v12117_v3  ;;  %8474 = vmatprep.subr.bf16.mxu0 %v12124_v2  ;;  %v12172_v3 = vcombine.high %v2270_v55, %v2274_v56  ;;  %v2278_v2 = vld [vmem:[#allocation9 + $0x1c90] sm:$0xff]  ;;  %v2323_v55 = vld [vmem:[#allocation9 + $0x1df8] sm:$0xff] }
 0x50d   :  { %8802 = vmatprep.subr.bf16.mxu1 %v12126_v20  ;;  %v2282_v20 = vld [vmem:[#allocation9 + $0x1cb0] sm:$0xff] }
 0x50e   :  { %v12179_v22 = vcombine.low %v2278_v2, %v2282_v20 }
 0x50f   :  { %8475 = vmatpush1.bf16.msra.mxu0 %v12123_v10  ;;  %v12173_v10 = vcombine.low %v2271_v57, %v2275_v58 }
 0x510   :  { %8803 = vmatpush1.bf16.msra.mxu1 %v12125_v8  ;;  %8476 = vmatprep.subr.bf16.mxu0 %v12132_v46  ;;  %v12180_v8 = vcombine.high %v2278_v2, %v2282_v20  ;;  %v12182_v46 = vcombine.high %v2279_v7, %v2283_v16  ;;  %v2327_v2 = vld [vmem:[#allocation9 + $0x1e18] sm:$0xff] }
 0x511   :  { %8804 = vmatprep.subr.bf16.mxu1 %v12134_v49  ;;  %v2286_v49 = vld [vmem:[#allocation9 + $0x1cd0] sm:$0xff]  ;;  %v2331_v20 = vld [vmem:[#allocation9 + $0x1e38] sm:$0xff] }
 0x513   :  { %8477 = vmatpush1.bf16.msra.mxu0 %v12131_v1  ;;  %v12188_v1 = vcombine.high %v2286_v49, %v2290_v12 }
 0x514   :  { %8805 = vmatpush1.bf16.msra.mxu1 %v12133_v53  ;;  %8478 = vmatprep.subr.bf16.mxu0 %v12140_v31  ;;  %v12190_v53 = vcombine.high %v2287_v41, %v2291_v14  ;;  %v2294_v31 = vld [vmem:[#allocation9 + $0x1d10] sm:$0xff]  ;;  %v12229_v41 = vcombine.low %v2327_v2, %v2331_v20 }
 0x515   :  { %8806 = vmatprep.subr.bf16.mxu1 %v12142_v17  ;;  %v2298_v17 = vld [vmem:[#allocation9 + $0x1d30] sm:$0xff] }
 0x516   :  { %v12196_v38 = vcombine.high %v2294_v31, %v2298_v17  ;;  %v12195_v27 = vcombine.low %v2294_v31, %v2298_v17  ;;  %v2347_v31 = vld [vmem:[#allocation9 + $0x1eb8] sm:$0xff] }
 0x517   :  { %8479 = vmatpush1.bf16.msra.mxu0 %v12139_v24  ;;  %v12198_v24 = vcombine.high %v2295_v42, %v2299_v18 }
 0x518   :  { %8807 = vmatpush1.bf16.msra.mxu1 %v12141_v48  ;;  %8480 = vmatprep.subr.bf16.mxu0 %v12148_v47  ;;  %v2302_v48 = vld [vmem:[#allocation9 + $0x1d50] sm:$0xff] }
 0x519   :  { %8808 = vmatprep.subr.bf16.mxu1 %v12150_v6  ;;  %v2306_v47 = vld [vmem:[#allocation9 + $0x1d70] sm:$0xff]  ;;  %v2303_v6 = vld [vmem:[#allocation9 + $0x1d58] sm:$0xff] }
 0x51a   :  { %v12204_v28 = vcombine.high %v2302_v48, %v2306_v47  ;;  %v12203_v39 = vcombine.low %v2302_v48, %v2306_v47  ;;  %v12205_v36 = vcombine.low %v2303_v6, %v2307_v60  ;;  %v2355_v48 = vld [vmem:[#allocation9 + $0x1ef8] sm:$0xff] }
 0x51b   :  { %8481 = vmatpush1.bf16.msra.mxu0 %v12147_v30  ;;  %v12206_v30 = vcombine.high %v2303_v6, %v2307_v60 }
 0x51c   :  { %8809 = vmatpush1.bf16.msra.mxu1 %v12149_v32  ;;  %8482 = vmatprep.subr.bf16.mxu0 %v12156_v33  ;;  %v2310_v32 = vld [vmem:[#allocation9 + $0x1d90] sm:$0xff] }
 0x51d   :  { %8810 = vmatprep.subr.bf16.mxu1 %v12158_v23  ;;  %v2314_v33 = vld [vmem:[#allocation9 + $0x1db0] sm:$0xff]  ;;  %v2311_v23 = vld [vmem:[#allocation9 + $0x1d98] sm:$0xff] }
 0x51e   :  { %v12212_v13 = vcombine.high %v2310_v32, %v2314_v33  ;;  %v12211_v56 = vcombine.low %v2310_v32, %v2314_v33  ;;  %v2363_v32 = vld [vmem:[#allocation9 + $0x1f38] sm:$0xff] }
 0x51f   :  { %8483 = vmatpush1.bf16.msra.mxu0 %v12155_v0  ;;  %v12214_v0 = vcombine.high %v2311_v23, %v2315_v35 }
 0x520   :  { %8811 = vmatpush1.bf16.msra.mxu1 %v12157_v54  ;;  %8493 = vmatprep.subr.bf16.mxu0 %v12164_v26  ;;  %v2318_v54 = vld [vmem:[#allocation9 + $0x1dd0] sm:$0xff] }
 0x521   :  { %8821 = vmatprep.subr.bf16.mxu1 %v12166_v29  ;;  %v2322_v26 = vld [vmem:[#allocation9 + $0x1df0] sm:$0xff]  ;;  %v2319_v29 = vld [vmem:[#allocation9 + $0x1dd8] sm:$0xff] }
 0x522   :  { %8485 = vmatmul.mubr.bf16.vlgmr.msra.gmra.mrb[20].mxu0 %v13794_v59  ;;  %v12220_v57 = vcombine.high %v2318_v54, %v2322_v26  ;;  %v12222_v58 = vcombine.high %v2319_v29, %v2323_v55 }
 0x523   :  { %8813 = vmatmul.mubr.bf16.vlgmr.msra.gmra.mrb[20].mxu1 %v13794_v59  ;;  %8494 = vmatpush1.bf16.msra.mxu0 %v12163_v11  ;;  %v12181_v59 = vcombine.low %v2279_v7, %v2283_v16  ;;  %v12213_v11 = vcombine.low %v2311_v23, %v2315_v35  ;;  %v12221_v7 = vcombine.low %v2319_v29, %v2323_v55 }
 0x524   :  { %8525 = vmatprep.mubr.bf16.mxu0 %v13796_v43  ;;  %8822 = vmatpush1.bf16.msra.mxu1 %v12165_v61  ;;  %v2326_v61 = vld [vmem:[#allocation9 + $0x1e10] sm:$0xff] }
 0x525   :  { %8853 = vmatprep.mubr.bf16.mxu1 %v13796_v43  ;;  %8495 = vmatprep.subr.bf16.mxu0 %v12172_v3  ;;  %v12187_v43 = vcombine.low %v2286_v49, %v2290_v12  ;;  %v2330_v3 = vld [vmem:[#allocation9 + $0x1e30] sm:$0xff]  ;;  %v2339_v49 = vld [vmem:[#allocation9 + $0x1e78] sm:$0xff] }
 0x526   :  { %8823 = vmatprep.subr.bf16.mxu1 %v12174_v4  ;;  %v12219_v4 = vcombine.low %v2318_v54, %v2322_v26  ;;  %v12228_v16 = vcombine.high %v2326_v61, %v2330_v3  ;;  %v12227_v12 = vcombine.low %v2326_v61, %v2330_v3  ;;  %v2371_v54 = vld [vmem:[#allocation9 + $0x1f78] sm:$0xff]  ;;  %v13845_v3 = vld [vmem:[#allocation11] sm:$0xff] }
 0x527   :  { %8496 = vmatpush1.bf16.msra.mxu0 %v12171_v9  ;;  %v12230_v9 = vcombine.high %v2327_v2, %v2331_v20  ;;  %v2379_v61 = vld [vmem:[#allocation9 + $0x1fb8] sm:$0xff] }
 0x528   :  { %8824 = vmatpush1.bf16.msra.mxu1 %v12173_v10  ;;  %8497 = vmatprep.subr.bf16.mxu0 %v12180_v8  ;;  %v2334_v10 = vld [vmem:[#allocation9 + $0x1e50] sm:$0xff] }
 0x529   :  { %8825 = vmatprep.subr.bf16.mxu1 %v12182_v46  ;;  %v2338_v8 = vld [vmem:[#allocation9 + $0x1e70] sm:$0xff]  ;;  %v2335_v46 = vld [vmem:[#allocation9 + $0x1e58] sm:$0xff] }
 0x52a   :  { %v12236_v14 = vcombine.high %v2334_v10, %v2338_v8  ;;  %v12235_v17 = vcombine.low %v2334_v10, %v2338_v8  ;;  %v12237_v42 = vcombine.low %v2335_v46, %v2339_v49  ;;  %v2397_v10 = vrot.slane %v13845_v3, %v13650_v21  ;;  %v2383_v8 = vld [vmem:[#allocation9 + $0x1fd8] sm:$0xff] }
 0x52b   :  { %8498 = vmatpush1.bf16.msra.mxu0 %v12179_v22  ;;  %v12238_v22 = vcombine.high %v2335_v46, %v2339_v49  ;;  %v2387_v46 = vld [vmem:[#allocation9 + $0x1ff8] sm:$0xff] }
 0x52c   :  { %8826 = vmatpush1.bf16.msra.mxu1 %v12181_v59  ;;  %8499 = vmatprep.subr.bf16.mxu0 %v12188_v1  ;;  %v2342_v59 = vld [vmem:[#allocation9 + $0x1e90] sm:$0xff] }
 0x52d   :  { %8827 = vmatprep.subr.bf16.mxu1 %v12190_v53  ;;  %v2346_v1 = vld [vmem:[#allocation9 + $0x1eb0] sm:$0xff]  ;;  %v2343_v53 = vld [vmem:[#allocation9 + $0x1e98] sm:$0xff] }
 0x52e   :  { %v12244_v18 = vcombine.high %v2342_v59, %v2346_v1  ;;  %v12243_v47 = vcombine.low %v2342_v59, %v2346_v1  ;;  %v12245_v6 = vcombine.low %v2343_v53, %v2347_v31  ;;  %v12285_v1 = vcombine.low %v2383_v8, %v2387_v46 }
 0x52f   :  { %8500 = vmatpush1.bf16.msra.mxu0 %v12187_v43  ;;  %v12246_v43 = vcombine.high %v2343_v53, %v2347_v31  ;;  %v12789_v53 = vld [vmem:[#allocation12 + $0x4] ss:$16 sps:$4 sm:$0xff]   ;;  %v12792_v31 = vld [vmem:[#allocation12 + $0xc] ss:$16 sps:$4 sm:$0xff]  }
 0x530   :  { %8828 = vmatpush1.bf16.msra.mxu1 %v12189_v40  ;;  %8501 = vmatprep.subr.bf16.mxu0 %v12196_v38  ;;  %v2350_v40 = vld [vmem:[#allocation9 + $0x1ed0] sm:$0xff] }
 0x531   :  { %8829 = vmatprep.subr.bf16.mxu1 %v12198_v24  ;;  %v2354_v38 = vld [vmem:[#allocation9 + $0x1ef0] sm:$0xff]  ;;  %v2351_v24 = vld [vmem:[#allocation9 + $0x1ed8] sm:$0xff] }
 0x532   :  { %v12252_v60 = vcombine.high %v2350_v40, %v2354_v38  ;;  %v12251_v33 = vcombine.low %v2350_v40, %v2354_v38  ;;  %v12253_v23 = vcombine.low %v2351_v24, %v2355_v48  ;;  %v12793_v38 = vld [vmem:[#allocation12 + $0x20] ss:$16 sps:$4 sm:$0xff]  }
 0x533   :  { %8502 = vmatpush1.bf16.msra.mxu0 %v12195_v27  ;;  %v12254_v27 = vcombine.high %v2351_v24, %v2355_v48  ;;  %v12796_v24 = vld [vmem:[#allocation12 + $0x28] ss:$16 sps:$4 sm:$0xff]   ;;  %v12801_v48 = vld [vmem:[#allocation12 + $0x44] ss:$16 sps:$4 sm:$0xff]  }
 0x534   :  { %8830 = vmatpush1.bf16.msra.mxu1 %v12197_v15  ;;  %8503 = vmatprep.subr.bf16.mxu0 %v12204_v28  ;;  %v2358_v15 = vld [vmem:[#allocation9 + $0x1f10] sm:$0xff] }
 0x535   :  { %8831 = vmatprep.subr.bf16.mxu1 %v12206_v30  ;;  %v2362_v28 = vld [vmem:[#allocation9 + $0x1f30] sm:$0xff]  ;;  %v2359_v30 = vld [vmem:[#allocation9 + $0x1f18] sm:$0xff] }
 0x536   :  { %v12260_v35 = vcombine.high %v2358_v15, %v2362_v28  ;;  %v12259_v26 = vcombine.low %v2358_v15, %v2362_v28  ;;  %v12261_v29 = vcombine.low %v2359_v30, %v2363_v32  ;;  %v12810_v15 = vld [vmem:[#allocation12 + $0x6c] ss:$16 sps:$4 sm:$0xff]   ;;  %v12808_v28 = vld [vmem:[#allocation12 + $0x68] ss:$16 sps:$4 sm:$0xff]  }
 0x537   :  { %8504 = vmatpush1.bf16.msra.mxu0 %v12203_v39  ;;  %v12262_v39 = vcombine.high %v2359_v30, %v2363_v32  ;;  %v12813_v30 = vld [vmem:[#allocation12 + $0x84] ss:$16 sps:$4 sm:$0xff]   ;;  %v12816_v32 = vld [vmem:[#allocation12 + $0x8c] ss:$16 sps:$4 sm:$0xff]  }
 0x538   :  { %8832 = vmatpush1.bf16.msra.mxu1 %v12205_v36  ;;  %8505 = vmatprep.subr.bf16.mxu0 %v12212_v13  ;;  %v2366_v36 = vld [vmem:[#allocation9 + $0x1f50] sm:$0xff] }
 0x539   :  { %8833 = vmatprep.subr.bf16.mxu1 %v12214_v0  ;;  %v2370_v13 = vld [vmem:[#allocation9 + $0x1f70] sm:$0xff]  ;;  %v2367_v0 = vld [vmem:[#allocation9 + $0x1f58] sm:$0xff] }
 0x53a   :  { %v12268_v55 = vcombine.high %v2366_v36, %v2370_v13  ;;  %v12267_v2 = vcombine.low %v2366_v36, %v2370_v13  ;;  %v12269_v20 = vcombine.low %v2367_v0, %v2371_v54  ;;  %v12817_v36 = vld [vmem:[#allocation12 + $0xa0] ss:$16 sps:$4 sm:$0xff]   ;;  %v12820_v13 = vld [vmem:[#allocation12 + $0xa8] ss:$16 sps:$4 sm:$0xff]  }
 0x53b   :  { %8506 = vmatpush1.bf16.msra.mxu0 %v12211_v56  ;;  %v12270_v56 = vcombine.high %v2367_v0, %v2371_v54  ;;  %v12825_v0 = vld [vmem:[#allocation12 + $0xc4] ss:$16 sps:$4 sm:$0xff]   ;;  %v12828_v54 = vld [vmem:[#allocation12 + $0xcc] ss:$16 sps:$4 sm:$0xff]  }
 0x53c   :  { %8834 = vmatpush1.bf16.msra.mxu1 %v12213_v11  ;;  %8507 = vmatprep.subr.bf16.mxu0 %v12220_v57  ;;  %v2374_v11 = vld [vmem:[#allocation9 + $0x1f90] sm:$0xff] }
 0x53d   :  { %8835 = vmatprep.subr.bf16.mxu1 %v12222_v58  ;;  %v2378_v57 = vld [vmem:[#allocation9 + $0x1fb0] sm:$0xff]  ;;  %v2375_v58 = vld [vmem:[#allocation9 + $0x1f98] sm:$0xff] }
 0x53e   :  { %v12275_v49 = vcombine.low %v2374_v11, %v2378_v57 }
 0x53f   :  { %8508 = vmatpush1.bf16.msra.mxu0 %v12219_v4  ;;  %v12276_v4 = vcombine.high %v2374_v11, %v2378_v57  ;;  %v12829_v11 = vld [vmem:[#allocation12 + $0xe0] ss:$16 sps:$4 sm:$0xff]   ;;  %v12832_v57 = vld [vmem:[#allocation12 + $0xe8] ss:$16 sps:$4 sm:$0xff]  }
 0x540   :  { %8836 = vmatpush1.bf16.msra.mxu1 %v12221_v7  ;;  %8509 = vmatprep.subr.bf16.mxu0 %v12228_v16  ;;  %v12278_v7 = vcombine.high %v2375_v58, %v2379_v61  ;;  %v2382_v16 = vld [vmem:[#allocation9 + $0x1fd0] sm:$0xff] }
 0x541   :  { %8837 = vmatprep.subr.bf16.mxu1 %v12230_v9  ;;  %v2386_v9 = vld [vmem:[#allocation9 + $0x1ff0] sm:$0xff] }
 0x542   :  { %v12283_v59 = vcombine.low %v2382_v16, %v2386_v9 }
 0x543   :  { %8510 = vmatpush1.bf16.msra.mxu0 %v12227_v12  ;;  %v12277_v12 = vcombine.low %v2375_v58, %v2379_v61  ;;  %v12837_v58 = vld [vmem:[#allocation12 + $0x104] ss:$16 sps:$4 sm:$0xff]   ;;  %v12840_v61 = vld [vmem:[#allocation12 + $0x10c] ss:$16 sps:$4 sm:$0xff]  }
 0x544   :  { %8838 = vmatpush1.bf16.msra.mxu1 %v12229_v41  ;;  %8511 = vmatprep.subr.bf16.mxu0 %v12236_v14  ;;  %v12284_v41 = vcombine.high %v2382_v16, %v2386_v9  ;;  %v12286_v14 = vcombine.high %v2383_v8, %v2387_v46  ;;  %v12841_v16 = vld [vmem:[#allocation12 + $0x120] ss:$16 sps:$4 sm:$0xff]   ;;  %v12844_v9 = vld [vmem:[#allocation12 + $0x128] ss:$16 sps:$4 sm:$0xff]   ;;  %v12852_v8 = vld [vmem:[#allocation12 + $0x14c] ss:$16 sps:$4 sm:$0xff]  }
 0x545   :  { %8839 = vmatprep.subr.bf16.mxu1 %v12238_v22  ;;  %v12621_v22 = vadd.f32 %v13825_v45, %v2397_v10  ;;  %v12798_v45 = vld [vmem:[#allocation12 + $0x2c] ss:$16 sps:$4 sm:$0xff]   ;;  %v12849_v10 = vld [vmem:[#allocation12 + $0x144] ss:$16 sps:$4 sm:$0xff]   ;;  %v12847_v46 = vld [vmem:[#allocation12 + $0x140] ss:$16 sps:$4 sm:$0xff]  }
 0x547   :  { %8512 = vmatpush1.bf16.msra.mxu0 %v12235_v17  ;;  %v8863_v17 = vmax.f32 %v12621_v22, 0.0  ;;  %v12856_v22 = vld [vmem:[#allocation12 + $0x168] ss:$16 sps:$4 sm:$0xff]  }
 0x548   :  { %8840 = vmatpush1.bf16.msra.mxu1 %v12237_v42  ;;  %8513 = vmatprep.subr.bf16.mxu0 %v12244_v18  ;;  %v12787_v42 = vld [vmem:[#allocation12] ss:$16 sps:$4 sm:$0xff]   ;;  %v12790_v18 = vld [vmem:[#allocation12 + $0x8] ss:$16 sps:$4 sm:$0xff]  }
 0x549   :  { %8841 = vmatprep.subr.bf16.mxu1 %v12246_v43  ;;  %v12795_v43 = vld [vmem:[#allocation12 + $0x24] ss:$16 sps:$4 sm:$0xff]   ;;  %v8871_v40 = vpack.c.bf16 %v8863_v17, %v8863_v17 }
 0x54a   :  { %v12867_v17 = vld [vmem:[#allocation12 + $0x1a4] ss:$16 sps:$4 sm:$0xff]  }
 0x54b   :  { %8514 = vmatpush1.bf16.msra.mxu0 %v12243_v47  ;;  %v12804_v47 = vld [vmem:[#allocation12 + $0x4c] ss:$16 sps:$4 sm:$0xff]  }
 0x54c   :  { %8842 = vmatpush1.bf16.msra.mxu1 %v12245_v6  ;;  %8515 = vmatprep.subr.bf16.mxu0 %v12252_v60  ;;  %v12799_v6 = vld [vmem:[#allocation12 + $0x40] ss:$16 sps:$4 sm:$0xff]   ;;  %v12802_v60 = vld [vmem:[#allocation12 + $0x48] ss:$16 sps:$4 sm:$0xff]  }
 0x54d   :  { %8843 = vmatprep.subr.bf16.mxu1 %v12254_v27  ;;  %v12807_v27 = vld [vmem:[#allocation12 + $0x64] ss:$16 sps:$4 sm:$0xff]  }
 0x54f   :  { %8516 = vmatpush1.bf16.msra.mxu0 %v12251_v33  ;;  %v12811_v33 = vld [vmem:[#allocation12 + $0x80] ss:$16 sps:$4 sm:$0xff]  }
 0x550   :  { %8844 = vmatpush1.bf16.msra.mxu1 %v12253_v23  ;;  %8517 = vmatprep.subr.bf16.mxu0 %v12260_v35  ;;  %v12814_v23 = vld [vmem:[#allocation12 + $0x88] ss:$16 sps:$4 sm:$0xff]   ;;  %v12819_v35 = vld [vmem:[#allocation12 + $0xa4] ss:$16 sps:$4 sm:$0xff]  }
 0x551   :  { %8845 = vmatprep.subr.bf16.mxu1 %v12262_v39  ;;  %v12822_v39 = vld [vmem:[#allocation12 + $0xac] ss:$16 sps:$4 sm:$0xff]  }
 0x553   :  { %8518 = vmatpush1.bf16.msra.mxu0 %v12259_v26  ;;  %v12823_v26 = vld [vmem:[#allocation12 + $0xc0] ss:$16 sps:$4 sm:$0xff]  }
 0x554   :  { %8846 = vmatpush1.bf16.msra.mxu1 %v12261_v29  ;;  %8519 = vmatprep.subr.bf16.mxu0 %v12268_v55  ;;  %v12826_v29 = vld [vmem:[#allocation12 + $0xc8] ss:$16 sps:$4 sm:$0xff]   ;;  %v12831_v55 = vld [vmem:[#allocation12 + $0xe4] ss:$16 sps:$4 sm:$0xff]  }
 0x555   :  { %8847 = vmatprep.subr.bf16.mxu1 %v12270_v56  ;;  %v12834_v56 = vld [vmem:[#allocation12 + $0xec] ss:$16 sps:$4 sm:$0xff]  }
 0x557   :  { %8520 = vmatpush1.bf16.msra.mxu0 %v12267_v2  ;;  %v12835_v2 = vld [vmem:[#allocation12 + $0x100] ss:$16 sps:$4 sm:$0xff]  }
 0x558   :  { %8848 = vmatpush1.bf16.msra.mxu1 %v12269_v20  ;;  %8521 = vmatprep.subr.bf16.mxu0 %v12276_v4  ;;  %v12838_v20 = vld [vmem:[#allocation12 + $0x108] ss:$16 sps:$4 sm:$0xff]   ;;  %v12843_v4 = vld [vmem:[#allocation12 + $0x124] ss:$16 sps:$4 sm:$0xff]  }
 0x559   :  { %8849 = vmatprep.subr.bf16.mxu1 %v12278_v7  ;;  %v12846_v7 = vld [vmem:[#allocation12 + $0x12c] ss:$16 sps:$4 sm:$0xff]  }
 0x55b   :  { %8522 = vmatpush1.bf16.msra.mxu0 %v12275_v49  ;;  %v12850_v49 = vld [vmem:[#allocation12 + $0x148] ss:$16 sps:$4 sm:$0xff]  }
 0x55c   :  { %8850 = vmatpush1.bf16.msra.mxu1 %v12277_v12  ;;  %8523 = vmatprep.subr.bf16.mxu0 %v12284_v41  ;;  %v12855_v12 = vld [vmem:[#allocation12 + $0x164] ss:$16 sps:$4 sm:$0xff]   ;;  %v12858_v41 = vld [vmem:[#allocation12 + $0x16c] ss:$16 sps:$4 sm:$0xff]  }
 0x55d   :  { %8851 = vmatprep.subr.bf16.mxu1 %v12286_v14  ;;  %v12853_v14 = vld [vmem:[#allocation12 + $0x160] ss:$16 sps:$4 sm:$0xff]  }
 0x55f   :  { %8524 = vmatpush1.bf16.msra.mxu0 %v12283_v59  ;;  %v12861_v59 = vld [vmem:[#allocation12 + $0x184] ss:$16 sps:$4 sm:$0xff]  }
 0x560   :  { %8852 = vmatpush1.bf16.msra.mxu1 %v12285_v1  ;;  %10436 = vmatprep.subr.bf16.mxu0 %v12789_v53  ;;  %v12864_v1 = vld [vmem:[#allocation12 + $0x18c] ss:$16 sps:$4 sm:$0xff]   ;;  %v12859_v53 = vld [vmem:[#allocation12 + $0x180] ss:$16 sps:$4 sm:$0xff]  }
 0x561   :  { %10600 = vmatprep.subr.bf16.mxu1 %v12792_v31  ;;  %v12862_v31 = vld [vmem:[#allocation12 + $0x188] ss:$16 sps:$4 sm:$0xff]  }
 0x562   :  { %8526 = vmatmul.mubr.bf16.vlgmr.msra.gmra.mrb[20].mxu0 %v13803_v51 }
 0x563   :  { %8854 = vmatmul.mubr.bf16.vlgmr.msra.gmra.mrb[20].mxu1 %v13803_v51  ;;  %10437 = vmatpush1.bf16.msra.mxu0 %v12787_v42  ;;  %v12805_v51 = vld [vmem:[#allocation12 + $0x60] ss:$16 sps:$4 sm:$0xff]   ;;  %v12870_v42 = vld [vmem:[#allocation12 + $0x1ac] ss:$16 sps:$4 sm:$0xff]  }
 0x564   :  { %10468 = vmatprep.mubr.bf16.mxu0 %v8871_v40  ;;  %10601 = vmatpush1.bf16.msra.mxu1 %v12790_v18  ;;  %v12865_v18 = vld [vmem:[#allocation12 + $0x1a0] ss:$16 sps:$4 sm:$0xff]  }
 0x565   :  { %10632 = vmatprep.mubr.bf16.mxu1 %v8871_v40  ;;  %10438 = vmatprep.subr.bf16.mxu0 %v12795_v43  ;;  %v2393_v43 = vrot.slane %v13845_v3, %v13645_v19  ;;  %v12868_v40 = vld [vmem:[#allocation12 + $0x1a8] ss:$16 sps:$4 sm:$0xff]  }
 0x566   :  { %10602 = vmatprep.subr.bf16.mxu1 %v12798_v45  ;;  %v12873_v45 = vld [vmem:[#allocation12 + $0x1c4] ss:$16 sps:$4 sm:$0xff]  }
 0x567   :  { %10439 = vmatpush1.bf16.msra.mxu0 %v12793_v38  ;;  %v12876_v38 = vld [vmem:[#allocation12 + $0x1cc] ss:$16 sps:$4 sm:$0xff]  }
 0x568   :  { %10603 = vmatpush1.bf16.msra.mxu1 %v12796_v24  ;;  %10440 = vmatprep.subr.bf16.mxu0 %v12801_v48  ;;  %v2405_v24 = vrot.slane %v13845_v3, %v13657_v25  ;;  %v12871_v48 = vld [vmem:[#allocation12 + $0x1c0] ss:$16 sps:$4 sm:$0xff]  }
 0x569   :  { %10604 = vmatprep.subr.bf16.mxu1 %v12804_v47  ;;  %v12620_v47 = vadd.f32 %v13821_v63, %v2393_v43  ;;  %v12883_v63 = vld [vmem:[#allocation12 + $0x200] ss:$16 sps:$4 sm:$0xff]   ;;  %v12942_v43 = vld [vmem:[#allocation12 + $0x32c] ss:$16 sps:$4 sm:$0xff]  }
 0x56b   :  { %10441 = vmatpush1.bf16.msra.mxu0 %v12799_v6  ;;  %v12874_v6 = vld [vmem:[#allocation12 + $0x1c8] ss:$16 sps:$4 sm:$0xff]  }
 0x56c   :  { %10605 = vmatpush1.bf16.msra.mxu1 %v12802_v60  ;;  %10442 = vmatprep.subr.bf16.mxu0 %v12807_v27  ;;  %v12879_v60 = vld [vmem:[#allocation12 + $0x1e4] ss:$16 sps:$4 sm:$0xff]   ;;  %v12882_v27 = vld [vmem:[#allocation12 + $0x1ec] ss:$16 sps:$4 sm:$0xff]  }
 0x56d   :  { %10606 = vmatprep.subr.bf16.mxu1 %v12810_v15  ;;  %v12623_v15 = vadd.f32 %v13827_v52, %v2405_v24  ;;  %v12894_v52 = vld [vmem:[#allocation12 + $0x22c] ss:$16 sps:$4 sm:$0xff]  }
 0x56e   :  { %v12948_v24 = vld [vmem:[#allocation12 + $0x34c] ss:$16 sps:$4 sm:$0xff]  }
 0x56f   :  { %10443 = vmatpush1.bf16.msra.mxu0 %v12805_v51  ;;  %v12877_v51 = vld [vmem:[#allocation12 + $0x1e0] ss:$16 sps:$4 sm:$0xff]  }
 0x570   :  { %10607 = vmatpush1.bf16.msra.mxu1 %v12808_v28  ;;  %10444 = vmatprep.subr.bf16.mxu0 %v12813_v30  ;;  %v8862_v28 = vmax.f32 %v12620_v47, 0.0  ;;  %v12880_v30 = vld [vmem:[#allocation12 + $0x1e8] ss:$16 sps:$4 sm:$0xff]  }
 0x571   :  { %10608 = vmatprep.subr.bf16.mxu1 %v12816_v32  ;;  %v12885_v32 = vld [vmem:[#allocation12 + $0x204] ss:$16 sps:$4 sm:$0xff]   ;;  %v12946_v47 = vld [vmem:[#allocation12 + $0x348] ss:$16 sps:$4 sm:$0xff]  }
 0x573   :  { %10445 = vmatpush1.bf16.msra.mxu0 %v12811_v33  ;;  %v12888_v33 = vld [vmem:[#allocation12 + $0x20c] ss:$16 sps:$4 sm:$0xff]  }
 0x574   :  { %10609 = vmatpush1.bf16.msra.mxu1 %v12814_v23  ;;  %10446 = vmatprep.subr.bf16.mxu0 %v12819_v35  ;;  %v8865_v23 = vmax.f32 %v12623_v15, 0.0  ;;  %v8870_v35 = vpack.c.bf16 %v8862_v28, %v8862_v28  ;;  %v12952_v15 = vld [vmem:[#allocation12 + $0x368] ss:$16 sps:$4 sm:$0xff]   ;;  %v12960_v28 = vld [vmem:[#allocation12 + $0x38c] ss:$16 sps:$4 sm:$0xff]  }
 0x575   :  { %10610 = vmatprep.subr.bf16.mxu1 %v12822_v39  ;;  %v12886_v39 = vld [vmem:[#allocation12 + $0x208] ss:$16 sps:$4 sm:$0xff]  }
 0x577   :  { %10447 = vmatpush1.bf16.msra.mxu0 %v12817_v36  ;;  %v12891_v36 = vld [vmem:[#allocation12 + $0x224] ss:$16 sps:$4 sm:$0xff]  }
 0x578   :  { %10611 = vmatpush1.bf16.msra.mxu1 %v12820_v13  ;;  %10448 = vmatprep.subr.bf16.mxu0 %v12825_v0  ;;  %v8873_v13 = vpack.c.bf16 %v8865_v23, %v8865_v23  ;;  %v12889_v0 = vld [vmem:[#allocation12 + $0x220] ss:$16 sps:$4 sm:$0xff]   ;;  %v12966_v23 = vld [vmem:[#allocation12 + $0x3ac] ss:$16 sps:$4 sm:$0xff]  }
 0x579   :  { %10612 = vmatprep.subr.bf16.mxu1 %v12828_v54  ;;  %v12892_v54 = vld [vmem:[#allocation12 + $0x228] ss:$16 sps:$4 sm:$0xff]  }
 0x57b   :  { %10449 = vmatpush1.bf16.msra.mxu0 %v12823_v26  ;;  %v12897_v26 = vld [vmem:[#allocation12 + $0x244] ss:$16 sps:$4 sm:$0xff]  }
 0x57c   :  { %10613 = vmatpush1.bf16.msra.mxu1 %v12826_v29  ;;  %10450 = vmatprep.subr.bf16.mxu0 %v12831_v55  ;;  %v12900_v29 = vld [vmem:[#allocation12 + $0x24c] ss:$16 sps:$4 sm:$0xff]   ;;  %v12895_v55 = vld [vmem:[#allocation12 + $0x240] ss:$16 sps:$4 sm:$0xff]  }
 0x57d   :  { %10614 = vmatprep.subr.bf16.mxu1 %v12834_v56  ;;  %v12898_v56 = vld [vmem:[#allocation12 + $0x248] ss:$16 sps:$4 sm:$0xff]  }
 0x57f   :  { %10451 = vmatpush1.bf16.msra.mxu0 %v12829_v11  ;;  %v12903_v11 = vld [vmem:[#allocation12 + $0x264] ss:$16 sps:$4 sm:$0xff]  }
 0x580   :  { %10615 = vmatpush1.bf16.msra.mxu1 %v12832_v57  ;;  %10452 = vmatprep.subr.bf16.mxu0 %v12837_v58  ;;  %v12906_v57 = vld [vmem:[#allocation12 + $0x26c] ss:$16 sps:$4 sm:$0xff]   ;;  %v12901_v58 = vld [vmem:[#allocation12 + $0x260] ss:$16 sps:$4 sm:$0xff]  }
 0x581   :  { %10616 = vmatprep.subr.bf16.mxu1 %v12840_v61  ;;  %v12904_v61 = vld [vmem:[#allocation12 + $0x268] ss:$16 sps:$4 sm:$0xff]  }
 0x583   :  { %10453 = vmatpush1.bf16.msra.mxu0 %v12835_v2  ;;  %v12909_v2 = vld [vmem:[#allocation12 + $0x284] ss:$16 sps:$4 sm:$0xff]  }
 0x584   :  { %10617 = vmatpush1.bf16.msra.mxu1 %v12838_v20  ;;  %10454 = vmatprep.subr.bf16.mxu0 %v12843_v4  ;;  %v12912_v20 = vld [vmem:[#allocation12 + $0x28c] ss:$16 sps:$4 sm:$0xff]   ;;  %v12907_v4 = vld [vmem:[#allocation12 + $0x280] ss:$16 sps:$4 sm:$0xff]  }
 0x585   :  { %10618 = vmatprep.subr.bf16.mxu1 %v12846_v7  ;;  %v12910_v7 = vld [vmem:[#allocation12 + $0x288] ss:$16 sps:$4 sm:$0xff]  }
 0x587   :  { %10455 = vmatpush1.bf16.msra.mxu0 %v12841_v16  ;;  %v12915_v16 = vld [vmem:[#allocation12 + $0x2a4] ss:$16 sps:$4 sm:$0xff]  }
 0x588   :  { %10619 = vmatpush1.bf16.msra.mxu1 %v12844_v9  ;;  %10456 = vmatprep.subr.bf16.mxu0 %v12849_v10  ;;  %v12918_v9 = vld [vmem:[#allocation12 + $0x2ac] ss:$16 sps:$4 sm:$0xff]   ;;  %v12913_v10 = vld [vmem:[#allocation12 + $0x2a0] ss:$16 sps:$4 sm:$0xff]  }
 0x589   :  { %10620 = vmatprep.subr.bf16.mxu1 %v12852_v8  ;;  %v12916_v8 = vld [vmem:[#allocation12 + $0x2a8] ss:$16 sps:$4 sm:$0xff]  }
 0x58b   :  { %10457 = vmatpush1.bf16.msra.mxu0 %v12847_v46  ;;  %v12921_v46 = vld [vmem:[#allocation12 + $0x2c4] ss:$16 sps:$4 sm:$0xff]  }
 0x58c   :  { %10621 = vmatpush1.bf16.msra.mxu1 %v12850_v49  ;;  %10458 = vmatprep.subr.bf16.mxu0 %v12855_v12  ;;  %v12924_v49 = vld [vmem:[#allocation12 + $0x2cc] ss:$16 sps:$4 sm:$0xff]   ;;  %v12919_v12 = vld [vmem:[#allocation12 + $0x2c0] ss:$16 sps:$4 sm:$0xff]  }
 0x58d   :  { %10622 = vmatprep.subr.bf16.mxu1 %v12858_v41  ;;  %v12922_v41 = vld [vmem:[#allocation12 + $0x2c8] ss:$16 sps:$4 sm:$0xff]  }
 0x58f   :  { %10459 = vmatpush1.bf16.msra.mxu0 %v12853_v14  ;;  %v12927_v14 = vld [vmem:[#allocation12 + $0x2e4] ss:$16 sps:$4 sm:$0xff]  }
 0x590   :  { %10623 = vmatpush1.bf16.msra.mxu1 %v12856_v22  ;;  %10460 = vmatprep.subr.bf16.mxu0 %v12861_v59  ;;  %v12930_v22 = vld [vmem:[#allocation12 + $0x2ec] ss:$16 sps:$4 sm:$0xff]   ;;  %v12925_v59 = vld [vmem:[#allocation12 + $0x2e0] ss:$16 sps:$4 sm:$0xff]  }
 0x591   :  { %10624 = vmatprep.subr.bf16.mxu1 %v12864_v1  ;;  %v12928_v1 = vld [vmem:[#allocation12 + $0x2e8] ss:$16 sps:$4 sm:$0xff]  }
 0x593   :  { %10461 = vmatpush1.bf16.msra.mxu0 %v12859_v53  ;;  %v12933_v53 = vld [vmem:[#allocation12 + $0x304] ss:$16 sps:$4 sm:$0xff]  }
 0x594   :  { %10625 = vmatpush1.bf16.msra.mxu1 %v12862_v31  ;;  %10462 = vmatprep.subr.bf16.mxu0 %v12867_v17  ;;  %v12936_v31 = vld [vmem:[#allocation12 + $0x30c] ss:$16 sps:$4 sm:$0xff]   ;;  %v12931_v17 = vld [vmem:[#allocation12 + $0x300] ss:$16 sps:$4 sm:$0xff]  }
 0x595   :  { %10626 = vmatprep.subr.bf16.mxu1 %v12870_v42  ;;  %v12934_v42 = vld [vmem:[#allocation12 + $0x308] ss:$16 sps:$4 sm:$0xff]  }
 0x597   :  { %10463 = vmatpush1.bf16.msra.mxu0 %v12865_v18  ;;  %v12939_v18 = vld [vmem:[#allocation12 + $0x324] ss:$16 sps:$4 sm:$0xff]  }
 0x598   :  { %10627 = vmatpush1.bf16.msra.mxu1 %v12868_v40  ;;  %10464 = vmatprep.subr.bf16.mxu0 %v12873_v45  ;;  %v12937_v40 = vld [vmem:[#allocation12 + $0x320] ss:$16 sps:$4 sm:$0xff]   ;;  %v12940_v45 = vld [vmem:[#allocation12 + $0x328] ss:$16 sps:$4 sm:$0xff]  }
 0x599   :  { %10628 = vmatprep.subr.bf16.mxu1 %v12876_v38  ;;  %v12945_v38 = vld [vmem:[#allocation12 + $0x344] ss:$16 sps:$4 sm:$0xff]  }
 0x59b   :  { %10465 = vmatpush1.bf16.msra.mxu0 %v12871_v48  ;;  %v12943_v48 = vld [vmem:[#allocation12 + $0x340] ss:$16 sps:$4 sm:$0xff]  }
 0x59c   :  { %10629 = vmatpush1.bf16.msra.mxu1 %v12874_v6  ;;  %10466 = vmatprep.subr.bf16.mxu0 %v12879_v60  ;;  %v12951_v6 = vld [vmem:[#allocation12 + $0x364] ss:$16 sps:$4 sm:$0xff]   ;;  %v12954_v60 = vld [vmem:[#allocation12 + $0x36c] ss:$16 sps:$4 sm:$0xff]  }
 0x59d   :  { %10630 = vmatprep.subr.bf16.mxu1 %v12882_v27  ;;  %v12949_v27 = vld [vmem:[#allocation12 + $0x360] ss:$16 sps:$4 sm:$0xff]  }
 0x59f   :  { %10467 = vmatpush1.bf16.msra.mxu0 %v12877_v51  ;;  %v12957_v51 = vld [vmem:[#allocation12 + $0x384] ss:$16 sps:$4 sm:$0xff]  }
 0x5a0   :  { %10631 = vmatpush1.bf16.msra.mxu1 %v12880_v30  ;;  %10477 = vmatprep.subr.bf16.mxu0 %v12885_v32  ;;  %v12955_v30 = vld [vmem:[#allocation12 + $0x380] ss:$16 sps:$4 sm:$0xff]   ;;  %v12958_v32 = vld [vmem:[#allocation12 + $0x388] ss:$16 sps:$4 sm:$0xff]  }
 0x5a1   :  { %10641 = vmatprep.subr.bf16.mxu1 %v12888_v33  ;;  %v12963_v33 = vld [vmem:[#allocation12 + $0x3a4] ss:$16 sps:$4 sm:$0xff]  }
 0x5a2   :  { %10469 = vmatmul.mubr.bf16.vlgmr.msra.gmra.mrb[24].mxu0 %v8870_v35 }
 0x5a3   :  { %10633 = vmatmul.mubr.bf16.vlgmr.msra.gmra.mrb[24].mxu1 %v8870_v35  ;;  %10478 = vmatpush1.bf16.msra.mxu0 %v12883_v63  ;;  %v12961_v63 = vld [vmem:[#allocation12 + $0x3a0] ss:$16 sps:$4 sm:$0xff]   ;;  %v2401_v35 = vrot.slane %v13845_v3, %v13686_v37 }
 0x5a4   :  { %10509 = vmatprep.mubr.bf16.mxu0 %v8873_v13  ;;  %10642 = vmatpush1.bf16.msra.mxu1 %v12886_v39  ;;  %v12964_v39 = vld [vmem:[#allocation12 + $0x3a8] ss:$16 sps:$4 sm:$0xff]  }
 0x5a5   :  { %10673 = vmatprep.mubr.bf16.mxu1 %v8873_v13  ;;  %10479 = vmatprep.subr.bf16.mxu0 %v12891_v36  ;;  %v12969_v36 = vld [vmem:[#allocation12 + $0x3c4] ss:$16 sps:$4 sm:$0xff]   ;;  %v12972_v13 = vld [vmem:[#allocation12 + $0x3cc] ss:$16 sps:$4 sm:$0xff]  }
 0x5a6   :  { %10643 = vmatprep.subr.bf16.mxu1 %v12894_v52  ;;  %v12967_v52 = vld [vmem:[#allocation12 + $0x3c0] ss:$16 sps:$4 sm:$0xff]  }
 0x5a7   :  { %10480 = vmatpush1.bf16.msra.mxu0 %v12889_v0  ;;  %v12622_v0 = vadd.f32 %v13823_v44, %v2401_v35  ;;  %v12982_v44 = vld [vmem:[#allocation12 + $0x408] ss:$16 sps:$4 sm:$0xff]   ;;  %v13039_v35 = vld [vmem:[#allocation12 + $0x540] ss:$16 sps:$4 sm:$0xff]  }
 0x5a8   :  { %10644 = vmatpush1.bf16.msra.mxu1 %v12892_v54  ;;  %10481 = vmatprep.subr.bf16.mxu0 %v12897_v26  ;;  %v12970_v54 = vld [vmem:[#allocation12 + $0x3c8] ss:$16 sps:$4 sm:$0xff]   ;;  %v12975_v26 = vld [vmem:[#allocation12 + $0x3e4] ss:$16 sps:$4 sm:$0xff]  }
 0x5a9   :  { %10645 = vmatprep.subr.bf16.mxu1 %v12900_v29  ;;  %v12978_v29 = vld [vmem:[#allocation12 + $0x3ec] ss:$16 sps:$4 sm:$0xff]  }
 0x5ab   :  { %10482 = vmatpush1.bf16.msra.mxu0 %v12895_v55  ;;  %v12973_v55 = vld [vmem:[#allocation12 + $0x3e0] ss:$16 sps:$4 sm:$0xff]  }
 0x5ac   :  { %10646 = vmatpush1.bf16.msra.mxu1 %v12898_v56  ;;  %10483 = vmatprep.subr.bf16.mxu0 %v12903_v11  ;;  %v8864_v56 = vmax.f32 %v12622_v0, 0.0  ;;  %v12976_v11 = vld [vmem:[#allocation12 + $0x3e8] ss:$16 sps:$4 sm:$0xff]  }
 0x5ad   :  { %10647 = vmatprep.subr.bf16.mxu1 %v12906_v57  ;;  %v12981_v57 = vld [vmem:[#allocation12 + $0x404] ss:$16 sps:$4 sm:$0xff]   ;;  %v13048_v0 = vld [vmem:[#allocation12 + $0x568] ss:$16 sps:$4 sm:$0xff]  }
 0x5af   :  { %10484 = vmatpush1.bf16.msra.mxu0 %v12901_v58  ;;  %v12984_v58 = vld [vmem:[#allocation12 + $0x40c] ss:$16 sps:$4 sm:$0xff]  }
 0x5b0   :  { %10648 = vmatpush1.bf16.msra.mxu1 %v12904_v61  ;;  %10485 = vmatprep.subr.bf16.mxu0 %v12909_v2  ;;  %v12979_v61 = vld [vmem:[#allocation12 + $0x400] ss:$16 sps:$4 sm:$0xff]   ;;  %v8872_v2 = vpack.c.bf16 %v8864_v56, %v8864_v56  ;;  %v13059_v56 = vld [vmem:[#allocation12 + $0x5a4] ss:$16 sps:$4 sm:$0xff]  }
 0x5b1   :  { %10649 = vmatprep.subr.bf16.mxu1 %v12912_v20  ;;  %v12987_v20 = vld [vmem:[#allocation12 + $0x424] ss:$16 sps:$4 sm:$0xff]  }
 0x5b3   :  { %10486 = vmatpush1.bf16.msra.mxu0 %v12907_v4  ;;  %v12990_v4 = vld [vmem:[#allocation12 + $0x42c] ss:$16 sps:$4 sm:$0xff]  }
 0x5b4   :  { %10650 = vmatpush1.bf16.msra.mxu1 %v12910_v7  ;;  %10487 = vmatprep.subr.bf16.mxu0 %v12915_v16  ;;  %v12985_v7 = vld [vmem:[#allocation12 + $0x420] ss:$16 sps:$4 sm:$0xff]   ;;  %v12988_v16 = vld [vmem:[#allocation12 + $0x428] ss:$16 sps:$4 sm:$0xff]  }
 0x5b5   :  { %10651 = vmatprep.subr.bf16.mxu1 %v12918_v9  ;;  %v12993_v9 = vld [vmem:[#allocation12 + $0x444] ss:$16 sps:$4 sm:$0xff]  }
 0x5b7   :  { %10488 = vmatpush1.bf16.msra.mxu0 %v12913_v10  ;;  %v12996_v10 = vld [vmem:[#allocation12 + $0x44c] ss:$16 sps:$4 sm:$0xff]  }
 0x5b8   :  { %10652 = vmatpush1.bf16.msra.mxu1 %v12916_v8  ;;  %10489 = vmatprep.subr.bf16.mxu0 %v12921_v46  ;;  %v12991_v8 = vld [vmem:[#allocation12 + $0x440] ss:$16 sps:$4 sm:$0xff]   ;;  %v12994_v46 = vld [vmem:[#allocation12 + $0x448] ss:$16 sps:$4 sm:$0xff]  }
 0x5b9   :  { %10653 = vmatprep.subr.bf16.mxu1 %v12924_v49  ;;  %v12999_v49 = vld [vmem:[#allocation12 + $0x464] ss:$16 sps:$4 sm:$0xff]  }
 0x5bb   :  { %10490 = vmatpush1.bf16.msra.mxu0 %v12919_v12  ;;  %v13002_v12 = vld [vmem:[#allocation12 + $0x46c] ss:$16 sps:$4 sm:$0xff]  }
 0x5bc   :  { %10654 = vmatpush1.bf16.msra.mxu1 %v12922_v41  ;;  %10491 = vmatprep.subr.bf16.mxu0 %v12927_v14  ;;  %v12997_v41 = vld [vmem:[#allocation12 + $0x460] ss:$16 sps:$4 sm:$0xff]   ;;  %v13000_v14 = vld [vmem:[#allocation12 + $0x468] ss:$16 sps:$4 sm:$0xff]  }
 0x5bd   :  { %10655 = vmatprep.subr.bf16.mxu1 %v12930_v22  ;;  %v13005_v22 = vld [vmem:[#allocation12 + $0x484] ss:$16 sps:$4 sm:$0xff]  }
 0x5bf   :  { %10492 = vmatpush1.bf16.msra.mxu0 %v12925_v59  ;;  %v13008_v59 = vld [vmem:[#allocation12 + $0x48c] ss:$16 sps:$4 sm:$0xff]  }
 0x5c0   :  { %10656 = vmatpush1.bf16.msra.mxu1 %v12928_v1  ;;  %10493 = vmatprep.subr.bf16.mxu0 %v12933_v53  ;;  %v13003_v1 = vld [vmem:[#allocation12 + $0x480] ss:$16 sps:$4 sm:$0xff]   ;;  %v13006_v53 = vld [vmem:[#allocation12 + $0x488] ss:$16 sps:$4 sm:$0xff]  }
 0x5c1   :  { %10657 = vmatprep.subr.bf16.mxu1 %v12936_v31  ;;  %v13011_v31 = vld [vmem:[#allocation12 + $0x4a4] ss:$16 sps:$4 sm:$0xff]  }
 0x5c3   :  { %10494 = vmatpush1.bf16.msra.mxu0 %v12931_v17  ;;  %v13014_v17 = vld [vmem:[#allocation12 + $0x4ac] ss:$16 sps:$4 sm:$0xff]  }
 0x5c4   :  { %10658 = vmatpush1.bf16.msra.mxu1 %v12934_v42  ;;  %10495 = vmatprep.subr.bf16.mxu0 %v12939_v18  ;;  %v13009_v42 = vld [vmem:[#allocation12 + $0x4a0] ss:$16 sps:$4 sm:$0xff]   ;;  %v13012_v18 = vld [vmem:[#allocation12 + $0x4a8] ss:$16 sps:$4 sm:$0xff]  }
 0x5c5   :  { %10659 = vmatprep.subr.bf16.mxu1 %v12942_v43  ;;  %v13017_v43 = vld [vmem:[#allocation12 + $0x4c4] ss:$16 sps:$4 sm:$0xff]  }
 0x5c7   :  { %10496 = vmatpush1.bf16.msra.mxu0 %v12937_v40  ;;  %v13020_v40 = vld [vmem:[#allocation12 + $0x4cc] ss:$16 sps:$4 sm:$0xff]  }
 0x5c8   :  { %10660 = vmatpush1.bf16.msra.mxu1 %v12940_v45  ;;  %10497 = vmatprep.subr.bf16.mxu0 %v12945_v38  ;;  %v13015_v45 = vld [vmem:[#allocation12 + $0x4c0] ss:$16 sps:$4 sm:$0xff]   ;;  %v13018_v38 = vld [vmem:[#allocation12 + $0x4c8] ss:$16 sps:$4 sm:$0xff]  }
 0x5c9   :  { %10661 = vmatprep.subr.bf16.mxu1 %v12948_v24  ;;  %v13023_v24 = vld [vmem:[#allocation12 + $0x4e4] ss:$16 sps:$4 sm:$0xff]  }
 0x5cb   :  { %10498 = vmatpush1.bf16.msra.mxu0 %v12943_v48  ;;  %v13026_v48 = vld [vmem:[#allocation12 + $0x4ec] ss:$16 sps:$4 sm:$0xff]  }
 0x5cc   :  { %10662 = vmatpush1.bf16.msra.mxu1 %v12946_v47  ;;  %10499 = vmatprep.subr.bf16.mxu0 %v12951_v6  ;;  %v13021_v47 = vld [vmem:[#allocation12 + $0x4e0] ss:$16 sps:$4 sm:$0xff]   ;;  %v13024_v6 = vld [vmem:[#allocation12 + $0x4e8] ss:$16 sps:$4 sm:$0xff]  }
 0x5cd   :  { %10663 = vmatprep.subr.bf16.mxu1 %v12954_v60  ;;  %v13029_v60 = vld [vmem:[#allocation12 + $0x504] ss:$16 sps:$4 sm:$0xff]  }
 0x5cf   :  { %10500 = vmatpush1.bf16.msra.mxu0 %v12949_v27  ;;  %v13032_v27 = vld [vmem:[#allocation12 + $0x50c] ss:$16 sps:$4 sm:$0xff]  }
 0x5d0   :  { %10664 = vmatpush1.bf16.msra.mxu1 %v12952_v15  ;;  %10501 = vmatprep.subr.bf16.mxu0 %v12957_v51  ;;  %v13027_v15 = vld [vmem:[#allocation12 + $0x500] ss:$16 sps:$4 sm:$0xff]   ;;  %v13030_v51 = vld [vmem:[#allocation12 + $0x508] ss:$16 sps:$4 sm:$0xff]  }
 0x5d1   :  { %10665 = vmatprep.subr.bf16.mxu1 %v12960_v28  ;;  %v13035_v28 = vld [vmem:[#allocation12 + $0x524] ss:$16 sps:$4 sm:$0xff]  }
 0x5d3   :  { %10502 = vmatpush1.bf16.msra.mxu0 %v12955_v30  ;;  %v13038_v30 = vld [vmem:[#allocation12 + $0x52c] ss:$16 sps:$4 sm:$0xff]  }
 0x5d4   :  { %10666 = vmatpush1.bf16.msra.mxu1 %v12958_v32  ;;  %10503 = vmatprep.subr.bf16.mxu0 %v12963_v33  ;;  %v13033_v32 = vld [vmem:[#allocation12 + $0x520] ss:$16 sps:$4 sm:$0xff]   ;;  %v13036_v33 = vld [vmem:[#allocation12 + $0x528] ss:$16 sps:$4 sm:$0xff]  }
 0x5d5   :  { %10667 = vmatprep.subr.bf16.mxu1 %v12966_v23  ;;  %v13041_v23 = vld [vmem:[#allocation12 + $0x544] ss:$16 sps:$4 sm:$0xff]  }
 0x5d7   :  { %10504 = vmatpush1.bf16.msra.mxu0 %v12961_v63  ;;  %v13044_v63 = vld [vmem:[#allocation12 + $0x54c] ss:$16 sps:$4 sm:$0xff]  }
 0x5d8   :  { %10668 = vmatpush1.bf16.msra.mxu1 %v12964_v39  ;;  %10505 = vmatprep.subr.bf16.mxu0 %v12969_v36  ;;  %v13042_v39 = vld [vmem:[#allocation12 + $0x548] ss:$16 sps:$4 sm:$0xff]   ;;  %v13047_v36 = vld [vmem:[#allocation12 + $0x564] ss:$16 sps:$4 sm:$0xff]  }
 0x5d9   :  { %10669 = vmatprep.subr.bf16.mxu1 %v12972_v13  ;;  %v13050_v13 = vld [vmem:[#allocation12 + $0x56c] ss:$16 sps:$4 sm:$0xff]  }
 0x5db   :  { %10506 = vmatpush1.bf16.msra.mxu0 %v12967_v52  ;;  %v13045_v52 = vld [vmem:[#allocation12 + $0x560] ss:$16 sps:$4 sm:$0xff]  }
 0x5dc   :  { %10670 = vmatpush1.bf16.msra.mxu1 %v12970_v54  ;;  %10507 = vmatprep.subr.bf16.mxu0 %v12975_v26  ;;  %v13053_v54 = vld [vmem:[#allocation12 + $0x584] ss:$16 sps:$4 sm:$0xff]   ;;  %v13056_v26 = vld [vmem:[#allocation12 + $0x58c] ss:$16 sps:$4 sm:$0xff]  }
 0x5dd   :  { %10671 = vmatprep.subr.bf16.mxu1 %v12978_v29  ;;  %v13051_v29 = vld [vmem:[#allocation12 + $0x580] ss:$16 sps:$4 sm:$0xff]  }
 0x5df   :  { %10508 = vmatpush1.bf16.msra.mxu0 %v12973_v55  ;;  %v13054_v55 = vld [vmem:[#allocation12 + $0x588] ss:$16 sps:$4 sm:$0xff]  }
 0x5e0   :  { %10672 = vmatpush1.bf16.msra.mxu1 %v12976_v11  ;;  %10518 = vmatprep.subr.bf16.mxu0 %v12981_v57  ;;  %v13062_v11 = vld [vmem:[#allocation12 + $0x5ac] ss:$16 sps:$4 sm:$0xff]   ;;  %v13057_v57 = vld [vmem:[#allocation12 + $0x5a0] ss:$16 sps:$4 sm:$0xff]  }
 0x5e1   :  { %10682 = vmatprep.subr.bf16.mxu1 %v12984_v58  ;;  %v13060_v58 = vld [vmem:[#allocation12 + $0x5a8] ss:$16 sps:$4 sm:$0xff]  }
 0x5e2   :  { %10510 = vmatmul.mubr.bf16.vlgmr.msra.gmra.mrb[24].mxu0 %v8872_v2 }
 0x5e3   :  { %10674 = vmatmul.mubr.bf16.vlgmr.msra.gmra.mrb[24].mxu1 %v8872_v2  ;;  %10519 = vmatpush1.bf16.msra.mxu0 %v12979_v61  ;;  %v13065_v61 = vld [vmem:[#allocation12 + $0x5c4] ss:$16 sps:$4 sm:$0xff]   ;;  %v13068_v2 = vld [vmem:[#allocation12 + $0x5cc] ss:$16 sps:$4 sm:$0xff]  }
 0x5e4   :  { %10683 = vmatpush1.bf16.msra.mxu1 %v12982_v44  ;;  %10520 = vmatprep.subr.bf16.mxu0 %v12987_v20  ;;  %v13063_v44 = vld [vmem:[#allocation12 + $0x5c0] ss:$16 sps:$4 sm:$0xff]   ;;  %v13066_v20 = vld [vmem:[#allocation12 + $0x5c8] ss:$16 sps:$4 sm:$0xff]  }
 0x5e5   :  { %10684 = vmatprep.subr.bf16.mxu1 %v12990_v4  ;;  %v13071_v4 = vld [vmem:[#allocation12 + $0x5e4] ss:$16 sps:$4 sm:$0xff]  }
 0x5e7   :  { %10521 = vmatpush1.bf16.msra.mxu0 %v12985_v7  ;;  %v13074_v7 = vld [vmem:[#allocation12 + $0x5ec] ss:$16 sps:$4 sm:$0xff]  }
 0x5e8   :  { %10685 = vmatpush1.bf16.msra.mxu1 %v12988_v16  ;;  %10522 = vmatprep.subr.bf16.mxu0 %v12993_v9  ;;  %v13069_v16 = vld [vmem:[#allocation12 + $0x5e0] ss:$16 sps:$4 sm:$0xff]   ;;  %v13072_v9 = vld [vmem:[#allocation12 + $0x5e8] ss:$16 sps:$4 sm:$0xff]  }
 0x5e9   :  { %10686 = vmatprep.subr.bf16.mxu1 %v12996_v10  ;;  %v13077_v10 = vld [vmem:[#allocation12 + $0x604] ss:$16 sps:$4 sm:$0xff]  }
 0x5eb   :  { %10523 = vmatpush1.bf16.msra.mxu0 %v12991_v8  ;;  %v13080_v8 = vld [vmem:[#allocation12 + $0x60c] ss:$16 sps:$4 sm:$0xff]  }
 0x5ec   :  { %10687 = vmatpush1.bf16.msra.mxu1 %v12994_v46  ;;  %10524 = vmatprep.subr.bf16.mxu0 %v12999_v49  ;;  %v2409_v46 = vrot.slane %v13845_v3, %v13720_v34  ;;  %v2413_v49 = vrot.slane %v13845_v3, %v13689_v50  ;;  %v13075_v50 = vld [vmem:[#allocation12 + $0x600] ss:$16 sps:$4 sm:$0xff]  }
 0x5ed   :  { %10688 = vmatprep.subr.bf16.mxu1 %v13002_v12  ;;  %v2421_v12 = vrot.slane %v13845_v3, %v13732_v5  ;;  %v13083_v5 = vld [vmem:[#allocation12 + $0x624] ss:$16 sps:$4 sm:$0xff]   ;;  %v13086_v3 = vld [vmem:[#allocation12 + $0x62c] ss:$16 sps:$4 sm:$0xff]  }
 0x5ef   :  { %10525 = vmatpush1.bf16.msra.mxu0 %v12997_v41 }
 0x5f0   :  { %10689 = vmatpush1.bf16.msra.mxu1 %v13000_v14  ;;  %10526 = vmatprep.subr.bf16.mxu0 %v13005_v22 }
 0x5f1   :  { %10690 = vmatprep.subr.bf16.mxu1 %v13008_v59 }
 0x5f3   :  { %10527 = vmatpush1.bf16.msra.mxu0 %v13003_v1 }
 0x5f4   :  { %10691 = vmatpush1.bf16.msra.mxu1 %v13006_v53  ;;  %10528 = vmatprep.subr.bf16.mxu0 %v13011_v31 }
 0x5f5   :  { %10692 = vmatprep.subr.bf16.mxu1 %v13014_v17 }
 0x5f7   :  { %10529 = vmatpush1.bf16.msra.mxu0 %v13009_v42 }
 0x5f8   :  { %10693 = vmatpush1.bf16.msra.mxu1 %v13012_v18  ;;  %10530 = vmatprep.subr.bf16.mxu0 %v13017_v43 }
 0x5f9   :  { %10694 = vmatprep.subr.bf16.mxu1 %v13020_v40 }
 0x5fb   :  { %10531 = vmatpush1.bf16.msra.mxu0 %v13015_v45 }
 0x5fc   :  { %10695 = vmatpush1.bf16.msra.mxu1 %v13018_v38  ;;  %10532 = vmatprep.subr.bf16.mxu0 %v13023_v24  ;;  %v13078_v24 = vld [vmem:[#allocation12 + $0x608] ss:$16 sps:$4 sm:$0xff]  }
 0x5fd   :  { %10696 = vmatprep.subr.bf16.mxu1 %v13026_v48 }
 0x5ff   :  { %10533 = vmatpush1.bf16.msra.mxu0 %v13021_v47 }
 0x600   :  { %10697 = vmatpush1.bf16.msra.mxu1 %v13024_v6  ;;  %10534 = vmatprep.subr.bf16.mxu0 %v13029_v60  ;;  %v13081_v6 = vld [vmem:[#allocation12 + $0x620] ss:$16 sps:$4 sm:$0xff]   ;;  %v13084_v60 = vld [vmem:[#allocation12 + $0x628] ss:$16 sps:$4 sm:$0xff]  }
 0x601   :  { %10698 = vmatprep.subr.bf16.mxu1 %v13032_v27  ;;  %v13089_v27 = vld [vmem:[#allocation12 + $0x644] ss:$16 sps:$4 sm:$0xff]  }
 0x603   :  { %10535 = vmatpush1.bf16.msra.mxu0 %v13027_v15  ;;  %v13092_v15 = vld [vmem:[#allocation12 + $0x64c] ss:$16 sps:$4 sm:$0xff]  }
 0x604   :  { %10699 = vmatpush1.bf16.msra.mxu1 %v13030_v51  ;;  %10536 = vmatprep.subr.bf16.mxu0 %v13035_v28  ;;  %v13087_v51 = vld [vmem:[#allocation12 + $0x640] ss:$16 sps:$4 sm:$0xff]   ;;  %v13090_v28 = vld [vmem:[#allocation12 + $0x648] ss:$16 sps:$4 sm:$0xff]  }
 0x605   :  { %10700 = vmatprep.subr.bf16.mxu1 %v13038_v30  ;;  %v13095_v30 = vld [vmem:[#allocation12 + $0x664] ss:$16 sps:$4 sm:$0xff]  }
 0x607   :  { %10537 = vmatpush1.bf16.msra.mxu0 %v13033_v32  ;;  %v13098_v32 = vld [vmem:[#allocation12 + $0x66c] ss:$16 sps:$4 sm:$0xff]  }
 0x608   :  { %10701 = vmatpush1.bf16.msra.mxu1 %v13036_v33  ;;  %10538 = vmatprep.subr.bf16.mxu0 %v13041_v23  ;;  %v13093_v33 = vld [vmem:[#allocation12 + $0x660] ss:$16 sps:$4 sm:$0xff]   ;;  %v13096_v23 = vld [vmem:[#allocation12 + $0x668] ss:$16 sps:$4 sm:$0xff]  }
 0x609   :  { %10702 = vmatprep.subr.bf16.mxu1 %v13044_v63  ;;  %v13101_v63 = vld [vmem:[#allocation12 + $0x684] ss:$16 sps:$4 sm:$0xff]  }
 0x60b   :  { %10539 = vmatpush1.bf16.msra.mxu0 %v13039_v35  ;;  %v13104_v35 = vld [vmem:[#allocation12 + $0x68c] ss:$16 sps:$4 sm:$0xff]  }
 0x60c   :  { %10703 = vmatpush1.bf16.msra.mxu1 %v13042_v39  ;;  %10540 = vmatprep.subr.bf16.mxu0 %v13047_v36  ;;  %v13099_v39 = vld [vmem:[#allocation12 + $0x680] ss:$16 sps:$4 sm:$0xff]   ;;  %v13102_v36 = vld [vmem:[#allocation12 + $0x688] ss:$16 sps:$4 sm:$0xff]  }
 0x60d   :  { %10704 = vmatprep.subr.bf16.mxu1 %v13050_v13  ;;  %v13107_v13 = vld [vmem:[#allocation12 + $0x6a4] ss:$16 sps:$4 sm:$0xff]  }
 0x60f   :  { %10541 = vmatpush1.bf16.msra.mxu0 %v13045_v52  ;;  %v13110_v52 = vld [vmem:[#allocation12 + $0x6ac] ss:$16 sps:$4 sm:$0xff]  }
 0x610   :  { %10705 = vmatpush1.bf16.msra.mxu1 %v13048_v0  ;;  %10542 = vmatprep.subr.bf16.mxu0 %v13053_v54  ;;  %v13105_v0 = vld [vmem:[#allocation12 + $0x6a0] ss:$16 sps:$4 sm:$0xff]   ;;  %v13108_v54 = vld [vmem:[#allocation12 + $0x6a8] ss:$16 sps:$4 sm:$0xff]  }
 0x611   :  { %10706 = vmatprep.subr.bf16.mxu1 %v13056_v26  ;;  %v13113_v26 = vld [vmem:[#allocation12 + $0x6c4] ss:$16 sps:$4 sm:$0xff]  }
 0x613   :  { %10543 = vmatpush1.bf16.msra.mxu0 %v13051_v29  ;;  %v13116_v29 = vld [vmem:[#allocation12 + $0x6cc] ss:$16 sps:$4 sm:$0xff]  }
 0x614   :  { %10707 = vmatpush1.bf16.msra.mxu1 %v13054_v55  ;;  %10544 = vmatprep.subr.bf16.mxu0 %v13059_v56  ;;  %v13111_v55 = vld [vmem:[#allocation12 + $0x6c0] ss:$16 sps:$4 sm:$0xff]   ;;  %v13114_v56 = vld [vmem:[#allocation12 + $0x6c8] ss:$16 sps:$4 sm:$0xff]  }
 0x615   :  { %10708 = vmatprep.subr.bf16.mxu1 %v13062_v11  ;;  %v13119_v11 = vld [vmem:[#allocation12 + $0x6e4] ss:$16 sps:$4 sm:$0xff]  }
 0x617   :  { %10545 = vmatpush1.bf16.msra.mxu0 %v13057_v57  ;;  %v13122_v57 = vld [vmem:[#allocation12 + $0x6ec] ss:$16 sps:$4 sm:$0xff]  }
 0x618   :  { %10709 = vmatpush1.bf16.msra.mxu1 %v13060_v58  ;;  %10546 = vmatprep.subr.bf16.mxu0 %v13065_v61  ;;  %v13117_v58 = vld [vmem:[#allocation12 + $0x6e0] ss:$16 sps:$4 sm:$0xff]   ;;  %v13120_v61 = vld [vmem:[#allocation12 + $0x6e8] ss:$16 sps:$4 sm:$0xff]  }
 0x619   :  { %10710 = vmatprep.subr.bf16.mxu1 %v13068_v2  ;;  %v13125_v2 = vld [vmem:[#allocation12 + $0x704] ss:$16 sps:$4 sm:$0xff]  }
 0x61b   :  { %10547 = vmatpush1.bf16.msra.mxu0 %v13063_v44  ;;  %v13128_v44 = vld [vmem:[#allocation12 + $0x70c] ss:$16 sps:$4 sm:$0xff]  }
 0x61c   :  { %10711 = vmatpush1.bf16.msra.mxu1 %v13066_v20  ;;  %10548 = vmatprep.subr.bf16.mxu0 %v13071_v4  ;;  %v13123_v20 = vld [vmem:[#allocation12 + $0x700] ss:$16 sps:$4 sm:$0xff]   ;;  %v13126_v4 = vld [vmem:[#allocation12 + $0x708] ss:$16 sps:$4 sm:$0xff]  }
 0x61d   :  { %10712 = vmatprep.subr.bf16.mxu1 %v13074_v7  ;;  %v13131_v7 = vld [vmem:[#allocation12 + $0x724] ss:$16 sps:$4 sm:$0xff]  }
 0x61f   :  { %10549 = vmatpush1.bf16.msra.mxu0 %v13069_v16  ;;  %v13134_v16 = vld [vmem:[#allocation12 + $0x72c] ss:$16 sps:$4 sm:$0xff]  }
 0x620   :  { %10713 = vmatpush1.bf16.msra.mxu1 %v13072_v9  ;;  %10559 = vmatprep.subr.bf16.mxu0 %v13077_v10  ;;  %v13129_v9 = vld [vmem:[#allocation12 + $0x720] ss:$16 sps:$4 sm:$0xff]   ;;  %v13132_v10 = vld [vmem:[#allocation12 + $0x728] ss:$16 sps:$4 sm:$0xff]  }
 0x621   :  { %10723 = vmatprep.subr.bf16.mxu1 %v13080_v8  ;;  %v13137_v8 = vld [vmem:[#allocation12 + $0x744] ss:$16 sps:$4 sm:$0xff]  }
 0x635   :  { %v8527_v41 = vpop.f32.mrb[20].mxu0 }
 0x636   :  { %v12624_v14 = vadd.f32 %v8527_v41, %v2409_v46  ;;  %v13867_v22 = vpop.f32.mrb[20].mxu1  ;;  %v8529_v59 = vpop.f32.mrb[21].mxu0  ;;  %v13140_v46 = vld [vmem:[#allocation12 + $0x74c] ss:$16 sps:$4 sm:$0xff]   ;;  %v13143_v41 = vld [vmem:[#allocation12 + $0x764] ss:$16 sps:$4 sm:$0xff]  }
 0x637   :  { %v12625_v1 = vadd.f32 %v8529_v59, %v2413_v49  ;;  %v8857_v53 = vpop.f32.mrb[21].mxu1  ;;  %v8531_v31 = vpop.f32.mrb[22].mxu0  ;;  %v13135_v49 = vld [vmem:[#allocation12 + $0x740] ss:$16 sps:$4 sm:$0xff]  }
 0x638   :  { %v8866_v17 = vmax.f32 %v12624_v14, 0.0  ;;  %v12627_v42 = vadd.f32 %v8857_v53, %v2421_v12  ;;  %v8859_v18 = vpop.f32.mrb[22].mxu1  ;;  %v8532_v43 = vpop.f32.mrb[23].mxu0  ;;  %v13138_v12 = vld [vmem:[#allocation12 + $0x748] ss:$16 sps:$4 sm:$0xff]  }
 0x639   :  { %v8867_v40 = vmax.f32 %v12625_v1, 0.0  ;;  %v8860_v34 = vpop.f32.mrb[23].mxu1  ;;  %v13146_v14 = vld [vmem:[#allocation12 + $0x76c] ss:$16 sps:$4 sm:$0xff]   ;;  %v13141_v59 = vld [vmem:[#allocation12 + $0x760] ss:$16 sps:$4 sm:$0xff]  }
 0x63a   :  { %v8869_v45 = vmax.f32 %v12627_v42, 0.0  ;;  %v8874_v48 = vpack.c.bf16 %v8866_v17, %v8866_v17  ;;  %v13144_v1 = vld [vmem:[#allocation12 + $0x768] ss:$16 sps:$4 sm:$0xff]   ;;  %v13149_v53 = vld [vmem:[#allocation12 + $0x784] ss:$16 sps:$4 sm:$0xff]  }
 0x63b   :  { %v8875_v38 = vpack.c.bf16 %v8867_v40, %v8867_v40  ;;  %v13152_v31 = vld [vmem:[#allocation12 + $0x78c] ss:$16 sps:$4 sm:$0xff]   ;;  %v13147_v17 = vld [vmem:[#allocation12 + $0x780] ss:$16 sps:$4 sm:$0xff]   ;;  %v13150_v42 = vld [vmem:[#allocation12 + $0x788] ss:$16 sps:$4 sm:$0xff]  }
 0x63c   :  { %v8877_v47 = vpack.c.bf16 %v8869_v45, %v8869_v45  ;;  %v13155_v18 = vld [vmem:[#allocation12 + $0x7a4] ss:$16 sps:$4 sm:$0xff]   ;;  %v13158_v43 = vld [vmem:[#allocation12 + $0x7ac] ss:$16 sps:$4 sm:$0xff]   ;;  %v13153_v40 = vld [vmem:[#allocation12 + $0x7a0] ss:$16 sps:$4 sm:$0xff]  }
 0x63d   :  { %10550 = vmatprep.mubr.bf16.mxu0 %v8875_v38  ;;  %10714 = vmatprep.mubr.bf16.mxu1 %v8875_v38  ;;  %v13156_v34 = vld [vmem:[#allocation12 + $0x7a8] ss:$16 sps:$4 sm:$0xff]  }
 0x63e   :  { %10551 = vmatmul.mubr.bf16.vlgmr.msra.gmra.mrb[24].mxu0 %v8874_v48  ;;  %10715 = vmatmul.mubr.bf16.vlgmr.msra.gmra.mrb[24].mxu1 %v8874_v48  ;;  %v13205_v45 = vld [vmem:[#allocation11] sm:$0xff]  ;;  %v13159_v48 = vld [vmem:[#allocation12 + $0x7c0] ss:$16 sps:$4 sm:$0xff]  }
 0x63f   :  { %10560 = vmatpush1.bf16.msra.mxu0 %v13075_v50  ;;  %10724 = vmatpush1.bf16.msra.mxu1 %v13078_v24  ;;  %v2417_v38 = vrot.slane %v13205_v45, %v13727_v62  ;;  %v13161_v50 = vld [vmem:[#allocation12 + $0x7c4] ss:$16 sps:$4 sm:$0xff]   ;;  %v13164_v24 = vld [vmem:[#allocation12 + $0x7cc] ss:$16 sps:$4 sm:$0xff]  }
 0x640   :  { %10591 = vmatprep.mubr.bf16.mxu0 %v8877_v47  ;;  %10755 = vmatprep.mubr.bf16.mxu1 %v8877_v47  ;;  %v13167_v47 = vld [vmem:[#allocation12 + $0x7e4] ss:$16 sps:$4 sm:$0xff]  }
 0x641   :  { %10561 = vmatprep.subr.bf16.mxu0 %v13083_v5  ;;  %10725 = vmatprep.subr.bf16.mxu1 %v13086_v3  ;;  %v13162_v5 = vld [vmem:[#allocation12 + $0x7c8] ss:$16 sps:$4 sm:$0xff]   ;;  %v12626_v3 = vadd.f32 %v13867_v22, %v2417_v38  ;;  %v13175_v22 = vld [vmem:[#allocation15 + $0x48] sm:$0xff]  }
 0x642   :  { %v13171_v62 = vld [vmem:[#allocation15 + $0x40] sm:$0xff]  }
 0x643   :  { %10562 = vmatpush1.bf16.msra.mxu0 %v13081_v6  ;;  %10726 = vmatpush1.bf16.msra.mxu1 %v13084_v60  ;;  %v13170_v6 = vld [vmem:[#allocation12 + $0x7ec] ss:$16 sps:$4 sm:$0xff]   ;;  %v13165_v60 = vld [vmem:[#allocation12 + $0x7e0] ss:$16 sps:$4 sm:$0xff]  }
 0x644   :  { %10563 = vmatprep.subr.bf16.mxu0 %v13089_v27  ;;  %10727 = vmatprep.subr.bf16.mxu1 %v13092_v15  ;;  %v13168_v27 = vld [vmem:[#allocation12 + $0x7e8] ss:$16 sps:$4 sm:$0xff]   ;;  %v8868_v15 = vmax.f32 %v12626_v3, 0.0 }
 0x647   :  { %10564 = vmatpush1.bf16.msra.mxu0 %v13087_v51  ;;  %10728 = vmatpush1.bf16.msra.mxu1 %v13090_v28  ;;  %v13172_v51 = vld [vmem:[#allocation15 + $0xc0] sm:$0xff]  }
 0x648   :  { %10565 = vmatprep.subr.bf16.mxu0 %v13095_v30  ;;  %10729 = vmatprep.subr.bf16.mxu1 %v13098_v32  ;;  %v13173_v28 = vld [vmem:[#allocation15] sm:$0xff]   ;;  %v8876_v32 = vpack.c.bf16 %v8868_v15, %v8868_v15 }
 0x649   :  { %v13174_v30 = vld [vmem:[#allocation15 + $0x80] sm:$0xff]  }
 0x64b   :  { %10566 = vmatpush1.bf16.msra.mxu0 %v13093_v33  ;;  %10730 = vmatpush1.bf16.msra.mxu1 %v13096_v23  ;;  %v13176_v33 = vld [vmem:[#allocation15 + $0xc8] sm:$0xff]  }
 0x64c   :  { %10567 = vmatprep.subr.bf16.mxu0 %v13101_v63  ;;  %10731 = vmatprep.subr.bf16.mxu1 %v13104_v35  ;;  %v13177_v23 = vld [vmem:[#allocation15 + $0x8] sm:$0xff]   ;;  %v13179_v35 = vld [vmem:[#allocation15 + $0x50] sm:$0xff]  }
 0x64d   :  { %v13178_v63 = vld [vmem:[#allocation15 + $0x88] sm:$0xff]  }
 0x64f   :  { %10568 = vmatpush1.bf16.msra.mxu0 %v13099_v39  ;;  %10732 = vmatpush1.bf16.msra.mxu1 %v13102_v36  ;;  %v13180_v39 = vld [vmem:[#allocation15 + $0xd0] sm:$0xff]  }
 0x650   :  { %10569 = vmatprep.subr.bf16.mxu0 %v13107_v13  ;;  %10733 = vmatprep.subr.bf16.mxu1 %v13110_v52  ;;  %v13181_v36 = vld [vmem:[#allocation15 + $0x10] sm:$0xff]   ;;  %v13183_v52 = vld [vmem:[#allocation15 + $0x58] sm:$0xff]  }
 0x651   :  { %v13182_v13 = vld [vmem:[#allocation15 + $0x90] sm:$0xff]  }
 0x653   :  { %10570 = vmatpush1.bf16.msra.mxu0 %v13105_v0  ;;  %10734 = vmatpush1.bf16.msra.mxu1 %v13108_v54  ;;  %v13184_v0 = vld [vmem:[#allocation15 + $0xd8] sm:$0xff]  }
 0x654   :  { %10571 = vmatprep.subr.bf16.mxu0 %v13113_v26  ;;  %10735 = vmatprep.subr.bf16.mxu1 %v13116_v29  ;;  %v13185_v54 = vld [vmem:[#allocation15 + $0x18] sm:$0xff]   ;;  %v13187_v29 = vld [vmem:[#allocation15 + $0x60] sm:$0xff]  }
 0x655   :  { %v13186_v26 = vld [vmem:[#allocation15 + $0x98] sm:$0xff]  }
 0x657   :  { %10572 = vmatpush1.bf16.msra.mxu0 %v13111_v55  ;;  %10736 = vmatpush1.bf16.msra.mxu1 %v13114_v56  ;;  %v13188_v55 = vld [vmem:[#allocation15 + $0xe0] sm:$0xff]  }
 0x658   :  { %10573 = vmatprep.subr.bf16.mxu0 %v13119_v11  ;;  %10737 = vmatprep.subr.bf16.mxu1 %v13122_v57  ;;  %v13189_v56 = vld [vmem:[#allocation15 + $0x20] sm:$0xff]   ;;  %v13191_v57 = vld [vmem:[#allocation15 + $0x68] sm:$0xff]  }
 0x659   :  { %v13190_v11 = vld [vmem:[#allocation15 + $0xa0] sm:$0xff]  }
 0x65b   :  { %10574 = vmatpush1.bf16.msra.mxu0 %v13117_v58  ;;  %10738 = vmatpush1.bf16.msra.mxu1 %v13120_v61  ;;  %v13192_v58 = vld [vmem:[#allocation15 + $0xe8] sm:$0xff]  }
 0x65c   :  { %10575 = vmatprep.subr.bf16.mxu0 %v13125_v2  ;;  %10739 = vmatprep.subr.bf16.mxu1 %v13128_v44  ;;  %v13193_v61 = vld [vmem:[#allocation15 + $0x28] sm:$0xff]   ;;  %v13195_v44 = vld [vmem:[#allocation15 + $0x70] sm:$0xff]  }
 0x65d   :  { %v13194_v2 = vld [vmem:[#allocation15 + $0xa8] sm:$0xff]  }
 0x65f   :  { %10576 = vmatpush1.bf16.msra.mxu0 %v13123_v20  ;;  %10740 = vmatpush1.bf16.msra.mxu1 %v13126_v4  ;;  %v13196_v20 = vld [vmem:[#allocation15 + $0xf0] sm:$0xff]  }
 0x660   :  { %10577 = vmatprep.subr.bf16.mxu0 %v13131_v7  ;;  %10741 = vmatprep.subr.bf16.mxu1 %v13134_v16  ;;  %v13197_v4 = vld [vmem:[#allocation15 + $0x30] sm:$0xff]   ;;  %v13199_v16 = vld [vmem:[#allocation15 + $0x78] sm:$0xff]  }
 0x661   :  { %v13198_v7 = vld [vmem:[#allocation15 + $0xb0] sm:$0xff]  }
 0x663   :  { %10578 = vmatpush1.bf16.msra.mxu0 %v13129_v9  ;;  %10742 = vmatpush1.bf16.msra.mxu1 %v13132_v10  ;;  %v13200_v9 = vld [vmem:[#allocation15 + $0xf8] sm:$0xff]  }
 0x664   :  { %10579 = vmatprep.subr.bf16.mxu0 %v13137_v8  ;;  %10743 = vmatprep.subr.bf16.mxu1 %v13140_v46  ;;  %v13201_v10 = vld [vmem:[#allocation15 + $0x38] sm:$0xff]  }
 0x665   :  { %v13202_v8 = vld [vmem:[#allocation15 + $0xb8] sm:$0xff]  }
 0x666   :  { %v9134_v46 = vld [vmem:[#allocation14] sm:$0xf] }
 0x667   :  { %10580 = vmatpush1.bf16.msra.mxu0 %v13135_v49  ;;  %10744 = vmatpush1.bf16.msra.mxu1 %v13138_v12  ;;  %v9139_v49 = vrot.slane %v9134_v46, %v13645_v19  ;;  %v9147_v12 = vrot.slane %v9134_v46, %v13686_v37 }
 0x668   :  { %10581 = vmatprep.subr.bf16.mxu0 %v13143_v41  ;;  %10745 = vmatprep.subr.bf16.mxu1 %v13146_v14  ;;  %v9143_v41 = vrot.slane %v9134_v46, %v13650_v21  ;;  %v9151_v14 = vrot.slane %v9134_v46, %v13657_v25 }
 0x66b   :  { %10582 = vmatpush1.bf16.msra.mxu0 %v13141_v59  ;;  %10746 = vmatpush1.bf16.msra.mxu1 %v13144_v1 }
 0x66c   :  { %10583 = vmatprep.subr.bf16.mxu0 %v13149_v53  ;;  %10747 = vmatprep.subr.bf16.mxu1 %v13152_v31 }
 0x66f   :  { %10584 = vmatpush1.bf16.msra.mxu0 %v13147_v17  ;;  %10748 = vmatpush1.bf16.msra.mxu1 %v13150_v42 }
 0x670   :  { %10585 = vmatprep.subr.bf16.mxu0 %v13155_v18  ;;  %10749 = vmatprep.subr.bf16.mxu1 %v13158_v43 }
 0x673   :  { %10586 = vmatpush1.bf16.msra.mxu0 %v13153_v40  ;;  %10750 = vmatpush1.bf16.msra.mxu1 %v13156_v34 }
 0x674   :  { %10587 = vmatprep.subr.bf16.mxu0 %v13161_v50  ;;  %10751 = vmatprep.subr.bf16.mxu1 %v13164_v24 }
 0x677   :  { %10588 = vmatpush1.bf16.msra.mxu0 %v13159_v48  ;;  %10752 = vmatpush1.bf16.msra.mxu1 %v13162_v5 }
 0x678   :  { %10589 = vmatprep.subr.bf16.mxu0 %v13167_v47  ;;  %10753 = vmatprep.subr.bf16.mxu1 %v13170_v6  ;;  %v12543_v6 = vld [vmem:[#allocation17] ss:$0 sm:$0xff] }
 0x67b   :  { %10590 = vmatpush1.bf16.msra.mxu0 %v13165_v60  ;;  %10754 = vmatpush1.bf16.msra.mxu1 %v13168_v27 }
 0x67c   :  { %12576 = vmatprep.subr.bf16.mxu0 %v13171_v62  ;;  %12598 = vmatprep.subr.bf16.mxu1 %v13172_v51 }
 0x67e   :  { %10592 = vmatmul.mubr.bf16.vlgmr.msra.gmra.mrb[24].mxu0 %v8876_v32  ;;  %10756 = vmatmul.mubr.bf16.vlgmr.msra.gmra.mrb[24].mxu1 %v8876_v32 }
 0x67f   :  { %12577 = vmatpush3.bf16.msra.mxu0 %v13173_v28  ;;  %12599 = vmatpush3.bf16.msra.mxu1 %v13174_v30 }
 0x680   :  { %12578 = vmatprep.subr.bf16.mxu0 %v13175_v22  ;;  %12600 = vmatprep.subr.bf16.mxu1 %v13176_v33 }
 0x683   :  { %12579 = vmatpush3.bf16.msra.mxu0 %v13177_v23  ;;  %12601 = vmatpush3.bf16.msra.mxu1 %v13178_v63 }
 0x684   :  { %12580 = vmatprep.subr.bf16.mxu0 %v13179_v35  ;;  %12602 = vmatprep.subr.bf16.mxu1 %v13180_v39 }
 0x687   :  { %12581 = vmatpush3.bf16.msra.mxu0 %v13181_v36  ;;  %12603 = vmatpush3.bf16.msra.mxu1 %v13182_v13 }
 0x688   :  { %12582 = vmatprep.subr.bf16.mxu0 %v13183_v52  ;;  %12604 = vmatprep.subr.bf16.mxu1 %v13184_v0 }
 0x68b   :  { %12583 = vmatpush3.bf16.msra.mxu0 %v13185_v54  ;;  %12605 = vmatpush3.bf16.msra.mxu1 %v13186_v26 }
 0x68c   :  { %12584 = vmatprep.subr.bf16.mxu0 %v13187_v29  ;;  %12606 = vmatprep.subr.bf16.mxu1 %v13188_v55 }
 0x68f   :  { %12585 = vmatpush3.bf16.msra.mxu0 %v13189_v56  ;;  %12607 = vmatpush3.bf16.msra.mxu1 %v13190_v11 }
 0x690   :  { %12586 = vmatprep.subr.bf16.mxu0 %v13191_v57  ;;  %12608 = vmatprep.subr.bf16.mxu1 %v13192_v58 }
 0x693   :  { %12587 = vmatpush3.bf16.msra.mxu0 %v13193_v61  ;;  %12609 = vmatpush3.bf16.msra.mxu1 %v13194_v2 }
 0x694   :  { %12588 = vmatprep.subr.bf16.mxu0 %v13195_v44  ;;  %12610 = vmatprep.subr.bf16.mxu1 %v13196_v20 }
 0x697   :  { %12589 = vmatpush3.bf16.msra.mxu0 %v13197_v4  ;;  %12611 = vmatpush3.bf16.msra.mxu1 %v13198_v7 }
 0x698   :  { %12590 = vmatprep.subr.bf16.mxu0 %v13199_v16  ;;  %12612 = vmatprep.subr.bf16.mxu1 %v13200_v9 }
 0x69b   :  { %12591 = vmatpush3.bf16.msra.mxu0 %v13201_v10  ;;  %12613 = vmatpush3.bf16.msra.mxu1 %v13202_v8 }
 0x751   :  { %v10593_v59 = vpop.f32.mrb[24].mxu0  ;;  %v10757_v1 = vpop.f32.mrb[24].mxu1 }
 0x752   :  { %v12628_v53 = vadd.f32 %v10593_v59, %v9139_v49  ;;  %v12630_v31 = vadd.f32 %v10757_v1, %v9147_v12  ;;  %v10595_v17 = vpop.f32.mrb[25].mxu0  ;;  %v10759_v42 = vpop.f32.mrb[25].mxu1 }
 0x753   :  { %v12629_v18 = vadd.f32 %v10595_v17, %v9143_v41  ;;  %v12631_v43 = vadd.f32 %v10759_v42, %v9151_v14  ;;  %v10597_v40 = vpop.f32.mrb[26].mxu0  ;;  %v10761_v34 = vpop.f32.mrb[26].mxu1 }
 0x754   :  { %v10764_v45 = vmax.f32 %v12628_v53, 0.0  ;;  %v10766_v38 = vmax.f32 %v12630_v31, 0.0  ;;  %v10598_v50 = vpop.f32.mrb[27].mxu0  ;;  %v10762_v19 = vpop.f32.mrb[27].mxu1 }
 0x755   :  { %v10765_v24 = vmax.f32 %v12629_v18, 0.0  ;;  %v10767_v37 = vmax.f32 %v12631_v43, 0.0 }
 0x756   :  { %v10768_v5 = vpack.c.bf16 %v10764_v45, %v10764_v45  ;;  %v10770_v25 = vpack.c.bf16 %v10766_v38, %v10766_v38 }
 0x757   :  { %v10769_v48 = vpack.c.bf16 %v10765_v24, %v10765_v24  ;;  %v10771_v21 = vpack.c.bf16 %v10767_v37, %v10767_v37 }
 0x759   :  { %11067 = vmatprep.mubr.bf16.mxu0 %v10769_v48  ;;  %11107 = vmatprep.mubr.bf16.mxu1 %v10771_v21 }
 0x75a   :  { %11068 = vmatmul.mubr.bf16.vlgmr.msra.gmra.mrb[28].mxu0 %v10768_v5  ;;  %11108 = vmatmul.mubr.bf16.vlgmr.msra.gmra.mrb[28].mxu1 %v10770_v25 }
 0x82d   :  { %v12592_v3 = vpop.f32.mrb[28].mxu0  ;;  %v12614_v47 = vpop.f32.mrb[28].mxu1 }
 0x82e   :  { %v12593_v60 = vpop.f32.mrb[29].mxu0  ;;  %v12615_v27 = vpop.f32.mrb[29].mxu1 }
 0x82f   :  { %v12594_v15 = vadd.f32 %v12593_v60, %v12592_v3  ;;  %v12616_v62 = vadd.f32 %v12615_v27, %v12614_v47  ;;  %v12595_v51 = vpop.f32.mrb[30].mxu0  ;;  %v12617_v28 = vpop.f32.mrb[30].mxu1 }
 0x830   :  { %v12596_v30 = vpop.f32.mrb[31].mxu0  ;;  %v12618_v32 = vpop.f32.mrb[31].mxu1 }
 0x831   :  { %v11070_v22 = vadd.f32 %v12594_v15, %v12543_v6 }
 0x833   :  { %v11110_v33 = vadd.f32 %v12616_v62, %v11070_v22 }
 0x835   :  { %11115 = vst [vmem:[#allocation18] sm:$0xff] %v11110_v33 }
 0x836   :  { %13415 = shalt.err (!%p13412_p6)
}
 0x837   :  { %s13416_s23 = scalar_lea.hbm %s13896_s9, 128 }
 0x838   :  { %p13417_p7 = scmp.ne.s32.totalorder %s13896_s9, %s13416_s23  ;;  %p13420_p8 = scmp.lt.u32.totalorder %s13416_s23, %s13896_s9 }
 0x83a   :  { %p13422_p9 = pnand %p13420_p8, %p13417_p7 }
 0x83c   :  { %13425 = shalt.err (!%p13422_p9)
}
 0x83d   :  { %11125 = dma.vmem_to_hbm [thread:$0]  %s11123_s24, 128, %s13896_s9, [#allocation5]  }
 0x83e   :  { %13436 = dma.done.wait [#allocation5], 128  }
 0x83f   :  { %13437 = vsyncadd [#allocation5], 4294967168 }
 0x840   :  { %11129 = vsyncpa [#allocation4], 1 }
 0x841   :  { %11130 = vsyncpa [#allocation7], 1 }
 0x842   :  { %11131 = vsyncpa [#allocation10], 1 }
 0x843   :  { %11132 = vsyncpa [#allocation13], 1 }
 0x844   :  { %11133 = vsyncpa [#allocation16], 1 }
 0x845   :  { %11134 = vsyncpa [#allocation5], 1 }

</bundles_post_ra>
